<compile_context>
chip_gen: v7x
topology: tpu7x:2x2x1
jax: 0.10.0
libtpu: 0.0.40
codegen_flags: <defaults>
</compile_context>

<pallas_src>
import jax
import jax.numpy as jnp
from jax.experimental import pallas as pl
from jax.experimental.pallas import tpu as pltpu


# ----------------------------------------------------------------------------
# Fused kernel: grid iterates over point tiles.
#   - fused conv1 (both branches), fused block-diag conv2 (both branches)
#   - per-branch conv3; STN branch relu+max into VMEM scratch, feat branch
#     (no relu) max into the resident output
#   - last step: STN head fc1/fc2/fc3 (+identity folded into bias) -> trans
# ----------------------------------------------------------------------------
def pointnetfeat_kernel(
    x_ref,
    # fused per-point layers (BN folded)
    w1_ref, b1_ref,        # conv1 of both branches packed: (128,128)/(1,128)
    w2_ref, b2_ref,        # conv2 block-diagonal:          (128,256)/(1,256)
    sw3_ref, sb3_ref,      # STN conv3:                     (128,1024)/(1,1024)
    fw3_ref, fb3_ref,      # feat conv3:                    (128,1024)/(1,1024)
    # STN3d head (fc1+bn4, fc2+bn5, fc3 padded to 128 cols, identity in bias)
    w4_ref, b4_ref, w5_ref, b5_ref, w6_ref, b6_ref,
    # outputs
    feat_ref, trans_ref,
    # scratch
    stn_pool,
):
    j = pl.program_id(0)
    nj = pl.num_programs(0)

    @pl.when(j == 0)
    def _init():
        stn_pool[...] = jnp.full(stn_pool.shape, -jnp.inf, jnp.float32)
        feat_ref[...] = jnp.full(feat_ref.shape, -jnp.inf, jnp.float32)

    B, TN, Cin = x_ref.shape
    x = x_ref[...].reshape(B * TN, Cin)                       # bf16 (B*TN, 128)

    # Fused conv1+bn1+relu for BOTH branches: cols 0:64 = STN, 64:128 = feat.
    h1 = jnp.dot(x, w1_ref[...], preferred_element_type=jnp.float32) + b1_ref[...]
    h1 = jnp.maximum(h1, 0.0).astype(jnp.bfloat16)            # (B*TN, 128)

    # Fused conv2+bn2+relu, block-diagonal: cols 0:128 = STN, 128:256 = feat.
    h2 = jnp.dot(h1, w2_ref[...], preferred_element_type=jnp.float32) + b2_ref[...]
    h2 = jnp.maximum(h2, 0.0).astype(jnp.bfloat16)            # (B*TN, 256)

    hs2 = h2[:, :128]      # STN branch (lane-aligned slice)
    hf2 = h2[:, 128:]      # feat branch

    # STN conv3+bn3+relu -> running max over points (f32 accumulator).
    hs = jnp.dot(hs2, sw3_ref[...], preferred_element_type=jnp.float32) + sb3_ref[...]
    hs = jnp.maximum(hs, 0.0)
    stn_pool[...] = jnp.maximum(stn_pool[...],
                                jnp.max(hs.reshape(B, TN, 1024), axis=1))

    # feat conv3+bn3 (NO relu) -> running max into the resident output.
    hf = jnp.dot(hf2, fw3_ref[...], preferred_element_type=jnp.float32) + fb3_ref[...]
    feat_ref[...] = jnp.maximum(feat_ref[...],
                                jnp.max(hf.reshape(B, TN, 1024), axis=1))

    # Fused STN3d head on the last grid step (dp1/dp2 identity at inference).
    @pl.when(j == nj - 1)
    def _head():
        p = stn_pool[...].astype(jnp.bfloat16)
        h = jnp.dot(p, w4_ref[...], preferred_element_type=jnp.float32) + b4_ref[...]
        h = jnp.maximum(h, 0.0).astype(jnp.bfloat16)
        h = jnp.dot(h, w5_ref[...], preferred_element_type=jnp.float32) + b5_ref[...]
        h = jnp.maximum(h, 0.0).astype(jnp.bfloat16)
        trans_ref[...] = (
            jnp.dot(h, w6_ref[...], preferred_element_type=jnp.float32) + b6_ref[...])


def _const_spec(shape):
    zeros = (0,) * len(shape)
    return pl.BlockSpec(tuple(shape), lambda j, _z=zeros: _z)


def pointnetfeat_forward(x_bnc, packed_params, *, tn=256):
    """x_bnc: (B, N, 128) float32.  Returns (global_feat (B,1024), trans (B,3,3))."""
    B, N, Cin = x_bnc.shape
    assert Cin == 128
    tn = min(tn, N)
    assert N % tn == 0 and tn % 8 == 0

    weight_args = tuple(packed_params)   # 14 arrays, see pack_params order

    # Advisory cost estimate so XLA schedules surrounding ops sensibly.
    flops = int(2 * B * N * (128 * 128 + 128 * 256 + 2 * 128 * 1024)
                + 2 * B * (1024 * 512 + 512 * 256 + 256 * 128))
    bytes_accessed = int(B * N * 128 * 2
                         + sum(int(p.size) * p.dtype.itemsize for p in weight_args)
                         + B * 1024 * 4 + B * 128 * 4)

    in_specs = [pl.BlockSpec((B, tn, 128), lambda j: (0, j, 0))]
    in_specs += [_const_spec(p.shape) for p in weight_args]

    feat, trans_pad = pl.pallas_call(
        pointnetfeat_kernel,
        out_shape=(jax.ShapeDtypeStruct((B, 1024), jnp.float32),
                   jax.ShapeDtypeStruct((B, 128), jnp.float32)),
        grid=(N // tn,),
        in_specs=in_specs,
        out_specs=(pl.BlockSpec((B, 1024), lambda j: (0, 0)),
                   pl.BlockSpec((B, 128), lambda j: (0, 0))),
        scratch_shapes=[pltpu.VMEM((B, 1024), jnp.float32)],
        compiler_params=pltpu.CompilerParams(
            dimension_semantics=("arbitrary",)),   # running-max reduction axis
        cost_estimate=pl.CostEstimate(flops=flops, transcendentals=0,
                                      bytes_accessed=bytes_accessed),
    )(x_bnc.astype(jnp.bfloat16), *weight_args)

    trans = trans_pad[:, :9].reshape(B, 3, 3)      # lane-dense slab -> (B,3,3)
    return feat, trans


# ----------------------------------------------------------------------------
# Deterministic synthetic parameters in "logical" (PyTorch-like, BN-folded)
# form, plus a packer that builds the lane-dense fused kernel operands.
# ----------------------------------------------------------------------------
def make_params(key):
    eps = 1e-5
    keys = iter(jax.random.split(key, 64))

    def lin(cin, cout):
        w = jax.random.normal(next(keys), (cin, cout), jnp.float32) / jnp.sqrt(cin)
        b = 0.1 * jax.random.normal(next(keys), (cout,), jnp.float32)
        return w, b

    def bn(c):
        gamma = 1.0 + 0.1 * jax.random.normal(next(keys), (c,), jnp.float32)
        beta = 0.1 * jax.random.normal(next(keys), (c,), jnp.float32)
        mean = 0.1 * jax.random.normal(next(keys), (c,), jnp.float32)
        var = jnp.abs(jax.random.normal(next(keys), (c,), jnp.float32)) + 0.5
        return gamma, beta, mean, var

    def fold(w, b, bnp):
        gamma, beta, mean, var = bnp
        scale = gamma / jnp.sqrt(var + eps)
        return w * scale[None, :], ((b - mean) * scale + beta).reshape(1, -1)

    def point_branch():
        w1, b1 = fold(*lin(128, 64), bn(64))        # conv1 + bn1
        w2, b2 = fold(*lin(64, 128), bn(128))       # conv2 + bn2
        w3, b3 = fold(*lin(128, 1024), bn(1024))    # conv3 + bn3
        return w1, b1, w2, b2, w3, b3

    s = point_branch()                               # STN3d conv stack
    f = point_branch()                               # PointNetfeat conv stack
    w4, b4 = fold(*lin(1024, 512), bn(512))          # STN fc1 + bn4
    w5, b5 = fold(*lin(512, 256), bn(256))           # STN fc2 + bn5
    w6, b6 = lin(256, 9)                             # STN fc3
    return (*s, *f, w4, b4, w5, b5, w6, b6.reshape(1, -1))


def pack_params(params):
    (sw1, sb1, sw2, sb2, sw3, sb3,
     fw1, fb1, fw2, fb2, fw3, fb3,
     w4, b4, w5, b5, w6, b6) = params

    bf = lambda w: w.astype(jnp.bfloat16)

    # conv1: both branches consume the same x -> pack output channels side by
    # side into one 128->128 matmul (cols 0:64 STN, 64:128 feat). Exact.
    w1c = jnp.concatenate([sw1, fw1], axis=1)                       # (128, 128)
    b1c = jnp.concatenate([sb1, fb1], axis=1)                       # (1, 128)

    # conv2: block-diagonal (zero cross-blocks contribute exact 0 in f32).
    w2c = (jnp.zeros((128, 256), jnp.float32)
           .at[:64, :128].set(sw2)
           .at[64:, 128:].set(fw2))                                 # (128, 256)
    b2c = jnp.concatenate([sb2, fb2], axis=1)                       # (1, 256)

    # fc3: pad 9 -> 128 lane-dense columns; fold "+ identity" into the bias.
    iden = jnp.eye(3, dtype=jnp.float32).reshape(1, 9)
    w6p = jnp.zeros((256, 128), jnp.float32).at[:, :9].set(w6)
    b6p = jnp.zeros((1, 128), jnp.float32).at[:, :9].set(b6 + iden)

    # Matmul operands to bf16; biases stay f32 (added post f32 accumulation).
    return (bf(w1c), b1c, bf(w2c), b2c,
            bf(sw3), sb3, bf(fw3), fb3,
            bf(w4), b4, bf(w5), b5, bf(w6p), b6p)


# ----------------------------------------------------------------------------
# Pure-JAX reference mirroring the kernel math (same bf16 operands / f32 accum)
# on the logical per-branch parameters.
# ----------------------------------------------------------------------------
def ref_forward(x_bnc, params):
    (sw1, sb1, sw2, sb2, sw3, sb3,
     fw1, fb1, fw2, fb2, fw3, fb3,
     w4, b4, w5, b5, w6, b6) = params
    B, N, C = x_bnc.shape
    x = x_bnc.astype(jnp.bfloat16).reshape(B * N, C)
    bf = lambda w: w.astype(jnp.bfloat16)

    def mlp3(xx, w1, b1, w2, b2, w3, b3, relu_last):
        h = jnp.dot(xx, bf(w1), preferred_element_type=jnp.float32) + b1
        h = jnp.maximum(h, 0.0).astype(jnp.bfloat16)
        h = jnp.dot(h, bf(w2), preferred_element_type=jnp.float32) + b2
        h = jnp.maximum(h, 0.0).astype(jnp.bfloat16)
        h = jnp.dot(h, bf(w3), preferred_element_type=jnp.float32) + b3
        return jnp.maximum(h, 0.0) if relu_last else h

    hs = mlp3(x, sw1, sb1, sw2, sb2, sw3, sb3, True).reshape(B, N, 1024)
    stn_pool = jnp.max(hs, axis=1)
    hf = mlp3(x, fw1, fb1, fw2, fb2, fw3, fb3, False).reshape(B, N, 1024)
    feat = jnp.max(hf, axis=1)

    p = stn_pool.astype(jnp.bfloat16)
    h = jnp.maximum(jnp.dot(p, bf(w4), preferred_element_type=jnp.float32) + b4, 0.0)
    h = h.astype(jnp.bfloat16)
    h = jnp.maximum(jnp.dot(h, bf(w5), preferred_element_type=jnp.float32) + b5, 0.0)
    h = h.astype(jnp.bfloat16)
    trans = jnp.dot(h, bf(w6), preferred_element_type=jnp.float32) + b6
    iden = jnp.eye(3, dtype=jnp.float32).reshape(1, 9)
    return feat, (trans + iden).reshape(B, 3, 3)


if __name__ == "__main__":
    key = jax.random.PRNGKey(0)
    kx, kp = jax.random.split(key)

    B, N = 2, 512
    # PyTorch-layout input (B, C=128, N); transpose ONCE (outside the kernel /
    # hot path) to channels-last (B, N, C).
    x_bcn = jax.random.normal(kx, (B, 128, N), jnp.float32)
    x_bnc = jnp.transpose(x_bcn, (0, 2, 1))

    params = make_params(kp)
    packed = pack_params(params)

    feat, trans = pointnetfeat_forward(x_bnc, packed, tn=256)
    feat = jax.block_until_ready(feat)
    trans = jax.block_until_ready(trans)

    feat_ref, trans_ref = ref_forward(x_bnc, params)

    assert feat.shape == (B, 1024) and trans.shape == (B, 3, 3)
    assert jnp.allclose(feat, feat_ref, atol=2e-2, rtol=2e-2)
    assert jnp.allclose(trans, trans_ref, atol=2e-2, rtol=2e-2)

    print("KERNEL_OK")
</pallas_src>

<mosaic_0001>
module attributes {stable_mosaic.version = 11 : i64} {
  func.func @pointnetfeat_kernel(%arg0: i32, %arg1: memref<2x256x128xbf16, #tpu.memory_space<vmem>>, %arg2: memref<128x128xbf16, #tpu.memory_space<vmem>>, %arg3: memref<1x128xf32, #tpu.memory_space<vmem>>, %arg4: memref<128x256xbf16, #tpu.memory_space<vmem>>, %arg5: memref<1x256xf32, #tpu.memory_space<vmem>>, %arg6: memref<128x1024xbf16, #tpu.memory_space<vmem>>, %arg7: memref<1x1024xf32, #tpu.memory_space<vmem>>, %arg8: memref<128x1024xbf16, #tpu.memory_space<vmem>>, %arg9: memref<1x1024xf32, #tpu.memory_space<vmem>>, %arg10: memref<1024x512xbf16, #tpu.memory_space<vmem>>, %arg11: memref<1x512xf32, #tpu.memory_space<vmem>>, %arg12: memref<512x256xbf16, #tpu.memory_space<vmem>>, %arg13: memref<1x256xf32, #tpu.memory_space<vmem>>, %arg14: memref<256x128xbf16, #tpu.memory_space<vmem>>, %arg15: memref<1x128xf32, #tpu.memory_space<vmem>>, %arg16: memref<2x1024xf32, #tpu.memory_space<vmem>>, %arg17: memref<2x128xf32, #tpu.memory_space<vmem>>, %arg18: memref<2x1024xf32, #tpu.memory_space<vmem>>) attributes {dimension_semantics = [#tpu.dimension_semantics<arbitrary>], iteration_bounds = array<i64: 2>, scalar_prefetch = 0 : i64, scratch_operands = 1 : i64, tpu.core_type = #tpu.core_type<tc>, window_params = [{transform_indices = @transform_0, window_bounds = array<i64: 2, 256, 128>}, {pipeline_mode = #tpu.pipeline_mode<synchronous>, transform_indices = @transform_1, window_bounds = array<i64: 128, 128>}, {pipeline_mode = #tpu.pipeline_mode<synchronous>, transform_indices = @transform_2, window_bounds = array<i64: 1, 128>}, {pipeline_mode = #tpu.pipeline_mode<synchronous>, transform_indices = @transform_3, window_bounds = array<i64: 128, 256>}, {pipeline_mode = #tpu.pipeline_mode<synchronous>, transform_indices = @transform_4, window_bounds = array<i64: 1, 256>}, {pipeline_mode = #tpu.pipeline_mode<synchronous>, transform_indices = @transform_5, window_bounds = array<i64: 128, 1024>}, {pipeline_mode = #tpu.pipeline_mode<synchronous>, transform_indices = @transform_6, window_bounds = array<i64: 1, 1024>}, {pipeline_mode = #tpu.pipeline_mode<synchronous>, transform_indices = @transform_7, window_bounds = array<i64: 128, 1024>}, {pipeline_mode = #tpu.pipeline_mode<synchronous>, transform_indices = @transform_8, window_bounds = array<i64: 1, 1024>}, {pipeline_mode = #tpu.pipeline_mode<synchronous>, transform_indices = @transform_9, window_bounds = array<i64: 1024, 512>}, {pipeline_mode = #tpu.pipeline_mode<synchronous>, transform_indices = @transform_10, window_bounds = array<i64: 1, 512>}, {pipeline_mode = #tpu.pipeline_mode<synchronous>, transform_indices = @transform_11, window_bounds = array<i64: 512, 256>}, {pipeline_mode = #tpu.pipeline_mode<synchronous>, transform_indices = @transform_12, window_bounds = array<i64: 1, 256>}, {pipeline_mode = #tpu.pipeline_mode<synchronous>, transform_indices = @transform_13, window_bounds = array<i64: 256, 128>}, {pipeline_mode = #tpu.pipeline_mode<synchronous>, transform_indices = @transform_14, window_bounds = array<i64: 1, 128>}, {pipeline_mode = #tpu.pipeline_mode<synchronous>, transform_indices = @transform_15, window_bounds = array<i64: 2, 1024>}, {pipeline_mode = #tpu.pipeline_mode<synchronous>, transform_indices = @transform_16, window_bounds = array<i64: 2, 128>}]} {
    %c0_i32 = arith.constant 0 : i32
    %0 = arith.cmpi eq, %arg0, %c0_i32 : i32
    %1 = arith.extui %0 : i1 to i32
    %c0_i32_0 = arith.constant 0 : i32
    %2 = arith.cmpi ne, %1, %c0_i32_0 : i32
    scf.if %2 {
      %cst_36 = arith.constant 0xFF800000 : f32
      %48 = vector.broadcast %cst_36 : f32 to vector<2x1024xf32>
      %c0_37 = arith.constant 0 : index
      %c0_38 = arith.constant 0 : index
      %49 = vector.load %arg18[%c0_37, %c0_38] : memref<2x1024xf32, #tpu.memory_space<vmem>>, vector<2x1024xf32>
      tpu.vector_store %arg18[%c0_37, %c0_38], %48 {strides = array<i32>} : memref<2x1024xf32, #tpu.memory_space<vmem>>, vector<2x1024xf32>,
      %cst_39 = arith.constant 0xFF800000 : f32
      %50 = vector.broadcast %cst_39 : f32 to vector<2x1024xf32>
      %c0_40 = arith.constant 0 : index
      %c0_41 = arith.constant 0 : index
      %51 = vector.load %arg16[%c0_40, %c0_41] : memref<2x1024xf32, #tpu.memory_space<vmem>>, vector<2x1024xf32>
      tpu.vector_store %arg16[%c0_40, %c0_41], %50 {strides = array<i32>} : memref<2x1024xf32, #tpu.memory_space<vmem>>, vector<2x1024xf32>,
    } else {
    }
    %c0 = arith.constant 0 : index
    %c0_1 = arith.constant 0 : index
    %c0_2 = arith.constant 0 : index
    %3 = vector.load %arg1[%c0, %c0_1, %c0_2] : memref<2x256x128xbf16, #tpu.memory_space<vmem>>, vector<2x256x128xbf16>
    %4 = vector.shape_cast %3 : vector<2x256x128xbf16> to vector<512x128xbf16>
    %c0_3 = arith.constant 0 : index
    %c0_4 = arith.constant 0 : index
    %5 = vector.load %arg2[%c0_3, %c0_4] : memref<128x128xbf16, #tpu.memory_space<vmem>>, vector<128x128xbf16>
    %cst = arith.constant dense<0.000000e+00> : vector<512x128xf32>
    %6 = tpu.matmul %4, %5, %cst {dimension_numbers = #tpu.dot_dimension_numbers<[1], [0], [0], [1], [0, 0, 1, 1], [], []>} : vector<512x128xbf16>, vector<128x128xbf16>, vector<512x128xf32> -> vector<512x128xf32>
    %c0_5 = arith.constant 0 : index
    %c0_6 = arith.constant 0 : index
    %7 = vector.load %arg3[%c0_5, %c0_6] : memref<1x128xf32, #tpu.memory_space<vmem>>, vector<1x128xf32>
    %8 = vector.broadcast %7 : vector<1x128xf32> to vector<512x128xf32>
    %9 = arith.addf %6, %8 : vector<512x128xf32>
    %cst_7 = arith.constant 0.000000e+00 : f32
    %10 = vector.broadcast %cst_7 : f32 to vector<512x128xf32>
    %11 = arith.maximumf %9, %10 : vector<512x128xf32>
    %12 = arith.truncf %11 : vector<512x128xf32> to vector<512x128xbf16>
    %c0_8 = arith.constant 0 : index
    %c0_9 = arith.constant 0 : index
    %13 = vector.load %arg4[%c0_8, %c0_9] : memref<128x256xbf16, #tpu.memory_space<vmem>>, vector<128x256xbf16>
    %cst_10 = arith.constant dense<0.000000e+00> : vector<512x256xf32>
    %14 = tpu.matmul %12, %13, %cst_10 {dimension_numbers = #tpu.dot_dimension_numbers<[1], [0], [0], [1], [0, 0, 1, 1], [], []>} : vector<512x128xbf16>, vector<128x256xbf16>, vector<512x256xf32> -> vector<512x256xf32>
    %c0_11 = arith.constant 0 : index
    %c0_12 = arith.constant 0 : index
    %15 = vector.load %arg5[%c0_11, %c0_12] : memref<1x256xf32, #tpu.memory_space<vmem>>, vector<1x256xf32>
    %16 = vector.broadcast %15 : vector<1x256xf32> to vector<512x256xf32>
    %17 = arith.addf %14, %16 : vector<512x256xf32>
    %cst_13 = arith.constant 0.000000e+00 : f32
    %18 = vector.broadcast %cst_13 : f32 to vector<512x256xf32>
    %19 = arith.maximumf %17, %18 : vector<512x256xf32>
    %20 = arith.truncf %19 : vector<512x256xf32> to vector<512x256xbf16>
    %21 = vector.extract_strided_slice %20 {offsets = [0, 0], sizes = [512, 128], strides = [1, 1]} : vector<512x256xbf16> to vector<512x128xbf16>
    %22 = vector.extract_strided_slice %20 {offsets = [0, 128], sizes = [512, 128], strides = [1, 1]} : vector<512x256xbf16> to vector<512x128xbf16>
    %c0_14 = arith.constant 0 : index
    %c0_15 = arith.constant 0 : index
    %23 = vector.load %arg6[%c0_14, %c0_15] : memref<128x1024xbf16, #tpu.memory_space<vmem>>, vector<128x1024xbf16>
    %cst_16 = arith.constant dense<0.000000e+00> : vector<512x1024xf32>
    %24 = tpu.matmul %21, %23, %cst_16 {dimension_numbers = #tpu.dot_dimension_numbers<[1], [0], [0], [1], [0, 0, 1, 1], [], []>} : vector<512x128xbf16>, vector<128x1024xbf16>, vector<512x1024xf32> -> vector<512x1024xf32>
    %c0_17 = arith.constant 0 : index
    %c0_18 = arith.constant 0 : index
    %25 = vector.load %arg7[%c0_17, %c0_18] : memref<1x1024xf32, #tpu.memory_space<vmem>>, vector<1x1024xf32>
    %26 = vector.broadcast %25 : vector<1x1024xf32> to vector<512x1024xf32>
    %27 = arith.addf %24, %26 : vector<512x1024xf32>
    %cst_19 = arith.constant 0.000000e+00 : f32
    %28 = vector.broadcast %cst_19 : f32 to vector<512x1024xf32>
    %29 = arith.maximumf %27, %28 : vector<512x1024xf32>
    %c0_20 = arith.constant 0 : index
    %c0_21 = arith.constant 0 : index
    %30 = vector.load %arg18[%c0_20, %c0_21] : memref<2x1024xf32, #tpu.memory_space<vmem>>, vector<2x1024xf32>
    %31 = vector.shape_cast %29 : vector<512x1024xf32> to vector<2x256x1024xf32>
    %cst_22 = arith.constant dense<0xFF800000> : vector<2x1024xf32>
    %32 = vector.multi_reduction <maximumf>, %31, %cst_22 [1] : vector<2x256x1024xf32> to vector<2x1024xf32>
    %33 = arith.maximumf %30, %32 : vector<2x1024xf32>
    %c0_23 = arith.constant 0 : index
    %c0_24 = arith.constant 0 : index
    %34 = vector.load %arg18[%c0_23, %c0_24] : memref<2x1024xf32, #tpu.memory_space<vmem>>, vector<2x1024xf32>
    tpu.vector_store %arg18[%c0_23, %c0_24], %33 {strides = array<i32>} : memref<2x1024xf32, #tpu.memory_space<vmem>>, vector<2x1024xf32>,
    %c0_25 = arith.constant 0 : index
    %c0_26 = arith.constant 0 : index
    %35 = vector.load %arg8[%c0_25, %c0_26] : memref<128x1024xbf16, #tpu.memory_space<vmem>>, vector<128x1024xbf16>
    %cst_27 = arith.constant dense<0.000000e+00> : vector<512x1024xf32>
    %36 = tpu.matmul %22, %35, %cst_27 {dimension_numbers = #tpu.dot_dimension_numbers<[1], [0], [0], [1], [0, 0, 1, 1], [], []>} : vector<512x128xbf16>, vector<128x1024xbf16>, vector<512x1024xf32> -> vector<512x1024xf32>
    %c0_28 = arith.constant 0 : index
    %c0_29 = arith.constant 0 : index
    %37 = vector.load %arg9[%c0_28, %c0_29] : memref<1x1024xf32, #tpu.memory_space<vmem>>, vector<1x1024xf32>
    %38 = vector.broadcast %37 : vector<1x1024xf32> to vector<512x1024xf32>
    %39 = arith.addf %36, %38 : vector<512x1024xf32>
    %c0_30 = arith.constant 0 : index
    %c0_31 = arith.constant 0 : index
    %40 = vector.load %arg16[%c0_30, %c0_31] : memref<2x1024xf32, #tpu.memory_space<vmem>>, vector<2x1024xf32>
    %41 = vector.shape_cast %39 : vector<512x1024xf32> to vector<2x256x1024xf32>
    %cst_32 = arith.constant dense<0xFF800000> : vector<2x1024xf32>
    %42 = vector.multi_reduction <maximumf>, %41, %cst_32 [1] : vector<2x256x1024xf32> to vector<2x1024xf32>
    %43 = arith.maximumf %40, %42 : vector<2x1024xf32>
    %c0_33 = arith.constant 0 : index
    %c0_34 = arith.constant 0 : index
    %44 = vector.load %arg16[%c0_33, %c0_34] : memref<2x1024xf32, #tpu.memory_space<vmem>>, vector<2x1024xf32>
    tpu.vector_store %arg16[%c0_33, %c0_34], %43 {strides = array<i32>} : memref<2x1024xf32, #tpu.memory_space<vmem>>, vector<2x1024xf32>,
    %c1_i32 = arith.constant 1 : i32
    %45 = arith.cmpi eq, %arg0, %c1_i32 : i32
    %46 = arith.extui %45 : i1 to i32
    %c0_i32_35 = arith.constant 0 : i32
    %47 = arith.cmpi ne, %46, %c0_i32_35 : i32
    scf.if %47 {
      %c0_36 = arith.constant 0 : index
      %c0_37 = arith.constant 0 : index
      %48 = vector.load %arg18[%c0_36, %c0_37] : memref<2x1024xf32, #tpu.memory_space<vmem>>, vector<2x1024xf32>
      %49 = arith.truncf %48 : vector<2x1024xf32> to vector<2x1024xbf16>
      %c0_38 = arith.constant 0 : index
      %c0_39 = arith.constant 0 : index
      %50 = vector.load %arg10[%c0_38, %c0_39] : memref<1024x512xbf16, #tpu.memory_space<vmem>>, vector<1024x512xbf16>
      %cst_40 = arith.constant dense<0.000000e+00> : vector<2x512xf32>
      %51 = tpu.matmul %49, %50, %cst_40 {dimension_numbers = #tpu.dot_dimension_numbers<[1], [0], [0], [1], [0, 0, 1, 1], [], []>} : vector<2x1024xbf16>, vector<1024x512xbf16>, vector<2x512xf32> -> vector<2x512xf32>
      %c0_41 = arith.constant 0 : index
      %c0_42 = arith.constant 0 : index
      %52 = vector.load %arg11[%c0_41, %c0_42] : memref<1x512xf32, #tpu.memory_space<vmem>>, vector<1x512xf32>
      %53 = vector.broadcast %52 : vector<1x512xf32> to vector<2x512xf32>
      %54 = arith.addf %51, %53 : vector<2x512xf32>
      %cst_43 = arith.constant 0.000000e+00 : f32
      %55 = vector.broadcast %cst_43 : f32 to vector<2x512xf32>
      %56 = arith.maximumf %54, %55 : vector<2x512xf32>
      %57 = arith.truncf %56 : vector<2x512xf32> to vector<2x512xbf16>
      %c0_44 = arith.constant 0 : index
      %c0_45 = arith.constant 0 : index
      %58 = vector.load %arg12[%c0_44, %c0_45] : memref<512x256xbf16, #tpu.memory_space<vmem>>, vector<512x256xbf16>
      %cst_46 = arith.constant dense<0.000000e+00> : vector<2x256xf32>
      %59 = tpu.matmul %57, %58, %cst_46 {dimension_numbers = #tpu.dot_dimension_numbers<[1], [0], [0], [1], [0, 0, 1, 1], [], []>} : vector<2x512xbf16>, vector<512x256xbf16>, vector<2x256xf32> -> vector<2x256xf32>
      %c0_47 = arith.constant 0 : index
      %c0_48 = arith.constant 0 : index
      %60 = vector.load %arg13[%c0_47, %c0_48] : memref<1x256xf32, #tpu.memory_space<vmem>>, vector<1x256xf32>
      %61 = vector.broadcast %60 : vector<1x256xf32> to vector<2x256xf32>
      %62 = arith.addf %59, %61 : vector<2x256xf32>
      %cst_49 = arith.constant 0.000000e+00 : f32
      %63 = vector.broadcast %cst_49 : f32 to vector<2x256xf32>
      %64 = arith.maximumf %62, %63 : vector<2x256xf32>
      %65 = arith.truncf %64 : vector<2x256xf32> to vector<2x256xbf16>
      %c0_50 = arith.constant 0 : index
      %c0_51 = arith.constant 0 : index
      %66 = vector.load %arg14[%c0_50, %c0_51] : memref<256x128xbf16, #tpu.memory_space<vmem>>, vector<256x128xbf16>
      %cst_52 = arith.constant dense<0.000000e+00> : vector<2x128xf32>
      %67 = tpu.matmul %65, %66, %cst_52 {dimension_numbers = #tpu.dot_dimension_numbers<[1], [0], [0], [1], [0, 0, 1, 1], [], []>} : vector<2x256xbf16>, vector<256x128xbf16>, vector<2x128xf32> -> vector<2x128xf32>
      %c0_53 = arith.constant 0 : index
      %c0_54 = arith.constant 0 : index
      %68 = vector.load %arg15[%c0_53, %c0_54] : memref<1x128xf32, #tpu.memory_space<vmem>>, vector<1x128xf32>
      %69 = vector.broadcast %68 : vector<1x128xf32> to vector<2x128xf32>
      %70 = arith.addf %67, %69 : vector<2x128xf32>
      %c0_55 = arith.constant 0 : index
      %c0_56 = arith.constant 0 : index
      %71 = vector.load %arg17[%c0_55, %c0_56] : memref<2x128xf32, #tpu.memory_space<vmem>>, vector<2x128xf32>
      tpu.vector_store %arg17[%c0_55, %c0_56], %70 {strides = array<i32>} : memref<2x128xf32, #tpu.memory_space<vmem>>, vector<2x128xf32>,
    } else {
    }
    return
  }
  func.func @transform_0(%arg0: i32) -> (i32, i32, i32) {
    %c0_i32 = arith.constant 0 : i32
    %c0_i32_0 = arith.constant 0 : i32
    %c0_i32_1 = arith.constant 0 : i32
    return %c0_i32, %arg0, %c0_i32_0 : i32, i32, i32
  }
  func.func @transform_1(%arg0: i32) -> (i32, i32) {
    %c0_i32 = arith.constant 0 : i32
    %c0_i32_0 = arith.constant 0 : i32
    %c0_i32_1 = arith.constant 0 : i32
    return %c0_i32, %c0_i32_0 : i32, i32
  }
  func.func @transform_2(%arg0: i32) -> (i32, i32) {
    %c0_i32 = arith.constant 0 : i32
    %c0_i32_0 = arith.constant 0 : i32
    %c0_i32_1 = arith.constant 0 : i32
    return %c0_i32, %c0_i32_0 : i32, i32
  }
  func.func @transform_3(%arg0: i32) -> (i32, i32) {
    %c0_i32 = arith.constant 0 : i32
    %c0_i32_0 = arith.constant 0 : i32
    %c0_i32_1 = arith.constant 0 : i32
    return %c0_i32, %c0_i32_0 : i32, i32
  }
  func.func @transform_4(%arg0: i32) -> (i32, i32) {
    %c0_i32 = arith.constant 0 : i32
    %c0_i32_0 = arith.constant 0 : i32
    %c0_i32_1 = arith.constant 0 : i32
    return %c0_i32, %c0_i32_0 : i32, i32
  }
  func.func @transform_5(%arg0: i32) -> (i32, i32) {
    %c0_i32 = arith.constant 0 : i32
    %c0_i32_0 = arith.constant 0 : i32
    %c0_i32_1 = arith.constant 0 : i32
    return %c0_i32, %c0_i32_0 : i32, i32
  }
  func.func @transform_6(%arg0: i32) -> (i32, i32) {
    %c0_i32 = arith.constant 0 : i32
    %c0_i32_0 = arith.constant 0 : i32
    %c0_i32_1 = arith.constant 0 : i32
    return %c0_i32, %c0_i32_0 : i32, i32
  }
  func.func @transform_7(%arg0: i32) -> (i32, i32) {
    %c0_i32 = arith.constant 0 : i32
    %c0_i32_0 = arith.constant 0 : i32
    %c0_i32_1 = arith.constant 0 : i32
    return %c0_i32, %c0_i32_0 : i32, i32
  }
  func.func @transform_8(%arg0: i32) -> (i32, i32) {
    %c0_i32 = arith.constant 0 : i32
    %c0_i32_0 = arith.constant 0 : i32
    %c0_i32_1 = arith.constant 0 : i32
    return %c0_i32, %c0_i32_0 : i32, i32
  }
  func.func @transform_9(%arg0: i32) -> (i32, i32) {
    %c0_i32 = arith.constant 0 : i32
    %c0_i32_0 = arith.constant 0 : i32
    %c0_i32_1 = arith.constant 0 : i32
    return %c0_i32, %c0_i32_0 : i32, i32
  }
  func.func @transform_10(%arg0: i32) -> (i32, i32) {
    %c0_i32 = arith.constant 0 : i32
    %c0_i32_0 = arith.constant 0 : i32
    %c0_i32_1 = arith.constant 0 : i32
    return %c0_i32, %c0_i32_0 : i32, i32
  }
  func.func @transform_11(%arg0: i32) -> (i32, i32) {
    %c0_i32 = arith.constant 0 : i32
    %c0_i32_0 = arith.constant 0 : i32
    %c0_i32_1 = arith.constant 0 : i32
    return %c0_i32, %c0_i32_0 : i32, i32
  }
  func.func @transform_12(%arg0: i32) -> (i32, i32) {
    %c0_i32 = arith.constant 0 : i32
    %c0_i32_0 = arith.constant 0 : i32
    %c0_i32_1 = arith.constant 0 : i32
    return %c0_i32, %c0_i32_0 : i32, i32
  }
  func.func @transform_13(%arg0: i32) -> (i32, i32) {
    %c0_i32 = arith.constant 0 : i32
    %c0_i32_0 = arith.constant 0 : i32
    %c0_i32_1 = arith.constant 0 : i32
    return %c0_i32, %c0_i32_0 : i32, i32
  }
  func.func @transform_14(%arg0: i32) -> (i32, i32) {
    %c0_i32 = arith.constant 0 : i32
    %c0_i32_0 = arith.constant 0 : i32
    %c0_i32_1 = arith.constant 0 : i32
    return %c0_i32, %c0_i32_0 : i32, i32
  }
  func.func @transform_15(%arg0: i32) -> (i32, i32) {
    %c0_i32 = arith.constant 0 : i32
    %c0_i32_0 = arith.constant 0 : i32
    %c0_i32_1 = arith.constant 0 : i32
    return %c0_i32, %c0_i32_0 : i32, i32
  }
  func.func @transform_16(%arg0: i32) -> (i32, i32) {
    %c0_i32 = arith.constant 0 : i32
    %c0_i32_0 = arith.constant 0 : i32
    %c0_i32_1 = arith.constant 0 : i32
    return %c0_i32, %c0_i32_0 : i32, i32
  }
}

</mosaic_0001>

<bundles_post_ra>
// kernel: tpu_custom_call.1
= control target key start
LH: loop header
LB: loop body
LE: loop exit
PB: predicated region body
PF: predicated region fallthrough
CT: control target
= control target key end

     0   :  { %s15066_s0 = inlined_call_operand.hbm [shape: bf16[2,512,128], index: 0, kind: input, shape index: {}]   ;;  %s15067_s1 = inlined_call_operand.hbm [shape: bf16[128,128], index: 1, kind: input, shape index: {}]   ;;  %s15068_s2 = inlined_call_operand.hbm [shape: f32[1,128], index: 2, kind: input, shape index: {}]   ;;  %s15069_s3 = inlined_call_operand.hbm [shape: bf16[128,256], index: 3, kind: input, shape index: {}]   ;;  %s15070_s4 = inlined_call_operand.vmem [shape: f32[1,256], index: 4, kind: input, shape index: {}]   ;;  %s15071_s5 = inlined_call_operand.hbm [shape: bf16[128,1024], index: 5, kind: input, shape index: {}]   ;;  %s15072_s6 = inlined_call_operand.vmem [shape: f32[1,1024], index: 6, kind: input, shape index: {}]   ;;  %s15073_s7 = inlined_call_operand.hbm [shape: bf16[128,1024], index: 7, kind: input, shape index: {}]   ;;  %s15074_s8 = inlined_call_operand.vmem [shape: f32[1,1024], index: 8, kind: input, shape index: {}]   ;;  %s15075_s9 = inlined_call_operand.hbm [shape: bf16[1024,512], index: 9, kind: input, shape index: {}]   ;;  %s15076_s10 = inlined_call_operand.vmem [shape: f32[1,512], index: 10, kind: input, shape index: {}]   ;;  %s15077_s11 = inlined_call_operand.hbm [shape: bf16[512,256], index: 11, kind: input, shape index: {}]   ;;  %s15078_s12 = inlined_call_operand.vmem [shape: f32[1,256], index: 12, kind: input, shape index: {}]   ;;  %s15079_s13 = inlined_call_operand.hbm [shape: bf16[256,128], index: 13, kind: input, shape index: {}]   ;;  %s15080_s14 = inlined_call_operand.vmem [shape: f32[1,128], index: 14, kind: input, shape index: {}]   ;;  %s15081_s15 = inlined_call_operand.hbm [shape: f32[2,1024], index: 15, kind: output, shape index: {0}]   ;;  %s15082_s16 = inlined_call_operand.hbm [shape: f32[2,128], index: 16, kind: output, shape index: {1}]  }
   0x1   :  { %15155 = sst [smem:[#allocation74_spill]] %s15066_s0 }
   0x2   :  { %15156 = sst [smem:[#allocation75_spill]] %s15067_s1 }
   0x3   :  { %15157 = sst [smem:[#allocation76_spill]] %s15072_s6 }
   0x4   :  { %15158 = sst [smem:[#allocation77_spill]] %s15074_s8 }
   0x5   :  { %15159 = sst [smem:[#allocation78_spill]] %s15076_s10 }
   0x6   :  { %15160 = sst [smem:[#allocation79_spill]] %s15078_s12 }
   0x7   :  { %15161 = sst [smem:[#allocation80_spill]] %s15080_s14 }
   0x8   :  { %15162 = sst [smem:[#allocation81_spill]] %s15081_s15 }
   0x9   :  { %15163 = sst [smem:[#allocation82_spill]] %s15082_s16 }
   0xa   :  { %22 = vsyncpa [#allocation4], 0 }
   0xb   :  { %24 = vsyncpa [#allocation4 + $0x1], 0 }
   0xc   :  { %25 = vsyncpa [#allocation7], 0 }
   0xd   :  { %26 = vsyncpa [#allocation10], 0 }
   0xe   :  { %27 = vsyncpa [#allocation13], 0 }
   0xf   :  { %28 = vsyncpa [#allocation16], 0 }
  0x10   :  { %29 = vsyncpa [#allocation5], 0 }
  0x11   :  { %30 = vsyncpa [#allocation20], 0  ;;  %s12308_s21 = smov 0   ;;  %s12310_s22 = smov 0  }
  0x12   :  { %s12312_s23 = smov 0   ;;  %s12314_s24 = smov 0  }
  0x13 LB: > { %s12327_s25 = sadd.s32 4294967295, %s12194_s24   ;;  %s12330_s26 = sadd.s32 1, %s12194_s24   ;;  %s12194_s24 = sphi %s12314_s24, %s15296_s24   ;;  %s12190_s23 = sphi %s12312_s23, %s15300_s23   ;;  %s12186_s22 = sphi %s12310_s22, %s15299_s22   ;;  %s12182_s21 = sphi %s12308_s21, %s15298_s21  }
  0x14   : > { %15164 = sst [smem:[#allocation31_spill]] %s12330_s26  ;;  %s40_s27 = ssub.s32 %s12194_s24, %s12330_s26 }
  0x15   : > { %s43_s28 = sadd.s32 1, %s12190_s23  ;;  %p41_p0 = scmp.eq.s32.totalorder %s40_s27, 0 }
  0x16   : > { %p50_p1 = scmp.ne.s32.totalorder %s12190_s23, %s12186_s22  ;;  %p51_p2 = scmp.eq.s32.totalorder %s12194_s24, 0 }
  0x17   : > { %p56_p3 = scmp.ne.s32.totalorder %s12186_s22, %s12182_s21  ;;  %p15087_p5 = scmp.eq.s32.totalorder %s12327_s25, 0 }
  0x18   : > { %s12340_s29 = scalar_select %p41_p0, %s12190_s23, %s43_s28  }
  0x19   : > { %p12342_p4 = por %p51_p2, %p50_p1  ;;  %p10397_p6 = scmp.ge.s32.totalorder %s12194_s24, 1 }
  0x1a   : > { %15165 = sst [smem:[#allocation32_spill]] %s12340_s29  ;;  %p403_p7 = scmp.lt.s32.totalorder %s12194_s24, 3 }
  0x1b   : > { %s15166_s30 = scalar_select %p12342_p4, 1, 0 }
  0x1c   : > { %p12351_p8 = por %p15087_p5, %p56_p3  ;;  %p12356_p10 = pnand %p10397_p6, %p403_p7 }
  0x1d   : > { %s12196_s18 = smov [#allocation6]   ;;  %s12197_s21 = smov [#allocation9]  }
  0x1e   : > { %s15167_s0 = scalar_select %p12351_p8, 1, 0 }
  0x1f   : > { %s15168_s17 = scalar_select %p12356_p10, 1, 0 }
  0x20   : > { %s415_s19 = sshll.u32 %s12196_s18, 4  ;;  %p11192_p11 = pneg %p12356_p10  ;;  %s416_s19 = int_to_ptr.vmem [resolvable:$true] %s415_s19 }
  0x21   : > { %s439_s27 = sshll.u32 %s12197_s21, 4  ;;  %s15170_s1 = sld [smem:[#allocation75_spill]]  ;;  %s12368_s27 = int_to_ptr.vmem [resolvable:$true] %s439_s27 }
  0x22   : > { %p12364_p12 = pnand %p11192_p11, %p15087_p5 }
  0x24   : > { %p12378_p0 = pneg %p12364_p12 }
  0x27   : > { %s11860_s26 = scalar_lea.hbm %s15170_s1, 1024 }
  0x28   : > { %p11861_p13 = scmp.ne.s32.totalorder %s15170_s1, %s11860_s26  ;;  %p11867_p3 = scmp.lt.u32.totalorder %s11860_s26, %s15170_s1 }
  0x2a   : > { %p11863_p1 = pnand %p12378_p0, %p11861_p13 }
  0x2c   : > { %p11864_p2 = pneg %p11863_p1 }
  0x2e   : > { %p11869_p6 = pnand %p11867_p3, %p11864_p2 }
  0x30   : > { %11872 = shalt.err (!%p11869_p6)
}
  0x31   : > { %s11873_s29 = scalar_lea.vmem %s416_s19, 1024  ;;  %p11881_p5 = scmp.lt.s32.totalorder %s416_s19, %s416_s19 }
  0x32   : > { %p11874_p7 = scmp.ne.s32.totalorder %s416_s19, %s11873_s29  ;;  %p11882_p8 = scmp.lt.s32.totalorder %s11873_s29, %s11873_s29 }
  0x34   : > { %p11876_p11 = pnand %p11874_p7, %p12378_p0  ;;  %p11883_p10 = por %p11882_p8, %p11881_p5 }
  0x36   : > { %p11877_p9 = pneg %p11876_p11 }
  0x38   : > { %p11884_p4 = pnand %p11883_p10, %p11877_p9 }
  0x3a   : > { %11887 = shalt.err (!%p11884_p4)
}
  0x3b   : > { %s15093_s15 = smov 64   ;;  %s15094_s16 = smov 4  }
  0x3c   : > { %11195 = dma.hbm_to_vmem [thread:$0]  (!%p12364_p12), %s15170_s1, 1024, %s416_s19, [#allocation7], %s15093_s15, %s15093_s15, %s15094_s16  }
  0x3d   : > { %s11888_s12 = scalar_lea.hbm %s15069_s3, 2048 }
  0x3e   : > { %p11889_p4 = scmp.ne.s32.totalorder %s15069_s3, %s11888_s12  ;;  %p11895_p9 = scmp.lt.u32.totalorder %s11888_s12, %s15069_s3 }
  0x40   : > { %p11891_p5 = pnand %p11889_p4, %p12378_p0 }
  0x42   : > { %p11892_p8 = pneg %p11891_p5 }
  0x44   : > { %p11897_p10 = pnand %p11895_p9, %p11892_p8 }
  0x46   : > { %11900 = shalt.err (!%p11897_p10)
}
  0x47   : > { %s11901_s19 = scalar_lea.vmem %s12368_s27, 2048  ;;  %p11909_p3 = scmp.lt.s32.totalorder %s12368_s27, %s12368_s27 }
  0x48   : > { %p11902_p13 = scmp.ne.s32.totalorder %s12368_s27, %s11901_s19  ;;  %p11910_p6 = scmp.lt.s32.totalorder %s11901_s19, %s11901_s19 }
  0x4a   : > { %p11904_p1 = pnand %p11902_p13, %p12378_p0  ;;  %p11911_p7 = por %p11910_p6, %p11909_p3 }
  0x4c   : > { %p11905_p2 = pneg %p11904_p1 }
  0x4e   : > { %p11912_p11 = pnand %p11911_p7, %p11905_p2 }
  0x50   : > { %11915 = shalt.err (!%p11912_p11)
}
  0x51   : > { %s15095_s10 = smov 128   ;;  %s12201_s6 = smov 8  }
  0x52   : > { %11201 = dma.hbm_to_vmem [thread:$0]  (!%p12364_p12), %s15069_s3, 2048, %s12368_s27, [#allocation10], %s15095_s10, %s15095_s10, %s12201_s6  }
  0x53   : > { %s12202_s14 = smov [#allocation12]   ;;  %s12203_s28 = smov [#allocation15]  }
  0x54   : > { %s471_s26 = sshll.u32 %s12202_s14, 4  ;;  %s503_s21 = sshll.u32 %s12203_s28, 4  ;;  %s472_s26 = int_to_ptr.vmem [resolvable:$true] %s471_s26  ;;  %s12423_s21 = int_to_ptr.vmem [resolvable:$true] %s503_s21 }
  0x55   : > { %s11916_s15 = scalar_lea.hbm %s15073_s7, 8192 }
  0x56   : > { %p11917_p4 = scmp.ne.s32.totalorder %s15073_s7, %s11916_s15  ;;  %p11923_p9 = scmp.lt.u32.totalorder %s11916_s15, %s15073_s7 }
  0x58   : > { %p11919_p5 = pnand %p11917_p4, %p12378_p0 }
  0x5a   : > { %p11920_p8 = pneg %p11919_p5 }
  0x5c   : > { %p11925_p10 = pnand %p11923_p9, %p11920_p8 }
  0x5e   : > { %11928 = shalt.err (!%p11925_p10)
}
  0x5f   : > { %s11929_s12 = scalar_lea.vmem %s472_s26, 8192  ;;  %p11937_p3 = scmp.lt.s32.totalorder %s472_s26, %s472_s26 }
  0x60   : > { %p11930_p13 = scmp.ne.s32.totalorder %s472_s26, %s11929_s12  ;;  %p11938_p6 = scmp.lt.s32.totalorder %s11929_s12, %s11929_s12 }
  0x62   : > { %p11932_p1 = pnand %p11930_p13, %p12378_p0  ;;  %p11939_p7 = por %p11938_p6, %p11937_p3 }
  0x64   : > { %p11933_p2 = pneg %p11932_p1 }
  0x66   : > { %p11940_p11 = pnand %p11939_p7, %p11933_p2 }
  0x68   : > { %11943 = shalt.err (!%p11940_p11)
}
  0x69   : > { %s15096_s1 = smov 512   ;;  %s15097_s16 = smov 32  }
  0x6a   : > { %11207 = dma.hbm_to_vmem [thread:$0]  (!%p12364_p12), %s15073_s7, 8192, %s472_s26, [#allocation13], %s15096_s1, %s15096_s1, %s15097_s16  }
  0x6b   : > { %s11944_s19 = scalar_lea.hbm %s15077_s11, 8192 }
  0x6c   : > { %p11945_p4 = scmp.ne.s32.totalorder %s15077_s11, %s11944_s19  ;;  %p11951_p9 = scmp.lt.u32.totalorder %s11944_s19, %s15077_s11 }
  0x6e   : > { %p11947_p5 = pnand %p11945_p4, %p12378_p0 }
  0x70   : > { %p11948_p8 = pneg %p11947_p5 }
  0x72   : > { %p11953_p10 = pnand %p11951_p9, %p11948_p8 }
  0x74   : > { %11956 = shalt.err (!%p11953_p10)
}
  0x75   : > { %s11957_s26 = scalar_lea.vmem %s12423_s21, 8192  ;;  %p11965_p3 = scmp.lt.s32.totalorder %s12423_s21, %s12423_s21 }
  0x76   : > { %p11958_p13 = scmp.ne.s32.totalorder %s12423_s21, %s11957_s26  ;;  %p11966_p6 = scmp.lt.s32.totalorder %s11957_s26, %s11957_s26 }
  0x78   : > { %p11960_p1 = pnand %p11958_p13, %p12378_p0  ;;  %p11967_p7 = por %p11966_p6, %p11965_p3 }
  0x7a   : > { %p11961_p2 = pneg %p11960_p1 }
  0x7c   : > { %p11968_p11 = pnand %p11967_p7, %p11961_p2 }
  0x7e   : > { %11971 = shalt.err (!%p11968_p11)
}
  0x7f   : > { %s15172_s10 = smov 128   ;;  %s12206_s28 = smov [#allocation8]  }
  0x80   : > { %11213 = dma.hbm_to_vmem [thread:$0]  (!%p12364_p12), %s15077_s11, 8192, %s12423_s21, [#allocation16], %s15172_s10, %s15172_s10, %s12201_s6  }
  0x81   : > { %s429_s29 = sshll.u32 %s12206_s28, 4  ;;  %s12207_s19 = smov [#allocation11]   ;;  %s430_s29 = int_to_ptr.vmem [resolvable:$true] %s429_s29 }
  0x82   : > { %s455_s8 = sshll.u32 %s12207_s19, 4  ;;  %s11972_s26 = scalar_lea.hbm %s15068_s2, 16  ;;  %s12472_s8 = int_to_ptr.vmem [resolvable:$true] %s455_s8 }
  0x83   : > { %p11973_p4 = scmp.ne.s32.totalorder %s15068_s2, %s11972_s26  ;;  %p11979_p9 = scmp.lt.u32.totalorder %s11972_s26, %s15068_s2 }
  0x85   : > { %p11975_p5 = pnand %p11973_p4, %p12378_p0 }
  0x87   : > { %p11976_p8 = pneg %p11975_p5 }
  0x89   : > { %p11981_p10 = pnand %p11979_p9, %p11976_p8 }
  0x8b   : > { %11984 = shalt.err (!%p11981_p10)
}
  0x8c   : > { %s11985_s21 = scalar_lea.vmem %s430_s29, 16  ;;  %s11992_s10 = scalar_lea.vmem %s430_s29, 32 }
  0x8d   : > { %p11986_p13 = scmp.ne.s32.totalorder %s430_s29, %s11985_s21  ;;  %p11993_p3 = scmp.lt.s32.totalorder %s430_s29, %s430_s29 }
  0x8e   : > { %p11994_p6 = scmp.lt.s32.totalorder %s11992_s10, %s11985_s21 }
  0x8f   : > { %p11988_p1 = pnand %p11986_p13, %p12378_p0 }
  0x90   : > { %p11995_p7 = por %p11994_p6, %p11993_p3 }
  0x91   : > { %p11989_p2 = pneg %p11988_p1 }
  0x93   : > { %p11996_p11 = pnand %p11995_p7, %p11989_p2 }
  0x95   : > { %11999 = shalt.err (!%p11996_p11)
}
  0x96   : > { %11198 = dma.hbm_to_vmem [thread:$0]  (!%p12364_p12), %s15068_s2, 16, %s430_s29, [#allocation7]  }
  0x97   : > { %s12000_s19 = scalar_lea.hbm %s15071_s5, 8192 }
  0x98   : > { %p12001_p4 = scmp.ne.s32.totalorder %s15071_s5, %s12000_s19  ;;  %p12007_p9 = scmp.lt.u32.totalorder %s12000_s19, %s15071_s5 }
  0x9a   : > { %p12003_p5 = pnand %p12001_p4, %p12378_p0 }
  0x9c   : > { %p12004_p8 = pneg %p12003_p5 }
  0x9e   : > { %p12009_p10 = pnand %p12007_p9, %p12004_p8 }
  0xa0   : > { %12012 = shalt.err (!%p12009_p10)
}
  0xa1   : > { %s12013_s29 = scalar_lea.vmem %s12472_s8, 8192  ;;  %p12021_p3 = scmp.lt.s32.totalorder %s12472_s8, %s12472_s8 }
  0xa2   : > { %p12014_p13 = scmp.ne.s32.totalorder %s12472_s8, %s12013_s29  ;;  %p12022_p6 = scmp.lt.s32.totalorder %s12013_s29, %s12013_s29 }
  0xa4   : > { %p12016_p1 = pnand %p12014_p13, %p12378_p0  ;;  %p12023_p7 = por %p12022_p6, %p12021_p3 }
  0xa6   : > { %p12017_p2 = pneg %p12016_p1 }
  0xa8   : > { %p12024_p11 = pnand %p12023_p7, %p12017_p2 }
  0xaa   : > { %12027 = shalt.err (!%p12024_p11)
}
  0xab   : > { %s15173_s6 = smov 32   ;;  %s15174_s21 = smov 512  }
  0xac   : > { %11204 = dma.hbm_to_vmem [thread:$0]  (!%p12364_p12), %s15071_s5, 8192, %s12472_s8, [#allocation10], %s15174_s21, %s15174_s21, %s15173_s6  }
  0xad   : > { %s12208_s16 = smov [#allocation14]   ;;  %s12028_s27 = scalar_lea.hbm %s15075_s9, 32768 }
  0xae   : > { %s487_s14 = sshll.u32 %s12208_s16, 4  ;;  %p12029_p4 = scmp.ne.s32.totalorder %s15075_s9, %s12028_s27  ;;  %s488_s14 = int_to_ptr.vmem [resolvable:$true] %s487_s14 }
  0xaf   : > { %p12035_p9 = scmp.lt.u32.totalorder %s12028_s27, %s15075_s9 }
  0xb0   : > { %p12031_p5 = pnand %p12029_p4, %p12378_p0 }
  0xb2   : > { %p12032_p8 = pneg %p12031_p5 }
  0xb4   : > { %p12037_p10 = pnand %p12035_p9, %p12032_p8 }
  0xb6   : > { %12040 = shalt.err (!%p12037_p10)
}
  0xb7   : > { %s12041_s8 = scalar_lea.vmem %s488_s14, 32768  ;;  %p12049_p3 = scmp.lt.s32.totalorder %s488_s14, %s488_s14 }
  0xb8   : > { %p12042_p13 = scmp.ne.s32.totalorder %s488_s14, %s12041_s8  ;;  %p12050_p6 = scmp.lt.s32.totalorder %s12041_s8, %s12041_s8 }
  0xba   : > { %p12044_p1 = pnand %p12042_p13, %p12378_p0  ;;  %p12051_p7 = por %p12050_p6, %p12049_p3 }
  0xbc   : > { %p12045_p2 = pneg %p12044_p1 }
  0xbe   : > { %p12052_p11 = pnand %p12051_p7, %p12045_p2 }
  0xc0   : > { %12055 = shalt.err (!%p12052_p11)
}
  0xc1   : > { %s12209_s6 = smov 256   ;;  %s12210_s21 = smov 16  }
  0xc2   : > { %11210 = dma.hbm_to_vmem [thread:$0]  (!%p12364_p12), %s15075_s9, 32768, %s488_s14, [#allocation13], %s12209_s6, %s12209_s6, %s12210_s21  }
  0xc3   : > { %s12211_s16 = smov [#allocation17]   ;;  %s12056_s12 = scalar_lea.hbm %s15079_s13, 2048 }
  0xc4   : > { %s519_s28 = sshll.u32 %s12211_s16, 4  ;;  %p12057_p4 = scmp.ne.s32.totalorder %s15079_s13, %s12056_s12  ;;  %s520_s28 = int_to_ptr.vmem [resolvable:$true] %s519_s28 }
  0xc5   : > { %p12063_p9 = scmp.lt.u32.totalorder %s12056_s12, %s15079_s13 }
  0xc6   : > { %p12059_p5 = pnand %p12057_p4, %p12378_p0 }
  0xc8   : > { %p12060_p8 = pneg %p12059_p5 }
  0xca   : > { %p12065_p10 = pnand %p12063_p9, %p12060_p8 }
  0xcc   : > { %12068 = shalt.err (!%p12065_p10)
}
  0xcd   : > { %s12069_s14 = scalar_lea.vmem %s520_s28, 2048  ;;  %p12077_p3 = scmp.lt.s32.totalorder %s520_s28, %s520_s28 }
  0xce   : > { %p12070_p13 = scmp.ne.s32.totalorder %s520_s28, %s12069_s14  ;;  %p12078_p6 = scmp.lt.s32.totalorder %s12069_s14, %s12069_s14 }
  0xd0   : > { %p12072_p1 = pnand %p12070_p13, %p12378_p0  ;;  %p12079_p7 = por %p12078_p6, %p12077_p3 }
  0xd2   : > { %p12073_p2 = pneg %p12072_p1 }
  0xd4   : > { %p12080_p11 = pnand %p12079_p7, %p12073_p2 }
  0xd6   : > { %12083 = shalt.err (!%p12080_p11)
}
  0xd7   : > { %s15175_s6 = smov 4   ;;  %s15176_s21 = smov 64  }
  0xd8   : > { %11216 = dma.hbm_to_vmem [thread:$0]  (!%p12364_p12), %s15079_s13, 2048, %s520_s28, [#allocation16], %s15176_s21, %s15176_s21, %s15175_s6  }
  0xd9   : > { %p10406_p4 = scmp.ge.s32.totalorder %s12194_s24, 2 }
  0xdb   : > { %532 = sbr.rel (%p10406_p4) target bundleno = 241 (0xf1), region = 72 }
  0xe2   : > { %s536_s18 = sand.u32 1, %s12190_s23   ;;  %s10952_s16 = sshll.u32 %s12194_s24, 11 }
  0xe3   : > { %s10407_s20 = sshll.u32 %s536_s18, 8  ;;  %s15177_s12 = sld [smem:[#allocation74_spill]] }
  0xe4   : > { %p15178_p0 = scmp.ne.s32.totalorder %s15166_s30, 0  ;;  %s540_s15 = scalar_lea.vmem [#allocation3], %s10407_s20 }
  0xe5   : > { %s559_s29 = sshll.u32 %s540_s15, 4  ;;  %s12212_s14 = smov 4096   ;;  %s560_s29 = int_to_ptr.vmem [resolvable:$true] %s559_s29 }
  0xe6   : > { %s11159_s28 = scalar_select %p15178_p0, [#allocation0], [#allocation23] }
  0xe7   : > { %11160 = sst [smem:[#allocation22]] (%p15178_p0), %s12212_s14  ;;  %s12213_s6 = smov 2048  }
  0xe8   : > { %s551_s8 = sld [smem:[%s11159_s28]]   ;;  %s12214_s24 = smov 32  }
  0xe9   : > { %s546_s26 = scalar_lea.hbm %s15177_s12, %s10952_s16  ;;  %11161 = sst [smem:[#allocation22 + $0x1]] (%p15178_p0), %s12213_s6 }
  0xea   : > { %11162 = sst [smem:[#allocation22 + $0x2]] (%p15178_p0), %s12214_s24  ;;  %s12215_s21 = smov 64  }
  0xeb   : > { %11163 = sst [smem:[#allocation22 + $0x3]] (%p15178_p0), %s12215_s21  ;;  %s12216_s1 = smov 4  }
  0xec   : > { %11164 = sst [smem:[#allocation22 + $0x4]] (%p15178_p0), %s12215_s21  ;;  %s537_s20 = scalar_lea.sflag [#allocation4], %s536_s18 }
  0xed   : > { %11165 = sst [smem:[#allocation22 + $0x5]] (%p15178_p0), %s12216_s1  ;;  %s12217_s19 = smov [#allocation21]  }
  0xee   : > { %s10410_s10 = sshll.u32 %s551_s8, 26 }
  0xef   : > { %s10411_s16 = sadd.s32 134217728, %s10410_s10 }
  0xf0   : > { %11166 = dma.general (%p15178_p0), %s546_s26, 4096, %s560_s29, %s537_s20, %s12217_s19, [#allocation22], %s10411_s16, 0  }
  0xf1 PF: > { %p15179_p12 = scmp.ne.s32.totalorder %s15168_s17, 0 }
  0xf3   : > { %584 = sbr.rel (%p15179_p12) target bundleno = 3042 (0xbe2), region = 80 }
  0xfa   : > { %s586_s27 = sand.u32 1, %s12186_s22   ;;  %p15180_p5 = scmp.ne.s32.totalorder %s15167_s0, 0 }
  0xfb   : > { %s10413_s12 = sshll.u32 %s586_s27, 8  ;;  %s587_s28 = scalar_lea.sflag [#allocation4], %s586_s27 }
  0xfc   : > { %s12582_s15 = scalar_lea.vmem [#allocation3], %s10413_s12 }
  0xfd   : > { %12153 = dma.done.wait (%p15180_p5), %s587_s28, 4096  }
  0xfe   : > { %12155 = vsyncadd (%p15180_p5), %s587_s28, 4294963200  ;;  %p15181_p8 = scmp.eq.s32.totalorder %s12327_s25, 0 }
 0x100   : > { %12157 = dma.done.wait (%p15181_p8), [#allocation7], 1040   ;;  %p15182_p9 = pmov %p15181_p8 }
 0x101   : > { %p15183_p10 = pmov %p15181_p8 }
 0x102   : > { %12159 = vsyncadd (%p15182_p9), [#allocation7], 4294966256 }
 0x103   : > { %12161 = dma.done.wait (%p15183_p10), [#allocation10], 10240   ;;  %p15184_p13 = pmov %p15181_p8 }
 0x104   : > { %p15185_p1 = pmov %p15181_p8 }
 0x105   : > { %12163 = vsyncadd (%p15184_p13), [#allocation10], 4294957056 }
 0x106   : > { %12165 = dma.done.wait (%p15185_p1), [#allocation13], 40960   ;;  %p15186_p2 = pmov %p15185_p1 }
 0x107   : > { %p15187_p3 = pmov %p15185_p1 }
 0x108   : > { %12167 = vsyncadd (%p15186_p2), [#allocation13], 4294926336 }
 0x109   : > { %12169 = dma.done.wait (%p15187_p3), [#allocation16], 10240   ;;  %p15188_p6 = pmov %p15185_p1 }
 0x10a   : > { %p15189_p7 = scmp.ne.s32.totalorder %s12327_s25, 0 }
 0x10b   : > { %12171 = vsyncadd (%p15188_p6), [#allocation16], 4294957056  ;;  %v12218_v0 = vmov (!%p15189_p7), -inf  }
 0x10c   : > { %671 = sbr.rel (%p15189_p7) target bundleno = 275 (0x113), region = 120  ;;  %672 = vst [vmem:[#allocation2] sm:$0xff] (!%p15189_p7), %v12218_v0  ;;  %673 = vst [vmem:[#allocation2 + $0x8] sm:$0xff] (!%p15189_p7), %v12218_v0 }
 0x10d   : > { %674 = vst [vmem:[#allocation18] sm:$0xff] (!%p15189_p7), %v12218_v0  ;;  %675 = vst [vmem:[#allocation18 + $0x8] sm:$0xff] (!%p15189_p7), %v12218_v0 }
 0x113 PF: > { %v11296_v1 = vld [vmem:[#allocation6] sm:$0xff]   ;;  %v11297_v2 = vld [vmem:[#allocation6 + $0x8] sm:$0xff]   ;;  %v11298_v3 = vld [vmem:[#allocation6 + $0x10] sm:$0xff]   ;;  %v15098_v51 = vmov 0   ;;  %s15226_s26 = sld [smem:[#allocation76_spill]]  ;;  %vm5074_vm0 = vcmask 1041409  }
 0x114   : > { %11015 = vmatprep.subr.bf16.mxu0 %v11296_v1  ;;  %v11299_v4 = vld [vmem:[#allocation6 + $0x18] sm:$0xff]   ;;  %v11304_v5 = vld [vmem:[%s12582_s15] sm:$0xff]   ;;  %v11301_v7 = vld [vmem:[#allocation6 + $0x28] sm:$0xff]   ;;  %1608 = vmatprep.mubr.bf16.mxu1 %v15098_v51  ;;  %vm5076_vm1 = vcmask 1043459   ;;  %vm5078_vm2 = vcmask 1045509   ;;  %vm5080_vm3 = vcmask 1047559  }
 0x115   : > { %11016 = vmatpush3.bf16.msra.mxu0 %v11296_v1  ;;  %11031 = vmatprep.mubr.bf16.mxu0 %v11304_v5  ;;  %v11300_v6 = vld [vmem:[#allocation6 + $0x20] sm:$0xff]   ;;  %v11302_v8 = vld [vmem:[#allocation6 + $0x30] sm:$0xff]   ;;  %v11303_v9 = vld [vmem:[#allocation6 + $0x38] sm:$0xff]   ;;  %s15265_s24 = sld [smem:[#allocation77_spill]]  ;;  %p10608_p11 = scmp.ne.s32.totalorder %s12327_s25, 1 }
 0x116   : > { %11017 = vmatprep.subr.bf16.mxu0 %v11297_v2  ;;  %v11324_v10 = vld [vmem:[#allocation9 + $0x4] ss:$8 sps:$4 sm:$0xff]   ;;  %v11322_v11 = vld [vmem:[#allocation9] ss:$8 sps:$4 sm:$0xff]   ;;  %v11329_v13 = vld [vmem:[#allocation9 + $0x14] ss:$8 sps:$4 sm:$0xff]  }
 0x117   : > { %11095 = vmatprep.subr.bf16.mxu1 %v11324_v10  ;;  %v11305_v12 = vld [vmem:[%s12582_s15 + $0x8] sm:$0xff]   ;;  %v11306_v14 = vld [vmem:[%s12582_s15 + $0x10] sm:$0xff]   ;;  %v11307_v19 = vld [vmem:[%s12582_s15 + $0x18] sm:$0xff]   ;;  %s15286_s19 = sld [smem:[#allocation78_spill]] (!%p10608_p11)  ;;  %s15291_s28 = sld [smem:[#allocation79_spill]] (!%p10608_p11) }
 0x118   : > { %11103 = vmatpush1.bf16.msra.mxu1 %v11322_v11  ;;  %v11327_v15 = vld [vmem:[#allocation9 + $0x10] ss:$8 sps:$4 sm:$0xff]   ;;  %v11334_v16 = vld [vmem:[#allocation9 + $0x24] ss:$8 sps:$4 sm:$0xff]   ;;  %v11332_v17 = vld [vmem:[#allocation9 + $0x20] ss:$8 sps:$4 sm:$0xff]  }
 0x119   : > { %11018 = vmatpush3.bf16.msra.mxu0 %v11297_v2  ;;  %11096 = vmatprep.subr.bf16.mxu1 %v11329_v13  ;;  %v11339_v18 = vld [vmem:[#allocation9 + $0x34] ss:$8 sps:$4 sm:$0xff]   ;;  %v11337_v21 = vld [vmem:[#allocation9 + $0x30] ss:$8 sps:$4 sm:$0xff]   ;;  %v11344_v22 = vld [vmem:[#allocation9 + $0x44] ss:$8 sps:$4 sm:$0xff]  }
 0x11a   : > { %11019 = vmatprep.subr.bf16.mxu0 %v11298_v3  ;;  %v11308_v20 = vld [vmem:[%s12582_s15 + $0x20] sm:$0xff]   ;;  %v11309_v25 = vld [vmem:[%s12582_s15 + $0x28] sm:$0xff]   ;;  %v11310_v26 = vld [vmem:[%s12582_s15 + $0x30] sm:$0xff]   ;;  %s15292_s0 = sld [smem:[#allocation80_spill]] (!%p10608_p11) }
 0x11b   : > { %v11342_v23 = vld [vmem:[#allocation9 + $0x40] ss:$8 sps:$4 sm:$0xff]   ;;  %v11349_v24 = vld [vmem:[#allocation9 + $0x54] ss:$8 sps:$4 sm:$0xff]   ;;  %v11347_v27 = vld [vmem:[#allocation9 + $0x50] ss:$8 sps:$4 sm:$0xff]   ;;  %s15266_s10 = smov %s15265_s24 }
 0x11c   : > { %11104 = vmatpush1.bf16.msra.mxu1 %v11327_v15  ;;  %v11354_v28 = vld [vmem:[#allocation9 + $0x64] ss:$8 sps:$4 sm:$0xff]   ;;  %v11352_v29 = vld [vmem:[#allocation9 + $0x60] ss:$8 sps:$4 sm:$0xff]   ;;  %v11359_v30 = vld [vmem:[#allocation9 + $0x74] ss:$8 sps:$4 sm:$0xff]  }
 0x11d   : > { %11020 = vmatpush3.bf16.msra.mxu0 %v11298_v3  ;;  %11097 = vmatprep.subr.bf16.mxu1 %v11334_v16  ;;  %v11311_v31 = vld [vmem:[%s12582_s15 + $0x38] sm:$0xff]   ;;  %v11312_v32 = vld [vmem:[%s12582_s15 + $0x40] sm:$0xff]   ;;  %v11313_v34 = vld [vmem:[%s12582_s15 + $0x48] sm:$0xff]  }
 0x11e   : > { %11021 = vmatprep.subr.bf16.mxu0 %v11299_v4  ;;  %v11357_v33 = vld [vmem:[#allocation9 + $0x70] ss:$8 sps:$4 sm:$0xff]   ;;  %v11316_v37 = vld [vmem:[%s12582_s15 + $0x60] sm:$0xff]   ;;  %v11317_v38 = vld [vmem:[%s12582_s15 + $0x68] sm:$0xff]  }
 0x11f   : > { %v11314_v35 = vld [vmem:[%s12582_s15 + $0x50] sm:$0xff]   ;;  %v11315_v36 = vld [vmem:[%s12582_s15 + $0x58] sm:$0xff]   ;;  %v11320_v41 = vld [vmem:[%s12582_s15 + $0x80] sm:$0xff]  }
 0x120   : > { %11105 = vmatpush1.bf16.msra.mxu1 %v11332_v17  ;;  %v11318_v39 = vld [vmem:[%s12582_s15 + $0x70] sm:$0xff]   ;;  %v11319_v40 = vld [vmem:[%s12582_s15 + $0x78] sm:$0xff]   ;;  %v11321_v42 = vld [vmem:[%s12582_s15 + $0x88] sm:$0xff]  }
 0x121   : > { %11022 = vmatpush3.bf16.msra.mxu0 %v11299_v4  ;;  %11098 = vmatprep.subr.bf16.mxu1 %v11339_v18  ;;  %v11325_v43 = vld [vmem:[%s12582_s15 + $0x90] sm:$0xff]   ;;  %v11326_v44 = vld [vmem:[%s12582_s15 + $0x98] sm:$0xff]   ;;  %v11330_v45 = vld [vmem:[%s12582_s15 + $0xa0] sm:$0xff]  }
 0x122   : > { %11023 = vmatprep.subr.bf16.mxu0 %v11300_v6  ;;  %v11331_v46 = vld [vmem:[%s12582_s15 + $0xa8] sm:$0xff]   ;;  %v11335_v47 = vld [vmem:[%s12582_s15 + $0xb0] sm:$0xff]   ;;  %v11336_v48 = vld [vmem:[%s12582_s15 + $0xb8] sm:$0xff]  }
 0x123   : > { %v11340_v49 = vld [vmem:[%s12582_s15 + $0xc0] sm:$0xff]   ;;  %v11341_v50 = vld [vmem:[%s12582_s15 + $0xc8] sm:$0xff]   ;;  %v11345_v52 = vld [vmem:[%s12582_s15 + $0xd0] sm:$0xff]  }
 0x124   : > { %11106 = vmatpush1.bf16.msra.mxu1 %v11337_v21  ;;  %v11346_v53 = vld [vmem:[%s12582_s15 + $0xd8] sm:$0xff]   ;;  %v11350_v54 = vld [vmem:[%s12582_s15 + $0xe0] sm:$0xff]   ;;  %v11351_v55 = vld [vmem:[%s12582_s15 + $0xe8] sm:$0xff]  }
 0x125   : > { %11024 = vmatpush3.bf16.msra.mxu0 %v11300_v6  ;;  %11099 = vmatprep.subr.bf16.mxu1 %v11344_v22  ;;  %v11355_v56 = vld [vmem:[%s12582_s15 + $0xf0] sm:$0xff]   ;;  %v11356_v57 = vld [vmem:[%s12582_s15 + $0xf8] sm:$0xff]   ;;  %v12648_v62 = vld [vmem:[#allocation8] ss:$0 sm:$0xff] }
 0x126   : > { %11025 = vmatprep.subr.bf16.mxu0 %v11301_v7  ;;  %v12640_v58 = vld [vmem:[#allocation11 + $0x8] sm:$0xff] }
 0x127   : > { %v12642_v59 = vld [vmem:[#allocation11 + $0x28] sm:$0xff] }
 0x128   : > { %11107 = vmatpush1.bf16.msra.mxu1 %v11342_v23  ;;  %v10482_v60 = vcombine.low %v12640_v58, %v12642_v59  ;;  %v10483_v61 = vcombine.high %v12640_v58, %v12642_v59 }
 0x129   : > { %11026 = vmatpush3.bf16.msra.mxu0 %v11301_v7  ;;  %11100 = vmatprep.subr.bf16.mxu1 %v11349_v24 }
 0x12a   : > { %11027 = vmatprep.subr.bf16.mxu0 %v11302_v8 }
 0x12c   : > { %11108 = vmatpush1.bf16.msra.mxu1 %v11347_v27 }
 0x12d   : > { %11028 = vmatpush3.bf16.msra.mxu0 %v11302_v8  ;;  %11101 = vmatprep.subr.bf16.mxu1 %v11354_v28 }
 0x12e   : > { %11029 = vmatprep.subr.bf16.mxu0 %v11303_v9 }
 0x130   : > { %11109 = vmatpush1.bf16.msra.mxu1 %v11352_v29 }
 0x131   : > { %11030 = vmatpush3.bf16.msra.mxu0 %v11303_v9  ;;  %11102 = vmatprep.subr.bf16.mxu1 %v11359_v30 }
 0x132   : > { %1496 = vmatprep.subr.bf16.mxu0 %v11324_v10 }
 0x134   : > { %11032 = vmatmul.mubr.bf16.vlgmr.msra.gmra.mrb[0].mxu0 %v11305_v12  ;;  %11110 = vmatpush1.bf16.msra.mxu1 %v11357_v33 }
 0x135   : > { %11035 = vmatprep.mubr.bf16.mxu0 %v11306_v14  ;;  %1497 = vmatpush1.bf16.msra.mxu0 %v11322_v11 }
 0x136   : > { %1498 = vmatprep.subr.bf16.mxu0 %v11329_v13  ;;  %2820 = vmatprep.subr.bf16.mxu1 %v10483_v61 }
 0x139   : > { %1499 = vmatpush1.bf16.msra.mxu0 %v11327_v15 }
 0x13a   : > { %1500 = vmatprep.subr.bf16.mxu0 %v11334_v16 }
 0x13c   : > { %11036 = vmatmul.mubr.bf16.gmra.mrb[4].mxu0 %v11307_v19 }
 0x13d   : > { %11039 = vmatprep.mubr.bf16.mxu0 %v11308_v20  ;;  %1501 = vmatpush1.bf16.msra.mxu0 %v11332_v17 }
 0x13e   : > { %1502 = vmatprep.subr.bf16.mxu0 %v11339_v18 }
 0x141   : > { %1503 = vmatpush1.bf16.msra.mxu0 %v11337_v21 }
 0x142   : > { %1504 = vmatprep.subr.bf16.mxu0 %v11344_v22 }
 0x144   : > { %11040 = vmatmul.mubr.bf16.gmra.mrb[8].mxu0 %v11309_v25 }
 0x145   : > { %11043 = vmatprep.mubr.bf16.mxu0 %v11310_v26  ;;  %1505 = vmatpush1.bf16.msra.mxu0 %v11342_v23 }
 0x146   : > { %1506 = vmatprep.subr.bf16.mxu0 %v11349_v24 }
 0x149   : > { %1507 = vmatpush1.bf16.msra.mxu0 %v11347_v27 }
 0x14a   : > { %1508 = vmatprep.subr.bf16.mxu0 %v11354_v28 }
 0x14c   : > { %11044 = vmatmul.mubr.bf16.gmra.mrb[12].mxu0 %v11311_v31 }
 0x14d   : > { %11047 = vmatprep.mubr.bf16.mxu0 %v11312_v32  ;;  %1509 = vmatpush1.bf16.msra.mxu0 %v11352_v29 }
 0x14e   : > { %1510 = vmatprep.subr.bf16.mxu0 %v11359_v30 }
 0x151   : > { %1511 = vmatpush1.bf16.msra.mxu0 %v11357_v33 }
 0x154   : > { %11048 = vmatmul.mubr.bf16.gmra.mrb[16].mxu0 %v11313_v34 }
 0x155   : > { %11051 = vmatprep.mubr.bf16.mxu0 %v11314_v35 }
 0x15c   : > { %11052 = vmatmul.mubr.bf16.gmra.mrb[20].mxu0 %v11315_v36 }
 0x15d   : > { %11055 = vmatprep.mubr.bf16.mxu0 %v11316_v37 }
 0x164   : > { %11056 = vmatmul.mubr.bf16.gmra.mrb[24].mxu0 %v11317_v38 }
 0x165   : > { %11059 = vmatprep.mubr.bf16.mxu0 %v11318_v39 }
 0x16c   : > { %11060 = vmatmul.mubr.bf16.gmra.mrb[28].mxu0 %v11319_v40 }
 0x16d   : > { %11063 = vmatprep.mubr.bf16.mxu0 %v11320_v41 }
 0x174   : > { %11064 = vmatmul.mubr.bf16.gmra.mrb[32].mxu0 %v11321_v42 }
 0x175   : > { %11067 = vmatprep.mubr.bf16.mxu0 %v11325_v43 }
 0x17c   : > { %11068 = vmatmul.mubr.bf16.gmra.mrb[36].mxu0 %v11326_v44 }
 0x17d   : > { %11071 = vmatprep.mubr.bf16.mxu0 %v11330_v45 }
 0x184   : > { %11072 = vmatmul.mubr.bf16.gmra.mrb[40].mxu0 %v11331_v46 }
 0x185   : > { %11075 = vmatprep.mubr.bf16.mxu0 %v11335_v47 }
 0x18c   : > { %11076 = vmatmul.mubr.bf16.gmra.mrb[44].mxu0 %v11336_v48 }
 0x18d   : > { %11079 = vmatprep.mubr.bf16.mxu0 %v11340_v49 }
 0x194   : > { %11080 = vmatmul.mubr.bf16.gmra.mrb[48].mxu0 %v11341_v50 }
 0x195   : > { %11083 = vmatprep.mubr.bf16.mxu0 %v11345_v52 }
 0x19c   : > { %11084 = vmatmul.mubr.bf16.gmra.mrb[52].mxu0 %v11346_v53 }
 0x19d   : > { %11087 = vmatprep.mubr.bf16.mxu0 %v11350_v54 }
 0x1a4   : > { %11088 = vmatmul.mubr.bf16.gmra.mrb[56].mxu0 %v11351_v55 }
 0x1a5   : > { %11091 = vmatprep.mubr.bf16.mxu0 %v11355_v56 }
 0x1ac   : > { %11092 = vmatmul.mubr.bf16.gmra.mrb[60].mxu0 %v11356_v57 }
 0x1ad   : > { %1528 = vmatprep.mubr.bf16.mxu0 %v15098_v51 }
 0x207   : > { %v11033_v63 = vpop.f32.mrb[0].mxu0 }
 0x208   : > { %v1046_v0 = vadd.f32 %v11033_v63, %v12648_v62  ;;  %v1037_v1 = vpop.f32.mrb[1].mxu0 }
 0x209   : > { %v1038_v2 = vadd.f32 %v12648_v62, %v1037_v1  ;;  %v11034_v3 = vpop.f32.mrb[2].mxu0 }
 0x20a   : > { %v1049_v4 = vadd.f32 %v11034_v3, %v12648_v62  ;;  %v1040_v5 = vpop.f32.mrb[3].mxu0  ;;  %v1294_v7 = vmax.f32 %v1046_v0, 0.0  ;;  %v2041_v3 = vld [vmem:[#allocation11] sm:$0xff] }
 0x20b   : > { %v1041_v6 = vadd.f32 %v12648_v62, %v1040_v5  ;;  %v1292_v9 = vmax.f32 %v1038_v2, 0.0 }
 0x20c   : > { %v1295_v8 = vmax.f32 %v1049_v4, 0.0  ;;  %v2045_v4 = vld [vmem:[#allocation11 + $0x20] sm:$0xff] }
 0x20d   : > { %v1293_v10 = vmax.f32 %v1041_v6, 0.0  ;;  %v10480_v6 = vcombine.low %v2041_v3, %v2045_v4 }
 0x20e   : > { %v1357_v11 = vpack.c.bf16 %v1295_v8, %v1294_v7  ;;  %v10481_v7 = vcombine.high %v2041_v3, %v2045_v4  ;;  %v2082_v3 = vld [vmem:[#allocation11 + $0x148] sm:$0xff] }
 0x20f   : > { %v1356_v12 = vpack.c.bf16 %v1293_v10, %v1292_v9  ;;  %v11037_v13 = vpop.f32.mrb[4].mxu0  ;;  %v2050_v10 = vld [vmem:[#allocation11 + $0x48] sm:$0xff] }
 0x210   : > { %v1062_v14 = vadd.f32 %v11037_v13, %v12648_v62  ;;  %v1053_v15 = vpop.f32.mrb[5].mxu0  ;;  %2467 = vmatprep.subr.bf16.mxu0 %v10481_v7  ;;  %v2086_v4 = vld [vmem:[#allocation11 + $0x168] sm:$0xff] }
 0x211   : > { %v1054_v16 = vadd.f32 %v12648_v62, %v1053_v15  ;;  %v11038_v17 = vpop.f32.mrb[6].mxu0  ;;  %1529 = vmatmul.mubr.bf16.vlgmr.msra.gmra.mrb[64].mxu0 %v1356_v12 }
 0x212   : > { %v1065_v18 = vadd.f32 %v11038_v17, %v12648_v62  ;;  %v1056_v19 = vpop.f32.mrb[7].mxu0  ;;  %1538 = vmatprep.mubr.bf16.mxu0 %v15098_v51  ;;  %v1298_v21 = vmax.f32 %v1062_v14, 0.0  ;;  %2468 = vmatpush1.bf16.msra.mxu0 %v10480_v6 }
 0x213   : > { %v1057_v20 = vadd.f32 %v12648_v62, %v1056_v19  ;;  %v1296_v23 = vmax.f32 %v1054_v16, 0.0  ;;  %v2062_v19 = vld [vmem:[#allocation11 + $0xa8] sm:$0xff] }
 0x214   : > { %v1299_v22 = vmax.f32 %v1065_v18, 0.0  ;;  %v2058_v18 = vld [vmem:[#allocation11 + $0x88] sm:$0xff] }
 0x215   : > { %v1297_v24 = vmax.f32 %v1057_v20, 0.0 }
 0x216   : > { %v1359_v25 = vpack.c.bf16 %v1299_v22, %v1298_v21 }
 0x217   : > { %v11041_v26 = vpop.f32.mrb[8].mxu0  ;;  %v1358_v27 = vpack.c.bf16 %v1297_v24, %v1296_v23 }
 0x218   : > { %v1078_v28 = vadd.f32 %v11041_v26, %v12648_v62  ;;  %v1069_v29 = vpop.f32.mrb[9].mxu0 }
 0x219   : > { %v1070_v30 = vadd.f32 %v12648_v62, %v1069_v29  ;;  %v11042_v31 = vpop.f32.mrb[10].mxu0  ;;  %1539 = vmatmul.mubr.bf16.gmra.mrb[68].mxu0 %v1357_v11  ;;  %v2054_v11 = vld [vmem:[#allocation11 + $0x68] sm:$0xff]  ;;  %v2049_v29 = vld [vmem:[#allocation11 + $0x40] sm:$0xff] }
 0x21a   : > { %v1081_v32 = vadd.f32 %v11042_v31, %v12648_v62  ;;  %v1072_v33 = vpop.f32.mrb[11].mxu0  ;;  %1548 = vmatprep.mubr.bf16.mxu0 %v15098_v51  ;;  %v1302_v35 = vmax.f32 %v1078_v28, 0.0  ;;  %v10491_v17 = vcombine.high %v2050_v10, %v2054_v11  ;;  %v10499_v28 = vcombine.high %v2058_v18, %v2062_v19 }
 0x21b   : > { %v1073_v34 = vadd.f32 %v12648_v62, %v1072_v33  ;;  %v1300_v37 = vmax.f32 %v1070_v30, 0.0  ;;  %v2053_v30 = vld [vmem:[#allocation11 + $0x60] sm:$0xff] }
 0x21c   : > { %v1303_v36 = vmax.f32 %v1081_v32, 0.0  ;;  %v10488_v33 = vcombine.low %v2049_v29, %v2053_v30 }
 0x21d   : > { %v1301_v38 = vmax.f32 %v1073_v34, 0.0  ;;  %v10489_v34 = vcombine.high %v2049_v29, %v2053_v30 }
 0x21e   : > { %v12664_v39 = vpack.c.bf16 %v1303_v36, %v1302_v35  ;;  %v2070_v35 = vld [vmem:[#allocation11 + $0xe8] sm:$0xff] }
 0x21f   : > { %v11045_v40 = vpop.f32.mrb[12].mxu0  ;;  %v1360_v41 = vpack.c.bf16 %v1301_v38, %v1300_v37  ;;  %2469 = vmatprep.subr.bf16.mxu0 %v10489_v34 }
 0x220   : > { %v1094_v42 = vadd.f32 %v11045_v40, %v12648_v62  ;;  %v1085_v43 = vpop.f32.mrb[13].mxu0  ;;  %2470 = vmatpush1.bf16.msra.mxu0 %v10488_v33  ;;  %v10498_v40 = vcombine.low %v2058_v18, %v2062_v19  ;;  %v10522_v19 = vcombine.low %v2082_v3, %v2086_v4 }
 0x221   : > { %v1086_v44 = vadd.f32 %v12648_v62, %v1085_v43  ;;  %v11046_v45 = vpop.f32.mrb[14].mxu0  ;;  %1549 = vmatmul.mubr.bf16.gmra.mrb[72].mxu0 %v1358_v27  ;;  %v10490_v27 = vcombine.low %v2050_v10, %v2054_v11  ;;  %v10523_v11 = vcombine.high %v2082_v3, %v2086_v4  ;;  %v2102_v3 = vld [vmem:[#allocation11 + $0x1e8] sm:$0xff] }
 0x222   : > { %v1097_v46 = vadd.f32 %v11046_v45, %v12648_v62  ;;  %v1088_v47 = vpop.f32.mrb[15].mxu0  ;;  %1558 = vmatprep.mubr.bf16.mxu0 %v15098_v51  ;;  %v1306_v49 = vmax.f32 %v1094_v42, 0.0 }
 0x223   : > { %v1089_v48 = vadd.f32 %v12648_v62, %v1088_v47  ;;  %v1304_v52 = vmax.f32 %v1086_v44, 0.0  ;;  %v2078_v47 = vld [vmem:[#allocation11 + $0x128] sm:$0xff] }
 0x224   : > { %v1307_v50 = vmax.f32 %v1097_v46, 0.0  ;;  %v2074_v46 = vld [vmem:[#allocation11 + $0x108] sm:$0xff] }
 0x225   : > { %v1305_v53 = vmax.f32 %v1089_v48, 0.0 }
 0x226   : > { %v12671_v54 = vpack.c.bf16 %v1307_v50, %v1306_v49 }
 0x227   : > { %v11049_v55 = vpop.f32.mrb[16].mxu0  ;;  %v12673_v56 = vpack.c.bf16 %v1305_v53, %v1304_v52  ;;  %v2057_v53 = vld [vmem:[#allocation11 + $0x80] sm:$0xff] }
 0x228   : > { %v1110_v57 = vadd.f32 %v11049_v55, %v12648_v62  ;;  %v1101_v61 = vpop.f32.mrb[17].mxu0  ;;  %v2061_v55 = vld [vmem:[#allocation11 + $0xa0] sm:$0xff] }
 0x229   : > { %v1102_v63 = vadd.f32 %v12648_v62, %v1101_v61  ;;  %v11050_v0 = vpop.f32.mrb[18].mxu0  ;;  %1559 = vmatmul.mubr.bf16.gmra.mrb[76].mxu0 %v1359_v25  ;;  %v10496_v61 = vcombine.low %v2057_v53, %v2061_v55 }
 0x22a   : > { %v1113_v1 = vadd.f32 %v11050_v0, %v12648_v62  ;;  %v1104_v2 = vpop.f32.mrb[19].mxu0  ;;  %1568 = vmatprep.mubr.bf16.mxu0 %v15098_v51  ;;  %v1310_v8 = vmax.f32 %v1110_v57, 0.0 }
 0x22b   : > { %v1105_v5 = vadd.f32 %v12648_v62, %v1104_v2  ;;  %v1308_v12 = vmax.f32 %v1102_v63, 0.0  ;;  %v10497_v63 = vcombine.high %v2057_v53, %v2061_v55 }
 0x22c   : > { %v1311_v9 = vmax.f32 %v1113_v1, 0.0  ;;  %v10515_v1 = vcombine.high %v2074_v46, %v2078_v47 }
 0x22d   : > { %v1309_v13 = vmax.f32 %v1105_v5, 0.0  ;;  %2471 = vmatprep.subr.bf16.mxu0 %v10497_v63 }
 0x22e   : > { %v1365_v14 = vpack.c.bf16 %v1311_v9, %v1310_v8  ;;  %2472 = vmatpush1.bf16.msra.mxu0 %v10496_v61  ;;  %v10514_v8 = vcombine.low %v2074_v46, %v2078_v47  ;;  %v2098_v61 = vld [vmem:[#allocation11 + $0x1c8] sm:$0xff] }
 0x22f   : > { %v1364_v15 = vpack.c.bf16 %v1309_v13, %v1308_v12  ;;  %v11053_v16 = vpop.f32.mrb[20].mxu0 }
 0x230   : > { %v1126_v20 = vadd.f32 %v11053_v16, %v12648_v62  ;;  %v1117_v21 = vpop.f32.mrb[21].mxu0 }
 0x231   : > { %1569 = vmatmul.mubr.bf16.gmra.mrb[80].mxu0 %v1360_v41  ;;  %1609 = vmatmul.mubr.bf16.vlgmr.msra.gmra.mrb[0].mxu1 %v1364_v15  ;;  %v1118_v22 = vadd.f32 %v12648_v62, %v1117_v21  ;;  %v11054_v23 = vpop.f32.mrb[22].mxu0  ;;  %v2094_v15 = vld [vmem:[#allocation11 + $0x1a8] sm:$0xff]  ;;  %v2069_v21 = vld [vmem:[#allocation11 + $0xe0] sm:$0xff] }
 0x232   : > { %2821 = vmatpush1.bf16.msra.mxu1 %v10482_v60  ;;  %v1314_v24 = vmax.f32 %v1126_v20, 0.0  ;;  %v1129_v25 = vadd.f32 %v11054_v23, %v12648_v62  ;;  %v1120_v26 = vpop.f32.mrb[23].mxu0  ;;  %1578 = vmatprep.mubr.bf16.mxu0 %v15098_v51  ;;  %v2066_v60 = vld [vmem:[#allocation11 + $0xc8] sm:$0xff]  ;;  %v2065_v20 = vld [vmem:[#allocation11 + $0xc0] sm:$0xff] }
 0x233   : > { %v1312_v31 = vmax.f32 %v1118_v22, 0.0  ;;  %v1121_v32 = vadd.f32 %v12648_v62, %v1120_v26  ;;  %1618 = vmatprep.mubr.bf16.mxu1 %v15098_v51  ;;  %2822 = vmatprep.subr.bf16.mxu1 %v10491_v17  ;;  %v10507_v43 = vcombine.high %v2066_v60, %v2070_v35  ;;  %v10506_v52 = vcombine.low %v2066_v60, %v2070_v35 }
 0x234   : > { %v1315_v58 = vmax.f32 %v1129_v25, 0.0  ;;  %v10504_v23 = vcombine.low %v2065_v20, %v2069_v21 }
 0x235   : > { %v1313_v59 = vmax.f32 %v1121_v32, 0.0 }
 0x236   : > { %v12689_v36 = vpack.c.bf16 %v1315_v58, %v1314_v24  ;;  %2823 = vmatpush1.bf16.msra.mxu1 %v10490_v27  ;;  %v10505_v24 = vcombine.high %v2065_v20, %v2069_v21  ;;  %v2093_v20 = vld [vmem:[#allocation11 + $0x1a0] sm:$0xff] }
 0x237   : > { %v1366_v37 = vpack.c.bf16 %v1313_v59, %v1312_v31  ;;  %v11057_v38 = vpop.f32.mrb[24].mxu0  ;;  %2824 = vmatprep.subr.bf16.mxu1 %v10499_v28 }
 0x238   : > { %v1142_v41 = vadd.f32 %v11057_v38, %v12648_v62  ;;  %v1133_v42 = vpop.f32.mrb[25].mxu0  ;;  %2473 = vmatprep.subr.bf16.mxu0 %v10505_v24  ;;  %v2077_v38 = vld [vmem:[#allocation11 + $0x120] sm:$0xff] }
 0x239   : > { %1579 = vmatmul.mubr.bf16.gmra.mrb[84].mxu0 %v12664_v39  ;;  %1619 = vmatmul.mubr.bf16.gmra.mrb[4].mxu1 %v1365_v14  ;;  %v1134_v44 = vadd.f32 %v12648_v62, %v1133_v42  ;;  %v11058_v45 = vpop.f32.mrb[26].mxu0  ;;  %v2090_v14 = vld [vmem:[#allocation11 + $0x188] sm:$0xff] }
 0x23a   : > { %1588 = vmatprep.mubr.bf16.mxu0 %v15098_v51  ;;  %1628 = vmatprep.mubr.bf16.mxu1 %v15098_v51  ;;  %v1318_v48 = vmax.f32 %v1142_v41, 0.0  ;;  %v1145_v49 = vadd.f32 %v11058_v45, %v12648_v62  ;;  %v1136_v50 = vpop.f32.mrb[27].mxu0  ;;  %v10531_v26 = vcombine.high %v2090_v14, %v2094_v15  ;;  %v10530_v31 = vcombine.low %v2090_v14, %v2094_v15 }
 0x23b   : > { %v1316_v57 = vmax.f32 %v1134_v44, 0.0  ;;  %v1137_v39 = vadd.f32 %v12648_v62, %v1136_v50  ;;  %2825 = vmatpush1.bf16.msra.mxu1 %v10498_v40  ;;  %2474 = vmatpush1.bf16.msra.mxu0 %v10504_v23 }
 0x23c   : > { %v1319_v0 = vmax.f32 %v1145_v49, 0.0  ;;  %2826 = vmatprep.subr.bf16.mxu1 %v10507_v43 }
 0x23d   : > { %v1317_v2 = vmax.f32 %v1137_v39, 0.0  ;;  %v2085_v39 = vld [vmem:[#allocation11 + $0x160] sm:$0xff] }
 0x23e   : > { %v12698_v5 = vpack.c.bf16 %v1319_v0, %v1318_v48 }
 0x23f   : > { %v12700_v6 = vpack.c.bf16 %v1317_v2, %v1316_v57  ;;  %v11061_v7 = vpop.f32.mrb[28].mxu0  ;;  %2827 = vmatpush1.bf16.msra.mxu1 %v10506_v52  ;;  %v2081_v57 = vld [vmem:[#allocation11 + $0x140] sm:$0xff] }
 0x240   : > { %v1158_v9 = vadd.f32 %v11061_v7, %v12648_v62  ;;  %v1149_v10 = vpop.f32.mrb[29].mxu0  ;;  %2828 = vmatprep.subr.bf16.mxu1 %v10515_v1  ;;  %v10520_v1 = vcombine.low %v2081_v57, %v2085_v39  ;;  %v10521_v2 = vcombine.high %v2081_v57, %v2085_v39  ;;  %v10539_v7 = vcombine.high %v2098_v61, %v2102_v3 }
 0x241   : > { %1589 = vmatmul.mubr.bf16.gmra.mrb[88].mxu0 %v12673_v56  ;;  %1629 = vmatmul.mubr.bf16.gmra.mrb[8].mxu1 %v1366_v37  ;;  %v1150_v12 = vadd.f32 %v12648_v62, %v1149_v10  ;;  %v11062_v13 = vpop.f32.mrb[30].mxu0  ;;  %v2073_v37 = vld [vmem:[#allocation11 + $0x100] sm:$0xff] }
 0x242   : > { %1598 = vmatprep.mubr.bf16.mxu0 %v15098_v51  ;;  %1638 = vmatprep.mubr.bf16.mxu1 %v15098_v51  ;;  %v1322_v16 = vmax.f32 %v1158_v9, 0.0  ;;  %v1161_v17 = vadd.f32 %v11062_v13, %v12648_v62  ;;  %v1152_v18 = vpop.f32.mrb[31].mxu0  ;;  %v10513_v42 = vcombine.high %v2073_v37, %v2077_v38 }
 0x243   : > { %v1320_v22 = vmax.f32 %v1150_v12, 0.0  ;;  %v1153_v56 = vadd.f32 %v12648_v62, %v1152_v18  ;;  %2829 = vmatpush1.bf16.msra.mxu1 %v10514_v8 }
 0x244   : > { %v1323_v25 = vmax.f32 %v1161_v17, 0.0  ;;  %2830 = vmatprep.subr.bf16.mxu1 %v10523_v11  ;;  %2475 = vmatprep.subr.bf16.mxu0 %v10513_v42 }
 0x245   : > { %v1321_v27 = vmax.f32 %v1153_v56, 0.0 }
 0x246   : > { %v12709_v28 = vpack.c.bf16 %v1323_v25, %v1322_v16 }
 0x247   : > { %v12711_v29 = vpack.c.bf16 %v1321_v27, %v1320_v22  ;;  %v11065_v30 = vpop.f32.mrb[32].mxu0  ;;  %2831 = vmatpush1.bf16.msra.mxu1 %v10522_v19  ;;  %v2089_v19 = vld [vmem:[#allocation11 + $0x180] sm:$0xff] }
 0x248   : > { %v1174_v32 = vadd.f32 %v11065_v30, %v12648_v62  ;;  %v1165_v33 = vpop.f32.mrb[33].mxu0  ;;  %2832 = vmatprep.subr.bf16.mxu1 %v10531_v26  ;;  %v10528_v56 = vcombine.low %v2089_v19, %v2093_v20  ;;  %v10529_v23 = vcombine.high %v2089_v19, %v2093_v20  ;;  %v12781_v19 = vld [vmem:[#allocation11 + $0x38] sm:$0xff] }
 0x249   : > { %1599 = vmatmul.mubr.bf16.gmra.mrb[92].mxu0 %v12671_v54  ;;  %1639 = vmatmul.mubr.bf16.gmra.mrb[12].mxu1 %v12689_v36  ;;  %v1166_v34 = vadd.f32 %v12648_v62, %v1165_v33  ;;  %v11066_v58 = vpop.f32.mrb[34].mxu0  ;;  %v10512_v54 = vcombine.low %v2073_v37, %v2077_v38 }
 0x24a   : > { %1648 = vmatprep.mubr.bf16.mxu1 %v15098_v51  ;;  %v1326_v59 = vmax.f32 %v1174_v32, 0.0  ;;  %v1177_v60 = vadd.f32 %v11066_v58, %v12648_v62  ;;  %v1168_v35 = vpop.f32.mrb[35].mxu0  ;;  %2499 = vmatprep.mubr.bf16.mxu0 %v15098_v51 }
 0x24b   : > { %v1324_v40 = vmax.f32 %v1166_v34, 0.0  ;;  %v1169_v41 = vadd.f32 %v12648_v62, %v1168_v35  ;;  %2833 = vmatpush1.bf16.msra.mxu1 %v10530_v31  ;;  %2476 = vmatpush1.bf16.msra.mxu0 %v10512_v54  ;;  %v2101_v54 = vld [vmem:[#allocation11 + $0x1e0] sm:$0xff] }
 0x24c   : > { %v1327_v36 = vmax.f32 %v1177_v60, 0.0  ;;  %2477 = vmatprep.subr.bf16.mxu0 %v10521_v2  ;;  %2834 = vmatprep.subr.bf16.mxu1 %v10539_v7 }
 0x24d   : > { %v1325_v43 = vmax.f32 %v1169_v41, 0.0  ;;  %v2097_v41 = vld [vmem:[#allocation11 + $0x1c0] sm:$0xff] }
 0x24e   : > { %v12721_v44 = vpack.c.bf16 %v1327_v36, %v1326_v59  ;;  %v10537_v36 = vcombine.high %v2097_v41, %v2101_v54 }
 0x24f   : > { %v12723_v45 = vpack.c.bf16 %v1325_v43, %v1324_v40  ;;  %v11069_v46 = vpop.f32.mrb[36].mxu0  ;;  %2478 = vmatpush1.bf16.msra.mxu0 %v10520_v1 }
 0x250   : > { %v1190_v47 = vadd.f32 %v11069_v46, %v12648_v62  ;;  %v1181_v48 = vpop.f32.mrb[37].mxu0  ;;  %2479 = vmatprep.subr.bf16.mxu0 %v10529_v23 }
 0x251   : > { %1649 = vmatmul.mubr.bf16.gmra.mrb[16].mxu1 %v12700_v6  ;;  %v1182_v49 = vadd.f32 %v12648_v62, %v1181_v48  ;;  %v11070_v50 = vpop.f32.mrb[38].mxu0  ;;  %v10538_v6 = vcombine.low %v2098_v61, %v2102_v3 }
 0x252   : > { %1658 = vmatprep.mubr.bf16.mxu1 %v15098_v51  ;;  %v1330_v52 = vmax.f32 %v1190_v47, 0.0  ;;  %v1193_v53 = vadd.f32 %v11070_v50, %v12648_v62  ;;  %v1184_v55 = vpop.f32.mrb[39].mxu0  ;;  %v10536_v47 = vcombine.low %v2097_v41, %v2101_v54 }
 0x253   : > { %v1328_v63 = vmax.f32 %v1182_v49, 0.0  ;;  %v1185_v0 = vadd.f32 %v12648_v62, %v1184_v55  ;;  %2835 = vmatpush1.bf16.msra.mxu1 %v10538_v6  ;;  %2480 = vmatpush1.bf16.msra.mxu0 %v10528_v56 }
 0x254   : > { %v1331_v4 = vmax.f32 %v1193_v53, 0.0  ;;  %2481 = vmatprep.subr.bf16.mxu0 %v10537_v36 }
 0x255   : > { %v1329_v8 = vmax.f32 %v1185_v0, 0.0 }
 0x256   : > { %v12731_v9 = vpack.c.bf16 %v1331_v4, %v1330_v52 }
 0x257   : > { %v12733_v10 = vpack.c.bf16 %v1329_v8, %v1328_v63  ;;  %v11073_v11 = vpop.f32.mrb[40].mxu0  ;;  %2482 = vmatpush1.bf16.msra.mxu0 %v10536_v47 }
 0x258   : > { %v1206_v12 = vadd.f32 %v11073_v11, %v12648_v62  ;;  %v1197_v13 = vpop.f32.mrb[41].mxu0 }
 0x259   : > { %1659 = vmatmul.mubr.bf16.gmra.mrb[20].mxu1 %v12698_v5  ;;  %v1198_v14 = vadd.f32 %v12648_v62, %v1197_v13  ;;  %v11074_v15 = vpop.f32.mrb[42].mxu0 }
 0x25a   : > { %1668 = vmatprep.mubr.bf16.mxu1 %v15098_v51  ;;  %v1334_v16 = vmax.f32 %v1206_v12, 0.0  ;;  %v1209_v17 = vadd.f32 %v11074_v15, %v12648_v62  ;;  %v1200_v18 = vpop.f32.mrb[43].mxu0  ;;  %v12773_v15 = vld [vmem:[#allocation11 + $0x30] sm:$0xff] }
 0x25b   : > { %v1332_v21 = vmax.f32 %v1198_v14, 0.0  ;;  %v1201_v22 = vadd.f32 %v12648_v62, %v1200_v18  ;;  %v12771_v14 = vld [vmem:[#allocation11 + $0x10] sm:$0xff] }
 0x25c   : > { %v1335_v24 = vmax.f32 %v1209_v17, 0.0  ;;  %v10484_v17 = vcombine.low %v12771_v14, %v12773_v15  ;;  %v10485_v18 = vcombine.high %v12771_v14, %v12773_v15  ;;  %v2071_v14 = vld [vmem:[#allocation11 + $0xf0] sm:$0xff] }
 0x25d   : > { %v1333_v25 = vmax.f32 %v1201_v22, 0.0 }
 0x25e   : > { %v12741_v5 = vpack.c.bf16 %v1335_v24, %v1334_v16  ;;  %v12775_v16 = vld [vmem:[#allocation11 + $0x18] sm:$0xff]  ;;  %3173 = vmatprep.subr.bf16.mxu0 %v10485_v18 }
 0x25f   : > { %v12743_v26 = vpack.c.bf16 %v1333_v25, %v1332_v21  ;;  %v11077_v27 = vpop.f32.mrb[44].mxu0  ;;  %v10486_v21 = vcombine.low %v12775_v16, %v12781_v19  ;;  %v10487_v22 = vcombine.high %v12775_v16, %v12781_v19  ;;  %v2052_v18 = vld [vmem:[#allocation11 + $0x58] sm:$0xff]  ;;  %v2075_v19 = vld [vmem:[#allocation11 + $0x110] sm:$0xff] }
 0x260   : > { %v1222_v30 = vadd.f32 %v11077_v27, %v12648_v62  ;;  %v1213_v31 = vpop.f32.mrb[45].mxu0 }
 0x261   : > { %1669 = vmatmul.mubr.bf16.gmra.mrb[24].mxu1 %v12711_v29  ;;  %v1214_v32 = vadd.f32 %v12648_v62, %v1213_v31  ;;  %v11078_v33 = vpop.f32.mrb[46].mxu0  ;;  %3526 = vmatprep.subr.bf16.mxu1 %v10487_v22 }
 0x262   : > { %1678 = vmatprep.mubr.bf16.mxu1 %v15098_v51  ;;  %v1338_v34 = vmax.f32 %v1222_v30, 0.0  ;;  %v1225_v58 = vadd.f32 %v11078_v33, %v12648_v62  ;;  %v1216_v59 = vpop.f32.mrb[47].mxu0 }
 0x263   : > { %v1336_v60 = vmax.f32 %v1214_v32, 0.0  ;;  %v1217_v35 = vadd.f32 %v12648_v62, %v1216_v59 }
 0x264   : > { %v1339_v37 = vmax.f32 %v1225_v58, 0.0 }
 0x265   : > { %v1337_v38 = vmax.f32 %v1217_v35, 0.0 }
 0x266   : > { %v12751_v40 = vpack.c.bf16 %v1339_v37, %v1338_v34 }
 0x267   : > { %v12753_v42 = vpack.c.bf16 %v1337_v38, %v1336_v60  ;;  %v11081_v29 = vpop.f32.mrb[48].mxu0 }
 0x268   : > { %v1238_v43 = vadd.f32 %v11081_v29, %v12648_v62  ;;  %v1229_v46 = vpop.f32.mrb[49].mxu0 }
 0x269   : > { %1679 = vmatmul.mubr.bf16.gmra.mrb[28].mxu1 %v12709_v28  ;;  %v1230_v48 = vadd.f32 %v12648_v62, %v1229_v46  ;;  %v11082_v49 = vpop.f32.mrb[50].mxu0 }
 0x26a   : > { %1688 = vmatprep.mubr.bf16.mxu1 %v15098_v51  ;;  %v1342_v50 = vmax.f32 %v1238_v43, 0.0  ;;  %v1241_v52 = vadd.f32 %v11082_v49, %v12648_v62  ;;  %v1232_v53 = vpop.f32.mrb[51].mxu0 }
 0x26b   : > { %v1340_v55 = vmax.f32 %v1230_v48, 0.0  ;;  %v1233_v57 = vadd.f32 %v12648_v62, %v1232_v53 }
 0x26c   : > { %v1343_v39 = vmax.f32 %v1241_v52, 0.0 }
 0x26d   : > { %v1341_v61 = vmax.f32 %v1233_v57, 0.0 }
 0x26e   : > { %v12761_v63 = vpack.c.bf16 %v1343_v39, %v1342_v50 }
 0x26f   : > { %v12763_v0 = vpack.c.bf16 %v1341_v61, %v1340_v55  ;;  %v11085_v28 = vpop.f32.mrb[52].mxu0 }
 0x270   : > { %v1254_v1 = vadd.f32 %v11085_v28, %v12648_v62  ;;  %v1245_v2 = vpop.f32.mrb[53].mxu0 }
 0x271   : > { %1689 = vmatmul.mubr.bf16.gmra.mrb[32].mxu1 %v12723_v45  ;;  %v1246_v3 = vadd.f32 %v12648_v62, %v1245_v2  ;;  %v11086_v4 = vpop.f32.mrb[54].mxu0  ;;  %v2051_v2 = vld [vmem:[#allocation11 + $0x50] sm:$0xff] }
 0x272   : > { %1698 = vmatprep.mubr.bf16.mxu1 %v15098_v51  ;;  %v1346_v6 = vmax.f32 %v1254_v1, 0.0  ;;  %v1257_v7 = vadd.f32 %v11086_v4, %v12648_v62  ;;  %v1248_v8 = vpop.f32.mrb[55].mxu0 }
 0x273   : > { %v1344_v11 = vmax.f32 %v1246_v3, 0.0  ;;  %v1249_v12 = vadd.f32 %v12648_v62, %v1248_v8  ;;  %v2055_v3 = vld [vmem:[#allocation11 + $0x70] sm:$0xff] }
 0x274   : > { %v1347_v13 = vmax.f32 %v1257_v7, 0.0 }
 0x275   : > { %v1345_v45 = vmax.f32 %v1249_v12, 0.0  ;;  %v10493_v12 = vcombine.high %v2051_v2, %v2055_v3 }
 0x276   : > { %v1383_v20 = vpack.c.bf16 %v1347_v13, %v1346_v6 }
 0x277   : > { %v1382_v56 = vpack.c.bf16 %v1345_v45, %v1344_v11  ;;  %v11089_v23 = vpop.f32.mrb[56].mxu0 }
 0x278   : > { %v1270_v24 = vadd.f32 %v11089_v23, %v12648_v62  ;;  %v1261_v25 = vpop.f32.mrb[57].mxu0  ;;  %v2059_v23 = vld [vmem:[#allocation11 + $0x90] sm:$0xff] }
 0x279   : > { %1699 = vmatmul.mubr.bf16.gmra.mrb[36].mxu1 %v12721_v44  ;;  %v1262_v27 = vadd.f32 %v12648_v62, %v1261_v25  ;;  %v11090_v30 = vpop.f32.mrb[58].mxu0 }
 0x27a   : > { %1708 = vmatprep.mubr.bf16.mxu1 %v15098_v51  ;;  %v1350_v31 = vmax.f32 %v1270_v24, 0.0  ;;  %v1273_v32 = vadd.f32 %v11090_v30, %v12648_v62  ;;  %v1264_v33 = vpop.f32.mrb[59].mxu0  ;;  %v2063_v24 = vld [vmem:[#allocation11 + $0xb0] sm:$0xff] }
 0x27b   : > { %v1348_v34 = vmax.f32 %v1262_v27, 0.0  ;;  %v1265_v58 = vadd.f32 %v12648_v62, %v1264_v33 }
 0x27c   : > { %v1351_v59 = vmax.f32 %v1273_v32, 0.0  ;;  %v10492_v32 = vcombine.low %v2051_v2, %v2055_v3 }
 0x27d   : > { %v1349_v60 = vmax.f32 %v1265_v58, 0.0  ;;  %v10501_v58 = vcombine.high %v2059_v23, %v2063_v24 }
 0x27e   : > { %v1385_v35 = vpack.c.bf16 %v1351_v59, %v1350_v31  ;;  %v2060_v59 = vld [vmem:[#allocation11 + $0x98] sm:$0xff] }
 0x27f   : > { %v1384_v37 = vpack.c.bf16 %v1349_v60, %v1348_v34  ;;  %v11093_v38 = vpop.f32.mrb[60].mxu0  ;;  %v2064_v60 = vld [vmem:[#allocation11 + $0xb8] sm:$0xff] }
 0x280   : > { %v1286_v41 = vadd.f32 %v11093_v38, %v12648_v62  ;;  %v1277_v44 = vpop.f32.mrb[61].mxu0  ;;  %v2067_v38 = vld [vmem:[#allocation11 + $0xd0] sm:$0xff] }
 0x281   : > { %1709 = vmatmul.mubr.bf16.gmra.mrb[40].mxu1 %v12733_v10  ;;  %v1278_v54 = vadd.f32 %v12648_v62, %v1277_v44  ;;  %v11094_v29 = vpop.f32.mrb[62].mxu0 }
 0x282   : > { %1718 = vmatprep.mubr.bf16.mxu1 %v15098_v51  ;;  %v1354_v36 = vmax.f32 %v1286_v41, 0.0  ;;  %v1289_v43 = vadd.f32 %v11094_v29, %v12648_v62  ;;  %v1280_v46 = vpop.f32.mrb[63].mxu0  ;;  %v10503_v29 = vcombine.high %v2060_v59, %v2064_v60 }
 0x283   : > { %v1352_v47 = vmax.f32 %v1278_v54, 0.0  ;;  %v1281_v48 = vadd.f32 %v12648_v62, %v1280_v46  ;;  %v1406_v62 = vlaneseq  ;;  %v10500_v54 = vcombine.low %v2059_v23, %v2063_v24 }
 0x284   : > { %v1355_v49 = vmax.f32 %v1289_v43, 0.0  ;;  %v10509_v46 = vcombine.high %v2067_v38, %v2071_v14 }
 0x285   : > { %v1353_v50 = vmax.f32 %v1281_v48, 0.0  ;;  %v2072_v48 = vld [vmem:[#allocation11 + $0xf8] sm:$0xff] }
 0x286   : > { %v1387_v52 = vpack.c.bf16 %v1355_v49, %v1354_v36 }
 0x287   : > { %v1386_v53 = vpack.c.bf16 %v1353_v50, %v1352_v47  ;;  %v2068_v47 = vld [vmem:[#allocation11 + $0xd8] sm:$0xff] }
 0x289   : > { %1719 = vmatmul.mubr.bf16.gmra.mrb[44].mxu1 %v12731_v9  ;;  %v12816_v9 = vshrl.u32 %v1406_v62, 7 }
 0x28a   : > { %1728 = vmatprep.mubr.bf16.mxu1 %v15098_v51 }
 0x28b   : > { %15190 = vst [vmem:[#allocation33_spill] sm:$0xff] %v12816_v9  ;;  %v12820_v10 = vsub.s32 0, %v12816_v9 }
 0x28d   : > { %15191 = vst [vmem:[#allocation34_spill] sm:$0xff] %v12820_v10 }
 0x291   : > { %1729 = vmatmul.mubr.bf16.gmra.mrb[48].mxu1 %v12743_v26  ;;  %v12826_v26 = vsub.s32 1, %v12816_v9 }
 0x292   : > { %1738 = vmatprep.mubr.bf16.mxu1 %v15098_v51 }
 0x293   : > { %15192 = vst [vmem:[#allocation35_spill] sm:$0xff] %v12826_v26 }
 0x299   : > { %1739 = vmatmul.mubr.bf16.gmra.mrb[52].mxu1 %v12741_v5  ;;  %v1404_v5 = vld [vmem:[%s15070_s4] sm:$0x3] }
 0x29a   : > { %1748 = vmatprep.mubr.bf16.mxu1 %v15098_v51 }
 0x2a1   : > { %1749 = vmatmul.mubr.bf16.gmra.mrb[56].mxu1 %v12753_v42  ;;  %v12832_v42 = vrot.slane %v1404_v5, %v12826_v26 }
 0x2a2   : > { %1758 = vmatprep.mubr.bf16.mxu1 %v15098_v51 }
 0x2a9   : > { %1759 = vmatmul.mubr.bf16.gmra.mrb[60].mxu1 %v12751_v40  ;;  %v12829_v40 = vrot.slane %v1404_v5, %v12820_v10 }
 0x2aa   : > { %1768 = vmatprep.mubr.bf16.mxu1 %v15098_v51 }
 0x2b1   : > { %1769 = vmatmul.mubr.bf16.gmra.mrb[64].mxu1 %v12763_v0 }
 0x2b2   : > { %1778 = vmatprep.mubr.bf16.mxu1 %v15098_v51 }
 0x2b9   : > { %1779 = vmatmul.mubr.bf16.gmra.mrb[68].mxu1 %v12761_v63 }
 0x2ba   : > { %1788 = vmatprep.mubr.bf16.mxu1 %v15098_v51 }
 0x2c1   : > { %1789 = vmatmul.mubr.bf16.gmra.mrb[72].mxu1 %v1382_v56 }
 0x2c2   : > { %1798 = vmatprep.mubr.bf16.mxu1 %v15098_v51 }
 0x2c9   : > { %1799 = vmatmul.mubr.bf16.gmra.mrb[76].mxu1 %v1383_v20  ;;  %v2056_v20 = vld [vmem:[#allocation11 + $0x78] sm:$0xff] }
 0x2ca   : > { %1808 = vmatprep.mubr.bf16.mxu1 %v15098_v51  ;;  %v10495_v33 = vcombine.high %v2052_v18, %v2056_v20  ;;  %v10494_v41 = vcombine.low %v2052_v18, %v2056_v20 }
 0x2d1   : > { %1809 = vmatmul.mubr.bf16.gmra.mrb[80].mxu1 %v1384_v37 }
 0x2d2   : > { %1818 = vmatprep.mubr.bf16.mxu1 %v15098_v51 }
 0x2d9   : > { %1819 = vmatmul.mubr.bf16.gmra.mrb[84].mxu1 %v1385_v35 }
 0x2da   : > { %1828 = vmatprep.mubr.bf16.mxu1 %v15098_v51 }
 0x2e1   : > { %1829 = vmatmul.mubr.bf16.gmra.mrb[88].mxu1 %v1386_v53  ;;  %v10502_v53 = vcombine.low %v2060_v59, %v2064_v60 }
 0x2e2   : > { %1838 = vmatprep.mubr.bf16.mxu1 %v15098_v51 }
 0x2e4   : > { %v1530_v55 = vpop.f32.mrb[64].mxu0 }
 0x2e5   : > { %v1531_v57 = vadd.f32 %v1530_v55, %v12829_v40  ;;  %v1532_v39 = vpop.f32.mrb[65].mxu0  ;;  %v10508_v55 = vcombine.low %v2067_v38, %v2071_v14 }
 0x2e6   : > { %v1533_v61 = vadd.f32 %v1532_v39, %v12832_v42  ;;  %v1534_v63 = vpop.f32.mrb[66].mxu0 }
 0x2e7   : > { %v1535_v0 = vadd.f32 %v1534_v63, %v12829_v40  ;;  %v1536_v28 = vpop.f32.mrb[67].mxu0  ;;  %v1849_v4 = vmax.f32 %v1531_v57, 0.0  ;;  %v10511_v57 = vcombine.high %v2068_v47, %v2072_v48  ;;  %v2076_v63 = vld [vmem:[#allocation11 + $0x118] sm:$0xff] }
 0x2e8   : > { %v1537_v1 = vadd.f32 %v1536_v28, %v12832_v42  ;;  %v1850_v7 = vmax.f32 %v1533_v61, 0.0 }
 0x2e9   : > { %v1851_v6 = vmax.f32 %v1535_v0, 0.0  ;;  %1839 = vmatmul.mubr.bf16.gmra.mrb[92].mxu1 %v1387_v52  ;;  %v2080_v0 = vld [vmem:[#allocation11 + $0x138] sm:$0xff] }
 0x2ea   : > { %v1852_v8 = vmax.f32 %v1537_v1, 0.0  ;;  %2852 = vmatprep.mubr.bf16.mxu1 %v15098_v51  ;;  %v10518_v23 = vcombine.low %v2076_v63, %v2080_v0 }
 0x2eb   : > { %v12840_v11 = vpack.c.bf16 %v1851_v6, %v1849_v4  ;;  %v10510_v4 = vcombine.low %v2068_v47, %v2072_v48 }
 0x2ec   : > { %v12842_v13 = vpack.c.bf16 %v1852_v8, %v1850_v7  ;;  %v1540_v45 = vpop.f32.mrb[68].mxu0  ;;  %v10519_v8 = vcombine.high %v2076_v63, %v2080_v0 }
 0x2ed   : > { %v1541_v22 = vadd.f32 %v1540_v45, %v12829_v40  ;;  %v1542_v56 = vpop.f32.mrb[69].mxu0  ;;  %2500 = vmatmul.mubr.bf16.vlgmr.msra.gmra.mrb[96].mxu0 %v12840_v11 }
 0x2ee   : > { %15193 = vst [vmem:[#allocation36_spill] sm:$0xff] %v12842_v13  ;;  %v1543_v25 = vadd.f32 %v1542_v56, %v12832_v42  ;;  %v1544_v27 = vpop.f32.mrb[70].mxu0  ;;  %3174 = vmatpush1.bf16.msra.mxu0 %v10484_v17  ;;  %2509 = vmatprep.mubr.bf16.mxu0 %v15098_v51 }
 0x2ef   : > { %v1545_v30 = vadd.f32 %v1544_v27, %v12829_v40  ;;  %v1546_v31 = vpop.f32.mrb[71].mxu0  ;;  %3175 = vmatprep.subr.bf16.mxu0 %v10493_v12  ;;  %v1853_v35 = vmax.f32 %v1541_v22, 0.0 }
 0x2f0   : > { %v1547_v34 = vadd.f32 %v1546_v31, %v12832_v42  ;;  %v1854_v15 = vmax.f32 %v1543_v25, 0.0 }
 0x2f1   : > { %v1855_v37 = vmax.f32 %v1545_v30, 0.0  ;;  %2853 = vmatmul.mubr.bf16.vlgmr.msra.gmra.mrb[96].mxu1 %v12840_v11 }
 0x2f2   : > { %v1856_v17 = vmax.f32 %v1547_v34, 0.0  ;;  %3527 = vmatpush1.bf16.msra.mxu1 %v10486_v21  ;;  %2862 = vmatprep.mubr.bf16.mxu1 %v15098_v51  ;;  %v2079_v21 = vld [vmem:[#allocation11 + $0x130] sm:$0xff] }
 0x2f3   : > { %v12858_v44 = vpack.c.bf16 %v1855_v37, %v1853_v35  ;;  %3528 = vmatprep.subr.bf16.mxu1 %v10495_v33  ;;  %3176 = vmatpush1.bf16.msra.mxu0 %v10492_v32  ;;  %v10517_v61 = vcombine.high %v2075_v19, %v2079_v21  ;;  %v10516_v7 = vcombine.low %v2075_v19, %v2079_v21 }
 0x2f4   : > { %v12860_v36 = vpack.c.bf16 %v1856_v17, %v1854_v15  ;;  %v1550_v43 = vpop.f32.mrb[72].mxu0  ;;  %3177 = vmatprep.subr.bf16.mxu0 %v10501_v58 }
 0x2f5   : > { %v1551_v49 = vadd.f32 %v1550_v43, %v12829_v40  ;;  %v1552_v16 = vpop.f32.mrb[73].mxu0  ;;  %2510 = vmatmul.mubr.bf16.gmra.mrb[100].mxu0 %v12858_v44 }
 0x2f6   : > { %15194 = vst [vmem:[#allocation37_spill] sm:$0xff] %v12860_v36  ;;  %v1553_v50 = vadd.f32 %v1552_v16, %v12832_v42  ;;  %v1554_v52 = vpop.f32.mrb[74].mxu0  ;;  %2519 = vmatprep.mubr.bf16.mxu0 %v15098_v51  ;;  %3529 = vmatpush1.bf16.msra.mxu1 %v10494_v41 }
 0x2f7   : > { %v1555_v62 = vadd.f32 %v1554_v52, %v12829_v40  ;;  %v1556_v5 = vpop.f32.mrb[75].mxu0  ;;  %3530 = vmatprep.subr.bf16.mxu1 %v10503_v29  ;;  %3178 = vmatpush1.bf16.msra.mxu0 %v10500_v54  ;;  %v1857_v28 = vmax.f32 %v1551_v49, 0.0 }
 0x2f8   : > { %v1557_v39 = vadd.f32 %v1556_v5, %v12832_v42  ;;  %3179 = vmatprep.subr.bf16.mxu0 %v10509_v46  ;;  %v1858_v2 = vmax.f32 %v1553_v50, 0.0 }
 0x2f9   : > { %v1859_v1 = vmax.f32 %v1555_v62, 0.0  ;;  %2863 = vmatmul.mubr.bf16.gmra.mrb[100].mxu1 %v12858_v44 }
 0x2fa   : > { %v1860_v3 = vmax.f32 %v1557_v39, 0.0  ;;  %2872 = vmatprep.mubr.bf16.mxu1 %v15098_v51  ;;  %3531 = vmatpush1.bf16.msra.mxu1 %v10502_v53 }
 0x2fb   : > { %v12870_v6 = vpack.c.bf16 %v1859_v1, %v1857_v28  ;;  %3532 = vmatprep.subr.bf16.mxu1 %v10511_v57  ;;  %3180 = vmatpush1.bf16.msra.mxu0 %v10508_v55 }
 0x2fc   : > { %v12872_v12 = vpack.c.bf16 %v1860_v3, %v1858_v2  ;;  %v1560_v45 = vpop.f32.mrb[76].mxu0  ;;  %3181 = vmatprep.subr.bf16.mxu0 %v10517_v61 }
 0x2fd   : > { %v1561_v18 = vadd.f32 %v1560_v45, %v12829_v40  ;;  %v1562_v20 = vpop.f32.mrb[77].mxu0  ;;  %2520 = vmatmul.mubr.bf16.gmra.mrb[104].mxu0 %v12870_v6 }
 0x2fe   : > { %15195 = vst [vmem:[#allocation38_spill] sm:$0xff] %v12872_v12  ;;  %v1563_v22 = vadd.f32 %v1562_v20, %v12832_v42  ;;  %v1564_v56 = vpop.f32.mrb[78].mxu0  ;;  %2529 = vmatprep.mubr.bf16.mxu0 %v15098_v51  ;;  %3533 = vmatpush1.bf16.msra.mxu1 %v10510_v4 }
 0x2ff   : > { %v1565_v24 = vadd.f32 %v1564_v56, %v12829_v40  ;;  %v1566_v25 = vpop.f32.mrb[79].mxu0  ;;  %3534 = vmatprep.subr.bf16.mxu1 %v10519_v8  ;;  %3182 = vmatpush1.bf16.msra.mxu0 %v10516_v7  ;;  %v1861_v30 = vmax.f32 %v1561_v18, 0.0 }
 0x300   : > { %v1567_v27 = vadd.f32 %v1566_v25, %v12832_v42  ;;  %v1862_v32 = vmax.f32 %v1563_v22, 0.0 }
 0x301   : > { %v1863_v31 = vmax.f32 %v1565_v24, 0.0  ;;  %2873 = vmatmul.mubr.bf16.gmra.mrb[104].mxu1 %v12870_v6 }
 0x302   : > { %v1864_v33 = vmax.f32 %v1567_v27, 0.0  ;;  %2882 = vmatprep.mubr.bf16.mxu1 %v15098_v51  ;;  %3535 = vmatpush1.bf16.msra.mxu1 %v10518_v23 }
 0x303   : > { %v12882_v34 = vpack.c.bf16 %v1863_v31, %v1861_v30 }
 0x304   : > { %v12884_v58 = vpack.c.bf16 %v1864_v33, %v1862_v32  ;;  %v1570_v59 = vpop.f32.mrb[80].mxu0  ;;  %v1610_v60 = vpop.f32.mrb[0].mxu1 }
 0x305   : > { %v1571_v35 = vadd.f32 %v1570_v59, %v12829_v40  ;;  %v1611_v37 = vadd.f32 %v1610_v60, %v12829_v40  ;;  %v1572_v38 = vpop.f32.mrb[81].mxu0  ;;  %v1612_v14 = vpop.f32.mrb[1].mxu1  ;;  %2530 = vmatmul.mubr.bf16.gmra.mrb[108].mxu0 %v12882_v34 }
 0x306   : > { %15196 = vst [vmem:[#allocation39_spill] sm:$0xff] %v12884_v58  ;;  %v1573_v15 = vadd.f32 %v1572_v38, %v12832_v42  ;;  %v1613_v17 = vadd.f32 %v1612_v14, %v12832_v42  ;;  %v1574_v41 = vpop.f32.mrb[82].mxu0  ;;  %v1614_v54 = vpop.f32.mrb[2].mxu1  ;;  %2539 = vmatprep.mubr.bf16.mxu0 %v15098_v51 }
 0x307   : > { %v1575_v29 = vadd.f32 %v1574_v41, %v12829_v40  ;;  %v1615_v43 = vadd.f32 %v1614_v54, %v12829_v40  ;;  %v1576_v46 = vpop.f32.mrb[83].mxu0  ;;  %v1616_v47 = vpop.f32.mrb[3].mxu1  ;;  %v1865_v16 = vmax.f32 %v1571_v35, 0.0  ;;  %v1881_v19 = vmax.f32 %v1611_v37, 0.0  ;;  %v2083_v41 = vld [vmem:[#allocation11 + $0x150] sm:$0xff] }
 0x308   : > { %v1577_v48 = vadd.f32 %v1576_v46, %v12832_v42  ;;  %v1617_v49 = vadd.f32 %v1616_v47, %v12832_v42  ;;  %v1866_v52 = vmax.f32 %v1573_v15, 0.0  ;;  %v1882_v53 = vmax.f32 %v1613_v17, 0.0  ;;  %v2087_v54 = vld [vmem:[#allocation11 + $0x170] sm:$0xff] }
 0x309   : > { %v1867_v21 = vmax.f32 %v1575_v29, 0.0  ;;  %v1883_v50 = vmax.f32 %v1615_v43, 0.0  ;;  %2883 = vmatmul.mubr.bf16.gmra.mrb[108].mxu1 %v12882_v34  ;;  %v2084_v29 = vld [vmem:[#allocation11 + $0x158] sm:$0xff] }
 0x30a   : > { %v1868_v62 = vmax.f32 %v1577_v48, 0.0  ;;  %v1884_v5 = vmax.f32 %v1617_v49, 0.0  ;;  %2892 = vmatprep.mubr.bf16.mxu1 %v15098_v51  ;;  %v10524_v49 = vcombine.low %v2083_v41, %v2087_v54 }
 0x30b   : > { %v12898_v55 = vpack.c.bf16 %v1867_v21, %v1865_v16  ;;  %v12900_v57 = vpack.c.bf16 %v1883_v50, %v1881_v19  ;;  %v10525_v16 = vcombine.high %v2083_v41, %v2087_v54  ;;  %v2088_v19 = vld [vmem:[#allocation11 + $0x178] sm:$0xff] }
 0x30c   : > { %v12902_v39 = vpack.c.bf16 %v1868_v62, %v1866_v52  ;;  %v12904_v61 = vpack.c.bf16 %v1884_v5, %v1882_v53  ;;  %v1580_v63 = vpop.f32.mrb[84].mxu0  ;;  %v1620_v0 = vpop.f32.mrb[4].mxu1  ;;  %v10526_v62 = vcombine.low %v2084_v29, %v2088_v19  ;;  %v10527_v5 = vcombine.high %v2084_v29, %v2088_v19 }
 0x30d   : > { %v1581_v28 = vadd.f32 %v1580_v63, %v12829_v40  ;;  %v1621_v1 = vadd.f32 %v1620_v0, %v12829_v40  ;;  %v1582_v2 = vpop.f32.mrb[85].mxu0  ;;  %v1622_v3 = vpop.f32.mrb[5].mxu1  ;;  %2540 = vmatmul.mubr.bf16.gmra.mrb[112].mxu0 %v12898_v55  ;;  %3183 = vmatprep.subr.bf16.mxu0 %v10525_v16 }
 0x30e   : > { %15197 = vst [vmem:[#allocation40_spill] sm:$0xff] %v12902_v39  ;;  %15198 = vst [vmem:[#allocation41_spill] sm:$0xff] %v12904_v61  ;;  %v1583_v4 = vadd.f32 %v1582_v2, %v12832_v42  ;;  %v1623_v7 = vadd.f32 %v1622_v3, %v12832_v42  ;;  %v1584_v8 = vpop.f32.mrb[86].mxu0  ;;  %v1624_v45 = vpop.f32.mrb[6].mxu1  ;;  %2549 = vmatprep.mubr.bf16.mxu0 %v15098_v51  ;;  %3536 = vmatprep.subr.bf16.mxu1 %v10527_v5 }
 0x30f   : > { %v1585_v18 = vadd.f32 %v1584_v8, %v12829_v40  ;;  %v1625_v20 = vadd.f32 %v1624_v45, %v12829_v40  ;;  %v1586_v22 = vpop.f32.mrb[87].mxu0  ;;  %v1626_v56 = vpop.f32.mrb[7].mxu1  ;;  %v1869_v25 = vmax.f32 %v1581_v28, 0.0  ;;  %v1885_v27 = vmax.f32 %v1621_v1, 0.0  ;;  %3184 = vmatpush1.bf16.msra.mxu0 %v10524_v49  ;;  %3537 = vmatpush1.bf16.msra.mxu1 %v10526_v62 }
 0x310   : > { %v1587_v23 = vadd.f32 %v1586_v22, %v12832_v42  ;;  %v1627_v24 = vadd.f32 %v1626_v56, %v12832_v42  ;;  %v1870_v32 = vmax.f32 %v1583_v4, 0.0  ;;  %v1886_v33 = vmax.f32 %v1623_v7, 0.0 }
 0x311   : > { %v1871_v30 = vmax.f32 %v1585_v18, 0.0  ;;  %v1887_v31 = vmax.f32 %v1625_v20, 0.0  ;;  %2893 = vmatmul.mubr.bf16.gmra.mrb[112].mxu1 %v12898_v55 }
 0x312   : > { %v1872_v59 = vmax.f32 %v1587_v23, 0.0  ;;  %v1888_v60 = vmax.f32 %v1627_v24, 0.0  ;;  %2902 = vmatprep.mubr.bf16.mxu1 %v15098_v51 }
 0x313   : > { %v12918_v35 = vpack.c.bf16 %v1871_v30, %v1869_v25  ;;  %v12920_v37 = vpack.c.bf16 %v1887_v31, %v1885_v27 }
 0x314   : > { %v12922_v38 = vpack.c.bf16 %v1872_v59, %v1870_v32  ;;  %v12924_v14 = vpack.c.bf16 %v1888_v60, %v1886_v33  ;;  %v1590_v15 = vpop.f32.mrb[88].mxu0  ;;  %v1630_v17 = vpop.f32.mrb[8].mxu1 }
 0x315   : > { %v1591_v43 = vadd.f32 %v1590_v15, %v12829_v40  ;;  %v1631_v46 = vadd.f32 %v1630_v17, %v12829_v40  ;;  %v1592_v47 = vpop.f32.mrb[89].mxu0  ;;  %v1632_v48 = vpop.f32.mrb[9].mxu1  ;;  %2550 = vmatmul.mubr.bf16.gmra.mrb[116].mxu0 %v12918_v35 }
 0x316   : > { %15199 = vst [vmem:[#allocation42_spill] sm:$0xff] %v12922_v38  ;;  %15200 = vst [vmem:[#allocation43_spill] sm:$0xff] %v12924_v14  ;;  %v1593_v21 = vadd.f32 %v1592_v47, %v12832_v42  ;;  %v1633_v50 = vadd.f32 %v1632_v48, %v12832_v42  ;;  %v1594_v52 = vpop.f32.mrb[90].mxu0  ;;  %v1634_v53 = vpop.f32.mrb[10].mxu1  ;;  %2559 = vmatprep.mubr.bf16.mxu0 %v15098_v51 }
 0x317   : > { %v1595_v63 = vadd.f32 %v1594_v52, %v12829_v40  ;;  %v1635_v0 = vadd.f32 %v1634_v53, %v12829_v40  ;;  %v1596_v28 = vpop.f32.mrb[91].mxu0  ;;  %v1636_v1 = vpop.f32.mrb[11].mxu1  ;;  %v1873_v4 = vmax.f32 %v1591_v43, 0.0  ;;  %v1889_v7 = vmax.f32 %v1631_v46, 0.0 }
 0x318   : > { %v1597_v2 = vadd.f32 %v1596_v28, %v12832_v42  ;;  %v1637_v3 = vadd.f32 %v1636_v1, %v12832_v42  ;;  %v1874_v18 = vmax.f32 %v1593_v21, 0.0  ;;  %v1890_v20 = vmax.f32 %v1633_v50, 0.0 }
 0x319   : > { %v1875_v8 = vmax.f32 %v1595_v63, 0.0  ;;  %v1891_v45 = vmax.f32 %v1635_v0, 0.0  ;;  %2903 = vmatmul.mubr.bf16.gmra.mrb[116].mxu1 %v12918_v35 }
 0x31a   : > { %v1876_v22 = vmax.f32 %v1597_v2, 0.0  ;;  %v1892_v56 = vmax.f32 %v1637_v3, 0.0  ;;  %2912 = vmatprep.mubr.bf16.mxu1 %v15098_v51 }
 0x31b   : > { %v12938_v23 = vpack.c.bf16 %v1875_v8, %v1873_v4  ;;  %v12940_v24 = vpack.c.bf16 %v1891_v45, %v1889_v7 }
 0x31c   : > { %v12942_v25 = vpack.c.bf16 %v1876_v22, %v1874_v18  ;;  %v12944_v27 = vpack.c.bf16 %v1892_v56, %v1890_v20  ;;  %v1600_v30 = vpop.f32.mrb[92].mxu0  ;;  %v1640_v31 = vpop.f32.mrb[12].mxu1 }
 0x31d   : > { %v1601_v32 = vadd.f32 %v1600_v30, %v12829_v40  ;;  %v1641_v33 = vadd.f32 %v1640_v31, %v12829_v40  ;;  %v1602_v59 = vpop.f32.mrb[93].mxu0  ;;  %v1642_v60 = vpop.f32.mrb[13].mxu1  ;;  %2560 = vmatmul.mubr.bf16.gmra.mrb[120].mxu0 %v12938_v23 }
 0x31e   : > { %15201 = vst [vmem:[#allocation44_spill] sm:$0xff] %v12942_v25  ;;  %15202 = vst [vmem:[#allocation45_spill] sm:$0xff] %v12944_v27  ;;  %v1603_v15 = vadd.f32 %v1602_v59, %v12832_v42  ;;  %v1643_v17 = vadd.f32 %v1642_v60, %v12832_v42  ;;  %v1604_v41 = vpop.f32.mrb[94].mxu0  ;;  %v1644_v54 = vpop.f32.mrb[14].mxu1  ;;  %2569 = vmatprep.mubr.bf16.mxu0 %v15098_v51 }
 0x31f   : > { %v1605_v29 = vadd.f32 %v1604_v41, %v12829_v40  ;;  %v1645_v43 = vadd.f32 %v1644_v54, %v12829_v40  ;;  %v1606_v46 = vpop.f32.mrb[95].mxu0  ;;  %v1646_v47 = vpop.f32.mrb[15].mxu1  ;;  %v1877_v16 = vmax.f32 %v1601_v32, 0.0  ;;  %v1893_v19 = vmax.f32 %v1641_v33, 0.0 }
 0x320   : > { %v1607_v48 = vadd.f32 %v1606_v46, %v12832_v42  ;;  %v1647_v49 = vadd.f32 %v1646_v47, %v12832_v42  ;;  %v1878_v52 = vmax.f32 %v1603_v15, 0.0  ;;  %v1894_v53 = vmax.f32 %v1643_v17, 0.0 }
 0x321   : > { %v1879_v21 = vmax.f32 %v1605_v29, 0.0  ;;  %v1895_v50 = vmax.f32 %v1645_v43, 0.0  ;;  %2913 = vmatmul.mubr.bf16.gmra.mrb[120].mxu1 %v12938_v23 }
 0x322   : > { %v1880_v62 = vmax.f32 %v1607_v48, 0.0  ;;  %v1896_v5 = vmax.f32 %v1647_v49, 0.0  ;;  %2922 = vmatprep.mubr.bf16.mxu1 %v15098_v51 }
 0x323   : > { %v12958_v63 = vpack.c.bf16 %v1879_v21, %v1877_v16  ;;  %v12960_v0 = vpack.c.bf16 %v1895_v50, %v1893_v19  ;;  %v2091_v50 = vld [vmem:[#allocation11 + $0x190] sm:$0xff] }
 0x324   : > { %v12962_v28 = vpack.c.bf16 %v1880_v62, %v1878_v52  ;;  %v12964_v1 = vpack.c.bf16 %v1896_v5, %v1894_v53  ;;  %v1650_v2 = vpop.f32.mrb[16].mxu1  ;;  %v2095_v52 = vld [vmem:[#allocation11 + $0x1b0] sm:$0xff]  ;;  %v2092_v53 = vld [vmem:[#allocation11 + $0x198] sm:$0xff] }
 0x325   : > { %v1651_v3 = vadd.f32 %v1650_v2, %v12829_v40  ;;  %v1652_v4 = vpop.f32.mrb[17].mxu1  ;;  %2570 = vmatmul.mubr.bf16.gmra.mrb[124].mxu0 %v12958_v63  ;;  %v10532_v2 = vcombine.low %v2091_v50, %v2095_v52 }
 0x326   : > { %15203 = vst [vmem:[#allocation46_spill] sm:$0xff] %v12962_v28  ;;  %15204 = vst [vmem:[#allocation47_spill] sm:$0xff] %v12964_v1  ;;  %v1653_v7 = vadd.f32 %v1652_v4, %v12832_v42  ;;  %v1654_v8 = vpop.f32.mrb[18].mxu1  ;;  %2579 = vmatprep.mubr.bf16.mxu0 %v15098_v51  ;;  %v2096_v4 = vld [vmem:[#allocation11 + $0x1b8] sm:$0xff] }
 0x327   : > { %v1655_v45 = vadd.f32 %v1654_v8, %v12829_v40  ;;  %v1656_v18 = vpop.f32.mrb[19].mxu1  ;;  %v1897_v22 = vmax.f32 %v1651_v3, 0.0  ;;  %v10533_v3 = vcombine.high %v2091_v50, %v2095_v52 }
 0x328   : > { %v1657_v20 = vadd.f32 %v1656_v18, %v12832_v42  ;;  %v1898_v30 = vmax.f32 %v1653_v7, 0.0  ;;  %v10535_v18 = vcombine.high %v2092_v53, %v2096_v4 }
 0x329   : > { %v1899_v56 = vmax.f32 %v1655_v45, 0.0  ;;  %2923 = vmatmul.mubr.bf16.gmra.mrb[124].mxu1 %v12958_v63  ;;  %v10534_v45 = vcombine.low %v2092_v53, %v2096_v4  ;;  %3185 = vmatprep.subr.bf16.mxu0 %v10533_v3 }
 0x32a   : > { %v1900_v31 = vmax.f32 %v1657_v20, 0.0  ;;  %2932 = vmatprep.mubr.bf16.mxu1 %v15098_v51  ;;  %3538 = vmatprep.subr.bf16.mxu1 %v10535_v18 }
 0x32b   : > { %v12974_v32 = vpack.c.bf16 %v1899_v56, %v1897_v22  ;;  %3186 = vmatpush1.bf16.msra.mxu0 %v10532_v2  ;;  %3539 = vmatpush1.bf16.msra.mxu1 %v10534_v45 }
 0x32c   : > { %v12976_v33 = vpack.c.bf16 %v1900_v31, %v1898_v30  ;;  %v1660_v59 = vpop.f32.mrb[20].mxu1 }
 0x32d   : > { %v1661_v60 = vadd.f32 %v1660_v59, %v12829_v40  ;;  %v1662_v15 = vpop.f32.mrb[21].mxu1  ;;  %2580 = vmatmul.mubr.bf16.gmra.mrb[128].mxu0 %v12900_v57 }
 0x32e   : > { %15205 = vst [vmem:[#allocation48_spill] sm:$0xff] %v12976_v33  ;;  %v1663_v17 = vadd.f32 %v1662_v15, %v12832_v42  ;;  %v1664_v41 = vpop.f32.mrb[22].mxu1  ;;  %2589 = vmatprep.mubr.bf16.mxu0 %v15098_v51 }
 0x32f   : > { %v1665_v54 = vadd.f32 %v1664_v41, %v12829_v40  ;;  %v1666_v29 = vpop.f32.mrb[23].mxu1  ;;  %v1901_v46 = vmax.f32 %v1661_v60, 0.0 }
 0x330   : > { %v1667_v43 = vadd.f32 %v1666_v29, %v12832_v42  ;;  %v1902_v48 = vmax.f32 %v1663_v17, 0.0 }
 0x331   : > { %v1903_v47 = vmax.f32 %v1665_v54, 0.0  ;;  %2933 = vmatmul.mubr.bf16.gmra.mrb[128].mxu1 %v12900_v57 }
 0x332   : > { %v1904_v49 = vmax.f32 %v1667_v43, 0.0  ;;  %2942 = vmatprep.mubr.bf16.mxu1 %v15098_v51 }
 0x333   : > { %v12986_v16 = vpack.c.bf16 %v1903_v47, %v1901_v46 }
 0x334   : > { %v12988_v19 = vpack.c.bf16 %v1904_v49, %v1902_v48  ;;  %v1670_v21 = vpop.f32.mrb[24].mxu1 }
 0x335   : > { %v1671_v62 = vadd.f32 %v1670_v21, %v12829_v40  ;;  %v1672_v5 = vpop.f32.mrb[25].mxu1  ;;  %2590 = vmatmul.mubr.bf16.gmra.mrb[132].mxu0 %v12920_v37 }
 0x336   : > { %15206 = vst [vmem:[#allocation49_spill] sm:$0xff] %v12988_v19  ;;  %v1673_v7 = vadd.f32 %v1672_v5, %v12832_v42  ;;  %v1674_v8 = vpop.f32.mrb[26].mxu1  ;;  %2599 = vmatprep.mubr.bf16.mxu0 %v15098_v51 }
 0x337   : > { %v1675_v20 = vadd.f32 %v1674_v8, %v12829_v40  ;;  %v1676_v22 = vpop.f32.mrb[27].mxu1  ;;  %v1905_v30 = vmax.f32 %v1671_v62, 0.0 }
 0x338   : > { %v1677_v56 = vadd.f32 %v1676_v22, %v12832_v42  ;;  %v1906_v59 = vmax.f32 %v1673_v7, 0.0 }
 0x339   : > { %v1907_v31 = vmax.f32 %v1675_v20, 0.0  ;;  %2943 = vmatmul.mubr.bf16.gmra.mrb[132].mxu1 %v12920_v37 }
 0x33a   : > { %v1908_v60 = vmax.f32 %v1677_v56, 0.0  ;;  %2952 = vmatprep.mubr.bf16.mxu1 %v15098_v51 }
 0x33b   : > { %v12998_v15 = vpack.c.bf16 %v1907_v31, %v1905_v30 }
 0x33c   : > { %v13000_v17 = vpack.c.bf16 %v1908_v60, %v1906_v59  ;;  %v1680_v41 = vpop.f32.mrb[28].mxu1 }
 0x33d   : > { %v1681_v54 = vadd.f32 %v1680_v41, %v12829_v40  ;;  %v1682_v29 = vpop.f32.mrb[29].mxu1  ;;  %2600 = vmatmul.mubr.bf16.gmra.mrb[136].mxu0 %v12940_v24 }
 0x33e   : > { %15207 = vst [vmem:[#allocation50_spill] sm:$0xff] %v13000_v17  ;;  %v1683_v43 = vadd.f32 %v1682_v29, %v12832_v42  ;;  %v1684_v46 = vpop.f32.mrb[30].mxu1  ;;  %2609 = vmatprep.mubr.bf16.mxu0 %v15098_v51 }
 0x33f   : > { %v1685_v47 = vadd.f32 %v1684_v46, %v12829_v40  ;;  %v1686_v48 = vpop.f32.mrb[31].mxu1  ;;  %v1909_v21 = vmax.f32 %v1681_v54, 0.0 }
 0x340   : > { %v1687_v49 = vadd.f32 %v1686_v48, %v12832_v42  ;;  %v1910_v52 = vmax.f32 %v1683_v43, 0.0 }
 0x341   : > { %v1911_v50 = vmax.f32 %v1685_v47, 0.0  ;;  %2953 = vmatmul.mubr.bf16.gmra.mrb[136].mxu1 %v12940_v24 }
 0x342   : > { %v1912_v53 = vmax.f32 %v1687_v49, 0.0  ;;  %2962 = vmatprep.mubr.bf16.mxu1 %v15098_v51 }
 0x343   : > { %v13010_v62 = vpack.c.bf16 %v1911_v50, %v1909_v21 }
 0x344   : > { %v13012_v5 = vpack.c.bf16 %v1912_v53, %v1910_v52  ;;  %v1690_v2 = vpop.f32.mrb[32].mxu1 }
 0x345   : > { %v1691_v3 = vadd.f32 %v1690_v2, %v12829_v40  ;;  %v1692_v4 = vpop.f32.mrb[33].mxu1  ;;  %2610 = vmatmul.mubr.bf16.gmra.mrb[140].mxu0 %v12960_v0 }
 0x346   : > { %15208 = vst [vmem:[#allocation51_spill] sm:$0xff] %v13012_v5  ;;  %v1693_v7 = vadd.f32 %v1692_v4, %v12832_v42  ;;  %v1694_v8 = vpop.f32.mrb[34].mxu1  ;;  %2619 = vmatprep.mubr.bf16.mxu0 %v15098_v51 }
 0x347   : > { %v1695_v45 = vadd.f32 %v1694_v8, %v12829_v40  ;;  %v1696_v18 = vpop.f32.mrb[35].mxu1  ;;  %v1913_v22 = vmax.f32 %v1691_v3, 0.0 }
 0x348   : > { %v1697_v20 = vadd.f32 %v1696_v18, %v12832_v42  ;;  %v1914_v30 = vmax.f32 %v1693_v7, 0.0  ;;  %v2103_v18 = vld [vmem:[#allocation11 + $0x1f0] sm:$0xff] }
 0x349   : > { %v1915_v56 = vmax.f32 %v1695_v45, 0.0  ;;  %2963 = vmatmul.mubr.bf16.gmra.mrb[140].mxu1 %v12960_v0  ;;  %v2099_v45 = vld [vmem:[#allocation11 + $0x1d0] sm:$0xff] }
 0x34a   : > { %v1916_v31 = vmax.f32 %v1697_v20, 0.0  ;;  %2972 = vmatprep.mubr.bf16.mxu1 %v15098_v51  ;;  %v2100_v20 = vld [vmem:[#allocation11 + $0x1d8] sm:$0xff] }
 0x34b   : > { %v13022_v59 = vpack.c.bf16 %v1915_v56, %v1913_v22 }
 0x34c   : > { %v13024_v60 = vpack.c.bf16 %v1916_v31, %v1914_v30  ;;  %v1700_v41 = vpop.f32.mrb[36].mxu1  ;;  %v10540_v30 = vcombine.low %v2099_v45, %v2103_v18  ;;  %v10541_v31 = vcombine.high %v2099_v45, %v2103_v18 }
 0x34d   : > { %v1701_v54 = vadd.f32 %v1700_v41, %v12829_v40  ;;  %v1702_v29 = vpop.f32.mrb[37].mxu1  ;;  %2620 = vmatmul.mubr.bf16.gmra.mrb[144].mxu0 %v12974_v32  ;;  %v2104_v41 = vld [vmem:[#allocation11 + $0x1f8] sm:$0xff] }
 0x34e   : > { %15209 = vst [vmem:[#allocation52_spill] sm:$0xff] %v13024_v60  ;;  %v1703_v43 = vadd.f32 %v1702_v29, %v12832_v42  ;;  %v1704_v46 = vpop.f32.mrb[38].mxu1  ;;  %2629 = vmatprep.mubr.bf16.mxu0 %v15098_v51  ;;  %3187 = vmatprep.subr.bf16.mxu0 %v10541_v31 }
 0x34f   : > { %v1705_v47 = vadd.f32 %v1704_v46, %v12829_v40  ;;  %v1706_v48 = vpop.f32.mrb[39].mxu1  ;;  %v1917_v21 = vmax.f32 %v1701_v54, 0.0  ;;  %v10543_v46 = vcombine.high %v2100_v20, %v2104_v41  ;;  %3188 = vmatpush1.bf16.msra.mxu0 %v10540_v30 }
 0x350   : > { %v1707_v49 = vadd.f32 %v1706_v48, %v12832_v42  ;;  %v1918_v52 = vmax.f32 %v1703_v43, 0.0  ;;  %v10542_v43 = vcombine.low %v2100_v20, %v2104_v41 }
 0x351   : > { %v1919_v50 = vmax.f32 %v1705_v47, 0.0  ;;  %2973 = vmatmul.mubr.bf16.gmra.mrb[144].mxu1 %v12974_v32  ;;  %3540 = vmatprep.subr.bf16.mxu1 %v10543_v46 }
 0x352   : > { %v1920_v53 = vmax.f32 %v1707_v49, 0.0  ;;  %2982 = vmatprep.mubr.bf16.mxu1 %v15098_v51  ;;  %3541 = vmatpush1.bf16.msra.mxu1 %v10542_v43 }
 0x353   : > { %v13034_v2 = vpack.c.bf16 %v1919_v50, %v1917_v21 }
 0x354   : > { %v13036_v3 = vpack.c.bf16 %v1920_v53, %v1918_v52  ;;  %v1710_v4 = vpop.f32.mrb[40].mxu1 }
 0x355   : > { %v1711_v7 = vadd.f32 %v1710_v4, %v12829_v40  ;;  %v1712_v8 = vpop.f32.mrb[41].mxu1  ;;  %2630 = vmatmul.mubr.bf16.gmra.mrb[148].mxu0 %v12986_v16 }
 0x356   : > { %15210 = vst [vmem:[#allocation53_spill] sm:$0xff] %v13036_v3  ;;  %v1713_v22 = vadd.f32 %v1712_v8, %v12832_v42  ;;  %v1714_v56 = vpop.f32.mrb[42].mxu1  ;;  %2639 = vmatprep.mubr.bf16.mxu0 %v15098_v51 }
 0x357   : > { %v1715_v54 = vadd.f32 %v1714_v56, %v12829_v40  ;;  %v1716_v29 = vpop.f32.mrb[43].mxu1  ;;  %v1921_v48 = vmax.f32 %v1711_v7, 0.0 }
 0x358   : > { %v1717_v47 = vadd.f32 %v1716_v29, %v12832_v42  ;;  %v1922_v21 = vmax.f32 %v1713_v22, 0.0 }
 0x359   : > { %v1923_v49 = vmax.f32 %v1715_v54, 0.0  ;;  %2983 = vmatmul.mubr.bf16.gmra.mrb[148].mxu1 %v12986_v16 }
 0x35a   : > { %v1924_v50 = vmax.f32 %v1717_v47, 0.0  ;;  %2992 = vmatprep.mubr.bf16.mxu1 %v15098_v51 }
 0x35b   : > { %v13046_v52 = vpack.c.bf16 %v1923_v49, %v1921_v48 }
 0x35c   : > { %v13048_v53 = vpack.c.bf16 %v1924_v50, %v1922_v21  ;;  %v1720_v4 = vpop.f32.mrb[44].mxu1 }
 0x35d   : > { %v1721_v8 = vadd.f32 %v1720_v4, %v12829_v40  ;;  %v1722_v45 = vpop.f32.mrb[45].mxu1  ;;  %2640 = vmatmul.mubr.bf16.gmra.mrb[152].mxu0 %v12998_v15 }
 0x35e   : > { %15211 = vst [vmem:[#allocation54_spill] sm:$0xff] %v13048_v53  ;;  %v1723_v7 = vadd.f32 %v1722_v45, %v12832_v42  ;;  %v1724_v18 = vpop.f32.mrb[46].mxu1  ;;  %2649 = vmatprep.mubr.bf16.mxu0 %v15098_v51 }
 0x35f   : > { %v1725_v20 = vadd.f32 %v1724_v18, %v12829_v40  ;;  %v1726_v22 = vpop.f32.mrb[47].mxu1  ;;  %v1925_v30 = vmax.f32 %v1721_v8, 0.0 }
 0x360   : > { %v1727_v56 = vadd.f32 %v1726_v22, %v12832_v42  ;;  %v1926_v41 = vmax.f32 %v1723_v7, 0.0 }
 0x361   : > { %v1927_v31 = vmax.f32 %v1725_v20, 0.0  ;;  %2993 = vmatmul.mubr.bf16.gmra.mrb[152].mxu1 %v12998_v15 }
 0x362   : > { %v1928_v54 = vmax.f32 %v1727_v56, 0.0  ;;  %3002 = vmatprep.mubr.bf16.mxu1 %v15098_v51 }
 0x363   : > { %v13058_v29 = vpack.c.bf16 %v1927_v31, %v1925_v30 }
 0x364   : > { %v13060_v43 = vpack.c.bf16 %v1928_v54, %v1926_v41  ;;  %v1730_v46 = vpop.f32.mrb[48].mxu1 }
 0x365   : > { %v1731_v47 = vadd.f32 %v1730_v46, %v12829_v40  ;;  %v1732_v48 = vpop.f32.mrb[49].mxu1  ;;  %2650 = vmatmul.mubr.bf16.gmra.mrb[156].mxu0 %v13010_v62 }
 0x366   : > { %15212 = vst [vmem:[#allocation55_spill] sm:$0xff] %v13060_v43  ;;  %v1733_v49 = vadd.f32 %v1732_v48, %v12832_v42  ;;  %v1734_v21 = vpop.f32.mrb[50].mxu1  ;;  %2659 = vmatprep.mubr.bf16.mxu0 %v15098_v51  ;;  %v15215_v43 = vmov 0  }
 0x367   : > { %v1735_v50 = vadd.f32 %v1734_v21, %v12829_v40  ;;  %v1736_v4 = vpop.f32.mrb[51].mxu1  ;;  %v1929_v45 = vmax.f32 %v1731_v47, 0.0 }
 0x368   : > { %v1737_v8 = vadd.f32 %v1736_v4, %v12832_v42  ;;  %v1930_v18 = vmax.f32 %v1733_v49, 0.0 }
 0x369   : > { %v1931_v7 = vmax.f32 %v1735_v50, 0.0  ;;  %3003 = vmatmul.mubr.bf16.gmra.mrb[156].mxu1 %v13010_v62 }
 0x36a   : > { %v1932_v20 = vmax.f32 %v1737_v8, 0.0  ;;  %3012 = vmatprep.mubr.bf16.mxu1 %v15098_v51 }
 0x36b   : > { %v13070_v22 = vpack.c.bf16 %v1931_v7, %v1929_v45 }
 0x36c   : > { %v13072_v56 = vpack.c.bf16 %v1932_v20, %v1930_v18  ;;  %v1740_v30 = vpop.f32.mrb[52].mxu1 }
 0x36d   : > { %v1741_v31 = vadd.f32 %v1740_v30, %v12829_v40  ;;  %v1742_v41 = vpop.f32.mrb[53].mxu1  ;;  %2660 = vmatmul.mubr.bf16.gmra.mrb[160].mxu0 %v13022_v59 }
 0x36e   : > { %15213 = vst [vmem:[#allocation56_spill] sm:$0xff] %v13072_v56  ;;  %v1743_v54 = vadd.f32 %v1742_v41, %v12832_v42  ;;  %v1744_v46 = vpop.f32.mrb[54].mxu1  ;;  %2669 = vmatprep.mubr.bf16.mxu0 %v15098_v51  ;;  %v13088_v41 = vld [vmem:[#allocation12] sm:$0xff] }
 0x36f   : > { %v1745_v47 = vadd.f32 %v1744_v46, %v12829_v40  ;;  %v1746_v48 = vpop.f32.mrb[55].mxu1  ;;  %v1933_v21 = vmax.f32 %v1741_v31, 0.0  ;;  %v13090_v31 = vld [vmem:[#allocation12 + $0x20] sm:$0xff]  ;;  %v13092_v46 = vld [vmem:[#allocation12 + $0x8] sm:$0xff] }
 0x370   : > { %v1747_v49 = vadd.f32 %v1746_v48, %v12832_v42  ;;  %v1934_v4 = vmax.f32 %v1743_v54, 0.0 }
 0x371   : > { %v1935_v50 = vmax.f32 %v1745_v47, 0.0  ;;  %3013 = vmatmul.mubr.bf16.gmra.mrb[160].mxu1 %v13022_v59 }
 0x372   : > { %v1936_v8 = vmax.f32 %v1747_v49, 0.0  ;;  %3022 = vmatprep.mubr.bf16.mxu1 %v15098_v51  ;;  %v10545_v49 = vcombine.high %v13088_v41, %v13090_v31 }
 0x373   : > { %v13082_v45 = vpack.c.bf16 %v1935_v50, %v1933_v21  ;;  %v13100_v21 = vld [vmem:[#allocation12 + $0x28] sm:$0xff] }
 0x374   : > { %v13084_v7 = vpack.c.bf16 %v1936_v8, %v1934_v4  ;;  %v1750_v18 = vpop.f32.mrb[56].mxu1  ;;  %5521 = vmatprep.subr.bf16.mxu0 %v10545_v49 }
 0x375   : > { %v1751_v20 = vadd.f32 %v1750_v18, %v12829_v40  ;;  %v1752_v30 = vpop.f32.mrb[57].mxu1  ;;  %2670 = vmatmul.mubr.bf16.gmra.mrb[164].mxu0 %v13034_v2  ;;  %v10547_v18 = vcombine.high %v13092_v46, %v13100_v21 }
 0x376   : > { %15214 = vst [vmem:[#allocation57_spill] sm:$0xff] %v13084_v7  ;;  %v1753_v54 = vadd.f32 %v1752_v30, %v12832_v42  ;;  %v1754_v47 = vpop.f32.mrb[58].mxu1  ;;  %2679 = vmatprep.mubr.bf16.mxu0 %v15098_v51 }
 0x377   : > { %v1755_v50 = vadd.f32 %v1754_v47, %v12829_v40  ;;  %v1756_v4 = vpop.f32.mrb[59].mxu1  ;;  %v1937_v51 = vmax.f32 %v1751_v20, 0.0  ;;  %5874 = vmatprep.subr.bf16.mxu1 %v10547_v18 }
 0x378   : > { %v1757_v30 = vadd.f32 %v1756_v4, %v12832_v42  ;;  %v1938_v48 = vmax.f32 %v1753_v54, 0.0 }
 0x379   : > { %v1939_v7 = vmax.f32 %v1755_v50, 0.0  ;;  %3023 = vmatmul.mubr.bf16.gmra.mrb[164].mxu1 %v13034_v2 }
 0x37a   : > { %v1940_v56 = vmax.f32 %v1757_v30, 0.0  ;;  %3032 = vmatprep.mubr.bf16.mxu1 %v15215_v43 }
 0x37b   : > { %v13110_v47 = vpack.c.bf16 %v1939_v7, %v1937_v51 }
 0x37c   : > { %v13112_v53 = vpack.c.bf16 %v1940_v56, %v1938_v48  ;;  %v1760_v8 = vpop.f32.mrb[60].mxu1 }
 0x37d   : > { %v1761_v3 = vadd.f32 %v1760_v8, %v12829_v40  ;;  %v1762_v60 = vpop.f32.mrb[61].mxu1  ;;  %2680 = vmatmul.mubr.bf16.gmra.mrb[168].mxu0 %v13046_v52 }
 0x37e   : > { %15216 = vst [vmem:[#allocation58_spill] sm:$0xff] %v13112_v53  ;;  %v1763_v20 = vadd.f32 %v1762_v60, %v12832_v42  ;;  %v1764_v49 = vpop.f32.mrb[62].mxu1  ;;  %2689 = vmatprep.mubr.bf16.mxu0 %v15215_v43 }
 0x37f   : > { %v1765_v54 = vadd.f32 %v1764_v49, %v12829_v40  ;;  %v1766_v50 = vpop.f32.mrb[63].mxu1  ;;  %v1941_v51 = vmax.f32 %v1761_v3, 0.0 }
 0x380   : > { %v1767_v4 = vadd.f32 %v1766_v50, %v12832_v42  ;;  %v1942_v56 = vmax.f32 %v1763_v20, 0.0 }
 0x381   : > { %v1943_v7 = vmax.f32 %v1765_v54, 0.0  ;;  %3033 = vmatmul.mubr.bf16.gmra.mrb[168].mxu1 %v13046_v52 }
 0x382   : > { %v1944_v48 = vmax.f32 %v1767_v4, 0.0  ;;  %3042 = vmatprep.mubr.bf16.mxu1 %v15215_v43 }
 0x383   : > { %v13122_v8 = vpack.c.bf16 %v1943_v7, %v1941_v51 }
 0x384   : > { %v13124_v18 = vpack.c.bf16 %v1944_v48, %v1942_v56  ;;  %v1770_v60 = vpop.f32.mrb[64].mxu1 }
 0x385   : > { %v1771_v30 = vadd.f32 %v1770_v60, %v12829_v40  ;;  %v1772_v53 = vpop.f32.mrb[65].mxu1  ;;  %2690 = vmatmul.mubr.bf16.gmra.mrb[172].mxu0 %v13058_v29 }
 0x386   : > { %15217 = vst [vmem:[#allocation59_spill] sm:$0xff] %v13124_v18  ;;  %v1773_v49 = vadd.f32 %v1772_v53, %v12832_v42  ;;  %v1774_v3 = vpop.f32.mrb[66].mxu1  ;;  %2699 = vmatprep.mubr.bf16.mxu0 %v15215_v43 }
 0x387   : > { %v1775_v20 = vadd.f32 %v1774_v3, %v12829_v40  ;;  %v1776_v54 = vpop.f32.mrb[67].mxu1  ;;  %v1945_v4 = vmax.f32 %v1771_v30, 0.0 }
 0x388   : > { %v1777_v50 = vadd.f32 %v1776_v54, %v12832_v42  ;;  %v1946_v7 = vmax.f32 %v1773_v49, 0.0 }
 0x389   : > { %v1947_v51 = vmax.f32 %v1775_v20, 0.0  ;;  %3043 = vmatmul.mubr.bf16.gmra.mrb[172].mxu1 %v13058_v29 }
 0x38a   : > { %v1948_v56 = vmax.f32 %v1777_v50, 0.0  ;;  %3052 = vmatprep.mubr.bf16.mxu1 %v15215_v43 }
 0x38b   : > { %v13134_v48 = vpack.c.bf16 %v1947_v51, %v1945_v4 }
 0x38c   : > { %v13136_v60 = vpack.c.bf16 %v1948_v56, %v1946_v7  ;;  %v1780_v53 = vpop.f32.mrb[68].mxu1 }
 0x38d   : > { %v1781_v18 = vadd.f32 %v1780_v53, %v12829_v40  ;;  %v1782_v5 = vpop.f32.mrb[69].mxu1  ;;  %2700 = vmatmul.mubr.bf16.gmra.mrb[176].mxu0 %v13070_v22 }
 0x38e   : > { %15218 = vst [vmem:[#allocation60_spill] sm:$0xff] %v13136_v60  ;;  %v1783_v3 = vadd.f32 %v1782_v5, %v12832_v42  ;;  %v1784_v30 = vpop.f32.mrb[70].mxu1  ;;  %2709 = vmatprep.mubr.bf16.mxu0 %v15215_v43 }
 0x38f   : > { %v1785_v49 = vadd.f32 %v1784_v30, %v12829_v40  ;;  %v1786_v20 = vpop.f32.mrb[71].mxu1  ;;  %v1949_v50 = vmax.f32 %v1781_v18, 0.0 }
 0x390   : > { %v1787_v54 = vadd.f32 %v1786_v20, %v12832_v42  ;;  %v1950_v51 = vmax.f32 %v1783_v3, 0.0 }
 0x391   : > { %v1951_v4 = vmax.f32 %v1785_v49, 0.0  ;;  %3053 = vmatmul.mubr.bf16.gmra.mrb[176].mxu1 %v13070_v22 }
 0x392   : > { %v1952_v7 = vmax.f32 %v1787_v54, 0.0  ;;  %3062 = vmatprep.mubr.bf16.mxu1 %v15215_v43 }
 0x393   : > { %v13146_v56 = vpack.c.bf16 %v1951_v4, %v1949_v50 }
 0x394   : > { %v13148_v53 = vpack.c.bf16 %v1952_v7, %v1950_v51  ;;  %v1790_v5 = vpop.f32.mrb[72].mxu1 }
 0x395   : > { %v1791_v60 = vadd.f32 %v1790_v5, %v12829_v40  ;;  %v1792_v17 = vpop.f32.mrb[73].mxu1  ;;  %2710 = vmatmul.mubr.bf16.gmra.mrb[180].mxu0 %v13082_v45 }
 0x396   : > { %15219 = vst [vmem:[#allocation61_spill] sm:$0xff] %v13148_v53  ;;  %v1793_v30 = vadd.f32 %v1792_v17, %v12832_v42  ;;  %v1794_v18 = vpop.f32.mrb[74].mxu1  ;;  %2719 = vmatprep.mubr.bf16.mxu0 %v15215_v43 }
 0x397   : > { %v1795_v3 = vadd.f32 %v1794_v18, %v12829_v40  ;;  %v1796_v49 = vpop.f32.mrb[75].mxu1  ;;  %v1953_v54 = vmax.f32 %v1791_v60, 0.0 }
 0x398   : > { %v1797_v20 = vadd.f32 %v1796_v49, %v12832_v42  ;;  %v1954_v4 = vmax.f32 %v1793_v30, 0.0 }
 0x399   : > { %v1955_v50 = vmax.f32 %v1795_v3, 0.0  ;;  %3063 = vmatmul.mubr.bf16.gmra.mrb[180].mxu1 %v13082_v45 }
 0x39a   : > { %v1956_v51 = vmax.f32 %v1797_v20, 0.0  ;;  %3072 = vmatprep.mubr.bf16.mxu1 %v15215_v43 }
 0x39b   : > { %v13158_v7 = vpack.c.bf16 %v1955_v50, %v1953_v54 }
 0x39c   : > { %v13160_v5 = vpack.c.bf16 %v1956_v51, %v1954_v4  ;;  %v1800_v17 = vpop.f32.mrb[76].mxu1 }
 0x39d   : > { %v1801_v53 = vadd.f32 %v1800_v17, %v12829_v40  ;;  %v1802_v19 = vpop.f32.mrb[77].mxu1  ;;  %2720 = vmatmul.mubr.bf16.gmra.mrb[184].mxu0 %v13110_v47 }
 0x39e   : > { %15220 = vst [vmem:[#allocation62_spill] sm:$0xff] %v13160_v5  ;;  %v1803_v18 = vadd.f32 %v1802_v19, %v12832_v42  ;;  %v1804_v60 = vpop.f32.mrb[78].mxu1  ;;  %2729 = vmatprep.mubr.bf16.mxu0 %v15215_v43 }
 0x39f   : > { %v1805_v30 = vadd.f32 %v1804_v60, %v12829_v40  ;;  %v1806_v3 = vpop.f32.mrb[79].mxu1  ;;  %v1957_v20 = vmax.f32 %v1801_v53, 0.0 }
 0x3a0   : > { %v1807_v49 = vadd.f32 %v1806_v3, %v12832_v42  ;;  %v1958_v50 = vmax.f32 %v1803_v18, 0.0 }
 0x3a1   : > { %v1959_v54 = vmax.f32 %v1805_v30, 0.0  ;;  %3073 = vmatmul.mubr.bf16.gmra.mrb[184].mxu1 %v13110_v47 }
 0x3a2   : > { %v1960_v4 = vmax.f32 %v1807_v49, 0.0  ;;  %3082 = vmatprep.mubr.bf16.mxu1 %v15215_v43 }
 0x3a3   : > { %v13170_v51 = vpack.c.bf16 %v1959_v54, %v1957_v20 }
 0x3a4   : > { %v13172_v17 = vpack.c.bf16 %v1960_v4, %v1958_v50  ;;  %v1810_v19 = vpop.f32.mrb[80].mxu1 }
 0x3a5   : > { %15221 = vst [vmem:[#allocation63_spill] sm:$0xff] %v13170_v51  ;;  %v1811_v5 = vadd.f32 %v1810_v19, %v12829_v40  ;;  %v1812_v33 = vpop.f32.mrb[81].mxu1  ;;  %2730 = vmatmul.mubr.bf16.gmra.mrb[188].mxu0 %v13122_v8 }
 0x3a6   : > { %15222 = vst [vmem:[#allocation64_spill] sm:$0xff] %v13172_v17  ;;  %v1813_v60 = vadd.f32 %v1812_v33, %v12832_v42  ;;  %v1814_v53 = vpop.f32.mrb[82].mxu1  ;;  %2739 = vmatprep.mubr.bf16.mxu0 %v15215_v43 }
 0x3a7   : > { %v1815_v18 = vadd.f32 %v1814_v53, %v12829_v40  ;;  %v1816_v30 = vpop.f32.mrb[83].mxu1  ;;  %v1961_v49 = vmax.f32 %v1811_v5, 0.0 }
 0x3a8   : > { %v1817_v3 = vadd.f32 %v1816_v30, %v12832_v42  ;;  %v1962_v54 = vmax.f32 %v1813_v60, 0.0 }
 0x3a9   : > { %v1963_v20 = vmax.f32 %v1815_v18, 0.0  ;;  %3083 = vmatmul.mubr.bf16.gmra.mrb[188].mxu1 %v13122_v8 }
 0x3aa   : > { %v1964_v50 = vmax.f32 %v1817_v3, 0.0  ;;  %3092 = vmatprep.mubr.bf16.mxu1 %v15215_v43 }
 0x3ab   : > { %v13182_v4 = vpack.c.bf16 %v1963_v20, %v1961_v49 }
 0x3ac   : > { %v13184_v19 = vpack.c.bf16 %v1964_v50, %v1962_v54  ;;  %v1820_v33 = vpop.f32.mrb[84].mxu1 }
 0x3ad   : > { %v1821_v17 = vadd.f32 %v1820_v33, %v12829_v40  ;;  %v1822_v1 = vpop.f32.mrb[85].mxu1  ;;  %2740 = vmatmul.mubr.bf16.gmra.mrb[192].mxu0 %v13134_v48 }
 0x3ae   : > { %15223 = vst [vmem:[#allocation65_spill] sm:$0xff] %v13184_v19  ;;  %v1823_v53 = vadd.f32 %v1822_v1, %v12832_v42  ;;  %v1824_v5 = vpop.f32.mrb[86].mxu1  ;;  %2749 = vmatprep.mubr.bf16.mxu0 %v15215_v43 }
 0x3af   : > { %v1825_v60 = vadd.f32 %v1824_v5, %v12829_v40  ;;  %v1826_v18 = vpop.f32.mrb[87].mxu1  ;;  %v1965_v3 = vmax.f32 %v1821_v17, 0.0 }
 0x3b0   : > { %v1827_v30 = vadd.f32 %v1826_v18, %v12832_v42  ;;  %v1966_v20 = vmax.f32 %v1823_v53, 0.0 }
 0x3b1   : > { %v1967_v49 = vmax.f32 %v1825_v60, 0.0  ;;  %3093 = vmatmul.mubr.bf16.gmra.mrb[192].mxu1 %v13134_v48 }
 0x3b2   : > { %v1968_v54 = vmax.f32 %v1827_v30, 0.0  ;;  %3102 = vmatprep.mubr.bf16.mxu1 %v15215_v43 }
 0x3b3   : > { %v13194_v50 = vpack.c.bf16 %v1967_v49, %v1965_v3 }
 0x3b4   : > { %v13196_v33 = vpack.c.bf16 %v1968_v54, %v1966_v20  ;;  %v1830_v1 = vpop.f32.mrb[88].mxu1  ;;  %v2105_v54 = vld [vmem:[%s15226_s26] sm:$0xff] }
 0x3b5   : > { %15224 = vst [vmem:[#allocation66_spill] sm:$0xff] %v13194_v50  ;;  %v1831_v19 = vadd.f32 %v1830_v1, %v12829_v40  ;;  %v1832_v27 = vpop.f32.mrb[89].mxu1  ;;  %2750 = vmatmul.mubr.bf16.gmra.mrb[196].mxu0 %v13146_v56 }
 0x3b6   : > { %15225 = vst [vmem:[#allocation67_spill] sm:$0xff] %v13196_v33  ;;  %v1833_v5 = vadd.f32 %v1832_v27, %v12832_v42  ;;  %v1834_v17 = vpop.f32.mrb[90].mxu1  ;;  %2759 = vmatprep.mubr.bf16.mxu0 %v15215_v43 }
 0x3b7   : > { %v1835_v53 = vadd.f32 %v1834_v17, %v12829_v40  ;;  %v1836_v60 = vpop.f32.mrb[91].mxu1  ;;  %v1969_v30 = vmax.f32 %v1831_v19, 0.0  ;;  %v13216_v19 = vrot.slane %v2105_v54, %v12820_v10 }
 0x3b8   : > { %v1837_v18 = vadd.f32 %v1836_v60, %v12832_v42  ;;  %v1970_v49 = vmax.f32 %v1833_v5, 0.0  ;;  %v13219_v5 = vsub.s32 2, %v12816_v9 }
 0x3b9   : > { %v1971_v3 = vmax.f32 %v1835_v53, 0.0  ;;  %3103 = vmatmul.mubr.bf16.gmra.mrb[196].mxu1 %v13146_v56 }
 0x3ba   : > { %v1972_v20 = vmax.f32 %v1837_v18, 0.0  ;;  %3112 = vmatprep.mubr.bf16.mxu1 %v15215_v43  ;;  %15229 = vst [vmem:[#allocation70_spill] sm:$0xff] %v13219_v5 }
 0x3bb   : > { %v13209_v27 = vpack.c.bf16 %v1971_v3, %v1969_v30  ;;  %v13223_v30 = vrot.slane %v2105_v54, %v12826_v26  ;;  %v13227_v3 = vsub.s32 3, %v12816_v9  ;;  %v13234_v26 = vrot.slane %v2105_v54, %v13219_v5 }
 0x3bc   : > { %v13211_v1 = vpack.c.bf16 %v1972_v20, %v1970_v49  ;;  %v1840_v17 = vpop.f32.mrb[92].mxu1 }
 0x3bd   : > { %15227 = vst [vmem:[#allocation68_spill] sm:$0xff] %v13209_v27  ;;  %v1841_v33 = vadd.f32 %v1840_v17, %v12829_v40  ;;  %v1842_v60 = vpop.f32.mrb[93].mxu1  ;;  %2760 = vmatmul.mubr.bf16.gmra.mrb[200].mxu0 %v13158_v7  ;;  %15230 = vst [vmem:[#allocation71_spill] sm:$0xff] %v13227_v3 }
 0x3be   : > { %15228 = vst [vmem:[#allocation69_spill] sm:$0xff] %v13211_v1  ;;  %v1843_v53 = vadd.f32 %v1842_v60, %v12832_v42  ;;  %v1844_v18 = vpop.f32.mrb[94].mxu1  ;;  %2769 = vmatprep.mubr.bf16.mxu0 %v15215_v43 }
 0x3bf   : > { %v1845_v49 = vadd.f32 %v1844_v18, %v12829_v40  ;;  %v1846_v20 = vpop.f32.mrb[95].mxu1  ;;  %v1973_v10 = vmax.f32 %v1841_v33, 0.0  ;;  %v13238_v40 = vrot.slane %v2105_v54, %v13227_v3 }
 0x3c0   : > { %v1847_v17 = vadd.f32 %v1846_v20, %v12832_v42  ;;  %v2501_v1 = vpop.f32.mrb[96].mxu0  ;;  %v1974_v28 = vmax.f32 %v1843_v53, 0.0 }
 0x3c1   : > { %v1975_v14 = vmax.f32 %v1845_v49, 0.0  ;;  %v2502_v61 = vadd.f32 %v2501_v1, %v13216_v19  ;;  %v2503_v60 = vpop.f32.mrb[97].mxu0  ;;  %3113 = vmatmul.mubr.bf16.gmra.mrb[200].mxu1 %v13158_v7 }
 0x3c2   : > { %v1976_v25 = vmax.f32 %v1847_v17, 0.0  ;;  %v2504_v38 = vadd.f32 %v2503_v60, %v13223_v30  ;;  %v2505_v39 = vpop.f32.mrb[98].mxu0  ;;  %3122 = vmatprep.mubr.bf16.mxu1 %v15215_v43 }
 0x3c3   : > { %v13241_v42 = vpack.c.bf16 %v1975_v14, %v1973_v10  ;;  %v2506_v33 = vadd.f32 %v2505_v39, %v13216_v19  ;;  %v2507_v1 = vpop.f32.mrb[99].mxu0  ;;  %v3879_v53 = vmax.f32 %v2502_v61, 0.0 }
 0x3c4   : > { %v13244_v18 = vpack.c.bf16 %v1976_v25, %v1974_v28  ;;  %v2508_v49 = vadd.f32 %v2507_v1, %v13223_v30  ;;  %v2854_v20 = vpop.f32.mrb[96].mxu1  ;;  %v3880_v3 = vmax.f32 %v2504_v38, 0.0 }
 0x3c5   : > { %15231 = vst [vmem:[#allocation72_spill] sm:$0xff] %v13241_v42  ;;  %v3887_v17 = vmax.f32 %v2506_v33, 0.0  ;;  %v2855_v60 = vadd.f32 %v2854_v20, %v13234_v26  ;;  %2770 = vmatmul.mubr.bf16.gmra.mrb[204].mxu0 %v13170_v51  ;;  %v2856_v54 = vpop.f32.mrb[97].mxu1 }
 0x3c6   : > { %15232 = vst [vmem:[#allocation73_spill] sm:$0xff] %v13244_v18  ;;  %v3888_v5 = vmax.f32 %v2508_v49, 0.0  ;;  %v2857_v10 = vadd.f32 %v2856_v54, %v13238_v40  ;;  %v2858_v14 = vpop.f32.mrb[98].mxu1  ;;  %2779 = vmatprep.mubr.bf16.mxu0 %v15215_v43 }
 0x3c7   : > { %v4393_v39 = vmax.f32 %v3879_v53, %v3887_v17  ;;  %v2859_v25 = vadd.f32 %v2858_v14, %v13234_v26  ;;  %v2860_v28 = vpop.f32.mrb[99].mxu1  ;;  %v3881_v18 = vmax.f32 %v2855_v60, 0.0 }
 0x3c8   : > { %v4430_v1 = vmax.f32 %v3880_v3, %v3888_v5  ;;  %v2861_v61 = vadd.f32 %v2860_v28, %v13238_v40  ;;  %v2511_v33 = vpop.f32.mrb[100].mxu0  ;;  %v3882_v38 = vmax.f32 %v2857_v10, 0.0 }
 0x3c9   : > { %v3889_v20 = vmax.f32 %v2859_v25, 0.0  ;;  %v2512_v58 = vadd.f32 %v2511_v33, %v13216_v19  ;;  %v2513_v12 = vpop.f32.mrb[101].mxu0  ;;  %3123 = vmatmul.mubr.bf16.gmra.mrb[204].mxu1 %v13170_v51 }
 0x3ca   : > { %v3890_v49 = vmax.f32 %v2861_v61, 0.0  ;;  %v2514_v54 = vadd.f32 %v2513_v12, %v13223_v30  ;;  %v2515_v36 = vpop.f32.mrb[102].mxu0  ;;  %3132 = vmatprep.mubr.bf16.mxu1 %v15215_v43 }
 0x3cb   : > { %v4467_v53 = vmax.f32 %v3881_v18, %v3889_v20  ;;  %v3895_v17 = vmax.f32 %v2512_v58, 0.0  ;;  %v2516_v5 = vadd.f32 %v2515_v36, %v13216_v19  ;;  %v2517_v3 = vpop.f32.mrb[103].mxu0 }
 0x3cc   : > { %v4504_v14 = vmax.f32 %v3882_v38, %v3890_v49  ;;  %v3896_v60 = vmax.f32 %v2514_v54, 0.0  ;;  %v2518_v25 = vadd.f32 %v2517_v3, %v13223_v30  ;;  %v2864_v28 = vpop.f32.mrb[100].mxu1 }
 0x3cd   : > { %v4394_v33 = vmax.f32 %v4393_v39, %v3895_v17  ;;  %v3903_v13 = vmax.f32 %v2516_v5, 0.0  ;;  %v2865_v10 = vadd.f32 %v2864_v28, %v13234_v26  ;;  %2780 = vmatmul.mubr.bf16.gmra.mrb[208].mxu0 %v13182_v4  ;;  %v2866_v12 = vpop.f32.mrb[101].mxu1 }
 0x3ce   : > { %v4431_v61 = vmax.f32 %v4430_v1, %v3896_v60  ;;  %v3904_v51 = vmax.f32 %v2518_v25, 0.0  ;;  %v2867_v18 = vadd.f32 %v2866_v12, %v13238_v40  ;;  %v2868_v58 = vpop.f32.mrb[102].mxu1  ;;  %2789 = vmatprep.mubr.bf16.mxu0 %v15215_v43 }
 0x3cf   : > { %v4395_v36 = vmax.f32 %v4394_v33, %v3903_v13  ;;  %v3897_v20 = vmax.f32 %v2865_v10, 0.0  ;;  %v2869_v38 = vadd.f32 %v2868_v58, %v13234_v26  ;;  %v2870_v49 = vpop.f32.mrb[103].mxu1 }
 0x3d0   : > { %v4432_v54 = vmax.f32 %v4431_v61, %v3904_v51  ;;  %v3898_v39 = vmax.f32 %v2867_v18, 0.0  ;;  %v2871_v17 = vadd.f32 %v2870_v49, %v13238_v40  ;;  %v2521_v5 = vpop.f32.mrb[104].mxu0 }
 0x3d1   : > { %v4468_v3 = vmax.f32 %v4467_v53, %v3897_v20  ;;  %v3905_v28 = vmax.f32 %v2869_v38, 0.0  ;;  %v2522_v1 = vadd.f32 %v2521_v5, %v13216_v19  ;;  %v2523_v60 = vpop.f32.mrb[105].mxu0  ;;  %3133 = vmatmul.mubr.bf16.gmra.mrb[208].mxu1 %v13182_v4 }
 0x3d2   : > { %v4505_v25 = vmax.f32 %v4504_v14, %v3898_v39  ;;  %v3906_v12 = vmax.f32 %v2871_v17, 0.0  ;;  %v2524_v13 = vadd.f32 %v2523_v60, %v13223_v30  ;;  %v2525_v33 = vpop.f32.mrb[106].mxu0  ;;  %3142 = vmatprep.mubr.bf16.mxu1 %v15215_v43 }
 0x3d3   : > { %v4469_v10 = vmax.f32 %v4468_v3, %v3905_v28  ;;  %v3911_v51 = vmax.f32 %v2522_v1, 0.0  ;;  %v2526_v61 = vadd.f32 %v2525_v33, %v13216_v19  ;;  %v2527_v18 = vpop.f32.mrb[107].mxu0 }
 0x3d4   : > { %v4506_v58 = vmax.f32 %v4505_v25, %v3906_v12  ;;  %v3912_v53 = vmax.f32 %v2524_v13, 0.0  ;;  %v2528_v20 = vadd.f32 %v2527_v18, %v13223_v30  ;;  %v2874_v38 = vpop.f32.mrb[104].mxu1 }
 0x3d5   : > { %v4396_v49 = vmax.f32 %v4395_v36, %v3911_v51  ;;  %v3919_v5 = vmax.f32 %v2526_v61, 0.0  ;;  %v2875_v14 = vadd.f32 %v2874_v38, %v13234_v26  ;;  %2790 = vmatmul.mubr.bf16.gmra.mrb[212].mxu0 %v13194_v50  ;;  %v2876_v39 = vpop.f32.mrb[105].mxu1 }
 0x3d6   : > { %v4433_v17 = vmax.f32 %v4432_v54, %v3912_v53  ;;  %v3920_v60 = vmax.f32 %v2528_v20, 0.0  ;;  %v2877_v3 = vadd.f32 %v2876_v39, %v13238_v40  ;;  %v2878_v28 = vpop.f32.mrb[106].mxu1  ;;  %2799 = vmatprep.mubr.bf16.mxu0 %v15215_v43 }
 0x3d7   : > { %v4397_v1 = vmax.f32 %v4396_v49, %v3919_v5  ;;  %v3913_v25 = vmax.f32 %v2875_v14, 0.0  ;;  %v2879_v12 = vadd.f32 %v2878_v28, %v13234_v26  ;;  %v2880_v13 = vpop.f32.mrb[107].mxu1 }
 0x3d8   : > { %v4434_v33 = vmax.f32 %v4433_v17, %v3920_v60  ;;  %v3914_v36 = vmax.f32 %v2877_v3, 0.0  ;;  %v2881_v51 = vadd.f32 %v2880_v13, %v13238_v40  ;;  %v2531_v61 = vpop.f32.mrb[108].mxu0 }
 0x3d9   : > { %v4470_v18 = vmax.f32 %v4469_v10, %v3913_v25  ;;  %v3921_v38 = vmax.f32 %v2879_v12, 0.0  ;;  %v2532_v54 = vadd.f32 %v2531_v61, %v13216_v19  ;;  %v2533_v53 = vpop.f32.mrb[109].mxu0  ;;  %3143 = vmatmul.mubr.bf16.gmra.mrb[212].mxu1 %v13194_v50 }
 0x3da   : > { %v4507_v20 = vmax.f32 %v4506_v58, %v3914_v36  ;;  %v3922_v39 = vmax.f32 %v2881_v51, 0.0  ;;  %v2534_v49 = vadd.f32 %v2533_v53, %v13223_v30  ;;  %v2535_v5 = vpop.f32.mrb[110].mxu0  ;;  %3152 = vmatprep.mubr.bf16.mxu1 %v15215_v43 }
 0x3db   : > { %v4471_v14 = vmax.f32 %v4470_v18, %v3921_v38  ;;  %v3927_v17 = vmax.f32 %v2532_v54, 0.0  ;;  %v2536_v60 = vadd.f32 %v2535_v5, %v13216_v19  ;;  %v2537_v3 = vpop.f32.mrb[111].mxu0 }
 0x3dc   : > { %v4508_v28 = vmax.f32 %v4507_v20, %v3922_v39  ;;  %v3928_v10 = vmax.f32 %v2534_v49, 0.0  ;;  %v2538_v25 = vadd.f32 %v2537_v3, %v13223_v30  ;;  %v2884_v12 = vpop.f32.mrb[108].mxu1 }
 0x3dd   : > { %v4398_v13 = vmax.f32 %v4397_v1, %v3927_v17  ;;  %v3935_v61 = vmax.f32 %v2536_v60, 0.0  ;;  %v2885_v58 = vadd.f32 %v2884_v12, %v13234_v26  ;;  %2800 = vmatmul.mubr.bf16.gmra.mrb[216].mxu0 %v13209_v27  ;;  %v2886_v36 = vpop.f32.mrb[109].mxu1 }
 0x3de   : > { %v4435_v51 = vmax.f32 %v4434_v33, %v3928_v10  ;;  %v3936_v53 = vmax.f32 %v2538_v25, 0.0  ;;  %v2887_v18 = vadd.f32 %v2886_v36, %v13238_v40  ;;  %v2888_v38 = vpop.f32.mrb[110].mxu1  ;;  %2809 = vmatprep.mubr.bf16.mxu0 %v15215_v43 }
 0x3df   : > { %v4399_v54 = vmax.f32 %v4398_v13, %v3935_v61  ;;  %v3929_v20 = vmax.f32 %v2885_v58, 0.0  ;;  %v2889_v39 = vadd.f32 %v2888_v38, %v13234_v26  ;;  %v2890_v49 = vpop.f32.mrb[111].mxu1 }
 0x3e0   : > { %v4436_v5 = vmax.f32 %v4435_v51, %v3936_v53  ;;  %v3930_v1 = vmax.f32 %v2887_v18, 0.0  ;;  %v2891_v17 = vadd.f32 %v2890_v49, %v13238_v40  ;;  %v2541_v60 = vpop.f32.mrb[112].mxu0 }
 0x3e1   : > { %v4472_v3 = vmax.f32 %v4471_v14, %v3929_v20  ;;  %v3937_v12 = vmax.f32 %v2889_v39, 0.0  ;;  %v2542_v33 = vadd.f32 %v2541_v60, %v13216_v19  ;;  %v2543_v10 = vpop.f32.mrb[113].mxu0  ;;  %3153 = vmatmul.mubr.bf16.gmra.mrb[216].mxu1 %v13209_v27  ;;  %v15233_v27 = vcombine.low %v13088_v41, %v13090_v31 }
 0x3e2   : > { %v4509_v25 = vmax.f32 %v4508_v28, %v3930_v1  ;;  %v3938_v36 = vmax.f32 %v2891_v17, 0.0  ;;  %v2544_v13 = vadd.f32 %v2543_v10, %v13223_v30  ;;  %v2545_v61 = vpop.f32.mrb[114].mxu0  ;;  %3162 = vmatprep.mubr.bf16.mxu1 %v15215_v43 }
 0x3e3   : > { %v4473_v58 = vmax.f32 %v4472_v3, %v3937_v12  ;;  %v3943_v51 = vmax.f32 %v2542_v33, 0.0  ;;  %v2546_v53 = vadd.f32 %v2545_v61, %v13216_v19  ;;  %v2547_v18 = vpop.f32.mrb[115].mxu0 }
 0x3e4   : > { %v4510_v38 = vmax.f32 %v4509_v25, %v3938_v36  ;;  %v3944_v14 = vmax.f32 %v2544_v13, 0.0  ;;  %v2548_v20 = vadd.f32 %v2547_v18, %v13223_v30  ;;  %v2894_v39 = vpop.f32.mrb[112].mxu1  ;;  %v13301_v18 = vld [vmem:[#allocation12 + $0x40] sm:$0xff] }
 0x3e5   : > { %v4400_v49 = vmax.f32 %v4399_v54, %v3943_v51  ;;  %v3951_v60 = vmax.f32 %v2546_v53, 0.0  ;;  %v2895_v28 = vadd.f32 %v2894_v39, %v13234_v26  ;;  %2810 = vmatmul.mubr.bf16.gmra.mrb[220].mxu0 %v13241_v42  ;;  %v2896_v1 = vpop.f32.mrb[113].mxu1  ;;  %v13303_v39 = vld [vmem:[#allocation12 + $0x60] sm:$0xff] }
 0x3e6   : > { %v4437_v17 = vmax.f32 %v4436_v5, %v3944_v14  ;;  %v3952_v10 = vmax.f32 %v2548_v20, 0.0  ;;  %v2897_v3 = vadd.f32 %v2896_v1, %v13238_v40  ;;  %v2898_v12 = vpop.f32.mrb[114].mxu1  ;;  %3205 = vmatprep.mubr.bf16.mxu0 %v15215_v43 }
 0x3e7   : > { %v4401_v33 = vmax.f32 %v4400_v49, %v3951_v60  ;;  %v3945_v25 = vmax.f32 %v2895_v28, 0.0  ;;  %v2899_v36 = vadd.f32 %v2898_v12, %v13234_v26  ;;  %v2900_v13 = vpop.f32.mrb[115].mxu1 }
 0x3e8   : > { %v4438_v61 = vmax.f32 %v4437_v17, %v3952_v10  ;;  %v3946_v54 = vmax.f32 %v2897_v3, 0.0  ;;  %v2901_v51 = vadd.f32 %v2900_v13, %v13238_v40  ;;  %v2551_v53 = vpop.f32.mrb[116].mxu0 }
 0x3e9   : > { %v4474_v5 = vmax.f32 %v4473_v58, %v3945_v25  ;;  %v3953_v14 = vmax.f32 %v2899_v36, 0.0  ;;  %v2552_v20 = vadd.f32 %v2551_v53, %v13216_v19  ;;  %v2553_v1 = vpop.f32.mrb[117].mxu0  ;;  %3163 = vmatmul.mubr.bf16.gmra.mrb[220].mxu1 %v13241_v42  ;;  %v10553_v58 = vcombine.high %v13301_v18, %v13303_v39 }
 0x3ea   : > { %v4511_v49 = vmax.f32 %v4510_v38, %v3946_v54  ;;  %v3954_v60 = vmax.f32 %v2901_v51, 0.0  ;;  %v2554_v28 = vadd.f32 %v2553_v1, %v13223_v30  ;;  %v2555_v17 = vpop.f32.mrb[118].mxu0  ;;  %3558 = vmatprep.mubr.bf16.mxu1 %v15215_v43  ;;  %v13313_v38 = vld [vmem:[#allocation12 + $0x48] sm:$0xff] }
 0x3eb   : > { %v4475_v10 = vmax.f32 %v4474_v5, %v3953_v14  ;;  %v3959_v3 = vmax.f32 %v2552_v20, 0.0  ;;  %v2556_v12 = vadd.f32 %v2555_v17, %v13216_v19  ;;  %v2557_v13 = vpop.f32.mrb[119].mxu0  ;;  %v13315_v54 = vld [vmem:[#allocation12 + $0x68] sm:$0xff]  ;;  %v13319_v20 = vld [vmem:[#allocation12 + $0x80] sm:$0xff] }
 0x3ec   : > { %v4512_v25 = vmax.f32 %v4511_v49, %v3954_v60  ;;  %v3960_v36 = vmax.f32 %v2554_v28, 0.0  ;;  %v2558_v53 = vadd.f32 %v2557_v13, %v13223_v30  ;;  %v2904_v42 = vpop.f32.mrb[116].mxu1  ;;  %v13321_v17 = vld [vmem:[#allocation12 + $0xa0] sm:$0xff] }
 0x3ed   : > { %v4402_v51 = vmax.f32 %v4401_v33, %v3959_v3  ;;  %v3967_v1 = vmax.f32 %v2556_v12, 0.0  ;;  %v2905_v5 = vadd.f32 %v2904_v42, %v13234_v26  ;;  %v2906_v14 = vpop.f32.mrb[117].mxu1  ;;  %3206 = vmatmul.mubr.bf16.vlgmr.msra.gmra.mrb[224].mxu0 %v12840_v11  ;;  %v10552_v42 = vcombine.low %v13301_v18, %v13303_v39  ;;  %v13338_v18 = vld [vmem:[#allocation12 + $0xa8] sm:$0xff] }
 0x3ee   : > { %v4439_v49 = vmax.f32 %v4438_v61, %v3960_v36  ;;  %v3968_v60 = vmax.f32 %v2558_v53, 0.0  ;;  %v2907_v28 = vadd.f32 %v2906_v14, %v13238_v40  ;;  %v2908_v13 = vpop.f32.mrb[118].mxu1  ;;  %5522 = vmatpush1.bf16.msra.mxu0 %v15233_v27  ;;  %3215 = vmatprep.mubr.bf16.mxu0 %v15215_v43  ;;  %v10555_v61 = vcombine.high %v13313_v38, %v13315_v54  ;;  %v13336_v27 = vld [vmem:[#allocation12 + $0x88] sm:$0xff] }
 0x3ef   : > { %v4403_v33 = vmax.f32 %v4402_v51, %v3967_v1  ;;  %v3961_v3 = vmax.f32 %v2905_v5, 0.0  ;;  %v2909_v12 = vadd.f32 %v2908_v13, %v13234_v26  ;;  %v2910_v50 = vpop.f32.mrb[119].mxu1  ;;  %5523 = vmatprep.subr.bf16.mxu0 %v10553_v58  ;;  %v10561_v31 = vcombine.high %v13319_v20, %v13321_v17 }
 0x3f0   : > { %v4440_v36 = vmax.f32 %v4439_v49, %v3968_v60  ;;  %v3962_v53 = vmax.f32 %v2907_v28, 0.0  ;;  %v2911_v14 = vadd.f32 %v2910_v50, %v13238_v40  ;;  %v2561_v41 = vpop.f32.mrb[120].mxu0  ;;  %v10554_v5 = vcombine.low %v13313_v38, %v13315_v54  ;;  %v13344_v49 = vld [vmem:[#allocation12 + $0xc0] sm:$0xff] }
 0x3f1   : > { %v4476_v39 = vmax.f32 %v4475_v10, %v3961_v3  ;;  %v3969_v51 = vmax.f32 %v2909_v12, 0.0  ;;  %v2562_v1 = vadd.f32 %v2561_v41, %v13216_v19  ;;  %v2563_v58 = vpop.f32.mrb[121].mxu0  ;;  %3559 = vmatmul.mubr.bf16.vlgmr.msra.gmra.mrb[224].mxu1 %v12840_v11  ;;  %v13346_v50 = vld [vmem:[#allocation12 + $0xe0] sm:$0xff]  ;;  %v15234_v10 = vcombine.low %v13092_v46, %v13100_v21 }
 0x3f2   : > { %v4513_v60 = vmax.f32 %v4512_v25, %v3962_v53  ;;  %v3970_v28 = vmax.f32 %v2911_v14, 0.0  ;;  %v2564_v13 = vadd.f32 %v2563_v58, %v13223_v30  ;;  %v2565_v3 = vpop.f32.mrb[122].mxu0  ;;  %3568 = vmatprep.mubr.bf16.mxu1 %v15215_v43  ;;  %v10560_v11 = vcombine.low %v13319_v20, %v13321_v17  ;;  %5524 = vmatpush1.bf16.msra.mxu0 %v10552_v42  ;;  %v13361_v20 = vld [vmem:[#allocation12 + $0xc8] sm:$0xff] }
 0x3f3   : > { %5875 = vmatpush1.bf16.msra.mxu1 %v15234_v10  ;;  %v4477_v12 = vmax.f32 %v4476_v39, %v3969_v51  ;;  %v3975_v38 = vmax.f32 %v2562_v1, 0.0  ;;  %v2566_v54 = vadd.f32 %v2565_v3, %v13216_v19  ;;  %v2567_v41 = vpop.f32.mrb[123].mxu0  ;;  %v10563_v25 = vcombine.high %v13336_v27, %v13338_v18  ;;  %5525 = vmatprep.subr.bf16.mxu0 %v10561_v31  ;;  %v13363_v17 = vld [vmem:[#allocation12 + $0xe8] sm:$0xff]  ;;  %v13371_v31 = vld [vmem:[#allocation12 + $0x120] sm:$0xff] }
 0x3f4   : > { %5876 = vmatprep.subr.bf16.mxu1 %v10555_v61  ;;  %v4514_v53 = vmax.f32 %v4513_v60, %v3970_v28  ;;  %v3976_v14 = vmax.f32 %v2564_v13, 0.0  ;;  %v2568_v46 = vadd.f32 %v2567_v41, %v13223_v30  ;;  %v2914_v21 = vpop.f32.mrb[120].mxu1  ;;  %v10569_v58 = vcombine.high %v13344_v49, %v13346_v50  ;;  %v13369_v60 = vld [vmem:[#allocation12 + $0x100] sm:$0xff] }
 0x3f5   : > { %v4404_v39 = vmax.f32 %v4403_v33, %v3975_v38  ;;  %v3983_v51 = vmax.f32 %v2566_v54, 0.0  ;;  %v2915_v42 = vadd.f32 %v2914_v21, %v13234_v26  ;;  %v2916_v61 = vpop.f32.mrb[121].mxu1  ;;  %3216 = vmatmul.mubr.bf16.gmra.mrb[228].mxu0 %v12858_v44  ;;  %v10562_v1 = vcombine.low %v13336_v27, %v13338_v18 }
 0x3f6   : > { %v4441_v28 = vmax.f32 %v4440_v36, %v3976_v14  ;;  %v3984_v13 = vmax.f32 %v2568_v46, 0.0  ;;  %v2917_v10 = vadd.f32 %v2916_v61, %v13238_v40  ;;  %v2918_v3 = vpop.f32.mrb[122].mxu1  ;;  %3225 = vmatprep.mubr.bf16.mxu0 %v15215_v43  ;;  %v10568_v33 = vcombine.low %v13344_v49, %v13346_v50  ;;  %5526 = vmatpush1.bf16.msra.mxu0 %v10560_v11  ;;  %v5128_v49 = vld [vmem:[#allocation12 + $0x108] sm:$0xff] }
 0x3f7   : > { %5877 = vmatpush1.bf16.msra.mxu1 %v10554_v5  ;;  %v4405_v38 = vmax.f32 %v4404_v39, %v3983_v51  ;;  %v3977_v54 = vmax.f32 %v2915_v42, 0.0  ;;  %v2919_v41 = vadd.f32 %v2918_v3, %v13234_v26  ;;  %v2920_v27 = vpop.f32.mrb[123].mxu1  ;;  %v10571_v36 = vcombine.high %v13361_v20, %v13363_v17  ;;  %5527 = vmatprep.subr.bf16.mxu0 %v10569_v58  ;;  %v5132_v50 = vld [vmem:[#allocation12 + $0x128] sm:$0xff] }
 0x3f8   : > { %5878 = vmatprep.subr.bf16.mxu1 %v10563_v25  ;;  %v4442_v18 = vmax.f32 %v4441_v28, %v3984_v13  ;;  %v3978_v14 = vmax.f32 %v2917_v10, 0.0  ;;  %v2921_v46 = vadd.f32 %v2920_v27, %v13238_v40  ;;  %v2571_v21 = vpop.f32.mrb[124].mxu0  ;;  %v10577_v5 = vcombine.high %v13369_v60, %v13371_v31 }
 0x3f9   : > { %v4478_v39 = vmax.f32 %v4477_v12, %v3977_v54  ;;  %v3985_v51 = vmax.f32 %v2919_v41, 0.0  ;;  %v2572_v42 = vadd.f32 %v2571_v21, %v13216_v19  ;;  %v2573_v25 = vpop.f32.mrb[125].mxu0  ;;  %3569 = vmatmul.mubr.bf16.gmra.mrb[228].mxu1 %v12858_v44  ;;  %v10570_v11 = vcombine.low %v13361_v20, %v13363_v17 }
 0x3fa   : > { %v4515_v61 = vmax.f32 %v4514_v53, %v3978_v14  ;;  %v3986_v28 = vmax.f32 %v2921_v46, 0.0  ;;  %v2574_v13 = vadd.f32 %v2573_v25, %v13223_v30  ;;  %v2575_v58 = vpop.f32.mrb[126].mxu0  ;;  %3578 = vmatprep.mubr.bf16.mxu1 %v15215_v43  ;;  %v10576_v12 = vcombine.low %v13369_v60, %v13371_v31  ;;  %5528 = vmatpush1.bf16.msra.mxu0 %v10568_v33 }
 0x3fb   : > { %5879 = vmatpush1.bf16.msra.mxu1 %v10562_v1  ;;  %v4479_v10 = vmax.f32 %v4478_v39, %v3985_v51  ;;  %v3991_v3 = vmax.f32 %v2572_v42, 0.0  ;;  %v2576_v54 = vadd.f32 %v2575_v58, %v13216_v19  ;;  %v2577_v41 = vpop.f32.mrb[127].mxu0  ;;  %v10579_v44 = vcombine.high %v5128_v49, %v5132_v50  ;;  %5529 = vmatprep.subr.bf16.mxu0 %v10577_v5 }
 0x3fc   : > { %5880 = vmatprep.subr.bf16.mxu1 %v10571_v36  ;;  %v4516_v20 = vmax.f32 %v4515_v61, %v3986_v28  ;;  %v3992_v53 = vmax.f32 %v2574_v13, 0.0  ;;  %v2578_v17 = vadd.f32 %v2577_v41, %v13223_v30  ;;  %v2924_v27 = vpop.f32.mrb[124].mxu1  ;;  %v10578_v33 = vcombine.low %v5128_v49, %v5132_v50 }
 0x3fd   : > { %v4406_v14 = vmax.f32 %v4405_v38, %v3991_v3  ;;  %v3999_v46 = vmax.f32 %v2576_v54, 0.0  ;;  %v2925_v1 = vadd.f32 %v2924_v27, %v13234_v26  ;;  %v2926_v21 = vpop.f32.mrb[125].mxu1  ;;  %3226 = vmatmul.mubr.bf16.gmra.mrb[232].mxu0 %v12870_v6 }
 0x3fe   : > { %v4443_v60 = vmax.f32 %v4442_v18, %v3992_v53  ;;  %v4000_v31 = vmax.f32 %v2578_v17, 0.0  ;;  %v2927_v39 = vadd.f32 %v2926_v21, %v13238_v40  ;;  %v2928_v36 = vpop.f32.mrb[126].mxu1  ;;  %3235 = vmatprep.mubr.bf16.mxu0 %v15215_v43  ;;  %5530 = vmatpush1.bf16.msra.mxu0 %v10576_v12 }
 0x3ff   : > { %5881 = vmatpush1.bf16.msra.mxu1 %v10570_v11  ;;  %v4407_v51 = vmax.f32 %v4406_v14, %v3999_v46  ;;  %v3993_v42 = vmax.f32 %v2925_v1, 0.0  ;;  %v2929_v5 = vadd.f32 %v2928_v36, %v13234_v26  ;;  %v2930_v38 = vpop.f32.mrb[127].mxu1 }
 0x400   : > { %5882 = vmatprep.subr.bf16.mxu1 %v10579_v44  ;;  %v4444_v25 = vmax.f32 %v4443_v60, %v4000_v31  ;;  %v3994_v61 = vmax.f32 %v2927_v39, 0.0  ;;  %v2931_v28 = vadd.f32 %v2930_v38, %v13238_v40  ;;  %v2581_v18 = vpop.f32.mrb[128].mxu0 }
 0x401   : > { %v4480_v13 = vmax.f32 %v4479_v10, %v3993_v42  ;;  %v4001_v58 = vmax.f32 %v2929_v5, 0.0  ;;  %v2582_v3 = vadd.f32 %v2581_v18, %v13216_v19  ;;  %v2583_v54 = vpop.f32.mrb[129].mxu0  ;;  %3579 = vmatmul.mubr.bf16.gmra.mrb[232].mxu1 %v12870_v6 }
 0x402   : > { %v4517_v49 = vmax.f32 %v4516_v20, %v3994_v61  ;;  %v4002_v50 = vmax.f32 %v2931_v28, 0.0  ;;  %v2584_v11 = vadd.f32 %v2583_v54, %v13223_v30  ;;  %v2585_v41 = vpop.f32.mrb[130].mxu0  ;;  %3588 = vmatprep.mubr.bf16.mxu1 %v15215_v43 }
 0x403   : > { %5883 = vmatpush1.bf16.msra.mxu1 %v10578_v33  ;;  %v4481_v12 = vmax.f32 %v4480_v13, %v4001_v58  ;;  %v4007_v44 = vmax.f32 %v2582_v3, 0.0  ;;  %v2586_v53 = vadd.f32 %v2585_v41, %v13216_v19  ;;  %v2587_v17 = vpop.f32.mrb[131].mxu0 }
 0x404   : > { %v4518_v10 = vmax.f32 %v4517_v49, %v4002_v50  ;;  %v4008_v27 = vmax.f32 %v2584_v11, 0.0  ;;  %v2588_v14 = vadd.f32 %v2587_v17, %v13223_v30  ;;  %v2934_v46 = vpop.f32.mrb[128].mxu1 }
 0x405   : > { %v4408_v1 = vmax.f32 %v4407_v51, %v4007_v44  ;;  %v4015_v6 = vmax.f32 %v2586_v53, 0.0  ;;  %v2935_v20 = vadd.f32 %v2934_v46, %v13234_v26  ;;  %v2936_v21 = vpop.f32.mrb[129].mxu1  ;;  %3236 = vmatmul.mubr.bf16.gmra.mrb[236].mxu0 %v12882_v34 }
 0x406   : > { %v4445_v60 = vmax.f32 %v4444_v25, %v4008_v27  ;;  %v4016_v31 = vmax.f32 %v2588_v14, 0.0  ;;  %v2937_v39 = vadd.f32 %v2936_v21, %v13238_v40  ;;  %v2938_v36 = vpop.f32.mrb[130].mxu1  ;;  %3245 = vmatprep.mubr.bf16.mxu0 %v15215_v43 }
 0x407   : > { %v4409_v33 = vmax.f32 %v4408_v1, %v4015_v6  ;;  %v4009_v42 = vmax.f32 %v2935_v20, 0.0  ;;  %v2939_v5 = vadd.f32 %v2938_v36, %v13234_v26  ;;  %v2940_v38 = vpop.f32.mrb[131].mxu1 }
 0x408   : > { %v4446_v61 = vmax.f32 %v4445_v60, %v4016_v31  ;;  %v4010_v51 = vmax.f32 %v2937_v39, 0.0  ;;  %v2941_v28 = vadd.f32 %v2940_v38, %v13238_v40  ;;  %v2591_v18 = vpop.f32.mrb[132].mxu0 }
 0x409   : > { %v4482_v13 = vmax.f32 %v4481_v12, %v4009_v42  ;;  %v4017_v58 = vmax.f32 %v2939_v5, 0.0  ;;  %v2592_v25 = vadd.f32 %v2591_v18, %v13216_v19  ;;  %v2593_v3 = vpop.f32.mrb[133].mxu0  ;;  %3589 = vmatmul.mubr.bf16.gmra.mrb[236].mxu1 %v12882_v34 }
 0x40a   : > { %v4519_v54 = vmax.f32 %v4518_v10, %v4010_v51  ;;  %v4018_v49 = vmax.f32 %v2941_v28, 0.0  ;;  %v2594_v50 = vadd.f32 %v2593_v3, %v13223_v30  ;;  %v2595_v11 = vpop.f32.mrb[134].mxu0  ;;  %3598 = vmatprep.mubr.bf16.mxu1 %v15215_v43 }
 0x40b   : > { %v4483_v41 = vmax.f32 %v4482_v13, %v4017_v58  ;;  %v4023_v44 = vmax.f32 %v2592_v25, 0.0  ;;  %v2596_v53 = vadd.f32 %v2595_v11, %v13216_v19  ;;  %v2597_v17 = vpop.f32.mrb[135].mxu0 }
 0x40c   : > { %v4520_v27 = vmax.f32 %v4519_v54, %v4018_v49  ;;  %v4024_v12 = vmax.f32 %v2594_v50, 0.0  ;;  %v2598_v14 = vadd.f32 %v2597_v17, %v13223_v30  ;;  %v2944_v46 = vpop.f32.mrb[132].mxu1 }
 0x40d   : > { %v4410_v1 = vmax.f32 %v4409_v33, %v4023_v44  ;;  %v4031_v6 = vmax.f32 %v2596_v53, 0.0  ;;  %v2945_v34 = vadd.f32 %v2944_v46, %v13234_v26  ;;  %v2946_v10 = vpop.f32.mrb[133].mxu1  ;;  %3246 = vmatmul.mubr.bf16.gmra.mrb[240].mxu0 %v12898_v55 }
 0x40e   : > { %v4447_v20 = vmax.f32 %v4446_v61, %v4024_v12  ;;  %v4032_v21 = vmax.f32 %v2598_v14, 0.0  ;;  %v2947_v60 = vadd.f32 %v2946_v10, %v13238_v40  ;;  %v2948_v31 = vpop.f32.mrb[134].mxu1  ;;  %3255 = vmatprep.mubr.bf16.mxu0 %v15215_v43  ;;  %v5136_v10 = vld [vmem:[#allocation12 + $0x148] sm:$0xff] }
 0x40f   : > { %v4411_v39 = vmax.f32 %v4410_v1, %v4031_v6  ;;  %v4025_v36 = vmax.f32 %v2945_v34, 0.0  ;;  %v2949_v42 = vadd.f32 %v2948_v31, %v13234_v26  ;;  %v2950_v5 = vpop.f32.mrb[135].mxu1  ;;  %v5135_v6 = vld [vmem:[#allocation12 + $0x140] sm:$0xff] }
 0x410   : > { %v4448_v38 = vmax.f32 %v4447_v20, %v4032_v21  ;;  %v4026_v33 = vmax.f32 %v2947_v60, 0.0  ;;  %v2951_v51 = vadd.f32 %v2950_v5, %v13238_v40  ;;  %v2601_v28 = vpop.f32.mrb[136].mxu0  ;;  %v5139_v34 = vld [vmem:[#allocation12 + $0x160] sm:$0xff] }
 0x411   : > { %v4484_v18 = vmax.f32 %v4483_v41, %v4025_v36  ;;  %v4033_v13 = vmax.f32 %v2949_v42, 0.0  ;;  %v2602_v61 = vadd.f32 %v2601_v28, %v13216_v19  ;;  %v2603_v58 = vpop.f32.mrb[137].mxu0  ;;  %3599 = vmatmul.mubr.bf16.gmra.mrb[240].mxu1 %v12898_v55  ;;  %v10584_v36 = vcombine.low %v5135_v6, %v5139_v34  ;;  %v5140_v42 = vld [vmem:[#allocation12 + $0x168] sm:$0xff] }
 0x412   : > { %v4521_v25 = vmax.f32 %v4520_v27, %v4026_v33  ;;  %v4034_v3 = vmax.f32 %v2951_v51, 0.0  ;;  %v2604_v54 = vadd.f32 %v2603_v58, %v13223_v30  ;;  %v2605_v49 = vpop.f32.mrb[138].mxu0  ;;  %3608 = vmatprep.mubr.bf16.mxu1 %v15215_v43  ;;  %v10585_v28 = vcombine.high %v5135_v6, %v5139_v34 }
 0x413   : > { %v4485_v50 = vmax.f32 %v4484_v18, %v4033_v13  ;;  %v4039_v11 = vmax.f32 %v2602_v61, 0.0  ;;  %v2606_v44 = vadd.f32 %v2605_v49, %v13216_v19  ;;  %v2607_v53 = vpop.f32.mrb[139].mxu0 }
 0x414   : > { %v4522_v17 = vmax.f32 %v4521_v25, %v4034_v3  ;;  %v4040_v41 = vmax.f32 %v2604_v54, 0.0  ;;  %v2608_v12 = vadd.f32 %v2607_v53, %v13223_v30  ;;  %v2954_v14 = vpop.f32.mrb[136].mxu1  ;;  %5531 = vmatprep.subr.bf16.mxu0 %v10585_v28 }
 0x415   : > { %v4412_v46 = vmax.f32 %v4411_v39, %v4039_v11  ;;  %v4047_v1 = vmax.f32 %v2606_v44, 0.0  ;;  %v2955_v55 = vadd.f32 %v2954_v14, %v13234_v26  ;;  %v2956_v27 = vpop.f32.mrb[137].mxu1  ;;  %3256 = vmatmul.mubr.bf16.gmra.mrb[244].mxu0 %v12918_v35  ;;  %v10587_v11 = vcombine.high %v5136_v10, %v5140_v42 }
 0x416   : > { %v4449_v20 = vmax.f32 %v4448_v38, %v4040_v41  ;;  %v4048_v21 = vmax.f32 %v2608_v12, 0.0  ;;  %v2957_v60 = vadd.f32 %v2956_v27, %v13238_v40  ;;  %v2958_v31 = vpop.f32.mrb[138].mxu1  ;;  %3265 = vmatprep.mubr.bf16.mxu0 %v15215_v43  ;;  %v10586_v38 = vcombine.low %v5136_v10, %v5140_v42  ;;  %5532 = vmatpush1.bf16.msra.mxu0 %v10584_v36 }
 0x417   : > { %v4413_v5 = vmax.f32 %v4412_v46, %v4047_v1  ;;  %v4041_v39 = vmax.f32 %v2955_v55, 0.0  ;;  %v2959_v33 = vadd.f32 %v2958_v31, %v13234_v26  ;;  %v2960_v51 = vpop.f32.mrb[139].mxu1  ;;  %5884 = vmatprep.subr.bf16.mxu1 %v10587_v11 }
 0x418   : > { %v4450_v18 = vmax.f32 %v4449_v20, %v4048_v21  ;;  %v4042_v13 = vmax.f32 %v2957_v60, 0.0  ;;  %v2961_v61 = vadd.f32 %v2960_v51, %v13238_v40  ;;  %v2611_v58 = vpop.f32.mrb[140].mxu0  ;;  %5885 = vmatpush1.bf16.msra.mxu1 %v10586_v38 }
 0x419   : > { %v4486_v25 = vmax.f32 %v4485_v50, %v4041_v39  ;;  %v4049_v3 = vmax.f32 %v2959_v33, 0.0  ;;  %v2612_v54 = vadd.f32 %v2611_v58, %v13216_v19  ;;  %v2613_v49 = vpop.f32.mrb[141].mxu0  ;;  %3609 = vmatmul.mubr.bf16.gmra.mrb[244].mxu1 %v12918_v35 }
 0x41a   : > { %v4523_v44 = vmax.f32 %v4522_v17, %v4042_v13  ;;  %v4050_v53 = vmax.f32 %v2961_v61, 0.0  ;;  %v2614_v41 = vadd.f32 %v2613_v49, %v13223_v30  ;;  %v2615_v12 = vpop.f32.mrb[142].mxu0  ;;  %3618 = vmatprep.mubr.bf16.mxu1 %v15215_v43 }
 0x41b   : > { %v4487_v14 = vmax.f32 %v4486_v25, %v4049_v3  ;;  %v4055_v46 = vmax.f32 %v2612_v54, 0.0  ;;  %v2616_v50 = vadd.f32 %v2615_v12, %v13216_v19  ;;  %v2617_v1 = vpop.f32.mrb[143].mxu0 }
 0x41c   : > { %v4524_v55 = vmax.f32 %v4523_v44, %v4050_v53  ;;  %v4056_v27 = vmax.f32 %v2614_v41, 0.0  ;;  %v2618_v35 = vadd.f32 %v2617_v1, %v13223_v30  ;;  %v2964_v6 = vpop.f32.mrb[140].mxu1 }
 0x41d   : > { %v4414_v17 = vmax.f32 %v4413_v5, %v4055_v46  ;;  %v4063_v34 = vmax.f32 %v2616_v50, 0.0  ;;  %v2965_v10 = vadd.f32 %v2964_v6, %v13234_v26  ;;  %v2966_v20 = vpop.f32.mrb[141].mxu1  ;;  %3266 = vmatmul.mubr.bf16.gmra.mrb[248].mxu0 %v12938_v23 }
 0x41e   : > { %v4451_v21 = vmax.f32 %v4450_v18, %v4056_v27  ;;  %v4064_v60 = vmax.f32 %v2618_v35, 0.0  ;;  %v2967_v31 = vadd.f32 %v2966_v20, %v13238_v40  ;;  %v2968_v36 = vpop.f32.mrb[142].mxu1  ;;  %3275 = vmatprep.mubr.bf16.mxu0 %v15215_v43 }
 0x41f   : > { %v4415_v42 = vmax.f32 %v4414_v17, %v4063_v34  ;;  %v4057_v39 = vmax.f32 %v2965_v10, 0.0  ;;  %v2969_v33 = vadd.f32 %v2968_v36, %v13234_v26  ;;  %v2970_v51 = vpop.f32.mrb[143].mxu1 }
 0x420   : > { %v4452_v28 = vmax.f32 %v4451_v21, %v4064_v60  ;;  %v4058_v5 = vmax.f32 %v2967_v31, 0.0  ;;  %v2971_v13 = vadd.f32 %v2970_v51, %v13238_v40  ;;  %v2621_v61 = vpop.f32.mrb[144].mxu0 }
 0x421   : > { %v4488_v58 = vmax.f32 %v4487_v14, %v4057_v39  ;;  %v4065_v38 = vmax.f32 %v2969_v33, 0.0  ;;  %v2622_v18 = vadd.f32 %v2621_v61, %v13216_v19  ;;  %v2623_v25 = vpop.f32.mrb[145].mxu0  ;;  %3619 = vmatmul.mubr.bf16.gmra.mrb[248].mxu1 %v12938_v23 }
 0x422   : > { %v4525_v3 = vmax.f32 %v4524_v55, %v4058_v5  ;;  %v4066_v54 = vmax.f32 %v2971_v13, 0.0  ;;  %v2624_v49 = vadd.f32 %v2623_v25, %v13223_v30  ;;  %v2625_v11 = vpop.f32.mrb[146].mxu0  ;;  %3628 = vmatprep.mubr.bf16.mxu1 %v15215_v43 }
 0x423   : > { %v4489_v44 = vmax.f32 %v4488_v58, %v4065_v38  ;;  %v4071_v53 = vmax.f32 %v2622_v18, 0.0  ;;  %v2626_v41 = vadd.f32 %v2625_v11, %v13216_v19  ;;  %v2627_v12 = vpop.f32.mrb[147].mxu0 }
 0x424   : > { %v4526_v46 = vmax.f32 %v4525_v3, %v4066_v54  ;;  %v4072_v14 = vmax.f32 %v2624_v49, 0.0  ;;  %v2628_v50 = vadd.f32 %v2627_v12, %v13223_v30  ;;  %v2974_v1 = vpop.f32.mrb[144].mxu1 }
 0x425   : > { %v4416_v27 = vmax.f32 %v4415_v42, %v4071_v53  ;;  %v4079_v35 = vmax.f32 %v2626_v41, 0.0  ;;  %v2975_v23 = vadd.f32 %v2974_v1, %v13234_v26  ;;  %v2976_v55 = vpop.f32.mrb[145].mxu1  ;;  %3276 = vmatmul.mubr.bf16.gmra.mrb[252].mxu0 %v12958_v63 }
 0x426   : > { %v4453_v6 = vmax.f32 %v4452_v28, %v4072_v14  ;;  %v4080_v17 = vmax.f32 %v2628_v50, 0.0  ;;  %v2977_v34 = vadd.f32 %v2976_v55, %v13238_v40  ;;  %v2978_v10 = vpop.f32.mrb[146].mxu1  ;;  %3285 = vmatprep.mubr.bf16.mxu0 %v15215_v43 }
 0x427   : > { %v4417_v20 = vmax.f32 %v4416_v27, %v4079_v35  ;;  %v4073_v21 = vmax.f32 %v2975_v23, 0.0  ;;  %v2979_v60 = vadd.f32 %v2978_v10, %v13234_v26  ;;  %v2980_v31 = vpop.f32.mrb[147].mxu1 }
 0x428   : > { %v4454_v36 = vmax.f32 %v4453_v6, %v4080_v17  ;;  %v4074_v42 = vmax.f32 %v2977_v34, 0.0  ;;  %v2981_v39 = vadd.f32 %v2980_v31, %v13238_v40  ;;  %v2631_v33 = vpop.f32.mrb[148].mxu0 }
 0x429   : > { %v4490_v51 = vmax.f32 %v4489_v44, %v4073_v21  ;;  %v4081_v5 = vmax.f32 %v2979_v60, 0.0  ;;  %v2632_v28 = vadd.f32 %v2631_v33, %v13216_v19  ;;  %v2633_v13 = vpop.f32.mrb[149].mxu0  ;;  %3629 = vmatmul.mubr.bf16.gmra.mrb[252].mxu1 %v12958_v63 }
 0x42a   : > { %v4527_v61 = vmax.f32 %v4526_v46, %v4074_v42  ;;  %v4082_v58 = vmax.f32 %v2981_v39, 0.0  ;;  %v2634_v38 = vadd.f32 %v2633_v13, %v13223_v30  ;;  %v2635_v18 = vpop.f32.mrb[150].mxu0  ;;  %3638 = vmatprep.mubr.bf16.mxu1 %v15215_v43 }
 0x42b   : > { %v4491_v25 = vmax.f32 %v4490_v51, %v4081_v5  ;;  %v4087_v3 = vmax.f32 %v2632_v28, 0.0  ;;  %v2636_v54 = vadd.f32 %v2635_v18, %v13216_v19  ;;  %v2637_v49 = vpop.f32.mrb[151].mxu0 }
 0x42c   : > { %v4528_v11 = vmax.f32 %v4527_v61, %v4082_v58  ;;  %v4088_v44 = vmax.f32 %v2634_v38, 0.0  ;;  %v2638_v53 = vadd.f32 %v2637_v49, %v13223_v30  ;;  %v2984_v41 = vpop.f32.mrb[148].mxu1 }
 0x42d   : > { %v4418_v12 = vmax.f32 %v4417_v20, %v4087_v3  ;;  %v4095_v14 = vmax.f32 %v2636_v54, 0.0  ;;  %v2985_v63 = vadd.f32 %v2984_v41, %v13234_v26  ;;  %v2986_v46 = vpop.f32.mrb[149].mxu1  ;;  %3286 = vmatmul.mubr.bf16.gmra.mrb[0].mxu0 %v12900_v57  ;;  %v5143_v41 = vld [vmem:[#allocation12 + $0x180] sm:$0xff] }
 0x42e   : > { %v4455_v50 = vmax.f32 %v4454_v36, %v4088_v44  ;;  %v4096_v1 = vmax.f32 %v2638_v53, 0.0  ;;  %v2987_v27 = vadd.f32 %v2986_v46, %v13238_v40  ;;  %v2988_v35 = vpop.f32.mrb[150].mxu1  ;;  %3295 = vmatprep.mubr.bf16.mxu0 %v15215_v43  ;;  %v12220_v44 = vmov 1983009808  }
 0x42f   : > { %v4419_v23 = vmax.f32 %v4418_v12, %v4095_v14  ;;  %v4089_v55 = vmax.f32 %v2985_v63, 0.0  ;;  %v2989_v6 = vadd.f32 %v2988_v35, %v13234_v26  ;;  %v2990_v17 = vpop.f32.mrb[151].mxu1  ;;  %v5004_v53 = vunpack.c.l.s4 %v12220_v44  ;;  %v5147_v12 = vld [vmem:[#allocation12 + $0x1a0] sm:$0xff]  ;;  %v5144_v14 = vld [vmem:[#allocation12 + $0x188] sm:$0xff] }
 0x430   : > { %v4456_v34 = vmax.f32 %v4455_v50, %v4096_v1  ;;  %v4090_v10 = vmax.f32 %v2987_v27, 0.0  ;;  %v2991_v20 = vadd.f32 %v2990_v17, %v13238_v40  ;;  %v2641_v21 = vpop.f32.mrb[152].mxu0  ;;  %v10592_v27 = vcombine.low %v5143_v41, %v5147_v12  ;;  %v5148_v35 = vld [vmem:[#allocation12 + $0x1a8] sm:$0xff] }
 0x431   : > { %v4492_v60 = vmax.f32 %v4491_v25, %v4089_v55  ;;  %v4097_v31 = vmax.f32 %v2989_v6, 0.0  ;;  %v2642_v36 = vadd.f32 %v2641_v21, %v13216_v19  ;;  %v2643_v42 = vpop.f32.mrb[153].mxu0  ;;  %3639 = vmatmul.mubr.bf16.gmra.mrb[0].mxu1 %v12900_v57 }
 0x432   : > { %v4529_v39 = vmax.f32 %v4528_v11, %v4090_v10  ;;  %v4098_v33 = vmax.f32 %v2991_v20, 0.0  ;;  %v2644_v51 = vadd.f32 %v2643_v42, %v13223_v30  ;;  %v2645_v5 = vpop.f32.mrb[154].mxu0  ;;  %3648 = vmatprep.mubr.bf16.mxu1 %v15215_v43  ;;  %v10593_v10 = vcombine.high %v5143_v41, %v5147_v12 }
 0x433   : > { %v4493_v28 = vmax.f32 %v4492_v60, %v4097_v31  ;;  %v4103_v13 = vmax.f32 %v2642_v36, 0.0  ;;  %v2646_v61 = vadd.f32 %v2645_v5, %v13216_v19  ;;  %v2647_v58 = vpop.f32.mrb[155].mxu0 }
 0x434   : > { %v4530_v38 = vmax.f32 %v4529_v39, %v4098_v33  ;;  %v4104_v18 = vmax.f32 %v2644_v51, 0.0  ;;  %v2648_v25 = vadd.f32 %v2647_v58, %v13223_v30  ;;  %v2994_v3 = vpop.f32.mrb[152].mxu1  ;;  %5533 = vmatprep.subr.bf16.mxu0 %v10593_v10  ;;  %v10595_v51 = vcombine.high %v5144_v14, %v5148_v35 }
 0x435   : > { %v4420_v54 = vmax.f32 %v4419_v23, %v4103_v13  ;;  %v4111_v49 = vmax.f32 %v2646_v61, 0.0  ;;  %v2995_v57 = vadd.f32 %v2994_v3, %v13234_v26  ;;  %v2996_v11 = vpop.f32.mrb[153].mxu1  ;;  %3296 = vmatmul.mubr.bf16.gmra.mrb[4].mxu0 %v12920_v37 }
 0x436   : > { %v4457_v63 = vmax.f32 %v4456_v34, %v4104_v18  ;;  %v4112_v46 = vmax.f32 %v2648_v25, 0.0  ;;  %v2997_v50 = vadd.f32 %v2996_v11, %v13238_v40  ;;  %v2998_v1 = vpop.f32.mrb[154].mxu1  ;;  %3305 = vmatprep.mubr.bf16.mxu0 %v15215_v43  ;;  %v10594_v34 = vcombine.low %v5144_v14, %v5148_v35  ;;  %5534 = vmatpush1.bf16.msra.mxu0 %v10592_v27 }
 0x437   : > { %v4421_v23 = vmax.f32 %v4420_v54, %v4111_v49  ;;  %v4105_v55 = vmax.f32 %v2995_v57, 0.0  ;;  %v2999_v6 = vadd.f32 %v2998_v1, %v13234_v26  ;;  %v3000_v17 = vpop.f32.mrb[155].mxu1  ;;  %5886 = vmatprep.subr.bf16.mxu1 %v10595_v51  ;;  %v5005_v57 = vunpack.c.0.s8 %v5004_v53 }
 0x438   : > { %v4458_v20 = vmax.f32 %v4457_v63, %v4112_v46  ;;  %v4106_v21 = vmax.f32 %v2997_v50, 0.0  ;;  %v3001_v60 = vadd.f32 %v3000_v17, %v13238_v40  ;;  %v2651_v31 = vpop.f32.mrb[156].mxu0  ;;  %5887 = vmatpush1.bf16.msra.mxu1 %v10594_v34 }
 0x439   : > { %v4494_v36 = vmax.f32 %v4493_v28, %v4105_v55  ;;  %v4113_v42 = vmax.f32 %v2999_v6, 0.0  ;;  %v2652_v39 = vadd.f32 %v2651_v31, %v13216_v19  ;;  %v2653_v33 = vpop.f32.mrb[157].mxu0  ;;  %3649 = vmatmul.mubr.bf16.gmra.mrb[4].mxu1 %v12920_v37 }
 0x43a   : > { %v4531_v5 = vmax.f32 %v4530_v38, %v4106_v21  ;;  %v4114_v13 = vmax.f32 %v3001_v60, 0.0  ;;  %v2654_v61 = vadd.f32 %v2653_v33, %v13223_v30  ;;  %v2655_v58 = vpop.f32.mrb[158].mxu0  ;;  %3658 = vmatprep.mubr.bf16.mxu1 %v15215_v43 }
 0x43b   : > { %v4495_v18 = vmax.f32 %v4494_v36, %v4113_v42  ;;  %v4119_v25 = vmax.f32 %v2652_v39, 0.0  ;;  %v2656_v28 = vadd.f32 %v2655_v58, %v13216_v19  ;;  %v2657_v3 = vpop.f32.mrb[159].mxu0 }
 0x43c   : > { %v4532_v54 = vmax.f32 %v4531_v5, %v4114_v13  ;;  %v4120_v49 = vmax.f32 %v2654_v61, 0.0  ;;  %v2658_v37 = vadd.f32 %v2657_v3, %v13223_v30  ;;  %v3004_v11 = vpop.f32.mrb[156].mxu1 }
 0x43d   : > { %v4422_v38 = vmax.f32 %v4421_v23, %v4119_v25  ;;  %v4127_v44 = vmax.f32 %v2656_v28, 0.0  ;;  %v3005_v41 = vadd.f32 %v3004_v11, %v13234_v26  ;;  %v3006_v12 = vpop.f32.mrb[157].mxu1  ;;  %3306 = vmatmul.mubr.bf16.gmra.mrb[8].mxu0 %v12940_v24  ;;  %v13495_v23 = vsub.s32 %v5005_v57, %v12816_v9 }
 0x43e   : > { %v4459_v14 = vmax.f32 %v4458_v20, %v4120_v49  ;;  %v4128_v63 = vmax.f32 %v2658_v37, 0.0  ;;  %v3007_v46 = vadd.f32 %v3006_v12, %v13238_v40  ;;  %v3008_v50 = vpop.f32.mrb[158].mxu1  ;;  %3315 = vmatprep.mubr.bf16.mxu0 %v15215_v43 }
 0x43f   : > { %v4423_v1 = vmax.f32 %v4422_v38, %v4127_v44  ;;  %v4121_v27 = vmax.f32 %v3005_v41, 0.0  ;;  %v3009_v53 = vadd.f32 %v3008_v50, %v13234_v26  ;;  %v3010_v35 = vpop.f32.mrb[159].mxu1 }
 0x440   : > { %v4460_v55 = vmax.f32 %v4459_v14, %v4128_v63  ;;  %v4122_v6 = vmax.f32 %v3007_v46, 0.0  ;;  %v3011_v17 = vadd.f32 %v3010_v35, %v13238_v40  ;;  %v2661_v10 = vpop.f32.mrb[160].mxu0 }
 0x441   : > { %v4424_v20 = vrot.slane %v4423_v1, 4  ;;  %v4496_v21 = vmax.f32 %v4495_v18, %v4121_v27  ;;  %v4129_v60 = vmax.f32 %v3009_v53, 0.0  ;;  %v2662_v31 = vadd.f32 %v2661_v10, %v13216_v19  ;;  %v2663_v34 = vpop.f32.mrb[161].mxu0  ;;  %3659 = vmatmul.mubr.bf16.gmra.mrb[8].mxu1 %v12940_v24 }
 0x442   : > { %v4461_v36 = vrot.slane %v4460_v55, 4  ;;  %v4533_v42 = vmax.f32 %v4532_v54, %v4122_v6  ;;  %v4130_v39 = vmax.f32 %v3011_v17, 0.0  ;;  %v2664_v33 = vadd.f32 %v2663_v34, %v13223_v30  ;;  %v2665_v51 = vpop.f32.mrb[162].mxu0  ;;  %3668 = vmatprep.mubr.bf16.mxu1 %v15215_v43 }
 0x443   : > { %v4425_v5 = vmax.f32 %v4423_v1, %v4424_v20  ;;  %v4497_v13 = vmax.f32 %v4496_v21, %v4129_v60  ;;  %v4135_v61 = vmax.f32 %v2662_v31, 0.0  ;;  %v2666_v58 = vadd.f32 %v2665_v51, %v13216_v19  ;;  %v2667_v18 = vpop.f32.mrb[163].mxu0 }
 0x444   : > { %v4462_v25 = vmax.f32 %v4460_v55, %v4461_v36  ;;  %v4534_v28 = vmax.f32 %v4533_v42, %v4130_v39  ;;  %v4136_v3 = vmax.f32 %v2664_v33, 0.0  ;;  %v2668_v49 = vadd.f32 %v2667_v18, %v13223_v30  ;;  %v3014_v24 = vpop.f32.mrb[160].mxu1 }
 0x445   : > { %v4426_v37 = vrot.slane %v4425_v5, 2  ;;  %v4498_v54 = vrot.slane %v4497_v13, 4  ;;  %v4143_v57 = vmax.f32 %v2666_v58, 0.0  ;;  %v3015_v11 = vadd.f32 %v3014_v24, %v13234_v26  ;;  %v3016_v38 = vpop.f32.mrb[161].mxu1  ;;  %3316 = vmatmul.mubr.bf16.gmra.mrb[12].mxu0 %v12960_v0 }
 0x446   : > { %v4463_v44 = vrot.slane %v4462_v25, 2  ;;  %v4535_v41 = vrot.slane %v4534_v28, 4  ;;  %v4144_v12 = vmax.f32 %v2668_v49, 0.0  ;;  %v3017_v14 = vadd.f32 %v3016_v38, %v13238_v40  ;;  %v3018_v63 = vpop.f32.mrb[162].mxu1  ;;  %3325 = vmatprep.mubr.bf16.mxu0 %v15215_v43 }
 0x447   : > { %v4427_v46 = vmax.f32 %v4425_v5, %v4426_v37  ;;  %v4499_v50 = vmax.f32 %v4497_v13, %v4498_v54  ;;  %v4689_v1 = vmax.f32 %v4135_v61, %v4143_v57  ;;  %v4137_v27 = vmax.f32 %v3015_v11, 0.0  ;;  %v3020_v53 = vpop.f32.mrb[163].mxu1 }
 0x448   : > { %v4464_v35 = vmax.f32 %v4462_v25, %v4463_v44  ;;  %v4536_v55 = vmax.f32 %v4534_v28, %v4535_v41  ;;  %v4726_v6 = vmax.f32 %v4136_v3, %v4144_v12  ;;  %v4138_v17 = vmax.f32 %v3017_v14, 0.0  ;;  %v2671_v10 = vpop.f32.mrb[164].mxu0 }
 0x449   : > { %v4428_v20 = vrot.slane %v4427_v46, 1  ;;  %v4500_v21 = vrot.slane %v4499_v50, 2  ;;  %v3019_v60 = vadd.f32 %v3018_v63, %v13234_v26  ;;  %v3021_v31 = vadd.f32 %v3020_v53, %v13238_v40  ;;  %v2673_v34 = vpop.f32.mrb[165].mxu0  ;;  %3669 = vmatmul.mubr.bf16.gmra.mrb[12].mxu1 %v12960_v0 }
 0x44a   : > { %v4465_v36 = vrot.slane %v4464_v35, 1  ;;  %v4537_v42 = vrot.slane %v4536_v55, 2  ;;  %v2672_v39 = vadd.f32 %v2671_v10, %v13216_v19  ;;  %v2674_v33 = vadd.f32 %v2673_v34, %v13223_v30  ;;  %v2675_v51 = vpop.f32.mrb[166].mxu0  ;;  %3678 = vmatprep.mubr.bf16.mxu1 %v15215_v43 }
 0x44b   : > { %v4429_v5 = vmax.f32 %v4427_v46, %v4428_v20  ;;  %v4501_v13 = vmax.f32 %v4499_v50, %v4500_v21  ;;  %v4145_v61 = vmax.f32 %v3019_v60, 0.0  ;;  %v4146_v58 = vmax.f32 %v3021_v31, 0.0  ;;  %v2677_v18 = vpop.f32.mrb[167].mxu0 }
 0x44c   : > { %v4466_v25 = vmax.f32 %v4464_v35, %v4465_v36  ;;  %v4538_v28 = vmax.f32 %v4536_v55, %v4537_v42  ;;  %v4151_v3 = vmax.f32 %v2672_v39, 0.0  ;;  %v4152_v49 = vmax.f32 %v2674_v33, 0.0  ;;  %v3024_v24 = vpop.f32.mrb[164].mxu1 }
 0x44d   : > { %v4502_v0 = vrot.slane %v4501_v13, 1  ;;  %v4763_v37 = vmax.f32 %v4137_v27, %v4145_v61  ;;  %v4800_v54 = vmax.f32 %v4138_v17, %v4146_v58  ;;  %v2676_v57 = vadd.f32 %v2675_v51, %v13216_v19  ;;  %v3026_v11 = vpop.f32.mrb[165].mxu1  ;;  %3326 = vmatmul.mubr.bf16.gmra.mrb[16].mxu0 %v12974_v32 }
 0x44e   : > { %v5001_v38 = vcombine.low %v4429_v5, %v4466_v25  ;;  %v4539_v44 = vrot.slane %v4538_v28, 1  ;;  %v4690_v41 = vmax.f32 %v4689_v1, %v4151_v3  ;;  %v4727_v12 = vmax.f32 %v4726_v6, %v4152_v49  ;;  %v3028_v14 = vpop.f32.mrb[166].mxu1  ;;  %3335 = vmatprep.mubr.bf16.mxu0 %v15215_v43 }
 0x44f   : > { %v4503_v63 = vmax.f32 %v4501_v13, %v4502_v0  ;;  %v4159_v46 = vmax.f32 %v2676_v57, 0.0  ;;  %v2678_v50 = vadd.f32 %v2677_v18, %v13223_v30  ;;  %v3025_v53 = vadd.f32 %v3024_v24, %v13234_v26  ;;  %v3030_v27 = vpop.f32.mrb[167].mxu1 }
 0x450   : > { %v13520_v35 = vrot.slane %v5001_v38, %v13495_v23  ;;  %v4540_v55 = vmax.f32 %v4538_v28, %v4539_v44  ;;  %v3027_v17 = vadd.f32 %v3026_v11, %v13238_v40  ;;  %v3029_v10 = vadd.f32 %v3028_v14, %v13234_v26  ;;  %v2681_v1 = vpop.f32.mrb[168].mxu0 }
 0x451   : > { %v4691_v6 = vmax.f32 %v4690_v41, %v4159_v46  ;;  %v4160_v20 = vmax.f32 %v2678_v50, 0.0  ;;  %v4153_v21 = vmax.f32 %v3025_v53, 0.0  ;;  %v3031_v60 = vadd.f32 %v3030_v27, %v13238_v40  ;;  %v2683_v31 = vpop.f32.mrb[169].mxu0  ;;  %3679 = vmatmul.mubr.bf16.gmra.mrb[16].mxu1 %v12974_v32 }
 0x452   : > { %v5002_v34 = vcombine.low %v4503_v63, %v4540_v55  ;;  %v4154_v36 = vmax.f32 %v3027_v17, 0.0  ;;  %v4161_v42 = vmax.f32 %v3029_v10, 0.0  ;;  %v2682_v39 = vadd.f32 %v2681_v1, %v13216_v19  ;;  %v2685_v33 = vpop.f32.mrb[170].mxu0  ;;  %3688 = vmatprep.mubr.bf16.mxu1 %v15215_v43 }
 0x453   : > { %v4728_v51 = vmax.f32 %v4727_v12, %v4160_v20  ;;  %v4764_v5 = vmax.f32 %v4763_v37, %v4153_v21  ;;  %v4162_v13 = vmax.f32 %v3031_v60, 0.0  ;;  %v2684_v61 = vadd.f32 %v2683_v31, %v13223_v30  ;;  %v2687_v58 = vpop.f32.mrb[171].mxu0 }
 0x454   : > { %v13530_v18 = vrot.slane %v5002_v34, %v13495_v23  ;;  %v4801_v25 = vmax.f32 %v4800_v54, %v4154_v36  ;;  %v4167_v28 = vmax.f32 %v2682_v39, 0.0  ;;  %v2686_v32 = vadd.f32 %v2685_v33, %v13216_v19  ;;  %v3034_v3 = vpop.f32.mrb[168].mxu1 }
 0x455   : > { %v4765_v49 = vmax.f32 %v4764_v5, %v4161_v42  ;;  %v4168_v24 = vmax.f32 %v2684_v61, 0.0  ;;  %v2688_v0 = vadd.f32 %v2687_v58, %v13223_v30  ;;  %v3035_v57 = vadd.f32 %v3034_v3, %v13234_v26  ;;  %v3036_v11 = vpop.f32.mrb[169].mxu1  ;;  %3336 = vmatmul.mubr.bf16.gmra.mrb[20].mxu0 %v12986_v16 }
 0x456   : > { %v5017_v37 = vcombine.low %v13520_v35, %v13530_v18  ;;  %v4802_v38 = vmax.f32 %v4801_v25, %v4162_v13  ;;  %v4692_v44 = vmax.f32 %v4691_v6, %v4167_v28  ;;  %v4175_v41 = vmax.f32 %v2686_v32, 0.0  ;;  %v3038_v54 = vpop.f32.mrb[170].mxu1  ;;  %3345 = vmatprep.mubr.bf16.mxu0 %v15215_v43 }
 0x457   : > { %v4729_v12 = vmax.f32 %v4728_v51, %v4168_v24  ;;  %v4176_v14 = vmax.f32 %v2688_v0, 0.0  ;;  %v4169_v63 = vmax.f32 %v3035_v57, 0.0  ;;  %v3037_v46 = vadd.f32 %v3036_v11, %v13238_v40  ;;  %v3040_v50 = vpop.f32.mrb[171].mxu1 }
 0x458   : > { %v4693_v53 = vmax.f32 %v4692_v44, %v4175_v41  ;;  %v3039_v27 = vadd.f32 %v3038_v54, %v13234_v26  ;;  %v3041_v55 = vadd.f32 %v3040_v50, %v13238_v40  ;;  %v2691_v17 = vpop.f32.mrb[172].mxu0 }
 0x459   : > { %v4730_v10 = vmax.f32 %v4729_v12, %v4176_v14  ;;  %v4766_v1 = vmax.f32 %v4765_v49, %v4169_v63  ;;  %v4170_v20 = vmax.f32 %v3037_v46, 0.0  ;;  %v2692_v6 = vadd.f32 %v2691_v17, %v13216_v19  ;;  %v2693_v21 = vpop.f32.mrb[173].mxu0  ;;  %3689 = vmatmul.mubr.bf16.gmra.mrb[20].mxu1 %v12986_v16 }
 0x45a   : > { %v4177_v60 = vmax.f32 %v3039_v27, 0.0  ;;  %v4178_v31 = vmax.f32 %v3041_v55, 0.0  ;;  %v2694_v34 = vadd.f32 %v2693_v21, %v13223_v30  ;;  %v2695_v36 = vpop.f32.mrb[174].mxu0  ;;  %3698 = vmatprep.mubr.bf16.mxu1 %v15215_v43 }
 0x45b   : > { %v4803_v42 = vmax.f32 %v4802_v38, %v4170_v20  ;;  %v4183_v39 = vmax.f32 %v2692_v6, 0.0  ;;  %v2696_v33 = vadd.f32 %v2695_v36, %v13216_v19  ;;  %v2697_v51 = vpop.f32.mrb[175].mxu0  ;;  %v5151_v20 = vld [vmem:[#allocation12 + $0x1c0] sm:$0xff] }
 0x45c   : > { %v4767_v5 = vmax.f32 %v4766_v1, %v4177_v60  ;;  %v4184_v13 = vmax.f32 %v2694_v34, 0.0  ;;  %v2698_v61 = vadd.f32 %v2697_v51, %v13223_v30  ;;  %v3044_v58 = vpop.f32.mrb[172].mxu1  ;;  %v5155_v6 = vld [vmem:[#allocation12 + $0x1e0] sm:$0xff]  ;;  %v5156_v51 = vld [vmem:[#allocation12 + $0x1e8] sm:$0xff] }
 0x45d   : > { %v4804_v25 = vmax.f32 %v4803_v42, %v4178_v31  ;;  %v4694_v28 = vmax.f32 %v4693_v53, %v4183_v39  ;;  %v4191_v16 = vmax.f32 %v2696_v33, 0.0  ;;  %v3045_v32 = vadd.f32 %v3044_v58, %v13234_v26  ;;  %v3046_v3 = vpop.f32.mrb[173].mxu1  ;;  %3346 = vmatmul.mubr.bf16.gmra.mrb[24].mxu0 %v12998_v15 }
 0x45e   : > { %v4731_v49 = vmax.f32 %v4730_v10, %v4184_v13  ;;  %v4192_v24 = vmax.f32 %v2698_v61, 0.0  ;;  %v3047_v0 = vadd.f32 %v3046_v3, %v13238_v40  ;;  %v3048_v57 = vpop.f32.mrb[174].mxu1  ;;  %3355 = vmatprep.mubr.bf16.mxu0 %v15215_v43 }
 0x45f   : > { %v4695_v11 = vmax.f32 %v4694_v28, %v4191_v16  ;;  %v4185_v38 = vmax.f32 %v3045_v32, 0.0  ;;  %v3049_v44 = vadd.f32 %v3048_v57, %v13234_v26  ;;  %v3050_v41 = vpop.f32.mrb[175].mxu1 }
 0x460   : > { %v4732_v54 = vmax.f32 %v4731_v49, %v4192_v24  ;;  %v4186_v12 = vmax.f32 %v3047_v0, 0.0  ;;  %v3051_v14 = vadd.f32 %v3050_v41, %v13238_v40  ;;  %v2701_v63 = vpop.f32.mrb[176].mxu0  ;;  %v10601_v49 = vcombine.high %v5151_v20, %v5155_v6 }
 0x461   : > { %v4768_v46 = vmax.f32 %v4767_v5, %v4185_v38  ;;  %v4193_v50 = vmax.f32 %v3049_v44, 0.0  ;;  %v2702_v53 = vadd.f32 %v2701_v63, %v13216_v19  ;;  %v2703_v27 = vpop.f32.mrb[177].mxu0  ;;  %3699 = vmatmul.mubr.bf16.gmra.mrb[24].mxu1 %v12998_v15  ;;  %v5152_v15 = vld [vmem:[#allocation12 + $0x1c8] sm:$0xff] }
 0x462   : > { %v4805_v55 = vmax.f32 %v4804_v25, %v4186_v12  ;;  %v4194_v17 = vmax.f32 %v3051_v14, 0.0  ;;  %v2704_v10 = vadd.f32 %v2703_v27, %v13223_v30  ;;  %v2705_v1 = vpop.f32.mrb[178].mxu0  ;;  %3708 = vmatprep.mubr.bf16.mxu1 %v15215_v43  ;;  %v10600_v25 = vcombine.low %v5151_v20, %v5155_v6  ;;  %5535 = vmatprep.subr.bf16.mxu0 %v10601_v49 }
 0x463   : > { %v4769_v21 = vmax.f32 %v4768_v46, %v4193_v50  ;;  %v4199_v60 = vmax.f32 %v2702_v53, 0.0  ;;  %v2706_v31 = vadd.f32 %v2705_v1, %v13216_v19  ;;  %v2707_v34 = vpop.f32.mrb[179].mxu0  ;;  %v10602_v38 = vcombine.low %v5152_v15, %v5156_v51 }
 0x464   : > { %v4806_v36 = vmax.f32 %v4805_v55, %v4194_v17  ;;  %v4200_v42 = vmax.f32 %v2704_v10, 0.0  ;;  %v2708_v39 = vadd.f32 %v2707_v34, %v13223_v30  ;;  %v3054_v33 = vpop.f32.mrb[176].mxu1  ;;  %5536 = vmatpush1.bf16.msra.mxu0 %v10600_v25 }
 0x465   : > { %v4696_v5 = vmax.f32 %v4695_v11, %v4199_v60  ;;  %v4207_v13 = vmax.f32 %v2706_v31, 0.0  ;;  %v3055_v61 = vadd.f32 %v3054_v33, %v13234_v26  ;;  %v3056_v58 = vpop.f32.mrb[177].mxu1  ;;  %3356 = vmatmul.mubr.bf16.gmra.mrb[28].mxu0 %v13010_v62 }
 0x466   : > { %v4733_v28 = vmax.f32 %v4732_v54, %v4200_v42  ;;  %v4208_v16 = vmax.f32 %v2708_v39, 0.0  ;;  %v3057_v32 = vadd.f32 %v3056_v58, %v13238_v40  ;;  %v3058_v3 = vpop.f32.mrb[178].mxu1  ;;  %3365 = vmatprep.mubr.bf16.mxu0 %v15215_v43  ;;  %v10603_v54 = vcombine.high %v5152_v15, %v5156_v51 }
 0x467   : > { %v4697_v24 = vmax.f32 %v4696_v5, %v4207_v13  ;;  %v4201_v0 = vmax.f32 %v3055_v61, 0.0  ;;  %v3059_v57 = vadd.f32 %v3058_v3, %v13234_v26  ;;  %v3060_v11 = vpop.f32.mrb[179].mxu1 }
 0x468   : > { %v4734_v44 = vmax.f32 %v4733_v28, %v4208_v16  ;;  %v4202_v41 = vmax.f32 %v3057_v32, 0.0  ;;  %v3061_v12 = vadd.f32 %v3060_v11, %v13238_v40  ;;  %v2711_v14 = vpop.f32.mrb[180].mxu0  ;;  %5888 = vmatprep.subr.bf16.mxu1 %v10603_v54 }
 0x469   : > { %v4770_v63 = vmax.f32 %v4769_v21, %v4201_v0  ;;  %v4209_v46 = vmax.f32 %v3059_v57, 0.0  ;;  %v2712_v50 = vadd.f32 %v2711_v14, %v13216_v19  ;;  %v2713_v53 = vpop.f32.mrb[181].mxu0  ;;  %3709 = vmatmul.mubr.bf16.gmra.mrb[28].mxu1 %v13010_v62 }
 0x46a   : > { %v4807_v27 = vmax.f32 %v4806_v36, %v4202_v41  ;;  %v4210_v55 = vmax.f32 %v3061_v12, 0.0  ;;  %v2714_v17 = vadd.f32 %v2713_v53, %v13223_v30  ;;  %v2715_v10 = vpop.f32.mrb[182].mxu0  ;;  %3718 = vmatprep.mubr.bf16.mxu1 %v15215_v43  ;;  %5889 = vmatpush1.bf16.msra.mxu1 %v10602_v38 }
 0x46b   : > { %v4771_v1 = vmax.f32 %v4770_v63, %v4209_v46  ;;  %v4215_v20 = vmax.f32 %v2712_v50, 0.0  ;;  %v2716_v6 = vadd.f32 %v2715_v10, %v13216_v19  ;;  %v2717_v21 = vpop.f32.mrb[183].mxu0 }
 0x46c   : > { %v4808_v60 = vmax.f32 %v4807_v27, %v4210_v55  ;;  %v4216_v31 = vmax.f32 %v2714_v17, 0.0  ;;  %v2718_v34 = vadd.f32 %v2717_v21, %v13223_v30  ;;  %v3064_v62 = vpop.f32.mrb[180].mxu1  ;;  %v13590_v21 = vld [vmem:[#allocation12 + $0x18] sm:$0xff] }
 0x46d   : > { %v4698_v42 = vmax.f32 %v4697_v24, %v4215_v20  ;;  %v4223_v36 = vmax.f32 %v2716_v6, 0.0  ;;  %v3065_v39 = vadd.f32 %v3064_v62, %v13234_v26  ;;  %v3066_v33 = vpop.f32.mrb[181].mxu1  ;;  %3366 = vmatmul.mubr.bf16.gmra.mrb[32].mxu0 %v13022_v59  ;;  %v13586_v20 = vld [vmem:[#allocation12 + $0x10] sm:$0xff] }
 0x46e   : > { %v4735_v15 = vmax.f32 %v4734_v44, %v4216_v31  ;;  %v4224_v51 = vmax.f32 %v2718_v34, 0.0  ;;  %v3067_v5 = vadd.f32 %v3066_v33, %v13238_v40  ;;  %v3068_v13 = vpop.f32.mrb[182].mxu1  ;;  %3375 = vmatprep.mubr.bf16.mxu0 %v15215_v43  ;;  %v13588_v6 = vld [vmem:[#allocation12 + $0x30] sm:$0xff] }
 0x46f   : > { %v4699_v61 = vmax.f32 %v4698_v42, %v4223_v36  ;;  %v4217_v58 = vmax.f32 %v3065_v39, 0.0  ;;  %v3069_v25 = vadd.f32 %v3068_v13, %v13234_v26  ;;  %v3070_v28 = vpop.f32.mrb[183].mxu1  ;;  %v10548_v42 = vcombine.low %v13586_v20, %v13588_v6  ;;  %v13596_v36 = vld [vmem:[#allocation12 + $0x38] sm:$0xff] }
 0x470   : > { %v4736_v16 = vmax.f32 %v4735_v15, %v4224_v51  ;;  %v4218_v32 = vmax.f32 %v3067_v5, 0.0  ;;  %v3071_v3 = vadd.f32 %v3070_v28, %v13238_v40  ;;  %v2721_v49 = vpop.f32.mrb[184].mxu0  ;;  %v10549_v5 = vcombine.high %v13586_v20, %v13588_v6 }
 0x471   : > { %v4772_v24 = vmax.f32 %v4771_v1, %v4217_v58  ;;  %v4225_v0 = vmax.f32 %v3069_v25, 0.0  ;;  %v2722_v57 = vadd.f32 %v2721_v49, %v13216_v19  ;;  %v2723_v11 = vpop.f32.mrb[185].mxu0  ;;  %3719 = vmatmul.mubr.bf16.gmra.mrb[32].mxu1 %v13022_v59  ;;  %v10550_v28 = vcombine.low %v13590_v21, %v13596_v36 }
 0x472   : > { %v4809_v38 = vmax.f32 %v4808_v60, %v4218_v32  ;;  %v4226_v44 = vmax.f32 %v3071_v3, 0.0  ;;  %v2724_v41 = vadd.f32 %v2723_v11, %v13223_v30  ;;  %v2725_v12 = vpop.f32.mrb[186].mxu0  ;;  %3728 = vmatprep.mubr.bf16.mxu1 %v15215_v43  ;;  %6227 = vmatprep.subr.bf16.mxu0 %v10549_v5 }
 0x473   : > { %v4773_v14 = vmax.f32 %v4772_v24, %v4225_v0  ;;  %v4231_v54 = vmax.f32 %v2722_v57, 0.0  ;;  %v2726_v63 = vadd.f32 %v2725_v12, %v13216_v19  ;;  %v2727_v46 = vpop.f32.mrb[187].mxu0  ;;  %v10551_v24 = vcombine.high %v13590_v21, %v13596_v36 }
 0x474   : > { %v4810_v50 = vmax.f32 %v4809_v38, %v4226_v44  ;;  %v4232_v53 = vmax.f32 %v2724_v41, 0.0  ;;  %v2728_v27 = vadd.f32 %v2727_v46, %v13223_v30  ;;  %v3074_v55 = vpop.f32.mrb[184].mxu1 }
 0x475   : > { %v4700_v17 = vmax.f32 %v4699_v61, %v4231_v54  ;;  %v4239_v10 = vmax.f32 %v2726_v63, 0.0  ;;  %v3075_v59 = vadd.f32 %v3074_v55, %v13234_v26  ;;  %v3076_v1 = vpop.f32.mrb[185].mxu1  ;;  %3376 = vmatmul.mubr.bf16.gmra.mrb[36].mxu0 %v13034_v2  ;;  %6580 = vmatprep.subr.bf16.mxu1 %v10551_v24 }
 0x476   : > { %v4737_v60 = vmax.f32 %v4736_v16, %v4232_v53  ;;  %v4240_v31 = vmax.f32 %v2728_v27, 0.0  ;;  %v3077_v34 = vadd.f32 %v3076_v1, %v13238_v40  ;;  %v3078_v62 = vpop.f32.mrb[186].mxu1  ;;  %3385 = vmatprep.mubr.bf16.mxu0 %v15215_v43 }
 0x477   : > { %v4701_v39 = vmax.f32 %v4700_v17, %v4239_v10  ;;  %v4233_v33 = vmax.f32 %v3075_v59, 0.0  ;;  %v3079_v15 = vadd.f32 %v3078_v62, %v13234_v26  ;;  %v3080_v51 = vpop.f32.mrb[187].mxu1 }
 0x478   : > { %v4738_v13 = vmax.f32 %v4737_v60, %v4240_v31  ;;  %v4234_v61 = vmax.f32 %v3077_v34, 0.0  ;;  %v3081_v58 = vadd.f32 %v3080_v51, %v13238_v40  ;;  %v2731_v25 = vpop.f32.mrb[188].mxu0 }
 0x479   : > { %v4774_v16 = vmax.f32 %v4773_v14, %v4233_v33  ;;  %v4241_v32 = vmax.f32 %v3079_v15, 0.0  ;;  %v2732_v3 = vadd.f32 %v2731_v25, %v13216_v19  ;;  %v2733_v49 = vpop.f32.mrb[189].mxu0  ;;  %3729 = vmatmul.mubr.bf16.gmra.mrb[36].mxu1 %v13034_v2 }
 0x47a   : > { %v4811_v0 = vmax.f32 %v4810_v50, %v4234_v61  ;;  %v4242_v57 = vmax.f32 %v3081_v58, 0.0  ;;  %v2734_v11 = vadd.f32 %v2733_v49, %v13223_v30  ;;  %v2735_v38 = vpop.f32.mrb[190].mxu0  ;;  %3738 = vmatprep.mubr.bf16.mxu1 %v15215_v43 }
 0x47b   : > { %v4775_v44 = vmax.f32 %v4774_v16, %v4241_v32  ;;  %v4247_v41 = vmax.f32 %v2732_v3, 0.0  ;;  %v2736_v12 = vadd.f32 %v2735_v38, %v13216_v19  ;;  %v2737_v14 = vpop.f32.mrb[191].mxu0 }
 0x47c   : > { %v4812_v54 = vmax.f32 %v4811_v0, %v4242_v57  ;;  %v4248_v63 = vmax.f32 %v2734_v11, 0.0  ;;  %v2738_v2 = vadd.f32 %v2737_v14, %v13223_v30  ;;  %v3084_v46 = vpop.f32.mrb[188].mxu1 }
 0x47d   : > { %v4702_v53 = vmax.f32 %v4701_v39, %v4247_v41  ;;  %v4255_v27 = vmax.f32 %v2736_v12, 0.0  ;;  %v3085_v50 = vadd.f32 %v3084_v46, %v13234_v26  ;;  %v3086_v55 = vpop.f32.mrb[189].mxu1  ;;  %3386 = vmatmul.mubr.bf16.gmra.mrb[40].mxu0 %v13046_v52 }
 0x47e   : > { %v4739_v17 = vmax.f32 %v4738_v13, %v4248_v63  ;;  %v4256_v10 = vmax.f32 %v2738_v2, 0.0  ;;  %v3087_v59 = vadd.f32 %v3086_v55, %v13238_v40  ;;  %v3088_v1 = vpop.f32.mrb[190].mxu1  ;;  %3395 = vmatprep.mubr.bf16.mxu0 %v15215_v43 }
 0x47f   : > { %v4703_v60 = vmax.f32 %v4702_v53, %v4255_v27  ;;  %v4249_v31 = vmax.f32 %v3085_v50, 0.0  ;;  %v3089_v34 = vadd.f32 %v3088_v1, %v13234_v26  ;;  %v3090_v62 = vpop.f32.mrb[191].mxu1 }
 0x480   : > { %v4740_v33 = vmax.f32 %v4739_v17, %v4256_v10  ;;  %v4250_v39 = vmax.f32 %v3087_v59, 0.0  ;;  %v3091_v15 = vadd.f32 %v3090_v62, %v13238_v40  ;;  %v2741_v51 = vpop.f32.mrb[192].mxu0 }
 0x481   : > { %v4776_v5 = vmax.f32 %v4775_v44, %v4249_v31  ;;  %v4257_v61 = vmax.f32 %v3089_v34, 0.0  ;;  %v2742_v13 = vadd.f32 %v2741_v51, %v13216_v19  ;;  %v2743_v58 = vpop.f32.mrb[193].mxu0  ;;  %3739 = vmatmul.mubr.bf16.gmra.mrb[40].mxu1 %v13046_v52 }
 0x482   : > { %v4813_v25 = vmax.f32 %v4812_v54, %v4250_v39  ;;  %v4258_v16 = vmax.f32 %v3091_v15, 0.0  ;;  %v2744_v32 = vadd.f32 %v2743_v58, %v13223_v30  ;;  %v2745_v3 = vpop.f32.mrb[194].mxu0  ;;  %3748 = vmatprep.mubr.bf16.mxu1 %v15215_v43 }
 0x483   : > { %v4777_v49 = vmax.f32 %v4776_v5, %v4257_v61  ;;  %v4263_v24 = vmax.f32 %v2742_v13, 0.0  ;;  %v2746_v0 = vadd.f32 %v2745_v3, %v13216_v19  ;;  %v2747_v57 = vpop.f32.mrb[195].mxu0 }
 0x484   : > { %v4814_v11 = vmax.f32 %v4813_v25, %v4258_v16  ;;  %v4264_v38 = vmax.f32 %v2744_v32, 0.0  ;;  %v2748_v44 = vadd.f32 %v2747_v57, %v13223_v30  ;;  %v3094_v41 = vpop.f32.mrb[192].mxu1 }
 0x485   : > { %v4704_v12 = vmax.f32 %v4703_v60, %v4263_v24  ;;  %v4271_v14 = vmax.f32 %v2746_v0, 0.0  ;;  %v3095_v52 = vadd.f32 %v3094_v41, %v13234_v26  ;;  %v3096_v54 = vpop.f32.mrb[193].mxu1  ;;  %3396 = vmatmul.mubr.bf16.gmra.mrb[44].mxu0 %v13058_v29 }
 0x486   : > { %v4741_v63 = vmax.f32 %v4740_v33, %v4264_v38  ;;  %v4272_v2 = vmax.f32 %v2748_v44, 0.0  ;;  %v3097_v46 = vadd.f32 %v3096_v54, %v13238_v40  ;;  %v3098_v53 = vpop.f32.mrb[194].mxu1  ;;  %3405 = vmatprep.mubr.bf16.mxu0 %v15215_v43 }
 0x487   : > { %v4705_v27 = vmax.f32 %v4704_v12, %v4271_v14  ;;  %v4265_v50 = vmax.f32 %v3095_v52, 0.0  ;;  %v3099_v55 = vadd.f32 %v3098_v53, %v13234_v26  ;;  %v3100_v17 = vpop.f32.mrb[195].mxu1 }
 0x488   : > { %v4742_v10 = vmax.f32 %v4741_v63, %v4272_v2  ;;  %v4266_v59 = vmax.f32 %v3097_v46, 0.0  ;;  %v3101_v1 = vadd.f32 %v3100_v17, %v13238_v40  ;;  %v2751_v60 = vpop.f32.mrb[196].mxu0 }
 0x489   : > { %v4778_v31 = vmax.f32 %v4777_v49, %v4265_v50  ;;  %v4273_v34 = vmax.f32 %v3099_v55, 0.0  ;;  %v2752_v62 = vadd.f32 %v2751_v60, %v13216_v19  ;;  %v2753_v33 = vpop.f32.mrb[197].mxu0  ;;  %3749 = vmatmul.mubr.bf16.gmra.mrb[44].mxu1 %v13058_v29 }
 0x48a   : > { %v4815_v39 = vmax.f32 %v4814_v11, %v4266_v59  ;;  %v4274_v15 = vmax.f32 %v3101_v1, 0.0  ;;  %v2754_v51 = vadd.f32 %v2753_v33, %v13223_v30  ;;  %v2755_v5 = vpop.f32.mrb[198].mxu0  ;;  %3758 = vmatprep.mubr.bf16.mxu1 %v15215_v43 }
 0x48b   : > { %v4779_v61 = vmax.f32 %v4778_v31, %v4273_v34  ;;  %v4279_v13 = vmax.f32 %v2752_v62, 0.0  ;;  %v2756_v58 = vadd.f32 %v2755_v5, %v13216_v19  ;;  %v2757_v25 = vpop.f32.mrb[199].mxu0 }
 0x48c   : > { %v4816_v16 = vmax.f32 %v4815_v39, %v4274_v15  ;;  %v4280_v32 = vmax.f32 %v2754_v51, 0.0  ;;  %v2758_v3 = vadd.f32 %v2757_v25, %v13223_v30  ;;  %v3104_v49 = vpop.f32.mrb[196].mxu1 }
 0x48d   : > { %v4706_v24 = vmax.f32 %v4705_v27, %v4279_v13  ;;  %v4287_v0 = vmax.f32 %v2756_v58, 0.0  ;;  %v3105_v29 = vadd.f32 %v3104_v49, %v13234_v26  ;;  %v3106_v57 = vpop.f32.mrb[197].mxu1  ;;  %3406 = vmatmul.mubr.bf16.gmra.mrb[48].mxu0 %v13070_v22 }
 0x48e   : > { %v4743_v11 = vmax.f32 %v4742_v10, %v4280_v32  ;;  %v4288_v38 = vmax.f32 %v2758_v3, 0.0  ;;  %v3107_v44 = vadd.f32 %v3106_v57, %v13238_v40  ;;  %v3108_v41 = vpop.f32.mrb[198].mxu1  ;;  %3415 = vmatprep.mubr.bf16.mxu0 %v15215_v43 }
 0x48f   : > { %v4707_v12 = vmax.f32 %v4706_v24, %v4287_v0  ;;  %v4281_v14 = vmax.f32 %v3105_v29, 0.0  ;;  %v3109_v52 = vadd.f32 %v3108_v41, %v13234_v26  ;;  %v3110_v54 = vpop.f32.mrb[199].mxu1 }
 0x490   : > { %v4744_v63 = vmax.f32 %v4743_v11, %v4288_v38  ;;  %v4282_v2 = vmax.f32 %v3107_v44, 0.0  ;;  %v3111_v46 = vadd.f32 %v3110_v54, %v13238_v40  ;;  %v2761_v53 = vpop.f32.mrb[200].mxu0 }
 0x491   : > { %v4780_v27 = vmax.f32 %v4779_v61, %v4281_v14  ;;  %v4289_v50 = vmax.f32 %v3109_v52, 0.0  ;;  %v2762_v55 = vadd.f32 %v2761_v53, %v13216_v19  ;;  %v2763_v17 = vpop.f32.mrb[201].mxu0  ;;  %3759 = vmatmul.mubr.bf16.gmra.mrb[48].mxu1 %v13070_v22 }
 0x492   : > { %v4817_v10 = vmax.f32 %v4816_v16, %v4282_v2  ;;  %v4290_v59 = vmax.f32 %v3111_v46, 0.0  ;;  %v2764_v1 = vadd.f32 %v2763_v17, %v13223_v30  ;;  %v2765_v60 = vpop.f32.mrb[202].mxu0  ;;  %3768 = vmatprep.mubr.bf16.mxu1 %v15215_v43 }
 0x493   : > { %v4781_v31 = vmax.f32 %v4780_v27, %v4289_v50  ;;  %v4295_v34 = vmax.f32 %v2762_v55, 0.0  ;;  %v2766_v62 = vadd.f32 %v2765_v60, %v13216_v19  ;;  %v2767_v33 = vpop.f32.mrb[203].mxu0 }
 0x494   : > { %v4818_v39 = vmax.f32 %v4817_v10, %v4290_v59  ;;  %v4296_v15 = vmax.f32 %v2764_v1, 0.0  ;;  %v2768_v51 = vadd.f32 %v2767_v33, %v13223_v30  ;;  %v3114_v5 = vpop.f32.mrb[200].mxu1 }
 0x495   : > { %v4708_v61 = vmax.f32 %v4707_v12, %v4295_v34  ;;  %v4303_v13 = vmax.f32 %v2766_v62, 0.0  ;;  %v3115_v22 = vadd.f32 %v3114_v5, %v13234_v26  ;;  %v3116_v58 = vpop.f32.mrb[201].mxu1  ;;  %3416 = vmatmul.mubr.bf16.gmra.mrb[52].mxu0 %v13082_v45 }
 0x496   : > { %v4745_v25 = vmax.f32 %v4744_v63, %v4296_v15  ;;  %v4304_v16 = vmax.f32 %v2768_v51, 0.0  ;;  %v3117_v32 = vadd.f32 %v3116_v58, %v13238_v40  ;;  %v3118_v3 = vpop.f32.mrb[202].mxu1  ;;  %3425 = vmatprep.mubr.bf16.mxu0 %v15215_v43 }
 0x497   : > { %v4709_v49 = vmax.f32 %v4708_v61, %v4303_v13  ;;  %v4297_v24 = vmax.f32 %v3115_v22, 0.0  ;;  %v3119_v0 = vadd.f32 %v3118_v3, %v13234_v26  ;;  %v3120_v29 = vpop.f32.mrb[203].mxu1 }
 0x498   : > { %v4746_v57 = vmax.f32 %v4745_v25, %v4304_v16  ;;  %v4298_v11 = vmax.f32 %v3117_v32, 0.0  ;;  %v3121_v38 = vadd.f32 %v3120_v29, %v13238_v40  ;;  %v2771_v44 = vpop.f32.mrb[204].mxu0 }
 0x499   : > { %v4782_v41 = vmax.f32 %v4781_v31, %v4297_v24  ;;  %v4305_v12 = vmax.f32 %v3119_v0, 0.0  ;;  %v2772_v14 = vadd.f32 %v2771_v44, %v13216_v19  ;;  %v2773_v52 = vpop.f32.mrb[205].mxu0  ;;  %3769 = vmatmul.mubr.bf16.gmra.mrb[52].mxu1 %v13082_v45 }
 0x49a   : > { %v4819_v54 = vmax.f32 %v4818_v39, %v4298_v11  ;;  %v4306_v63 = vmax.f32 %v3121_v38, 0.0  ;;  %v2774_v2 = vadd.f32 %v2773_v52, %v13223_v30  ;;  %v2775_v46 = vpop.f32.mrb[206].mxu0  ;;  %3778 = vmatprep.mubr.bf16.mxu1 %v15215_v43 }
 0x49b   : > { %v4783_v53 = vmax.f32 %v4782_v41, %v4305_v12  ;;  %v4311_v27 = vmax.f32 %v2772_v14, 0.0  ;;  %v2776_v50 = vadd.f32 %v2775_v46, %v13216_v19  ;;  %v2777_v55 = vpop.f32.mrb[207].mxu0 }
 0x49c   : > { %v4820_v17 = vmax.f32 %v4819_v54, %v4306_v63  ;;  %v4312_v10 = vmax.f32 %v2774_v2, 0.0  ;;  %v2778_v59 = vadd.f32 %v2777_v55, %v13223_v30  ;;  %v3124_v1 = vpop.f32.mrb[204].mxu1 }
 0x49d   : > { %v4710_v60 = vmax.f32 %v4709_v49, %v4311_v27  ;;  %v4319_v31 = vmax.f32 %v2776_v50, 0.0  ;;  %v3125_v45 = vadd.f32 %v3124_v1, %v13234_v26  ;;  %v3126_v34 = vpop.f32.mrb[205].mxu1  ;;  %3426 = vmatmul.mubr.bf16.gmra.mrb[56].mxu0 %v13110_v47 }
 0x49e   : > { %v4747_v62 = vmax.f32 %v4746_v57, %v4312_v10  ;;  %v4320_v33 = vmax.f32 %v2778_v59, 0.0  ;;  %v3127_v39 = vadd.f32 %v3126_v34, %v13238_v40  ;;  %v3128_v15 = vpop.f32.mrb[206].mxu1  ;;  %3435 = vmatprep.mubr.bf16.mxu0 %v15215_v43 }
 0x49f   : > { %v4711_v51 = vmax.f32 %v4710_v60, %v4319_v31  ;;  %v4313_v5 = vmax.f32 %v3125_v45, 0.0  ;;  %v3129_v61 = vadd.f32 %v3128_v15, %v13234_v26  ;;  %v3130_v13 = vpop.f32.mrb[207].mxu1 }
 0x4a0   : > { %v4748_v22 = vmax.f32 %v4747_v62, %v4320_v33  ;;  %v4314_v58 = vmax.f32 %v3127_v39, 0.0  ;;  %v3131_v25 = vadd.f32 %v3130_v13, %v13238_v40  ;;  %v2781_v16 = vpop.f32.mrb[208].mxu0 }
 0x4a1   : > { %v4784_v32 = vmax.f32 %v4783_v53, %v4313_v5  ;;  %v4321_v3 = vmax.f32 %v3129_v61, 0.0  ;;  %v2782_v49 = vadd.f32 %v2781_v16, %v13216_v19  ;;  %v2783_v24 = vpop.f32.mrb[209].mxu0  ;;  %3779 = vmatmul.mubr.bf16.gmra.mrb[56].mxu1 %v13110_v47 }
 0x4a2   : > { %v4821_v0 = vmax.f32 %v4820_v17, %v4314_v58  ;;  %v4322_v29 = vmax.f32 %v3131_v25, 0.0  ;;  %v2784_v57 = vadd.f32 %v2783_v24, %v13223_v30  ;;  %v2785_v11 = vpop.f32.mrb[210].mxu0  ;;  %3788 = vmatprep.mubr.bf16.mxu1 %v15215_v43 }
 0x4a3   : > { %v4785_v38 = vmax.f32 %v4784_v32, %v4321_v3  ;;  %v4327_v44 = vmax.f32 %v2782_v49, 0.0  ;;  %v2786_v41 = vadd.f32 %v2785_v11, %v13216_v19  ;;  %v2787_v12 = vpop.f32.mrb[211].mxu0 }
 0x4a4   : > { %v4822_v14 = vmax.f32 %v4821_v0, %v4322_v29  ;;  %v4328_v52 = vmax.f32 %v2784_v57, 0.0  ;;  %v2788_v54 = vadd.f32 %v2787_v12, %v13223_v30  ;;  %v3134_v63 = vpop.f32.mrb[208].mxu1 }
 0x4a5   : > { %v4712_v2 = vmax.f32 %v4711_v51, %v4327_v44  ;;  %v4335_v46 = vmax.f32 %v2786_v41, 0.0  ;;  %v3135_v47 = vadd.f32 %v3134_v63, %v13234_v26  ;;  %v3136_v53 = vpop.f32.mrb[209].mxu1  ;;  %3436 = vmatmul.mubr.bf16.gmra.mrb[60].mxu0 %v13122_v8 }
 0x4a6   : > { %v4749_v27 = vmax.f32 %v4748_v22, %v4328_v52  ;;  %v4336_v50 = vmax.f32 %v2788_v54, 0.0  ;;  %v3137_v55 = vadd.f32 %v3136_v53, %v13238_v40  ;;  %v3138_v17 = vpop.f32.mrb[210].mxu1  ;;  %3445 = vmatprep.mubr.bf16.mxu0 %v15215_v43 }
 0x4a7   : > { %v4713_v10 = vmax.f32 %v4712_v2, %v4335_v46  ;;  %v4329_v59 = vmax.f32 %v3135_v47, 0.0  ;;  %v3139_v1 = vadd.f32 %v3138_v17, %v13234_v26  ;;  %v3140_v60 = vpop.f32.mrb[211].mxu1 }
 0x4a8   : > { %v4750_v31 = vmax.f32 %v4749_v27, %v4336_v50  ;;  %v4330_v45 = vmax.f32 %v3137_v55, 0.0  ;;  %v3141_v34 = vadd.f32 %v3140_v60, %v13238_v40  ;;  %v2791_v62 = vpop.f32.mrb[212].mxu0 }
 0x4a9   : > { %v4786_v33 = vmax.f32 %v4785_v38, %v4329_v59  ;;  %v4337_v39 = vmax.f32 %v3139_v1, 0.0  ;;  %v2792_v15 = vadd.f32 %v2791_v62, %v13216_v19  ;;  %v2793_v51 = vpop.f32.mrb[213].mxu0  ;;  %3789 = vmatmul.mubr.bf16.gmra.mrb[60].mxu1 %v13122_v8 }
 0x4aa   : > { %v4823_v5 = vmax.f32 %v4822_v14, %v4330_v45  ;;  %v4338_v61 = vmax.f32 %v3141_v34, 0.0  ;;  %v2794_v13 = vadd.f32 %v2793_v51, %v13223_v30  ;;  %v2795_v22 = vpop.f32.mrb[214].mxu0  ;;  %3798 = vmatprep.mubr.bf16.mxu1 %v15215_v43 }
 0x4ab   : > { %v4787_v58 = vmax.f32 %v4786_v33, %v4337_v39  ;;  %v4343_v25 = vmax.f32 %v2792_v15, 0.0  ;;  %v2796_v16 = vadd.f32 %v2795_v22, %v13216_v19  ;;  %v2797_v32 = vpop.f32.mrb[215].mxu0 }
 0x4ac   : > { %v4824_v3 = vmax.f32 %v4823_v5, %v4338_v61  ;;  %v4344_v49 = vmax.f32 %v2794_v13, 0.0  ;;  %v2798_v24 = vadd.f32 %v2797_v32, %v13223_v30  ;;  %v3144_v0 = vpop.f32.mrb[212].mxu1 }
 0x4ad   : > { %v4714_v29 = vmax.f32 %v4713_v10, %v4343_v25  ;;  %v4351_v57 = vmax.f32 %v2796_v16, 0.0  ;;  %v3145_v8 = vadd.f32 %v3144_v0, %v13234_v26  ;;  %v3146_v11 = vpop.f32.mrb[213].mxu1  ;;  %3446 = vmatmul.mubr.bf16.gmra.mrb[64].mxu0 %v13134_v48 }
 0x4ae   : > { %v4751_v38 = vmax.f32 %v4750_v31, %v4344_v49  ;;  %v4352_v44 = vmax.f32 %v2798_v24, 0.0  ;;  %v3147_v41 = vadd.f32 %v3146_v11, %v13238_v40  ;;  %v3148_v12 = vpop.f32.mrb[214].mxu1  ;;  %3455 = vmatprep.mubr.bf16.mxu0 %v15215_v43 }
 0x4af   : > { %v4715_v14 = vmax.f32 %v4714_v29, %v4351_v57  ;;  %v4345_v52 = vmax.f32 %v3145_v8, 0.0  ;;  %v3149_v54 = vadd.f32 %v3148_v12, %v13234_v26  ;;  %v3150_v63 = vpop.f32.mrb[215].mxu1  ;;  %v15149_v12 = vsub.s32 4, %v12816_v9 }
 0x4b0   : > { %v4752_v2 = vmax.f32 %v4751_v38, %v4352_v44  ;;  %v4346_v46 = vmax.f32 %v3147_v41, 0.0  ;;  %v3151_v47 = vadd.f32 %v3150_v63, %v13238_v40  ;;  %v2801_v53 = vpop.f32.mrb[216].mxu0 }
 0x4b1   : > { %v4788_v27 = vmax.f32 %v4787_v58, %v4345_v52  ;;  %v4353_v50 = vmax.f32 %v3149_v54, 0.0  ;;  %v2802_v55 = vadd.f32 %v2801_v53, %v13216_v19  ;;  %v2803_v17 = vpop.f32.mrb[217].mxu0  ;;  %3799 = vmatmul.mubr.bf16.gmra.mrb[64].mxu1 %v13134_v48 }
 0x4b2   : > { %v4825_v10 = vmax.f32 %v4824_v3, %v4346_v46  ;;  %v4354_v59 = vmax.f32 %v3151_v47, 0.0  ;;  %v2804_v1 = vadd.f32 %v2803_v17, %v13223_v30  ;;  %v2805_v60 = vpop.f32.mrb[218].mxu0  ;;  %3808 = vmatprep.mubr.bf16.mxu1 %v15215_v43 }
 0x4b3   : > { %v4789_v31 = vmax.f32 %v4788_v27, %v4353_v50  ;;  %v4359_v45 = vmax.f32 %v2802_v55, 0.0  ;;  %v2806_v34 = vadd.f32 %v2805_v60, %v13216_v19  ;;  %v2807_v62 = vpop.f32.mrb[219].mxu0  ;;  %v15147_v50 = vsub.s32 6, %v12816_v9 }
 0x4b4   : > { %v4826_v33 = vmax.f32 %v4825_v10, %v4354_v59  ;;  %v4360_v39 = vmax.f32 %v2804_v1, 0.0  ;;  %v2808_v15 = vadd.f32 %v2807_v62, %v13223_v30  ;;  %v3154_v51 = vpop.f32.mrb[216].mxu1  ;;  %v15146_v59 = vsub.s32 7, %v12816_v9 }
 0x4b5   : > { %v4716_v5 = vmax.f32 %v4715_v14, %v4359_v45  ;;  %v4367_v61 = vmax.f32 %v2806_v34, 0.0  ;;  %v3155_v48 = vadd.f32 %v3154_v51, %v13234_v26  ;;  %v3156_v13 = vpop.f32.mrb[217].mxu1  ;;  %3456 = vmatmul.mubr.bf16.gmra.mrb[68].mxu0 %v13146_v56 }
 0x4b6   : > { %v4753_v22 = vmax.f32 %v4752_v2, %v4360_v39  ;;  %v4368_v58 = vmax.f32 %v2808_v15, 0.0  ;;  %v3157_v25 = vadd.f32 %v3156_v13, %v13238_v40  ;;  %v3158_v16 = vpop.f32.mrb[218].mxu1  ;;  %3465 = vmatprep.mubr.bf16.mxu0 %v15215_v43  ;;  %v15148_v2 = vsub.s32 5, %v12816_v9 }
 0x4b7   : > { %v4717_v32 = vmax.f32 %v4716_v5, %v4367_v61  ;;  %v4361_v3 = vmax.f32 %v3155_v48, 0.0  ;;  %v3159_v49 = vadd.f32 %v3158_v16, %v13234_v26  ;;  %v3160_v24 = vpop.f32.mrb[219].mxu1 }
 0x4b8   : > { %v4754_v0 = vmax.f32 %v4753_v22, %v4368_v58  ;;  %v4362_v29 = vmax.f32 %v3157_v25, 0.0  ;;  %v3161_v57 = vadd.f32 %v3160_v24, %v13238_v40  ;;  %v2811_v8 = vpop.f32.mrb[220].mxu0 }
 0x4b9   : > { %v4790_v11 = vmax.f32 %v4789_v31, %v4361_v3  ;;  %v4369_v38 = vmax.f32 %v3159_v49, 0.0  ;;  %v2812_v44 = vadd.f32 %v2811_v8, %v13216_v19  ;;  %v2813_v41 = vpop.f32.mrb[221].mxu0  ;;  %3809 = vmatmul.mubr.bf16.gmra.mrb[68].mxu1 %v13146_v56 }
 0x4ba   : > { %v4827_v14 = vmax.f32 %v4826_v33, %v4362_v29  ;;  %v4370_v52 = vmax.f32 %v3161_v57, 0.0  ;;  %v2814_v54 = vadd.f32 %v2813_v41, %v13223_v30  ;;  %v2815_v63 = vpop.f32.mrb[222].mxu0  ;;  %3818 = vmatprep.mubr.bf16.mxu1 %v15215_v43 }
 0x4bb   : > { %v4791_v46 = vmax.f32 %v4790_v11, %v4369_v38  ;;  %v4375_v47 = vmax.f32 %v2812_v44, 0.0  ;;  %v2816_v53 = vadd.f32 %v2815_v63, %v13216_v19  ;;  %v2817_v27 = vpop.f32.mrb[223].mxu0  ;;  %v11360_v19 = vld [vmem:[%s15226_s26] sm:$0xff] }
 0x4bc   : > { %v4828_v55 = vmax.f32 %v4827_v14, %v4370_v52  ;;  %v4376_v56 = vmax.f32 %v2814_v54, 0.0  ;;  %v2818_v17 = vadd.f32 %v2817_v27, %v13223_v30  ;;  %v3164_v10 = vpop.f32.mrb[220].mxu1  ;;  %v13719_v34 = vrot.slane %v11360_v19, %v15149_v12 }
 0x4bd   : > { %v4718_v1 = vmax.f32 %v4717_v32, %v4375_v47  ;;  %v4383_v60 = vmax.f32 %v2816_v53, 0.0  ;;  %v3165_v31 = vadd.f32 %v3164_v10, %v13234_v26  ;;  %v3166_v45 = vpop.f32.mrb[221].mxu1  ;;  %3466 = vmatmul.mubr.bf16.gmra.mrb[72].mxu0 %v13158_v7  ;;  %v13724_v15 = vrot.slane %v11360_v19, %v15148_v2 }
 0x4be   : > { %v4755_v62 = vmax.f32 %v4754_v0, %v4376_v56  ;;  %v4384_v30 = vmax.f32 %v2818_v17, 0.0  ;;  %v3167_v33 = vadd.f32 %v3166_v45, %v13238_v40  ;;  %v3168_v39 = vpop.f32.mrb[222].mxu1  ;;  %3475 = vmatprep.mubr.bf16.mxu0 %v15215_v43  ;;  %v13730_v13 = vrot.slane %v11360_v19, %v15147_v50  ;;  %v15235_v17 = vld [vmem:[#allocation63_spill] sm:$0xff] }
 0x4bf   : > { %v4719_v51 = vmax.f32 %v4718_v1, %v4383_v60  ;;  %v4377_v5 = vmax.f32 %v3165_v31, 0.0  ;;  %v3169_v61 = vadd.f32 %v3168_v39, %v13234_v26  ;;  %v3170_v48 = vpop.f32.mrb[223].mxu1  ;;  %v13735_v32 = vrot.slane %v11360_v19, %v15146_v59 }
 0x4c0   : > { %v4756_v22 = vmax.f32 %v4755_v62, %v4384_v30  ;;  %v4378_v58 = vmax.f32 %v3167_v33, 0.0  ;;  %v3171_v25 = vadd.f32 %v3170_v48, %v13238_v40  ;;  %v3207_v16 = vpop.f32.mrb[224].mxu0 }
 0x4c1   : > { %v4720_v3 = vrot.slane %v4719_v51, 4  ;;  %v4792_v49 = vmax.f32 %v4791_v46, %v4377_v5  ;;  %v4385_v24 = vmax.f32 %v3169_v61, 0.0  ;;  %v3208_v0 = vadd.f32 %v3207_v16, %v13719_v34  ;;  %v3209_v26 = vpop.f32.mrb[225].mxu0  ;;  %3819 = vmatmul.mubr.bf16.gmra.mrb[72].mxu1 %v13158_v7 }
 0x4c2   : > { %v4757_v29 = vrot.slane %v4756_v22, 4  ;;  %v4829_v57 = vmax.f32 %v4828_v55, %v4378_v58  ;;  %v4386_v8 = vmax.f32 %v3171_v25, 0.0  ;;  %v3210_v11 = vadd.f32 %v3209_v26, %v13724_v15  ;;  %v3211_v38 = vpop.f32.mrb[226].mxu0  ;;  %3828 = vmatprep.mubr.bf16.mxu1 %v15215_v43 }
 0x4c3   : > { %v4721_v40 = vmax.f32 %v4719_v51, %v4720_v3  ;;  %v4793_v44 = vmax.f32 %v4792_v49, %v4385_v24  ;;  %v3883_v41 = vmax.f32 %v3208_v0, 0.0  ;;  %v3212_v14 = vadd.f32 %v3211_v38, %v13719_v34  ;;  %v3213_v52 = vpop.f32.mrb[227].mxu0 }
 0x4c4   : > { %v4758_v54 = vmax.f32 %v4756_v22, %v4757_v29  ;;  %v4830_v63 = vmax.f32 %v4829_v57, %v4386_v8  ;;  %v3884_v46 = vmax.f32 %v3210_v11, 0.0  ;;  %v3214_v47 = vadd.f32 %v3213_v52, %v13724_v15  ;;  %v3560_v7 = vpop.f32.mrb[224].mxu1 }
 0x4c5   : > { %v4722_v53 = vrot.slane %v4721_v40, 2  ;;  %v4794_v27 = vrot.slane %v4793_v44, 4  ;;  %v3891_v55 = vmax.f32 %v3212_v14, 0.0  ;;  %v3561_v56 = vadd.f32 %v3560_v7, %v13730_v13  ;;  %3476 = vmatmul.mubr.bf16.gmra.mrb[76].mxu0 %v15235_v17  ;;  %v3562_v10 = vpop.f32.mrb[225].mxu1 }
 0x4c6   : > { %v4759_v1 = vrot.slane %v4758_v54, 2  ;;  %v4831_v60 = vrot.slane %v4830_v63, 4  ;;  %v3892_v31 = vmax.f32 %v3214_v47, 0.0  ;;  %v3563_v45 = vadd.f32 %v3562_v10, %v13735_v32  ;;  %v3564_v19 = vpop.f32.mrb[226].mxu1  ;;  %3485 = vmatprep.mubr.bf16.mxu0 %v15215_v43 }
 0x4c7   : > { %v4723_v62 = vmax.f32 %v4721_v40, %v4722_v53  ;;  %v4795_v30 = vmax.f32 %v4793_v44, %v4794_v27  ;;  %v4541_v33 = vmax.f32 %v3883_v41, %v3891_v55  ;;  %v3885_v39 = vmax.f32 %v3561_v56, 0.0  ;;  %v3566_v51 = vpop.f32.mrb[227].mxu1 }
 0x4c8   : > { %v4760_v5 = vmax.f32 %v4758_v54, %v4759_v1  ;;  %v4832_v61 = vmax.f32 %v4830_v63, %v4831_v60  ;;  %v4578_v48 = vmax.f32 %v3884_v46, %v3892_v31  ;;  %v3886_v22 = vmax.f32 %v3563_v45, 0.0  ;;  %v3217_v58 = vpop.f32.mrb[228].mxu0 }
 0x4c9   : > { %v4724_v25 = vrot.slane %v4723_v62, 1  ;;  %v4796_v16 = vrot.slane %v4795_v30, 2  ;;  %v3565_v3 = vadd.f32 %v3564_v19, %v13730_v13  ;;  %v3567_v49 = vadd.f32 %v3566_v51, %v13735_v32  ;;  %v3219_v24 = vpop.f32.mrb[229].mxu0  ;;  %3829 = vmatmul.mubr.bf16.gmra.mrb[76].mxu1 %v15235_v17 }
 0x4ca   : > { %v4761_v0 = vrot.slane %v4760_v5, 1  ;;  %v4833_v26 = vrot.slane %v4832_v61, 2  ;;  %v3218_v29 = vadd.f32 %v3217_v58, %v13719_v34  ;;  %v3220_v57 = vadd.f32 %v3219_v24, %v13724_v15  ;;  %v3221_v8 = vpop.f32.mrb[230].mxu0  ;;  %3838 = vmatprep.mubr.bf16.mxu1 %v15215_v43 }
 0x4cb   : > { %v4725_v11 = vmax.f32 %v4723_v62, %v4724_v25  ;;  %v4797_v38 = vmax.f32 %v4795_v30, %v4796_v16  ;;  %v3893_v40 = vmax.f32 %v3565_v3, 0.0  ;;  %v3894_v44 = vmax.f32 %v3567_v49, 0.0  ;;  %v3223_v41 = vpop.f32.mrb[231].mxu0 }
 0x4cc   : > { %v4762_v14 = vmax.f32 %v4760_v5, %v4761_v0  ;;  %v4834_v52 = vmax.f32 %v4832_v61, %v4833_v26  ;;  %v3899_v54 = vmax.f32 %v3218_v29, 0.0  ;;  %v3900_v63 = vmax.f32 %v3220_v57, 0.0  ;;  %v3570_v46 = vpop.f32.mrb[228].mxu1 }
 0x4cd   : > { %v4798_v47 = vrot.slane %v4797_v38, 1  ;;  %v4615_v7 = vmax.f32 %v3885_v39, %v3893_v40  ;;  %v4652_v53 = vmax.f32 %v3886_v22, %v3894_v44  ;;  %v3222_v27 = vadd.f32 %v3221_v8, %v13719_v34  ;;  %3486 = vmatmul.mubr.bf16.gmra.mrb[80].mxu0 %v13182_v4  ;;  %v3572_v55 = vpop.f32.mrb[229].mxu1 }
 0x4ce   : > { %v5035_v56 = vcombine.low %v4725_v11, %v4762_v14  ;;  %v4835_v17 = vrot.slane %v4834_v52, 1  ;;  %v4542_v10 = vmax.f32 %v4541_v33, %v3899_v54  ;;  %v4579_v1 = vmax.f32 %v4578_v48, %v3900_v63  ;;  %v3574_v60 = vpop.f32.mrb[230].mxu1  ;;  %3495 = vmatprep.mubr.bf16.mxu0 %v15215_v43 }
 0x4cf   : > { %v4799_v31 = vmax.f32 %v4797_v38, %v4798_v47  ;;  %v3907_v45 = vmax.f32 %v3222_v27, 0.0  ;;  %v3224_v19 = vadd.f32 %v3223_v41, %v13724_v15  ;;  %v3571_v62 = vadd.f32 %v3570_v46, %v13730_v13  ;;  %v3576_v30 = vpop.f32.mrb[231].mxu1  ;;  %v15236_v47 = vld [vmem:[#allocation66_spill] sm:$0xff] }
 0x4d0   : > { %v5043_v39 = vrot.slane %v5035_v56, %v13495_v23  ;;  %v4836_v51 = vmax.f32 %v4834_v52, %v4835_v17  ;;  %v3573_v5 = vadd.f32 %v3572_v55, %v13735_v32  ;;  %v3575_v33 = vadd.f32 %v3574_v60, %v13730_v13  ;;  %v3227_v61 = vpop.f32.mrb[232].mxu0 }
 0x4d1   : > { %v4543_v48 = vmax.f32 %v4542_v10, %v3907_v45  ;;  %v3908_v22 = vmax.f32 %v3224_v19, 0.0  ;;  %v3901_v58 = vmax.f32 %v3571_v62, 0.0  ;;  %v3577_v25 = vadd.f32 %v3576_v30, %v13735_v32  ;;  %v3229_v16 = vpop.f32.mrb[233].mxu0  ;;  %3839 = vmatmul.mubr.bf16.gmra.mrb[80].mxu1 %v13182_v4 }
 0x4d2   : > { %v5036_v3 = vcombine.low %v4799_v31, %v4836_v51  ;;  %v3902_v49 = vmax.f32 %v3573_v5, 0.0  ;;  %v3909_v24 = vmax.f32 %v3575_v33, 0.0  ;;  %v3228_v0 = vadd.f32 %v3227_v61, %v13719_v34  ;;  %v3231_v26 = vpop.f32.mrb[234].mxu0  ;;  %3848 = vmatprep.mubr.bf16.mxu1 %v15215_v43 }
 0x4d3   : > { %v4580_v29 = vmax.f32 %v4579_v1, %v3908_v22  ;;  %v4616_v57 = vmax.f32 %v4615_v7, %v3901_v58  ;;  %v3910_v8 = vmax.f32 %v3577_v25, 0.0  ;;  %v3230_v11 = vadd.f32 %v3229_v16, %v13724_v15  ;;  %v3233_v38 = vpop.f32.mrb[235].mxu0 }
 0x4d4   : > { %v5050_v40 = vrot.slane %v5036_v3, %v13495_v23  ;;  %v4653_v44 = vmax.f32 %v4652_v53, %v3902_v49  ;;  %v3915_v41 = vmax.f32 %v3228_v0, 0.0  ;;  %v3232_v4 = vadd.f32 %v3231_v26, %v13719_v34  ;;  %v3580_v14 = vpop.f32.mrb[232].mxu1 }
 0x4d5   : > { %v4617_v52 = vmax.f32 %v4616_v57, %v3909_v24  ;;  %v3916_v54 = vmax.f32 %v3230_v11, 0.0  ;;  %v3234_v63 = vadd.f32 %v3233_v38, %v13724_v15  ;;  %v3581_v46 = vadd.f32 %v3580_v14, %v13730_v13  ;;  %3496 = vmatmul.mubr.bf16.gmra.mrb[84].mxu0 %v15236_v47  ;;  %v3582_v7 = vpop.f32.mrb[233].mxu1  ;;  %v4391_v24 = vld [vmem:[#allocation2] sm:$0xff] }
 0x4d6   : > { %v5051_v27 = vcombine.low %v5043_v39, %v5050_v40  ;;  %v4654_v55 = vmax.f32 %v4653_v44, %v3910_v8  ;;  %v4544_v56 = vmax.f32 %v4543_v48, %v3915_v41  ;;  %v3923_v17 = vmax.f32 %v3232_v4, 0.0  ;;  %v3584_v10 = vpop.f32.mrb[234].mxu1  ;;  %3505 = vmatprep.mubr.bf16.mxu0 %v15215_v43  ;;  %v15237_v14 = vld [vmem:[#allocation68_spill] sm:$0xff] }
 0x4d7   : > { %v4581_v53 = vmax.f32 %v4580_v29, %v3916_v54  ;;  %v3924_v1 = vmax.f32 %v3234_v63, 0.0  ;;  %v3917_v60 = vmax.f32 %v3581_v46, 0.0  ;;  %v3583_v31 = vadd.f32 %v3582_v7, %v13735_v32  ;;  %v3586_v45 = vpop.f32.mrb[235].mxu1 }
 0x4d8   : > { %v5073_v19 = vrot.slane %v5051_v27, 7  ;;  %v4545_v62 = vmax.f32 %v4544_v56, %v3923_v17  ;;  %v3585_v30 = vadd.f32 %v3584_v10, %v13730_v13  ;;  %v3587_v51 = vadd.f32 %v3586_v45, %v13735_v32  ;;  %v3237_v5 = vpop.f32.mrb[236].mxu0 }
 0x4d9   : > { %v4582_v39 = vmax.f32 %v4581_v53, %v3924_v1  ;;  %v4618_v33 = vmax.f32 %v4617_v52, %v3917_v60  ;;  %v3918_v61 = vmax.f32 %v3583_v31, 0.0  ;;  %v3238_v48 = vadd.f32 %v3237_v5, %v13719_v34  ;;  %v3239_v22 = vpop.f32.mrb[237].mxu0  ;;  %3849 = vmatmul.mubr.bf16.gmra.mrb[84].mxu1 %v15236_v47 }
 0x4da   : > { %v5075_v58 = vsel %vm5074_vm0, %v5073_v19, %v5017_v37  ;;  %v3925_v25 = vmax.f32 %v3585_v30, 0.0  ;;  %v3926_v16 = vmax.f32 %v3587_v51, 0.0  ;;  %v3240_v3 = vadd.f32 %v3239_v22, %v13724_v15  ;;  %v3241_v49 = vpop.f32.mrb[238].mxu0  ;;  %3858 = vmatprep.mubr.bf16.mxu1 %v15215_v43 }
 0x4db   : > { %v5077_v0 = vsel %vm5076_vm1, %v5073_v19, %v5075_v58  ;;  %v4655_v26 = vmax.f32 %v4654_v55, %v3918_v61  ;;  %v3931_v29 = vmax.f32 %v3238_v48, 0.0  ;;  %v3242_v57 = vadd.f32 %v3241_v49, %v13719_v34  ;;  %v3243_v8 = vpop.f32.mrb[239].mxu0 }
 0x4dc   : > { %v5079_v11 = vsel %vm5078_vm2, %v5073_v19, %v5077_v0  ;;  %v4619_v35 = vmax.f32 %v4618_v33, %v3925_v25  ;;  %v3932_v18 = vmax.f32 %v3240_v3, 0.0  ;;  %v3244_v37 = vadd.f32 %v3243_v8, %v13724_v15  ;;  %v3590_v38 = vpop.f32.mrb[236].mxu1 }
 0x4dd   : > { %v5081_v40 = vsel %vm5080_vm3, %v5073_v19, %v5079_v11  ;;  %v4656_v44 = vmax.f32 %v4655_v26, %v3926_v16  ;;  %v4546_v41 = vmax.f32 %v4545_v62, %v3931_v29  ;;  %v3939_v4 = vmax.f32 %v3242_v57, 0.0  ;;  %3506 = vmatmul.mubr.bf16.gmra.mrb[88].mxu0 %v15237_v14  ;;  %v3592_v52 = vpop.f32.mrb[237].mxu1  ;;  %v15238_v29 = vld [vmem:[#allocation72_spill] sm:$0xff] }
 0x4de   : > { %v5091_v54 = vmax.f32 %v4391_v24, %v5081_v40  ;;  %v4583_v63 = vmax.f32 %v4582_v39, %v3932_v18  ;;  %v3940_v46 = vmax.f32 %v3244_v37, 0.0  ;;  %v3591_v47 = vadd.f32 %v3590_v38, %v13730_v13  ;;  %v3594_v7 = vpop.f32.mrb[238].mxu1  ;;  %3515 = vmatprep.mubr.bf16.mxu0 %v15215_v43 }
 0x4df   : > { %v4547_v27 = vmax.f32 %v4546_v41, %v3939_v4  ;;  %v3593_v55 = vadd.f32 %v3592_v52, %v13735_v32  ;;  %v3595_v56 = vadd.f32 %v3594_v7, %v13730_v13  ;;  %v3596_v17 = vpop.f32.mrb[239].mxu1 }
 0x4e0   : > { %5093 = vst [vmem:[#allocation2] sm:$0xff] %v5091_v54  ;;  %v4584_v10 = vmax.f32 %v4583_v63, %v3940_v46  ;;  %v3933_v53 = vmax.f32 %v3591_v47, 0.0  ;;  %v3597_v1 = vadd.f32 %v3596_v17, %v13735_v32  ;;  %v3247_v60 = vpop.f32.mrb[240].mxu0  ;;  %v13806_v54 = vld [vmem:[#allocation12 + $0x50] sm:$0xff] }
 0x4e1   : > { %v3934_v31 = vmax.f32 %v3593_v55, 0.0  ;;  %v3941_v45 = vmax.f32 %v3595_v56, 0.0  ;;  %v3248_v19 = vadd.f32 %v3247_v60, %v13719_v34  ;;  %v3249_v62 = vpop.f32.mrb[241].mxu0  ;;  %3859 = vmatmul.mubr.bf16.gmra.mrb[88].mxu1 %v15237_v14  ;;  %v13808_v63 = vld [vmem:[#allocation12 + $0x70] sm:$0xff] }
 0x4e2   : > { %v4620_v30 = vmax.f32 %v4619_v35, %v3933_v53  ;;  %v3942_v51 = vmax.f32 %v3597_v1, 0.0  ;;  %v3250_v5 = vadd.f32 %v3249_v62, %v13724_v15  ;;  %v3251_v39 = vpop.f32.mrb[242].mxu0  ;;  %3868 = vmatprep.mubr.bf16.mxu1 %v15215_v43 }
 0x4e3   : > { %v4657_v33 = vmax.f32 %v4656_v44, %v3934_v31  ;;  %v3947_v61 = vmax.f32 %v3248_v19, 0.0  ;;  %v3252_v48 = vadd.f32 %v3251_v39, %v13719_v34  ;;  %v3253_v22 = vpop.f32.mrb[243].mxu0  ;;  %v13820_v39 = vld [vmem:[#allocation12 + $0x78] sm:$0xff] }
 0x4e4   : > { %v4621_v58 = vmax.f32 %v4620_v30, %v3941_v45  ;;  %v3948_v25 = vmax.f32 %v3250_v5, 0.0  ;;  %v3254_v16 = vadd.f32 %v3253_v22, %v13724_v15  ;;  %v3600_v3 = vpop.f32.mrb[240].mxu1  ;;  %v10557_v45 = vcombine.high %v13806_v54, %v13808_v63  ;;  %v13818_v5 = vld [vmem:[#allocation12 + $0x58] sm:$0xff] }
 0x4e5   : > { %v4658_v49 = vmax.f32 %v4657_v33, %v3942_v51  ;;  %v4548_v24 = vmax.f32 %v4547_v27, %v3947_v61  ;;  %v3955_v0 = vmax.f32 %v3252_v48, 0.0  ;;  %v3601_v26 = vadd.f32 %v3600_v3, %v13730_v13  ;;  %3516 = vmatmul.mubr.bf16.gmra.mrb[92].mxu0 %v15238_v29  ;;  %v3602_v57 = vpop.f32.mrb[241].mxu1 }
 0x4e6   : > { %v4585_v8 = vmax.f32 %v4584_v10, %v3948_v25  ;;  %v3956_v11 = vmax.f32 %v3254_v16, 0.0  ;;  %v3603_v35 = vadd.f32 %v3602_v57, %v13735_v32  ;;  %v3604_v18 = vpop.f32.mrb[242].mxu1  ;;  %5553 = vmatprep.mubr.bf16.mxu0 %v15215_v43  ;;  %v13824_v25 = vld [vmem:[#allocation12 + $0x90] sm:$0xff] }
 0x4e7   : > { %v4549_v37 = vmax.f32 %v4548_v24, %v3955_v0  ;;  %v3949_v38 = vmax.f32 %v3601_v26, 0.0  ;;  %v3605_v40 = vadd.f32 %v3604_v18, %v13730_v13  ;;  %v3606_v44 = vpop.f32.mrb[243].mxu1  ;;  %v13826_v16 = vld [vmem:[#allocation12 + $0xb0] sm:$0xff]  ;;  %v10556_v26 = vcombine.low %v13806_v54, %v13808_v63 }
 0x4e8   : > { %v4586_v41 = vmax.f32 %v4585_v8, %v3956_v11  ;;  %v3950_v4 = vmax.f32 %v3603_v35, 0.0  ;;  %v3607_v14 = vadd.f32 %v3606_v44, %v13735_v32  ;;  %v3257_v52 = vpop.f32.mrb[244].mxu0  ;;  %v10559_v35 = vcombine.high %v13818_v5, %v13820_v39  ;;  %v13849_v54 = vld [vmem:[#allocation12 + $0xd0] sm:$0xff] }
 0x4e9   : > { %v4622_v46 = vmax.f32 %v4621_v58, %v3949_v38  ;;  %v3957_v47 = vmax.f32 %v3605_v40, 0.0  ;;  %v3258_v7 = vadd.f32 %v3257_v52, %v13719_v34  ;;  %v3259_v27 = vpop.f32.mrb[245].mxu0  ;;  %3869 = vmatmul.mubr.bf16.gmra.mrb[92].mxu1 %v15238_v29  ;;  %v15239_v58 = vld [vmem:[#allocation36_spill] sm:$0xff]  ;;  %v10565_v6 = vcombine.high %v13824_v25, %v13826_v16  ;;  %v13843_v40 = vld [vmem:[#allocation12 + $0xb8] sm:$0xff] }
 0x4ea   : > { %v4659_v55 = vmax.f32 %v4658_v49, %v3950_v4  ;;  %v3958_v56 = vmax.f32 %v3607_v14, 0.0  ;;  %v3260_v17 = vadd.f32 %v3259_v27, %v13724_v15  ;;  %v3261_v10 = vpop.f32.mrb[246].mxu0  ;;  %5906 = vmatprep.mubr.bf16.mxu1 %v15215_v43  ;;  %v10558_v52 = vcombine.low %v13818_v5, %v13820_v39  ;;  %v13851_v63 = vld [vmem:[#allocation12 + $0xf0] sm:$0xff] }
 0x4eb   : > { %v4623_v53 = vmax.f32 %v4622_v46, %v3957_v47  ;;  %v3963_v1 = vmax.f32 %v3258_v7, 0.0  ;;  %v3262_v60 = vadd.f32 %v3261_v10, %v13719_v34  ;;  %v3263_v31 = vpop.f32.mrb[247].mxu0  ;;  %v15240_v39 = vld [vmem:[#allocation37_spill] sm:$0xff] }
 0x4ec   : > { %v4660_v19 = vmax.f32 %v4659_v55, %v3958_v56  ;;  %v3964_v62 = vmax.f32 %v3260_v17, 0.0  ;;  %v3264_v30 = vadd.f32 %v3263_v31, %v13724_v15  ;;  %v3610_v51 = vpop.f32.mrb[244].mxu1  ;;  %v10564_v55 = vcombine.low %v13824_v25, %v13826_v16 }
 0x4ed   : > { %v4550_v33 = vmax.f32 %v4549_v37, %v3963_v1  ;;  %v3971_v61 = vmax.f32 %v3262_v60, 0.0  ;;  %v3611_v48 = vadd.f32 %v3610_v51, %v13730_v13  ;;  %v3612_v22 = vpop.f32.mrb[245].mxu1  ;;  %5554 = vmatmul.mubr.bf16.vlgmr.msra.gmra.mrb[96].mxu0 %v15239_v58 }
 0x4ee   : > { %v4587_v3 = vmax.f32 %v4586_v41, %v3964_v62  ;;  %v3972_v49 = vmax.f32 %v3264_v30, 0.0  ;;  %v3613_v24 = vadd.f32 %v3612_v22, %v13735_v32  ;;  %v3614_v0 = vpop.f32.mrb[246].mxu1  ;;  %6228 = vmatpush1.bf16.msra.mxu0 %v10548_v42  ;;  %5563 = vmatprep.mubr.bf16.mxu0 %v15215_v43  ;;  %v13841_v42 = vld [vmem:[#allocation12 + $0x98] sm:$0xff] }
 0x4ef   : > { %v4551_v29 = vmax.f32 %v4550_v33, %v3971_v61  ;;  %v3965_v57 = vmax.f32 %v3611_v48, 0.0  ;;  %v3615_v8 = vadd.f32 %v3614_v0, %v13730_v13  ;;  %v3616_v11 = vpop.f32.mrb[247].mxu1  ;;  %6229 = vmatprep.subr.bf16.mxu0 %v10557_v45  ;;  %v10567_v1 = vcombine.high %v13841_v42, %v13843_v40  ;;  %v13866_v45 = vld [vmem:[#allocation12 + $0xd8] sm:$0xff]  ;;  %v13874_v61 = vld [vmem:[#allocation12 + $0x110] sm:$0xff] }
 0x4f0   : > { %v4588_v18 = vmax.f32 %v4587_v3, %v3972_v49  ;;  %v3966_v37 = vmax.f32 %v3613_v24, 0.0  ;;  %v3617_v38 = vadd.f32 %v3616_v11, %v13735_v32  ;;  %v3267_v20 = vpop.f32.mrb[248].mxu0  ;;  %v10566_v33 = vcombine.low %v13841_v42, %v13843_v40  ;;  %v13876_v48 = vld [vmem:[#allocation12 + $0x130] sm:$0xff] }
 0x4f1   : > { %v4624_v44 = vmax.f32 %v4623_v53, %v3965_v57  ;;  %v3973_v41 = vmax.f32 %v3615_v8, 0.0  ;;  %v3268_v4 = vadd.f32 %v3267_v20, %v13719_v34  ;;  %v3269_v14 = vpop.f32.mrb[249].mxu0  ;;  %5907 = vmatmul.mubr.bf16.vlgmr.msra.gmra.mrb[96].mxu1 %v15239_v58  ;;  %v10572_v49 = vcombine.low %v13849_v54, %v13851_v63  ;;  %v5134_v20 = vld [vmem:[#allocation12 + $0x138] sm:$0xff] }
 0x4f2   : > { %v4661_v46 = vmax.f32 %v4660_v19, %v3966_v37  ;;  %v3974_v47 = vmax.f32 %v3617_v38, 0.0  ;;  %v3270_v7 = vadd.f32 %v3269_v14, %v13724_v15  ;;  %6581 = vmatpush1.bf16.msra.mxu1 %v10550_v28  ;;  %v3271_v27 = vpop.f32.mrb[250].mxu0  ;;  %5916 = vmatprep.mubr.bf16.mxu1 %v15215_v43  ;;  %v10573_v28 = vcombine.high %v13849_v54, %v13851_v63  ;;  %v13868_v19 = vld [vmem:[#allocation12 + $0xf8] sm:$0xff] }
 0x4f3   : > { %v4625_v56 = vmax.f32 %v4624_v44, %v3973_v41  ;;  %v3979_v17 = vmax.f32 %v3268_v4, 0.0  ;;  %v3272_v10 = vadd.f32 %v3271_v27, %v13719_v34  ;;  %v3273_v53 = vpop.f32.mrb[251].mxu0  ;;  %6582 = vmatprep.subr.bf16.mxu1 %v10559_v35  ;;  %6230 = vmatpush1.bf16.msra.mxu0 %v10556_v26  ;;  %v10575_v57 = vcombine.high %v13866_v45, %v13868_v19  ;;  %v5130_v38 = vld [vmem:[#allocation12 + $0x118] sm:$0xff] }
 0x4f4   : > { %v4662_v60 = vmax.f32 %v4661_v46, %v3974_v47  ;;  %v3980_v31 = vmax.f32 %v3270_v7, 0.0  ;;  %v3274_v21 = vadd.f32 %v3273_v53, %v13724_v15  ;;  %v3620_v36 = vpop.f32.mrb[248].mxu1  ;;  %6231 = vmatprep.subr.bf16.mxu0 %v10565_v6  ;;  %v10581_v37 = vcombine.high %v13874_v61, %v13876_v48 }
 0x4f5   : > { %v4552_v62 = vmax.f32 %v4551_v29, %v3979_v17  ;;  %v3987_v30 = vmax.f32 %v3272_v10, 0.0  ;;  %v3621_v51 = vadd.f32 %v3620_v36, %v13730_v13  ;;  %v3622_v5 = vpop.f32.mrb[249].mxu1  ;;  %5564 = vmatmul.mubr.bf16.gmra.mrb[100].mxu0 %v15240_v39  ;;  %v10574_v41 = vcombine.low %v13866_v45, %v13868_v19  ;;  %v15241_v36 = vld [vmem:[#allocation38_spill] sm:$0xff] }
 0x4f6   : > { %v4589_v22 = vmax.f32 %v4588_v18, %v3980_v31  ;;  %v3988_v25 = vmax.f32 %v3274_v21, 0.0  ;;  %v3623_v16 = vadd.f32 %v3622_v5, %v13735_v32  ;;  %v3624_v3 = vpop.f32.mrb[250].mxu1  ;;  %5573 = vmatprep.mubr.bf16.mxu0 %v15215_v43  ;;  %6583 = vmatpush1.bf16.msra.mxu1 %v10558_v52  ;;  %v10580_v63 = vcombine.low %v13874_v61, %v13876_v48 }
 0x4f7   : > { %v4553_v24 = vmax.f32 %v4552_v62, %v3987_v30  ;;  %v3981_v0 = vmax.f32 %v3621_v51, 0.0  ;;  %v3625_v26 = vadd.f32 %v3624_v3, %v13730_v13  ;;  %v3626_v29 = vpop.f32.mrb[251].mxu1  ;;  %6584 = vmatprep.subr.bf16.mxu1 %v10567_v1  ;;  %6232 = vmatpush1.bf16.msra.mxu0 %v10564_v55  ;;  %v10583_v55 = vcombine.high %v5130_v38, %v5134_v20 }
 0x4f8   : > { %v4590_v8 = vmax.f32 %v4589_v22, %v3988_v25  ;;  %v3982_v11 = vmax.f32 %v3623_v16, 0.0  ;;  %v3627_v35 = vadd.f32 %v3626_v29, %v13735_v32  ;;  %v3277_v18 = vpop.f32.mrb[252].mxu0  ;;  %6233 = vmatprep.subr.bf16.mxu0 %v10573_v28  ;;  %v10582_v30 = vcombine.low %v5130_v38, %v5134_v20 }
 0x4f9   : > { %v4626_v6 = vmax.f32 %v4625_v56, %v3981_v0  ;;  %v3989_v42 = vmax.f32 %v3625_v26, 0.0  ;;  %v3278_v40 = vadd.f32 %v3277_v18, %v13719_v34  ;;  %v3279_v44 = vpop.f32.mrb[253].mxu0  ;;  %5917 = vmatmul.mubr.bf16.gmra.mrb[100].mxu1 %v15240_v39 }
 0x4fa   : > { %v4663_v4 = vmax.f32 %v4662_v60, %v3982_v11  ;;  %v3990_v14 = vmax.f32 %v3627_v35, 0.0  ;;  %v3280_v52 = vadd.f32 %v3279_v44, %v13724_v15  ;;  %v3281_v54 = vpop.f32.mrb[254].mxu0  ;;  %5926 = vmatprep.mubr.bf16.mxu1 %v15215_v43  ;;  %6585 = vmatpush1.bf16.msra.mxu1 %v10566_v33 }
 0x4fb   : > { %v4627_v46 = vmax.f32 %v4626_v6, %v3989_v42  ;;  %v3995_v47 = vmax.f32 %v3278_v40, 0.0  ;;  %v3282_v7 = vadd.f32 %v3281_v54, %v13719_v34  ;;  %v3283_v27 = vpop.f32.mrb[255].mxu0  ;;  %6586 = vmatprep.subr.bf16.mxu1 %v10575_v57  ;;  %6234 = vmatpush1.bf16.msra.mxu0 %v10572_v49 }
 0x4fc   : > { %v4664_v56 = vmax.f32 %v4663_v4, %v3990_v14  ;;  %v3996_v17 = vmax.f32 %v3280_v52, 0.0  ;;  %v3284_v10 = vadd.f32 %v3283_v27, %v13724_v15  ;;  %v3630_v53 = vpop.f32.mrb[252].mxu1  ;;  %6235 = vmatprep.subr.bf16.mxu0 %v10581_v37  ;;  %v15242_v14 = vld [vmem:[#allocation39_spill] sm:$0xff] }
 0x4fd   : > { %v4554_v1 = vmax.f32 %v4553_v24, %v3995_v47  ;;  %v4003_v60 = vmax.f32 %v3282_v7, 0.0  ;;  %v3631_v31 = vadd.f32 %v3630_v53, %v13730_v13  ;;  %v3632_v21 = vpop.f32.mrb[253].mxu1  ;;  %5574 = vmatmul.mubr.bf16.gmra.mrb[104].mxu0 %v15241_v36 }
 0x4fe   : > { %v4591_v28 = vmax.f32 %v4590_v8, %v3996_v17  ;;  %v4004_v45 = vmax.f32 %v3284_v10, 0.0  ;;  %v3633_v19 = vadd.f32 %v3632_v21, %v13735_v32  ;;  %v3634_v62 = vpop.f32.mrb[254].mxu1  ;;  %5583 = vmatprep.mubr.bf16.mxu0 %v15215_v43  ;;  %6587 = vmatpush1.bf16.msra.mxu1 %v10574_v41 }
 0x4ff   : > { %v4555_v51 = vmax.f32 %v4554_v1, %v4003_v60  ;;  %v3997_v5 = vmax.f32 %v3631_v31, 0.0  ;;  %v3635_v33 = vadd.f32 %v3634_v62, %v13730_v13  ;;  %v3636_v61 = vpop.f32.mrb[255].mxu1  ;;  %6588 = vmatprep.subr.bf16.mxu1 %v10583_v55  ;;  %6236 = vmatpush1.bf16.msra.mxu0 %v10580_v63 }
 0x500   : > { %v4592_v48 = vmax.f32 %v4591_v28, %v4004_v45  ;;  %v3998_v22 = vmax.f32 %v3633_v19, 0.0  ;;  %v3637_v25 = vadd.f32 %v3636_v61, %v13735_v32  ;;  %v3287_v16 = vpop.f32.mrb[0].mxu0 }
 0x501   : > { %v4628_v3 = vmax.f32 %v4627_v46, %v3997_v5  ;;  %v4005_v49 = vmax.f32 %v3635_v33, 0.0  ;;  %v3288_v24 = vadd.f32 %v3287_v16, %v13719_v34  ;;  %v3289_v0 = vpop.f32.mrb[1].mxu0  ;;  %5927 = vmatmul.mubr.bf16.gmra.mrb[104].mxu1 %v15241_v36 }
 0x502   : > { %v4665_v26 = vmax.f32 %v4664_v56, %v3998_v22  ;;  %v4006_v29 = vmax.f32 %v3637_v25, 0.0  ;;  %v3290_v57 = vadd.f32 %v3289_v0, %v13724_v15  ;;  %v3291_v8 = vpop.f32.mrb[2].mxu0  ;;  %5936 = vmatprep.mubr.bf16.mxu1 %v15215_v43  ;;  %6589 = vmatpush1.bf16.msra.mxu1 %v10582_v30  ;;  %v15243_v0 = vld [vmem:[#allocation40_spill] sm:$0xff] }
 0x503   : > { %v4629_v11 = vmax.f32 %v4628_v3, %v4005_v49  ;;  %v4011_v35 = vmax.f32 %v3288_v24, 0.0  ;;  %v3292_v18 = vadd.f32 %v3291_v8, %v13719_v34  ;;  %v3293_v37 = vpop.f32.mrb[3].mxu0 }
 0x504   : > { %v4666_v38 = vmax.f32 %v4665_v26, %v4006_v29  ;;  %v4012_v20 = vmax.f32 %v3290_v57, 0.0  ;;  %v3294_v6 = vadd.f32 %v3293_v37, %v13724_v15  ;;  %v3640_v42 = vpop.f32.mrb[0].mxu1 }
 0x505   : > { %v4556_v40 = vmax.f32 %v4555_v51, %v4011_v35  ;;  %v4019_v44 = vmax.f32 %v3292_v18, 0.0  ;;  %v3641_v41 = vadd.f32 %v3640_v42, %v13730_v13  ;;  %v3642_v4 = vpop.f32.mrb[1].mxu1  ;;  %5584 = vmatmul.mubr.bf16.gmra.mrb[108].mxu0 %v15242_v14 }
 0x506   : > { %v4593_v52 = vmax.f32 %v4592_v48, %v4012_v20  ;;  %v4020_v54 = vmax.f32 %v3294_v6, 0.0  ;;  %v3643_v63 = vadd.f32 %v3642_v4, %v13735_v32  ;;  %v3644_v46 = vpop.f32.mrb[2].mxu1  ;;  %5593 = vmatprep.mubr.bf16.mxu0 %v15215_v43 }
 0x507   : > { %v4557_v47 = vmax.f32 %v4556_v40, %v4019_v44  ;;  %v4013_v7 = vmax.f32 %v3641_v41, 0.0  ;;  %v3645_v27 = vadd.f32 %v3644_v46, %v13730_v13  ;;  %v3646_v55 = vpop.f32.mrb[3].mxu1 }
 0x508   : > { %v4594_v56 = vmax.f32 %v4593_v52, %v4020_v54  ;;  %v4014_v17 = vmax.f32 %v3643_v63, 0.0  ;;  %v3647_v10 = vadd.f32 %v3646_v55, %v13735_v32  ;;  %v3297_v53 = vpop.f32.mrb[4].mxu0 }
 0x509   : > { %v4630_v1 = vmax.f32 %v4629_v11, %v4013_v7  ;;  %v4021_v60 = vmax.f32 %v3645_v27, 0.0  ;;  %v3298_v31 = vadd.f32 %v3297_v53, %v13719_v34  ;;  %v3299_v21 = vpop.f32.mrb[5].mxu0  ;;  %5937 = vmatmul.mubr.bf16.gmra.mrb[108].mxu1 %v15242_v14 }
 0x50a   : > { %v4667_v28 = vmax.f32 %v4666_v38, %v4014_v17  ;;  %v4022_v45 = vmax.f32 %v3647_v10, 0.0  ;;  %v3300_v19 = vadd.f32 %v3299_v21, %v13724_v15  ;;  %v3301_v62 = vpop.f32.mrb[6].mxu0  ;;  %5946 = vmatprep.mubr.bf16.mxu1 %v15215_v43 }
 0x50b   : > { %v4631_v30 = vmax.f32 %v4630_v1, %v4021_v60  ;;  %v4027_v51 = vmax.f32 %v3298_v31, 0.0  ;;  %v3302_v5 = vadd.f32 %v3301_v62, %v13719_v34  ;;  %v3303_v33 = vpop.f32.mrb[7].mxu0  ;;  %v5138_v62 = vld [vmem:[#allocation12 + $0x158] sm:$0xff] }
 0x50c   : > { %v4668_v61 = vmax.f32 %v4667_v28, %v4022_v45  ;;  %v4028_v48 = vmax.f32 %v3300_v19, 0.0  ;;  %v3304_v22 = vadd.f32 %v3303_v33, %v13724_v15  ;;  %v3650_v25 = vpop.f32.mrb[4].mxu1  ;;  %v15244_v28 = vld [vmem:[#allocation42_spill] sm:$0xff]  ;;  %v5137_v45 = vld [vmem:[#allocation12 + $0x150] sm:$0xff] }
 0x50d   : > { %v4558_v16 = vmax.f32 %v4557_v47, %v4027_v51  ;;  %v4035_v3 = vmax.f32 %v3302_v5, 0.0  ;;  %v3651_v49 = vadd.f32 %v3650_v25, %v13730_v13  ;;  %v3652_v24 = vpop.f32.mrb[5].mxu1  ;;  %5594 = vmatmul.mubr.bf16.gmra.mrb[112].mxu0 %v15243_v0  ;;  %v5141_v19 = vld [vmem:[#allocation12 + $0x170] sm:$0xff] }
 0x50e   : > { %v4595_v26 = vmax.f32 %v4594_v56, %v4028_v48  ;;  %v4036_v29 = vmax.f32 %v3304_v22, 0.0  ;;  %v3653_v57 = vadd.f32 %v3652_v24, %v13735_v32  ;;  %v3654_v8 = vpop.f32.mrb[6].mxu1  ;;  %5603 = vmatprep.mubr.bf16.mxu0 %v15215_v43  ;;  %v5142_v48 = vld [vmem:[#allocation12 + $0x178] sm:$0xff] }
 0x50f   : > { %v4559_v11 = vmax.f32 %v4558_v16, %v4035_v3  ;;  %v4029_v35 = vmax.f32 %v3651_v49, 0.0  ;;  %v3655_v18 = vadd.f32 %v3654_v8, %v13730_v13  ;;  %v3656_v37 = vpop.f32.mrb[7].mxu1  ;;  %v10589_v49 = vcombine.high %v5137_v45, %v5141_v19 }
 0x510   : > { %v4596_v38 = vmax.f32 %v4595_v26, %v4036_v29  ;;  %v4030_v20 = vmax.f32 %v3653_v57, 0.0  ;;  %v3657_v6 = vadd.f32 %v3656_v37, %v13735_v32  ;;  %v3307_v42 = vpop.f32.mrb[8].mxu0  ;;  %v10590_v8 = vcombine.low %v5138_v62, %v5142_v48 }
 0x511   : > { %v4632_v40 = vmax.f32 %v4631_v30, %v4029_v35  ;;  %v4037_v44 = vmax.f32 %v3655_v18, 0.0  ;;  %v3308_v41 = vadd.f32 %v3307_v42, %v13719_v34  ;;  %v3309_v4 = vpop.f32.mrb[9].mxu0  ;;  %5947 = vmatmul.mubr.bf16.gmra.mrb[112].mxu1 %v15243_v0  ;;  %6237 = vmatprep.subr.bf16.mxu0 %v10589_v49 }
 0x512   : > { %v4669_v52 = vmax.f32 %v4668_v61, %v4030_v20  ;;  %v4038_v54 = vmax.f32 %v3657_v6, 0.0  ;;  %v3310_v63 = vadd.f32 %v3309_v4, %v13724_v15  ;;  %v3311_v46 = vpop.f32.mrb[10].mxu0  ;;  %5956 = vmatprep.mubr.bf16.mxu1 %v15215_v43  ;;  %v10588_v61 = vcombine.low %v5137_v45, %v5141_v19 }
 0x513   : > { %v4633_v47 = vmax.f32 %v4632_v40, %v4037_v44  ;;  %v4043_v7 = vmax.f32 %v3308_v41, 0.0  ;;  %v3312_v27 = vadd.f32 %v3311_v46, %v13719_v34  ;;  %v3313_v55 = vpop.f32.mrb[11].mxu0 }
 0x514   : > { %v4670_v56 = vmax.f32 %v4669_v52, %v4038_v54  ;;  %v4044_v17 = vmax.f32 %v3310_v63, 0.0  ;;  %v3314_v10 = vadd.f32 %v3313_v55, %v13724_v15  ;;  %v3660_v53 = vpop.f32.mrb[8].mxu1  ;;  %6238 = vmatpush1.bf16.msra.mxu0 %v10588_v61 }
 0x515   : > { %v4560_v1 = vmax.f32 %v4559_v11, %v4043_v7  ;;  %v4051_v60 = vmax.f32 %v3312_v27, 0.0  ;;  %v3661_v31 = vadd.f32 %v3660_v53, %v13730_v13  ;;  %v3662_v21 = vpop.f32.mrb[9].mxu1  ;;  %5604 = vmatmul.mubr.bf16.gmra.mrb[116].mxu0 %v15244_v28 }
 0x516   : > { %v4597_v30 = vmax.f32 %v4596_v38, %v4044_v17  ;;  %v4052_v51 = vmax.f32 %v3314_v10, 0.0  ;;  %v3663_v5 = vadd.f32 %v3662_v21, %v13735_v32  ;;  %v3664_v33 = vpop.f32.mrb[10].mxu1  ;;  %5613 = vmatprep.mubr.bf16.mxu0 %v15215_v43  ;;  %v10591_v38 = vcombine.high %v5138_v62, %v5142_v48  ;;  %v15245_v17 = vld [vmem:[#allocation44_spill] sm:$0xff] }
 0x517   : > { %v4561_v22 = vmax.f32 %v4560_v1, %v4051_v60  ;;  %v4045_v25 = vmax.f32 %v3661_v31, 0.0  ;;  %v3665_v16 = vadd.f32 %v3664_v33, %v13730_v13  ;;  %v3666_v3 = vpop.f32.mrb[11].mxu1 }
 0x518   : > { %v4598_v24 = vmax.f32 %v4597_v30, %v4052_v51  ;;  %v4046_v26 = vmax.f32 %v3663_v5, 0.0  ;;  %v3667_v29 = vadd.f32 %v3666_v3, %v13735_v32  ;;  %v3317_v57 = vpop.f32.mrb[12].mxu0  ;;  %6590 = vmatprep.subr.bf16.mxu1 %v10591_v38 }
 0x519   : > { %v4634_v11 = vmax.f32 %v4633_v47, %v4045_v25  ;;  %v4053_v35 = vmax.f32 %v3665_v16, 0.0  ;;  %v3318_v18 = vadd.f32 %v3317_v57, %v13719_v34  ;;  %v3319_v37 = vpop.f32.mrb[13].mxu0  ;;  %5957 = vmatmul.mubr.bf16.gmra.mrb[116].mxu1 %v15244_v28 }
 0x51a   : > { %v4671_v20 = vmax.f32 %v4670_v56, %v4046_v26  ;;  %v4054_v6 = vmax.f32 %v3667_v29, 0.0  ;;  %v3320_v42 = vadd.f32 %v3319_v37, %v13724_v15  ;;  %v3321_v40 = vpop.f32.mrb[14].mxu0  ;;  %5966 = vmatprep.mubr.bf16.mxu1 %v15215_v43  ;;  %6591 = vmatpush1.bf16.msra.mxu1 %v10590_v8 }
 0x51b   : > { %v4635_v44 = vmax.f32 %v4634_v11, %v4053_v35  ;;  %v4059_v41 = vmax.f32 %v3318_v18, 0.0  ;;  %v3322_v4 = vadd.f32 %v3321_v40, %v13719_v34  ;;  %v3323_v52 = vpop.f32.mrb[15].mxu0 }
 0x51c   : > { %v4672_v54 = vmax.f32 %v4671_v20, %v4054_v6  ;;  %v4060_v63 = vmax.f32 %v3320_v42, 0.0  ;;  %v3324_v46 = vadd.f32 %v3323_v52, %v13724_v15  ;;  %v3670_v47 = vpop.f32.mrb[12].mxu1  ;;  %v15246_v42 = vld [vmem:[#allocation46_spill] sm:$0xff] }
 0x51d   : > { %v4562_v7 = vmax.f32 %v4561_v22, %v4059_v41  ;;  %v4067_v27 = vmax.f32 %v3322_v4, 0.0  ;;  %v3671_v55 = vadd.f32 %v3670_v47, %v13730_v13  ;;  %v3672_v56 = vpop.f32.mrb[13].mxu1  ;;  %5614 = vmatmul.mubr.bf16.gmra.mrb[120].mxu0 %v15245_v17 }
 0x51e   : > { %v4599_v10 = vmax.f32 %v4598_v24, %v4060_v63  ;;  %v4068_v53 = vmax.f32 %v3324_v46, 0.0  ;;  %v3673_v1 = vadd.f32 %v3672_v56, %v13735_v32  ;;  %v3674_v60 = vpop.f32.mrb[14].mxu1  ;;  %5623 = vmatprep.mubr.bf16.mxu0 %v15215_v43 }
 0x51f   : > { %v4563_v31 = vmax.f32 %v4562_v7, %v4067_v27  ;;  %v4061_v21 = vmax.f32 %v3671_v55, 0.0  ;;  %v3675_v45 = vadd.f32 %v3674_v60, %v13730_v13  ;;  %v3676_v19 = vpop.f32.mrb[15].mxu1 }
 0x520   : > { %v4600_v62 = vmax.f32 %v4599_v10, %v4068_v53  ;;  %v4062_v30 = vmax.f32 %v3673_v1, 0.0  ;;  %v3677_v51 = vadd.f32 %v3676_v19, %v13735_v32  ;;  %v3327_v5 = vpop.f32.mrb[16].mxu0 }
 0x521   : > { %v4636_v33 = vmax.f32 %v4635_v44, %v4061_v21  ;;  %v4069_v61 = vmax.f32 %v3675_v45, 0.0  ;;  %v3328_v48 = vadd.f32 %v3327_v5, %v13719_v34  ;;  %v3329_v22 = vpop.f32.mrb[17].mxu0  ;;  %5967 = vmatmul.mubr.bf16.gmra.mrb[120].mxu1 %v15245_v17 }
 0x522   : > { %v4673_v25 = vmax.f32 %v4672_v54, %v4062_v30  ;;  %v4070_v16 = vmax.f32 %v3677_v51, 0.0  ;;  %v3330_v3 = vadd.f32 %v3329_v22, %v13724_v15  ;;  %v3331_v49 = vpop.f32.mrb[18].mxu0  ;;  %5976 = vmatprep.mubr.bf16.mxu1 %v15215_v43 }
 0x523   : > { %v4637_v24 = vmax.f32 %v4636_v33, %v4069_v61  ;;  %v4075_v26 = vmax.f32 %v3328_v48, 0.0  ;;  %v3332_v29 = vadd.f32 %v3331_v49, %v13719_v34  ;;  %v3333_v57 = vpop.f32.mrb[19].mxu0  ;;  %v15247_v49 = vld [vmem:[#allocation41_spill] sm:$0xff] }
 0x524   : > { %v4674_v8 = vmax.f32 %v4673_v25, %v4070_v16  ;;  %v4076_v11 = vmax.f32 %v3330_v3, 0.0  ;;  %v3334_v35 = vadd.f32 %v3333_v57, %v13724_v15  ;;  %v3680_v18 = vpop.f32.mrb[16].mxu1 }
 0x525   : > { %v4564_v37 = vmax.f32 %v4563_v31, %v4075_v26  ;;  %v4083_v38 = vmax.f32 %v3332_v29, 0.0  ;;  %v3681_v20 = vadd.f32 %v3680_v18, %v13730_v13  ;;  %v3682_v6 = vpop.f32.mrb[17].mxu1  ;;  %5624 = vmatmul.mubr.bf16.gmra.mrb[124].mxu0 %v15246_v42 }
 0x526   : > { %v4601_v40 = vmax.f32 %v4600_v62, %v4076_v11  ;;  %v4084_v44 = vmax.f32 %v3334_v35, 0.0  ;;  %v3683_v41 = vadd.f32 %v3682_v6, %v13735_v32  ;;  %v3684_v4 = vpop.f32.mrb[18].mxu1  ;;  %5633 = vmatprep.mubr.bf16.mxu0 %v15215_v43 }
 0x527   : > { %v4565_v52 = vmax.f32 %v4564_v37, %v4083_v38  ;;  %v4077_v54 = vmax.f32 %v3681_v20, 0.0  ;;  %v3685_v63 = vadd.f32 %v3684_v4, %v13730_v13  ;;  %v3686_v46 = vpop.f32.mrb[19].mxu1 }
 0x528   : > { %v4602_v47 = vmax.f32 %v4601_v40, %v4084_v44  ;;  %v4078_v7 = vmax.f32 %v3683_v41, 0.0  ;;  %v3687_v27 = vadd.f32 %v3686_v46, %v13735_v32  ;;  %v3337_v55 = vpop.f32.mrb[20].mxu0 }
 0x529   : > { %v4638_v56 = vmax.f32 %v4637_v24, %v4077_v54  ;;  %v4085_v10 = vmax.f32 %v3685_v63, 0.0  ;;  %v3338_v53 = vadd.f32 %v3337_v55, %v13719_v34  ;;  %v3339_v1 = vpop.f32.mrb[21].mxu0  ;;  %5977 = vmatmul.mubr.bf16.gmra.mrb[124].mxu1 %v15246_v42 }
 0x52a   : > { %v4675_v60 = vmax.f32 %v4674_v8, %v4078_v7  ;;  %v4086_v31 = vmax.f32 %v3687_v27, 0.0  ;;  %v3340_v21 = vadd.f32 %v3339_v1, %v13724_v15  ;;  %v3341_v45 = vpop.f32.mrb[22].mxu0  ;;  %5986 = vmatprep.mubr.bf16.mxu1 %v15215_v43 }
 0x52b   : > { %v4639_v19 = vmax.f32 %v4638_v56, %v4085_v10  ;;  %v4091_v62 = vmax.f32 %v3338_v53, 0.0  ;;  %v3342_v30 = vadd.f32 %v3341_v45, %v13719_v34  ;;  %v3343_v51 = vpop.f32.mrb[23].mxu0 }
 0x52c   : > { %v4676_v5 = vmax.f32 %v4675_v60, %v4086_v31  ;;  %v4092_v33 = vmax.f32 %v3340_v21, 0.0  ;;  %v3344_v61 = vadd.f32 %v3343_v51, %v13724_v15  ;;  %v3690_v48 = vpop.f32.mrb[20].mxu1  ;;  %v5146_v51 = vld [vmem:[#allocation12 + $0x198] sm:$0xff] }
 0x52d   : > { %v4566_v22 = vmax.f32 %v4565_v52, %v4091_v62  ;;  %v4099_v25 = vmax.f32 %v3342_v30, 0.0  ;;  %v3691_v16 = vadd.f32 %v3690_v48, %v13730_v13  ;;  %v3692_v3 = vpop.f32.mrb[21].mxu1  ;;  %5634 = vmatmul.mubr.bf16.gmra.mrb[128].mxu0 %v15247_v49  ;;  %v5145_v62 = vld [vmem:[#allocation12 + $0x190] sm:$0xff] }
 0x52e   : > { %v4603_v24 = vmax.f32 %v4602_v47, %v4092_v33  ;;  %v4100_v26 = vmax.f32 %v3344_v61, 0.0  ;;  %v3693_v29 = vadd.f32 %v3692_v3, %v13735_v32  ;;  %v3694_v57 = vpop.f32.mrb[22].mxu1  ;;  %5643 = vmatprep.mubr.bf16.mxu0 %v15215_v43  ;;  %v5149_v30 = vld [vmem:[#allocation12 + $0x1b0] sm:$0xff] }
 0x52f   : > { %v4567_v8 = vmax.f32 %v4566_v22, %v4099_v25  ;;  %v4093_v11 = vmax.f32 %v3691_v16, 0.0  ;;  %v3695_v35 = vadd.f32 %v3694_v57, %v13730_v13  ;;  %v3696_v18 = vpop.f32.mrb[23].mxu1  ;;  %v10596_v22 = vcombine.low %v5145_v62, %v5149_v30  ;;  %v5150_v25 = vld [vmem:[#allocation12 + $0x1b8] sm:$0xff] }
 0x530   : > { %v4604_v37 = vmax.f32 %v4603_v24, %v4100_v26  ;;  %v4094_v38 = vmax.f32 %v3693_v29, 0.0  ;;  %v3697_v20 = vadd.f32 %v3696_v18, %v13735_v32  ;;  %v3347_v6 = vpop.f32.mrb[24].mxu0  ;;  %v10597_v29 = vcombine.high %v5145_v62, %v5149_v30 }
 0x531   : > { %v4640_v40 = vmax.f32 %v4639_v19, %v4093_v11  ;;  %v4101_v44 = vmax.f32 %v3695_v35, 0.0  ;;  %v3348_v41 = vadd.f32 %v3347_v6, %v13719_v34  ;;  %v3349_v4 = vpop.f32.mrb[25].mxu0  ;;  %5987 = vmatmul.mubr.bf16.gmra.mrb[128].mxu1 %v15247_v49  ;;  %v15248_v19 = vld [vmem:[#allocation43_spill] sm:$0xff]  ;;  %v10598_v18 = vcombine.low %v5146_v51, %v5150_v25 }
 0x532   : > { %v4677_v52 = vmax.f32 %v4676_v5, %v4094_v38  ;;  %v4102_v54 = vmax.f32 %v3697_v20, 0.0  ;;  %v3350_v63 = vadd.f32 %v3349_v4, %v13724_v15  ;;  %v3351_v46 = vpop.f32.mrb[26].mxu0  ;;  %5996 = vmatprep.mubr.bf16.mxu1 %v15215_v43  ;;  %6239 = vmatprep.subr.bf16.mxu0 %v10597_v29 }
 0x533   : > { %v4641_v47 = vmax.f32 %v4640_v40, %v4101_v44  ;;  %v4107_v7 = vmax.f32 %v3348_v41, 0.0  ;;  %v3352_v27 = vadd.f32 %v3351_v46, %v13719_v34  ;;  %v3353_v55 = vpop.f32.mrb[27].mxu0  ;;  %v10599_v40 = vcombine.high %v5146_v51, %v5150_v25  ;;  %6240 = vmatpush1.bf16.msra.mxu0 %v10596_v22 }
 0x534   : > { %v4678_v56 = vmax.f32 %v4677_v52, %v4102_v54  ;;  %v4108_v10 = vmax.f32 %v3350_v63, 0.0  ;;  %v3354_v53 = vadd.f32 %v3353_v55, %v13724_v15  ;;  %v3700_v1 = vpop.f32.mrb[24].mxu1 }
 0x535   : > { %v4568_v60 = vmax.f32 %v4567_v8, %v4107_v7  ;;  %v4115_v31 = vmax.f32 %v3352_v27, 0.0  ;;  %v3701_v21 = vadd.f32 %v3700_v1, %v13730_v13  ;;  %v3702_v45 = vpop.f32.mrb[25].mxu1  ;;  %5644 = vmatmul.mubr.bf16.gmra.mrb[132].mxu0 %v15248_v19  ;;  %6592 = vmatprep.subr.bf16.mxu1 %v10599_v40 }
 0x536   : > { %v4605_v5 = vmax.f32 %v4604_v37, %v4108_v10  ;;  %v4116_v33 = vmax.f32 %v3354_v53, 0.0  ;;  %v3703_v61 = vadd.f32 %v3702_v45, %v13735_v32  ;;  %v3704_v48 = vpop.f32.mrb[26].mxu1  ;;  %5653 = vmatprep.mubr.bf16.mxu0 %v15215_v43  ;;  %6593 = vmatpush1.bf16.msra.mxu1 %v10598_v18 }
 0x537   : > { %v4569_v16 = vmax.f32 %v4568_v60, %v4115_v31  ;;  %v4109_v3 = vmax.f32 %v3701_v21, 0.0  ;;  %v3705_v24 = vadd.f32 %v3704_v48, %v13730_v13  ;;  %v3706_v26 = vpop.f32.mrb[27].mxu1  ;;  %v15249_v31 = vld [vmem:[#allocation45_spill] sm:$0xff] }
 0x538   : > { %v4606_v57 = vmax.f32 %v4605_v5, %v4116_v33  ;;  %v4110_v8 = vmax.f32 %v3703_v61, 0.0  ;;  %v3707_v11 = vadd.f32 %v3706_v26, %v13735_v32  ;;  %v3357_v35 = vpop.f32.mrb[28].mxu0 }
 0x539   : > { %v4642_v37 = vmax.f32 %v4641_v47, %v4109_v3  ;;  %v4117_v38 = vmax.f32 %v3705_v24, 0.0  ;;  %v3358_v20 = vadd.f32 %v3357_v35, %v13719_v34  ;;  %v3359_v6 = vpop.f32.mrb[29].mxu0  ;;  %5997 = vmatmul.mubr.bf16.gmra.mrb[132].mxu1 %v15248_v19 }
 0x53a   : > { %v4679_v44 = vmax.f32 %v4678_v56, %v4110_v8  ;;  %v4118_v41 = vmax.f32 %v3707_v11, 0.0  ;;  %v3360_v4 = vadd.f32 %v3359_v6, %v13724_v15  ;;  %v3361_v52 = vpop.f32.mrb[30].mxu0  ;;  %6006 = vmatprep.mubr.bf16.mxu1 %v15215_v43 }
 0x53b   : > { %v4643_v54 = vmax.f32 %v4642_v37, %v4117_v38  ;;  %v4123_v63 = vmax.f32 %v3358_v20, 0.0  ;;  %v3362_v46 = vadd.f32 %v3361_v52, %v13719_v34  ;;  %v3363_v47 = vpop.f32.mrb[31].mxu0 }
 0x53c   : > { %v4680_v7 = vmax.f32 %v4679_v44, %v4118_v41  ;;  %v4124_v27 = vmax.f32 %v3360_v4, 0.0  ;;  %v3364_v55 = vadd.f32 %v3363_v47, %v13724_v15  ;;  %v3710_v10 = vpop.f32.mrb[28].mxu1 }
 0x53d   : > { %v4570_v56 = vmax.f32 %v4569_v16, %v4123_v63  ;;  %v4131_v53 = vmax.f32 %v3362_v46, 0.0  ;;  %v3711_v1 = vadd.f32 %v3710_v10, %v13730_v13  ;;  %v3712_v60 = vpop.f32.mrb[29].mxu1  ;;  %5654 = vmatmul.mubr.bf16.gmra.mrb[136].mxu0 %v15249_v31  ;;  %v15250_v10 = vld [vmem:[#allocation47_spill] sm:$0xff] }
 0x53e   : > { %v4607_v21 = vmax.f32 %v4606_v57, %v4124_v27  ;;  %v4132_v45 = vmax.f32 %v3364_v55, 0.0  ;;  %v3713_v62 = vadd.f32 %v3712_v60, %v13735_v32  ;;  %v3714_v30 = vpop.f32.mrb[30].mxu1  ;;  %5663 = vmatprep.mubr.bf16.mxu0 %v15215_v43 }
 0x53f   : > { %v4571_v51 = vmax.f32 %v4570_v56, %v4131_v53  ;;  %v4125_v5 = vmax.f32 %v3711_v1, 0.0  ;;  %v3715_v33 = vadd.f32 %v3714_v30, %v13730_v13  ;;  %v3716_v61 = vpop.f32.mrb[31].mxu1 }
 0x540   : > { %v4608_v48 = vmax.f32 %v4607_v21, %v4132_v45  ;;  %v4126_v22 = vmax.f32 %v3713_v62, 0.0  ;;  %v3717_v25 = vadd.f32 %v3716_v61, %v13735_v32  ;;  %v3367_v16 = vpop.f32.mrb[32].mxu0 }
 0x541   : > { %v4572_v3 = vrot.slane %v4571_v51, 4  ;;  %v4644_v24 = vmax.f32 %v4643_v54, %v4125_v5  ;;  %v4133_v26 = vmax.f32 %v3715_v33, 0.0  ;;  %v3368_v29 = vadd.f32 %v3367_v16, %v13719_v34  ;;  %v3369_v57 = vpop.f32.mrb[33].mxu0  ;;  %6007 = vmatmul.mubr.bf16.gmra.mrb[136].mxu1 %v15249_v31 }
 0x542   : > { %v4609_v8 = vrot.slane %v4608_v48, 4  ;;  %v4681_v11 = vmax.f32 %v4680_v7, %v4126_v22  ;;  %v4134_v35 = vmax.f32 %v3717_v25, 0.0  ;;  %v3370_v18 = vadd.f32 %v3369_v57, %v13724_v15  ;;  %v3371_v37 = vpop.f32.mrb[34].mxu0  ;;  %6016 = vmatprep.mubr.bf16.mxu1 %v15215_v43 }
 0x543   : > { %v4573_v38 = vmax.f32 %v4571_v51, %v4572_v3  ;;  %v4645_v20 = vmax.f32 %v4644_v24, %v4133_v26  ;;  %v4139_v6 = vmax.f32 %v3368_v29, 0.0  ;;  %v3372_v40 = vadd.f32 %v3371_v37, %v13719_v34  ;;  %v3373_v44 = vpop.f32.mrb[35].mxu0 }
 0x544   : > { %v4610_v41 = vmax.f32 %v4608_v48, %v4609_v8  ;;  %v4682_v4 = vmax.f32 %v4681_v11, %v4134_v35  ;;  %v4140_v52 = vmax.f32 %v3370_v18, 0.0  ;;  %v3374_v54 = vadd.f32 %v3373_v44, %v13724_v15  ;;  %v3720_v63 = vpop.f32.mrb[32].mxu1 }
 0x545   : > { %v4574_v46 = vrot.slane %v4573_v38, 2  ;;  %v4646_v47 = vrot.slane %v4645_v20, 4  ;;  %v4147_v7 = vmax.f32 %v3372_v40, 0.0  ;;  %v3721_v27 = vadd.f32 %v3720_v63, %v13730_v13  ;;  %v3722_v55 = vpop.f32.mrb[33].mxu1  ;;  %5664 = vmatmul.mubr.bf16.gmra.mrb[140].mxu0 %v15250_v10 }
 0x546   : > { %v4611_v56 = vrot.slane %v4610_v41, 2  ;;  %v4683_v53 = vrot.slane %v4682_v4, 4  ;;  %v4148_v1 = vmax.f32 %v3374_v54, 0.0  ;;  %v3723_v60 = vadd.f32 %v3722_v55, %v13735_v32  ;;  %v3724_v21 = vpop.f32.mrb[34].mxu1  ;;  %5673 = vmatprep.mubr.bf16.mxu0 %v15215_v43  ;;  %v15251_v55 = vld [vmem:[#allocation48_spill] sm:$0xff] }
 0x547   : > { %v4575_v45 = vmax.f32 %v4573_v38, %v4574_v46  ;;  %v4647_v62 = vmax.f32 %v4645_v20, %v4646_v47  ;;  %v4837_v30 = vmax.f32 %v4139_v6, %v4147_v7  ;;  %v4141_v51 = vmax.f32 %v3721_v27, 0.0  ;;  %v3726_v5 = vpop.f32.mrb[35].mxu1 }
 0x548   : > { %v4612_v33 = vmax.f32 %v4610_v41, %v4611_v56  ;;  %v4684_v61 = vmax.f32 %v4682_v4, %v4683_v53  ;;  %v4874_v48 = vmax.f32 %v4140_v52, %v4148_v1  ;;  %v4142_v22 = vmax.f32 %v3723_v60, 0.0  ;;  %v3377_v25 = vpop.f32.mrb[36].mxu0 }
 0x549   : > { %v4576_v16 = vrot.slane %v4575_v45, 1  ;;  %v4648_v3 = vrot.slane %v4647_v62, 2  ;;  %v3725_v24 = vadd.f32 %v3724_v21, %v13730_v13  ;;  %v3727_v26 = vadd.f32 %v3726_v5, %v13735_v32  ;;  %v3379_v29 = vpop.f32.mrb[37].mxu0  ;;  %6017 = vmatmul.mubr.bf16.gmra.mrb[140].mxu1 %v15250_v10 }
 0x54a   : > { %v4613_v57 = vrot.slane %v4612_v33, 1  ;;  %v4685_v8 = vrot.slane %v4684_v61, 2  ;;  %v3378_v11 = vadd.f32 %v3377_v25, %v13719_v34  ;;  %v3380_v35 = vadd.f32 %v3379_v29, %v13724_v15  ;;  %v3381_v18 = vpop.f32.mrb[38].mxu0  ;;  %6026 = vmatprep.mubr.bf16.mxu1 %v15215_v43 }
 0x54b   : > { %v4577_v37 = vmax.f32 %v4575_v45, %v4576_v16  ;;  %v4649_v38 = vmax.f32 %v4647_v62, %v4648_v3  ;;  %v4149_v20 = vmax.f32 %v3725_v24, 0.0  ;;  %v4150_v6 = vmax.f32 %v3727_v26, 0.0  ;;  %v3383_v40 = vpop.f32.mrb[39].mxu0 }
 0x54c   : > { %v4614_v44 = vmax.f32 %v4612_v33, %v4613_v57  ;;  %v4686_v41 = vmax.f32 %v4684_v61, %v4685_v8  ;;  %v4155_v4 = vmax.f32 %v3378_v11, 0.0  ;;  %v4156_v52 = vmax.f32 %v3380_v35, 0.0  ;;  %v3730_v54 = vpop.f32.mrb[36].mxu1 }
 0x54d   : > { %v4650_v63 = vrot.slane %v4649_v38, 1  ;;  %v4911_v46 = vmax.f32 %v4141_v51, %v4149_v20  ;;  %v4948_v47 = vmax.f32 %v4142_v22, %v4150_v6  ;;  %v3382_v7 = vadd.f32 %v3381_v18, %v13719_v34  ;;  %v3732_v27 = vpop.f32.mrb[37].mxu1  ;;  %5674 = vmatmul.mubr.bf16.gmra.mrb[144].mxu0 %v15251_v55 }
 0x54e   : > { %v5018_v56 = vcombine.low %v4577_v37, %v4614_v44  ;;  %v4687_v53 = vrot.slane %v4686_v41, 1  ;;  %v4838_v1 = vmax.f32 %v4837_v30, %v4155_v4  ;;  %v4875_v60 = vmax.f32 %v4874_v48, %v4156_v52  ;;  %v3734_v21 = vpop.f32.mrb[38].mxu1  ;;  %5683 = vmatprep.mubr.bf16.mxu0 %v15215_v43 }
 0x54f   : > { %v4651_v45 = vmax.f32 %v4649_v38, %v4650_v63  ;;  %v4163_v62 = vmax.f32 %v3382_v7, 0.0  ;;  %v3384_v5 = vadd.f32 %v3383_v40, %v13724_v15  ;;  %v3731_v33 = vadd.f32 %v3730_v54, %v13730_v13  ;;  %v3736_v51 = vpop.f32.mrb[39].mxu1 }
 0x550   : > { %v14022_v61 = vrot.slane %v5018_v56, %v13495_v23  ;;  %v4688_v22 = vmax.f32 %v4686_v41, %v4687_v53  ;;  %v3733_v25 = vadd.f32 %v3732_v27, %v13735_v32  ;;  %v3735_v16 = vadd.f32 %v3734_v21, %v13730_v13  ;;  %v3387_v30 = vpop.f32.mrb[40].mxu0 }
 0x551   : > { %v4839_v48 = vmax.f32 %v4838_v1, %v4163_v62  ;;  %v4164_v3 = vmax.f32 %v3384_v5, 0.0  ;;  %v4157_v24 = vmax.f32 %v3731_v33, 0.0  ;;  %v3737_v26 = vadd.f32 %v3736_v51, %v13735_v32  ;;  %v3389_v29 = vpop.f32.mrb[41].mxu0  ;;  %6027 = vmatmul.mubr.bf16.gmra.mrb[144].mxu1 %v15251_v55 }
 0x552   : > { %v5019_v57 = vcombine.low %v4651_v45, %v4688_v22  ;;  %v4158_v8 = vmax.f32 %v3733_v25, 0.0  ;;  %v4165_v11 = vmax.f32 %v3735_v16, 0.0  ;;  %v3388_v35 = vadd.f32 %v3387_v30, %v13719_v34  ;;  %v3391_v18 = vpop.f32.mrb[42].mxu0  ;;  %6036 = vmatprep.mubr.bf16.mxu1 %v15215_v43 }
 0x553   : > { %v4876_v37 = vmax.f32 %v4875_v60, %v4164_v3  ;;  %v4912_v38 = vmax.f32 %v4911_v46, %v4157_v24  ;;  %v4166_v20 = vmax.f32 %v3737_v26, 0.0  ;;  %v3390_v6 = vadd.f32 %v3389_v29, %v13724_v15  ;;  %v3393_v40 = vpop.f32.mrb[43].mxu0  ;;  %v15252_v46 = vld [vmem:[#allocation49_spill] sm:$0xff] }
 0x554   : > { %v14032_v44 = vrot.slane %v5019_v57, %v13495_v23  ;;  %v4949_v41 = vmax.f32 %v4948_v47, %v4158_v8  ;;  %v4171_v4 = vmax.f32 %v3388_v35, 0.0  ;;  %v3392_v52 = vadd.f32 %v3391_v18, %v13719_v34  ;;  %v3740_v54 = vpop.f32.mrb[40].mxu1 }
 0x555   : > { %v4913_v63 = vmax.f32 %v4912_v38, %v4165_v11  ;;  %v4172_v7 = vmax.f32 %v3390_v6, 0.0  ;;  %v3394_v27 = vadd.f32 %v3393_v40, %v13724_v15  ;;  %v3741_v56 = vadd.f32 %v3740_v54, %v13730_v13  ;;  %v3742_v53 = vpop.f32.mrb[41].mxu1  ;;  %5684 = vmatmul.mubr.bf16.gmra.mrb[148].mxu0 %v15252_v46 }
 0x556   : > { %v4950_v60 = vmax.f32 %v4949_v41, %v4166_v20  ;;  %v4840_v21 = vmax.f32 %v4839_v48, %v4171_v4  ;;  %v4179_v45 = vmax.f32 %v3392_v52, 0.0  ;;  %v3744_v47 = vpop.f32.mrb[42].mxu1  ;;  %5693 = vmatprep.mubr.bf16.mxu0 %v15215_v43  ;;  %v3743_v51 = vadd.f32 %v3742_v53, %v13735_v32  ;;  %v15253_v53 = vld [vmem:[#allocation50_spill] sm:$0xff] }
 0x557   : > { %v4877_v62 = vmax.f32 %v4876_v37, %v4172_v7  ;;  %v4180_v5 = vmax.f32 %v3394_v27, 0.0  ;;  %v4173_v33 = vmax.f32 %v3741_v56, 0.0  ;;  %v3746_v22 = vpop.f32.mrb[43].mxu1  ;;  %v3745_v16 = vadd.f32 %v3744_v47, %v13730_v13 }
 0x558   : > { %v4841_v25 = vmax.f32 %v4840_v21, %v4179_v45  ;;  %v3747_v30 = vadd.f32 %v3746_v22, %v13735_v32  ;;  %v3397_v3 = vpop.f32.mrb[44].mxu0  ;;  %v4174_v29 = vmax.f32 %v3743_v51, 0.0 }
 0x559   : > { %v4878_v24 = vmax.f32 %v4877_v62, %v4180_v5  ;;  %v4914_v26 = vmax.f32 %v4913_v63, %v4173_v33  ;;  %v3398_v48 = vadd.f32 %v3397_v3, %v13719_v34  ;;  %v3399_v57 = vpop.f32.mrb[45].mxu0  ;;  %6037 = vmatmul.mubr.bf16.gmra.mrb[148].mxu1 %v15252_v46  ;;  %v4181_v8 = vmax.f32 %v3745_v16, 0.0  ;;  %v5153_v3 = vld [vmem:[#allocation12 + $0x1d0] sm:$0xff] }
 0x55a   : > { %v4182_v11 = vmax.f32 %v3747_v30, 0.0  ;;  %v3400_v35 = vadd.f32 %v3399_v57, %v13724_v15  ;;  %v3401_v18 = vpop.f32.mrb[46].mxu0  ;;  %6046 = vmatprep.mubr.bf16.mxu1 %v15215_v43  ;;  %v4951_v37 = vmax.f32 %v4950_v60, %v4174_v29  ;;  %v5154_v29 = vld [vmem:[#allocation12 + $0x1d8] sm:$0xff] }
 0x55b   : > { %v4187_v38 = vmax.f32 %v3398_v48, 0.0  ;;  %v3402_v20 = vadd.f32 %v3401_v18, %v13719_v34  ;;  %v3403_v6 = vpop.f32.mrb[47].mxu0  ;;  %v4915_v40 = vmax.f32 %v4914_v26, %v4181_v8  ;;  %v5157_v26 = vld [vmem:[#allocation12 + $0x1f0] sm:$0xff] }
 0x55c   : > { %v4188_v41 = vmax.f32 %v3400_v35, 0.0  ;;  %v3404_v4 = vadd.f32 %v3403_v6, %v13724_v15  ;;  %v3750_v52 = vpop.f32.mrb[44].mxu1  ;;  %v4952_v54 = vmax.f32 %v4951_v37, %v4182_v11  ;;  %v10604_v11 = vcombine.low %v5153_v3, %v5157_v26  ;;  %v5158_v35 = vld [vmem:[#allocation12 + $0x1f8] sm:$0xff] }
 0x55d   : > { %v4842_v63 = vmax.f32 %v4841_v25, %v4187_v38  ;;  %v4195_v7 = vmax.f32 %v3402_v20, 0.0  ;;  %v3751_v27 = vadd.f32 %v3750_v52, %v13730_v13  ;;  %v3752_v56 = vpop.f32.mrb[45].mxu1  ;;  %5694 = vmatmul.mubr.bf16.gmra.mrb[152].mxu0 %v15253_v53  ;;  %v10605_v6 = vcombine.high %v5153_v3, %v5157_v26 }
 0x55e   : > { %v4879_v21 = vmax.f32 %v4878_v24, %v4188_v41  ;;  %v4196_v45 = vmax.f32 %v3404_v4, 0.0  ;;  %v3753_v60 = vadd.f32 %v3752_v56, %v13735_v32  ;;  %v3754_v47 = vpop.f32.mrb[46].mxu1  ;;  %5703 = vmatprep.mubr.bf16.mxu0 %v15215_v43 }
 0x55f   : > { %v4843_v62 = vmax.f32 %v4842_v63, %v4195_v7  ;;  %v4189_v5 = vmax.f32 %v3751_v27, 0.0  ;;  %v3755_v33 = vadd.f32 %v3754_v47, %v13730_v13  ;;  %v3756_v51 = vpop.f32.mrb[47].mxu1  ;;  %v10606_v63 = vcombine.low %v5154_v29, %v5158_v35  ;;  %6241 = vmatprep.subr.bf16.mxu0 %v10605_v6 }
 0x560   : > { %v4880_v22 = vmax.f32 %v4879_v21, %v4196_v45  ;;  %v4190_v25 = vmax.f32 %v3753_v60, 0.0  ;;  %v3757_v16 = vadd.f32 %v3756_v51, %v13735_v32  ;;  %v3407_v30 = vpop.f32.mrb[48].mxu0  ;;  %6242 = vmatpush1.bf16.msra.mxu0 %v10604_v11 }
 0x561   : > { %v4916_v24 = vmax.f32 %v4915_v40, %v4189_v5  ;;  %v4197_v48 = vmax.f32 %v3755_v33, 0.0  ;;  %v3408_v57 = vadd.f32 %v3407_v30, %v13719_v34  ;;  %v3409_v8 = vpop.f32.mrb[49].mxu0  ;;  %6047 = vmatmul.mubr.bf16.gmra.mrb[152].mxu1 %v15253_v53  ;;  %v15254_v33 = vld [vmem:[#allocation51_spill] sm:$0xff] }
 0x562   : > { %v4953_v18 = vmax.f32 %v4952_v54, %v4190_v25  ;;  %v4198_v37 = vmax.f32 %v3757_v16, 0.0  ;;  %v3410_v38 = vadd.f32 %v3409_v8, %v13724_v15  ;;  %v3411_v20 = vpop.f32.mrb[50].mxu0  ;;  %6056 = vmatprep.mubr.bf16.mxu1 %v15215_v43  ;;  %v10607_v54 = vcombine.high %v5154_v29, %v5158_v35 }
 0x563   : > { %v4917_v41 = vmax.f32 %v4916_v24, %v4197_v48  ;;  %v4203_v4 = vmax.f32 %v3408_v57, 0.0  ;;  %v3412_v40 = vadd.f32 %v3411_v20, %v13719_v34  ;;  %v3413_v52 = vpop.f32.mrb[51].mxu0 }
 0x564   : > { %v4954_v7 = vmax.f32 %v4953_v18, %v4198_v37  ;;  %v4204_v27 = vmax.f32 %v3410_v38, 0.0  ;;  %v3414_v56 = vadd.f32 %v3413_v52, %v13724_v15  ;;  %v3760_v21 = vpop.f32.mrb[48].mxu1  ;;  %6594 = vmatprep.subr.bf16.mxu1 %v10607_v54 }
 0x565   : > { %v4844_v45 = vmax.f32 %v4843_v62, %v4203_v4  ;;  %v4211_v60 = vmax.f32 %v3412_v40, 0.0  ;;  %v3761_v47 = vadd.f32 %v3760_v21, %v13730_v13  ;;  %v3762_v5 = vpop.f32.mrb[49].mxu1  ;;  %5704 = vmatmul.mubr.bf16.gmra.mrb[156].mxu0 %v15254_v33  ;;  %6595 = vmatpush1.bf16.msra.mxu1 %v10606_v63 }
 0x566   : > { %v4881_v51 = vmax.f32 %v4880_v22, %v4204_v27  ;;  %v4212_v25 = vmax.f32 %v3414_v56, 0.0  ;;  %v3763_v16 = vadd.f32 %v3762_v5, %v13735_v32  ;;  %v3764_v30 = vpop.f32.mrb[50].mxu1  ;;  %5713 = vmatprep.mubr.bf16.mxu0 %v15215_v43 }
 0x567   : > { %v4845_v3 = vmax.f32 %v4844_v45, %v4211_v60  ;;  %v4205_v26 = vmax.f32 %v3761_v47, 0.0  ;;  %v3765_v24 = vadd.f32 %v3764_v30, %v13730_v13  ;;  %v3766_v29 = vpop.f32.mrb[51].mxu1  ;;  %v15255_v47 = vld [vmem:[#allocation52_spill] sm:$0xff] }
 0x568   : > { %v4882_v62 = vmax.f32 %v4881_v51, %v4212_v25  ;;  %v4206_v48 = vmax.f32 %v3763_v16, 0.0  ;;  %v3767_v57 = vadd.f32 %v3766_v29, %v13735_v32  ;;  %v3417_v8 = vpop.f32.mrb[52].mxu0 }
 0x569   : > { %v4918_v22 = vmax.f32 %v4917_v41, %v4205_v26  ;;  %v4213_v35 = vmax.f32 %v3765_v24, 0.0  ;;  %v3418_v18 = vadd.f32 %v3417_v8, %v13719_v34  ;;  %v3419_v37 = vpop.f32.mrb[53].mxu0  ;;  %6057 = vmatmul.mubr.bf16.gmra.mrb[156].mxu1 %v15254_v33 }
 0x56a   : > { %v4955_v38 = vmax.f32 %v4954_v7, %v4206_v48  ;;  %v4214_v20 = vmax.f32 %v3767_v57, 0.0  ;;  %v3420_v6 = vadd.f32 %v3419_v37, %v13724_v15  ;;  %v3421_v4 = vpop.f32.mrb[54].mxu0  ;;  %6066 = vmatprep.mubr.bf16.mxu1 %v15215_v43 }
 0x56b   : > { %v4919_v11 = vmax.f32 %v4918_v22, %v4213_v35  ;;  %v4219_v40 = vmax.f32 %v3418_v18, 0.0  ;;  %v3422_v52 = vadd.f32 %v3421_v4, %v13719_v34  ;;  %v3423_v63 = vpop.f32.mrb[55].mxu0 }
 0x56c   : > { %v4956_v27 = vmax.f32 %v4955_v38, %v4214_v20  ;;  %v4220_v41 = vmax.f32 %v3420_v6, 0.0  ;;  %v3424_v56 = vadd.f32 %v3423_v63, %v13724_v15  ;;  %v3770_v21 = vpop.f32.mrb[52].mxu1 }
 0x56d   : > { %v4846_v54 = vmax.f32 %v4845_v3, %v4219_v40  ;;  %v4227_v45 = vmax.f32 %v3422_v52, 0.0  ;;  %v3771_v7 = vadd.f32 %v3770_v21, %v13730_v13  ;;  %v3772_v60 = vpop.f32.mrb[53].mxu1  ;;  %5714 = vmatmul.mubr.bf16.gmra.mrb[160].mxu0 %v15255_v47 }
 0x56e   : > { %v4883_v5 = vmax.f32 %v4882_v62, %v4220_v41  ;;  %v4228_v51 = vmax.f32 %v3424_v56, 0.0  ;;  %v3773_v25 = vadd.f32 %v3772_v60, %v13735_v32  ;;  %v3774_v16 = vpop.f32.mrb[54].mxu1  ;;  %5723 = vmatprep.mubr.bf16.mxu0 %v15215_v43  ;;  %v15256_v60 = vld [vmem:[#allocation53_spill] sm:$0xff] }
 0x56f   : > { %v4847_v30 = vmax.f32 %v4846_v54, %v4227_v45  ;;  %v4221_v26 = vmax.f32 %v3771_v7, 0.0  ;;  %v3775_v24 = vadd.f32 %v3774_v16, %v13730_v13  ;;  %v3776_v29 = vpop.f32.mrb[55].mxu1 }
 0x570   : > { %v4884_v48 = vmax.f32 %v4883_v5, %v4228_v51  ;;  %v4222_v3 = vmax.f32 %v3773_v25, 0.0  ;;  %v3777_v57 = vadd.f32 %v3776_v29, %v13735_v32  ;;  %v3427_v8 = vpop.f32.mrb[56].mxu0 }
 0x571   : > { %v4920_v22 = vmax.f32 %v4919_v11, %v4221_v26  ;;  %v4229_v35 = vmax.f32 %v3775_v24, 0.0  ;;  %v3428_v62 = vadd.f32 %v3427_v8, %v13719_v34  ;;  %v3429_v18 = vpop.f32.mrb[57].mxu0  ;;  %6067 = vmatmul.mubr.bf16.gmra.mrb[160].mxu1 %v15255_v47 }
 0x572   : > { %v4957_v37 = vmax.f32 %v4956_v27, %v4222_v3  ;;  %v4230_v38 = vmax.f32 %v3777_v57, 0.0  ;;  %v3430_v20 = vadd.f32 %v3429_v18, %v13724_v15  ;;  %v3431_v6 = vpop.f32.mrb[58].mxu0  ;;  %6076 = vmatprep.mubr.bf16.mxu1 %v15215_v43 }
 0x573   : > { %v4921_v4 = vmax.f32 %v4920_v22, %v4229_v35  ;;  %v4235_v40 = vmax.f32 %v3428_v62, 0.0  ;;  %v3432_v52 = vadd.f32 %v3431_v6, %v13719_v34  ;;  %v3433_v63 = vpop.f32.mrb[59].mxu0 }
 0x574   : > { %v4958_v41 = vmax.f32 %v4957_v37, %v4230_v38  ;;  %v4236_v11 = vmax.f32 %v3430_v20, 0.0  ;;  %v3434_v56 = vadd.f32 %v3433_v63, %v13724_v15  ;;  %v3780_v21 = vpop.f32.mrb[56].mxu1 }
 0x575   : > { %v4848_v54 = vmax.f32 %v4847_v30, %v4235_v40  ;;  %v4243_v45 = vmax.f32 %v3432_v52, 0.0  ;;  %v3781_v27 = vadd.f32 %v3780_v21, %v13730_v13  ;;  %v3782_v7 = vpop.f32.mrb[57].mxu1  ;;  %5724 = vmatmul.mubr.bf16.gmra.mrb[164].mxu0 %v15256_v60 }
 0x576   : > { %v4885_v5 = vmax.f32 %v4884_v48, %v4236_v11  ;;  %v4244_v51 = vmax.f32 %v3434_v56, 0.0  ;;  %v3783_v25 = vadd.f32 %v3782_v7, %v13735_v32  ;;  %v3784_v16 = vpop.f32.mrb[58].mxu1  ;;  %5733 = vmatprep.mubr.bf16.mxu0 %v15215_v43 }
 0x577   : > { %v4849_v26 = vmax.f32 %v4848_v54, %v4243_v45  ;;  %v4237_v24 = vmax.f32 %v3781_v27, 0.0  ;;  %v3785_v29 = vadd.f32 %v3784_v16, %v13730_v13  ;;  %v3786_v3 = vpop.f32.mrb[59].mxu1 }
 0x578   : > { %v4886_v57 = vmax.f32 %v4885_v5, %v4244_v51  ;;  %v4238_v30 = vmax.f32 %v3783_v25, 0.0  ;;  %v3787_v8 = vadd.f32 %v3786_v3, %v13735_v32  ;;  %v3437_v22 = vpop.f32.mrb[60].mxu0  ;;  %v15257_v5 = vld [vmem:[#allocation54_spill] sm:$0xff] }
 0x579   : > { %v4922_v35 = vmax.f32 %v4921_v4, %v4237_v24  ;;  %v4245_v62 = vmax.f32 %v3785_v29, 0.0  ;;  %v3438_v48 = vadd.f32 %v3437_v22, %v13719_v34  ;;  %v3439_v18 = vpop.f32.mrb[61].mxu0  ;;  %6077 = vmatmul.mubr.bf16.gmra.mrb[164].mxu1 %v15256_v60 }
 0x57a   : > { %v4959_v37 = vmax.f32 %v4958_v41, %v4238_v30  ;;  %v4246_v38 = vmax.f32 %v3787_v8, 0.0  ;;  %v3440_v20 = vadd.f32 %v3439_v18, %v13724_v15  ;;  %v3441_v6 = vpop.f32.mrb[62].mxu0  ;;  %6086 = vmatprep.mubr.bf16.mxu1 %v15215_v43 }
 0x57b   : > { %v4923_v40 = vmax.f32 %v4922_v35, %v4245_v62  ;;  %v4251_v52 = vmax.f32 %v3438_v48, 0.0  ;;  %v3442_v63 = vadd.f32 %v3441_v6, %v13719_v34  ;;  %v3443_v11 = vpop.f32.mrb[63].mxu0 }
 0x57c   : > { %v4960_v56 = vmax.f32 %v4959_v37, %v4246_v38  ;;  %v4252_v4 = vmax.f32 %v3440_v20, 0.0  ;;  %v3444_v21 = vadd.f32 %v3443_v11, %v13724_v15  ;;  %v3790_v54 = vpop.f32.mrb[60].mxu1 }
 0x57d   : > { %v4850_v45 = vmax.f32 %v4849_v26, %v4251_v52  ;;  %v4259_v27 = vmax.f32 %v3442_v63, 0.0  ;;  %v3791_v41 = vadd.f32 %v3790_v54, %v13730_v13  ;;  %v3792_v7 = vpop.f32.mrb[61].mxu1  ;;  %5734 = vmatmul.mubr.bf16.gmra.mrb[168].mxu0 %v15257_v5 }
 0x57e   : > { %v4887_v51 = vmax.f32 %v4886_v57, %v4252_v4  ;;  %v4260_v25 = vmax.f32 %v3444_v21, 0.0  ;;  %v3793_v16 = vadd.f32 %v3792_v7, %v13735_v32  ;;  %v3794_v24 = vpop.f32.mrb[62].mxu1  ;;  %5743 = vmatprep.mubr.bf16.mxu0 %v15215_v43 }
 0x57f   : > { %v4851_v29 = vmax.f32 %v4850_v45, %v4259_v27  ;;  %v4253_v3 = vmax.f32 %v3791_v41, 0.0  ;;  %v3795_v30 = vadd.f32 %v3794_v24, %v13730_v13  ;;  %v3796_v8 = vpop.f32.mrb[63].mxu1 }
 0x580   : > { %v4888_v22 = vmax.f32 %v4887_v51, %v4260_v25  ;;  %v4254_v26 = vmax.f32 %v3793_v16, 0.0  ;;  %v3797_v35 = vadd.f32 %v3796_v8, %v13735_v32  ;;  %v3447_v62 = vpop.f32.mrb[64].mxu0  ;;  %v15258_v25 = vld [vmem:[#allocation55_spill] sm:$0xff] }
 0x581   : > { %v4924_v48 = vmax.f32 %v4923_v40, %v4253_v3  ;;  %v4261_v18 = vmax.f32 %v3795_v30, 0.0  ;;  %v3448_v57 = vadd.f32 %v3447_v62, %v13719_v34  ;;  %v3449_v37 = vpop.f32.mrb[65].mxu0  ;;  %6087 = vmatmul.mubr.bf16.gmra.mrb[168].mxu1 %v15257_v5 }
 0x582   : > { %v4961_v38 = vmax.f32 %v4960_v56, %v4254_v26  ;;  %v4262_v20 = vmax.f32 %v3797_v35, 0.0  ;;  %v3450_v6 = vadd.f32 %v3449_v37, %v13724_v15  ;;  %v3451_v52 = vpop.f32.mrb[66].mxu0  ;;  %6096 = vmatprep.mubr.bf16.mxu1 %v15215_v43 }
 0x583   : > { %v4925_v63 = vmax.f32 %v4924_v48, %v4261_v18  ;;  %v4267_v11 = vmax.f32 %v3448_v57, 0.0  ;;  %v3452_v4 = vadd.f32 %v3451_v52, %v13719_v34  ;;  %v3453_v21 = vpop.f32.mrb[67].mxu0 }
 0x584   : > { %v4962_v54 = vmax.f32 %v4961_v38, %v4262_v20  ;;  %v4268_v40 = vmax.f32 %v3450_v6, 0.0  ;;  %v3454_v45 = vadd.f32 %v3453_v21, %v13724_v15  ;;  %v3800_v27 = vpop.f32.mrb[64].mxu1 }
 0x585   : > { %v4852_v41 = vmax.f32 %v4851_v29, %v4267_v11  ;;  %v4275_v7 = vmax.f32 %v3452_v4, 0.0  ;;  %v3801_v56 = vadd.f32 %v3800_v27, %v13730_v13  ;;  %v3802_v51 = vpop.f32.mrb[65].mxu1  ;;  %5744 = vmatmul.mubr.bf16.gmra.mrb[172].mxu0 %v15258_v25 }
 0x586   : > { %v4889_v16 = vmax.f32 %v4888_v22, %v4268_v40  ;;  %v4276_v24 = vmax.f32 %v3454_v45, 0.0  ;;  %v3803_v3 = vadd.f32 %v3802_v51, %v13735_v32  ;;  %v3804_v30 = vpop.f32.mrb[66].mxu1  ;;  %5753 = vmatprep.mubr.bf16.mxu0 %v15215_v43 }
 0x587   : > { %v4853_v8 = vmax.f32 %v4852_v41, %v4275_v7  ;;  %v4269_v26 = vmax.f32 %v3801_v56, 0.0  ;;  %v3805_v35 = vadd.f32 %v3804_v30, %v13730_v13  ;;  %v3806_v62 = vpop.f32.mrb[67].mxu1 }
 0x588   : > { %v4890_v48 = vmax.f32 %v4889_v16, %v4276_v24  ;;  %v4270_v29 = vmax.f32 %v3803_v3, 0.0  ;;  %v3807_v18 = vadd.f32 %v3806_v62, %v13735_v32  ;;  %v3457_v57 = vpop.f32.mrb[68].mxu0  ;;  %v15259_v3 = vld [vmem:[#allocation56_spill] sm:$0xff] }
 0x589   : > { %v4926_v37 = vmax.f32 %v4925_v63, %v4269_v26  ;;  %v4277_v38 = vmax.f32 %v3805_v35, 0.0  ;;  %v3458_v22 = vadd.f32 %v3457_v57, %v13719_v34  ;;  %v3459_v20 = vpop.f32.mrb[69].mxu0  ;;  %6097 = vmatmul.mubr.bf16.gmra.mrb[172].mxu1 %v15258_v25 }
 0x58a   : > { %v4963_v6 = vmax.f32 %v4962_v54, %v4270_v29  ;;  %v4278_v52 = vmax.f32 %v3807_v18, 0.0  ;;  %v3460_v11 = vadd.f32 %v3459_v20, %v13724_v15  ;;  %v3461_v4 = vpop.f32.mrb[70].mxu0  ;;  %6106 = vmatprep.mubr.bf16.mxu1 %v15215_v43 }
 0x58b   : > { %v4927_v21 = vmax.f32 %v4926_v37, %v4277_v38  ;;  %v4283_v40 = vmax.f32 %v3458_v22, 0.0  ;;  %v3462_v45 = vadd.f32 %v3461_v4, %v13719_v34  ;;  %v3463_v27 = vpop.f32.mrb[71].mxu0 }
 0x58c   : > { %v4964_v41 = vmax.f32 %v4963_v6, %v4278_v52  ;;  %v4284_v63 = vmax.f32 %v3460_v11, 0.0  ;;  %v3464_v7 = vadd.f32 %v3463_v27, %v13724_v15  ;;  %v3810_v56 = vpop.f32.mrb[68].mxu1 }
 0x58d   : > { %v4854_v51 = vmax.f32 %v4853_v8, %v4283_v40  ;;  %v4291_v16 = vmax.f32 %v3462_v45, 0.0  ;;  %v3811_v54 = vadd.f32 %v3810_v56, %v13730_v13  ;;  %v3812_v24 = vpop.f32.mrb[69].mxu1  ;;  %5754 = vmatmul.mubr.bf16.gmra.mrb[176].mxu0 %v15259_v3 }
 0x58e   : > { %v4891_v30 = vmax.f32 %v4890_v48, %v4284_v63  ;;  %v4292_v26 = vmax.f32 %v3464_v7, 0.0  ;;  %v3813_v35 = vadd.f32 %v3812_v24, %v13735_v32  ;;  %v3814_v62 = vpop.f32.mrb[70].mxu1  ;;  %5763 = vmatprep.mubr.bf16.mxu0 %v15215_v43 }
 0x58f   : > { %v4855_v29 = vmax.f32 %v4854_v51, %v4291_v16  ;;  %v4285_v18 = vmax.f32 %v3811_v54, 0.0  ;;  %v3815_v57 = vadd.f32 %v3814_v62, %v13730_v13  ;;  %v3816_v37 = vpop.f32.mrb[71].mxu1  ;;  %v15260_v62 = vld [vmem:[#allocation57_spill] sm:$0xff] }
 0x590   : > { %v4892_v38 = vmax.f32 %v4891_v30, %v4292_v26  ;;  %v4286_v8 = vmax.f32 %v3813_v35, 0.0  ;;  %v3817_v22 = vadd.f32 %v3816_v37, %v13735_v32  ;;  %v3467_v20 = vpop.f32.mrb[72].mxu0 }
 0x591   : > { %v4928_v6 = vmax.f32 %v4927_v21, %v4285_v18  ;;  %v4293_v52 = vmax.f32 %v3815_v57, 0.0  ;;  %v3468_v48 = vadd.f32 %v3467_v20, %v13719_v34  ;;  %v3469_v11 = vpop.f32.mrb[73].mxu0  ;;  %6107 = vmatmul.mubr.bf16.gmra.mrb[176].mxu1 %v15259_v3 }
 0x592   : > { %v4965_v4 = vmax.f32 %v4964_v41, %v4286_v8  ;;  %v4294_v40 = vmax.f32 %v3817_v22, 0.0  ;;  %v3470_v45 = vadd.f32 %v3469_v11, %v13724_v15  ;;  %v3471_v27 = vpop.f32.mrb[74].mxu0  ;;  %6116 = vmatprep.mubr.bf16.mxu1 %v15215_v43 }
 0x593   : > { %v4929_v63 = vmax.f32 %v4928_v6, %v4293_v52  ;;  %v4299_v7 = vmax.f32 %v3468_v48, 0.0  ;;  %v3472_v56 = vadd.f32 %v3471_v27, %v13719_v34  ;;  %v3473_v51 = vpop.f32.mrb[75].mxu0 }
 0x594   : > { %v4966_v16 = vmax.f32 %v4965_v4, %v4294_v40  ;;  %v4300_v21 = vmax.f32 %v3470_v45, 0.0  ;;  %v3474_v54 = vadd.f32 %v3473_v51, %v13724_v15  ;;  %v3820_v24 = vpop.f32.mrb[72].mxu1 }
 0x595   : > { %v4856_v30 = vmax.f32 %v4855_v29, %v4299_v7  ;;  %v4307_v26 = vmax.f32 %v3472_v56, 0.0  ;;  %v3821_v41 = vadd.f32 %v3820_v24, %v13730_v13  ;;  %v3822_v35 = vpop.f32.mrb[73].mxu1  ;;  %5764 = vmatmul.mubr.bf16.gmra.mrb[180].mxu0 %v15260_v62 }
 0x596   : > { %v4893_v18 = vmax.f32 %v4892_v38, %v4300_v21  ;;  %v4308_v57 = vmax.f32 %v3474_v54, 0.0  ;;  %v3823_v37 = vadd.f32 %v3822_v35, %v13735_v32  ;;  %v3824_v8 = vpop.f32.mrb[74].mxu1  ;;  %5773 = vmatprep.mubr.bf16.mxu0 %v15215_v43 }
 0x597   : > { %v4857_v22 = vmax.f32 %v4856_v30, %v4307_v26  ;;  %v4301_v20 = vmax.f32 %v3821_v41, 0.0  ;;  %v3825_v6 = vadd.f32 %v3824_v8, %v13730_v13  ;;  %v3826_v52 = vpop.f32.mrb[75].mxu1 }
 0x598   : > { %v4894_v48 = vmax.f32 %v4893_v18, %v4308_v57  ;;  %v4302_v29 = vmax.f32 %v3823_v37, 0.0  ;;  %v3827_v11 = vadd.f32 %v3826_v52, %v13735_v32  ;;  %v3477_v4 = vpop.f32.mrb[76].mxu0 }
 0x599   : > { %v4930_v40 = vmax.f32 %v4929_v63, %v4301_v20  ;;  %v4309_v45 = vmax.f32 %v3825_v6, 0.0  ;;  %v3478_v38 = vadd.f32 %v3477_v4, %v13719_v34  ;;  %v3479_v27 = vpop.f32.mrb[77].mxu0  ;;  %6117 = vmatmul.mubr.bf16.gmra.mrb[180].mxu1 %v15260_v62  ;;  %v15261_v20 = vld [vmem:[#allocation58_spill] sm:$0xff] }
 0x59a   : > { %v4967_v7 = vmax.f32 %v4966_v16, %v4302_v29  ;;  %v4310_v56 = vmax.f32 %v3827_v11, 0.0  ;;  %v3480_v51 = vadd.f32 %v3479_v27, %v13724_v15  ;;  %v3481_v21 = vpop.f32.mrb[78].mxu0  ;;  %6126 = vmatprep.mubr.bf16.mxu1 %v15215_v43 }
 0x59b   : > { %v4931_v54 = vmax.f32 %v4930_v40, %v4309_v45  ;;  %v4315_v24 = vmax.f32 %v3478_v38, 0.0  ;;  %v3482_v30 = vadd.f32 %v3481_v21, %v13719_v34  ;;  %v3483_v26 = vpop.f32.mrb[79].mxu0 }
 0x59c   : > { %v4968_v41 = vmax.f32 %v4967_v7, %v4310_v56  ;;  %v4316_v63 = vmax.f32 %v3480_v51, 0.0  ;;  %v3484_v35 = vadd.f32 %v3483_v26, %v13724_v15  ;;  %v3830_v18 = vpop.f32.mrb[76].mxu1 }
 0x59d   : > { %v4858_v57 = vmax.f32 %v4857_v22, %v4315_v24  ;;  %v4323_v37 = vmax.f32 %v3482_v30, 0.0  ;;  %v3831_v16 = vadd.f32 %v3830_v18, %v13730_v13  ;;  %v3832_v8 = vpop.f32.mrb[77].mxu1  ;;  %5774 = vmatmul.mubr.bf16.gmra.mrb[184].mxu0 %v15261_v20 }
 0x59e   : > { %v4895_v6 = vmax.f32 %v4894_v48, %v4316_v63  ;;  %v4324_v52 = vmax.f32 %v3484_v35, 0.0  ;;  %v3833_v29 = vadd.f32 %v3832_v8, %v13735_v32  ;;  %v3834_v11 = vpop.f32.mrb[78].mxu1  ;;  %5783 = vmatprep.mubr.bf16.mxu0 %v15215_v43 }
 0x59f   : > { %v4859_v4 = vmax.f32 %v4858_v57, %v4323_v37  ;;  %v4317_v40 = vmax.f32 %v3831_v16, 0.0  ;;  %v3835_v45 = vadd.f32 %v3834_v11, %v13730_v13  ;;  %v3836_v38 = vpop.f32.mrb[79].mxu1 }
 0x5a0   : > { %v4896_v27 = vmax.f32 %v4895_v6, %v4324_v52  ;;  %v4318_v22 = vmax.f32 %v3833_v29, 0.0  ;;  %v3837_v7 = vadd.f32 %v3836_v38, %v13735_v32  ;;  %v3487_v56 = vpop.f32.mrb[80].mxu0 }
 0x5a1   : > { %v4932_v51 = vmax.f32 %v4931_v54, %v4317_v40  ;;  %v4325_v21 = vmax.f32 %v3835_v45, 0.0  ;;  %v3488_v48 = vadd.f32 %v3487_v56, %v13719_v34  ;;  %v3489_v24 = vpop.f32.mrb[81].mxu0  ;;  %6127 = vmatmul.mubr.bf16.gmra.mrb[184].mxu1 %v15261_v20  ;;  %v15262_v45 = vld [vmem:[#allocation59_spill] sm:$0xff] }
 0x5a2   : > { %v4969_v30 = vmax.f32 %v4968_v41, %v4318_v22  ;;  %v4326_v26 = vmax.f32 %v3837_v7, 0.0  ;;  %v3490_v63 = vadd.f32 %v3489_v24, %v13724_v15  ;;  %v3491_v35 = vpop.f32.mrb[82].mxu0  ;;  %6136 = vmatprep.mubr.bf16.mxu1 %v15215_v43 }
 0x5a3   : > { %v4933_v18 = vmax.f32 %v4932_v51, %v4325_v21  ;;  %v4331_v57 = vmax.f32 %v3488_v48, 0.0  ;;  %v3492_v37 = vadd.f32 %v3491_v35, %v13719_v34  ;;  %v3493_v16 = vpop.f32.mrb[83].mxu0 }
 0x5a4   : > { %v4970_v8 = vmax.f32 %v4969_v30, %v4326_v26  ;;  %v4332_v54 = vmax.f32 %v3490_v63, 0.0  ;;  %v3494_v6 = vadd.f32 %v3493_v16, %v13724_v15  ;;  %v3840_v52 = vpop.f32.mrb[80].mxu1 }
 0x5a5   : > { %v4860_v29 = vmax.f32 %v4859_v4, %v4331_v57  ;;  %v4339_v11 = vmax.f32 %v3492_v37, 0.0  ;;  %v3841_v41 = vadd.f32 %v3840_v52, %v13730_v13  ;;  %v3842_v40 = vpop.f32.mrb[81].mxu1  ;;  %5784 = vmatmul.mubr.bf16.gmra.mrb[188].mxu0 %v15262_v45 }
 0x5a6   : > { %v4897_v38 = vmax.f32 %v4896_v27, %v4332_v54  ;;  %v4340_v22 = vmax.f32 %v3494_v6, 0.0  ;;  %v3843_v7 = vadd.f32 %v3842_v40, %v13735_v32  ;;  %v3844_v56 = vpop.f32.mrb[82].mxu1  ;;  %5793 = vmatprep.mubr.bf16.mxu0 %v15215_v43 }
 0x5a7   : > { %v4861_v51 = vmax.f32 %v4860_v29, %v4339_v11  ;;  %v4333_v21 = vmax.f32 %v3841_v41, 0.0  ;;  %v3845_v48 = vadd.f32 %v3844_v56, %v13730_v13  ;;  %v3846_v24 = vpop.f32.mrb[83].mxu1 }
 0x5a8   : > { %v4898_v30 = vmax.f32 %v4897_v38, %v4340_v22  ;;  %v4334_v4 = vmax.f32 %v3843_v7, 0.0  ;;  %v3847_v26 = vadd.f32 %v3846_v24, %v13735_v32  ;;  %v3497_v63 = vpop.f32.mrb[84].mxu0  ;;  %v15263_v24 = vld [vmem:[#allocation60_spill] sm:$0xff] }
 0x5a9   : > { %v4934_v35 = vmax.f32 %v4933_v18, %v4333_v21  ;;  %v4341_v57 = vmax.f32 %v3845_v48, 0.0  ;;  %v3498_v27 = vadd.f32 %v3497_v63, %v13719_v34  ;;  %v3499_v37 = vpop.f32.mrb[85].mxu0  ;;  %6137 = vmatmul.mubr.bf16.gmra.mrb[188].mxu1 %v15262_v45 }
 0x5aa   : > { %v4971_v16 = vmax.f32 %v4970_v8, %v4334_v4  ;;  %v4342_v54 = vmax.f32 %v3847_v26, 0.0  ;;  %v3500_v6 = vadd.f32 %v3499_v37, %v13724_v15  ;;  %v3501_v52 = vpop.f32.mrb[86].mxu0  ;;  %6146 = vmatprep.mubr.bf16.mxu1 %v15215_v43 }
 0x5ab   : > { %v4935_v29 = vmax.f32 %v4934_v35, %v4341_v57  ;;  %v4347_v11 = vmax.f32 %v3498_v27, 0.0  ;;  %v3502_v41 = vadd.f32 %v3501_v52, %v13719_v34  ;;  %v3503_v40 = vpop.f32.mrb[87].mxu0 }
 0x5ac   : > { %v4972_v38 = vmax.f32 %v4971_v16, %v4342_v54  ;;  %v4348_v18 = vmax.f32 %v3500_v6, 0.0  ;;  %v3504_v22 = vadd.f32 %v3503_v40, %v13724_v15  ;;  %v3850_v7 = vpop.f32.mrb[84].mxu1 }
 0x5ad   : > { %v4862_v56 = vmax.f32 %v4861_v51, %v4347_v11  ;;  %v4355_v21 = vmax.f32 %v3502_v41, 0.0  ;;  %v3851_v8 = vadd.f32 %v3850_v7, %v13730_v13  ;;  %v3852_v48 = vpop.f32.mrb[85].mxu1  ;;  %5794 = vmatmul.mubr.bf16.gmra.mrb[192].mxu0 %v15263_v24 }
 0x5ae   : > { %v4899_v4 = vmax.f32 %v4898_v30, %v4348_v18  ;;  %v4356_v26 = vmax.f32 %v3504_v22, 0.0  ;;  %v3853_v63 = vadd.f32 %v3852_v48, %v13735_v32  ;;  %v3854_v35 = vpop.f32.mrb[86].mxu1  ;;  %5803 = vmatprep.mubr.bf16.mxu0 %v15215_v43 }
 0x5af   : > { %v4863_v57 = vmax.f32 %v4862_v56, %v4355_v21  ;;  %v4349_v27 = vmax.f32 %v3851_v8, 0.0  ;;  %v3855_v37 = vadd.f32 %v3854_v35, %v13730_v13  ;;  %v3856_v16 = vpop.f32.mrb[87].mxu1 }
 0x5b0   : > { %v4900_v54 = vmax.f32 %v4899_v4, %v4356_v26  ;;  %v4350_v51 = vmax.f32 %v3853_v63, 0.0  ;;  %v3857_v6 = vadd.f32 %v3856_v16, %v13735_v32  ;;  %v3507_v52 = vpop.f32.mrb[88].mxu0 }
 0x5b1   : > { %v4936_v11 = vmax.f32 %v4935_v29, %v4349_v27  ;;  %v4357_v41 = vmax.f32 %v3855_v37, 0.0  ;;  %v3508_v30 = vadd.f32 %v3507_v52, %v13719_v34  ;;  %v3509_v40 = vpop.f32.mrb[89].mxu0  ;;  %6147 = vmatmul.mubr.bf16.gmra.mrb[192].mxu1 %v15263_v24 }
 0x5b2   : > { %v4973_v18 = vmax.f32 %v4972_v38, %v4350_v51  ;;  %v4358_v22 = vmax.f32 %v3857_v6, 0.0  ;;  %v3510_v7 = vadd.f32 %v3509_v40, %v13724_v15  ;;  %v3511_v56 = vpop.f32.mrb[90].mxu0  ;;  %6156 = vmatprep.mubr.bf16.mxu1 %v15215_v43  ;;  %v15264_v51 = vld [vmem:[#allocation61_spill] sm:$0xff] }
 0x5b3   : > { %v4937_v21 = vmax.f32 %v4936_v11, %v4357_v41  ;;  %v4363_v8 = vmax.f32 %v3508_v30, 0.0  ;;  %v3512_v48 = vadd.f32 %v3511_v56, %v13719_v34  ;;  %v3513_v4 = vpop.f32.mrb[91].mxu0 }
 0x5b4   : > { %v4974_v26 = vmax.f32 %v4973_v18, %v4358_v22  ;;  %v4364_v29 = vmax.f32 %v3510_v7, 0.0  ;;  %v3514_v63 = vadd.f32 %v3513_v4, %v13724_v15  ;;  %v3860_v35 = vpop.f32.mrb[88].mxu1 }
 0x5b5   : > { %v4864_v27 = vmax.f32 %v4863_v57, %v4363_v8  ;;  %v4371_v37 = vmax.f32 %v3512_v48, 0.0  ;;  %v3861_v38 = vadd.f32 %v3860_v35, %v13730_v13  ;;  %v3862_v16 = vpop.f32.mrb[89].mxu1  ;;  %5804 = vmatmul.mubr.bf16.gmra.mrb[196].mxu0 %v15264_v51 }
 0x5b6   : > { %v4901_v6 = vmax.f32 %v4900_v54, %v4364_v29  ;;  %v4372_v52 = vmax.f32 %v3514_v63, 0.0  ;;  %v3863_v11 = vadd.f32 %v3862_v16, %v13735_v32  ;;  %v3864_v41 = vpop.f32.mrb[90].mxu1  ;;  %5813 = vmatprep.mubr.bf16.mxu0 %v15215_v43 }
 0x5b7   : > { %v4865_v30 = vmax.f32 %v4864_v27, %v4371_v37  ;;  %v4365_v40 = vmax.f32 %v3861_v38, 0.0  ;;  %v3865_v18 = vadd.f32 %v3864_v41, %v13730_v13  ;;  %v3866_v22 = vpop.f32.mrb[91].mxu1 }
 0x5b8   : > { %v4902_v7 = vmax.f32 %v4901_v6, %v4372_v52  ;;  %v4366_v57 = vmax.f32 %v3863_v11, 0.0  ;;  %v3867_v56 = vadd.f32 %v3866_v22, %v13735_v32  ;;  %v3517_v8 = vpop.f32.mrb[92].mxu0 }
 0x5b9   : > { %v4938_v48 = vmax.f32 %v4937_v21, %v4365_v40  ;;  %v4373_v4 = vmax.f32 %v3865_v18, 0.0  ;;  %v3518_v54 = vadd.f32 %v3517_v8, %v13719_v34  ;;  %v3519_v29 = vpop.f32.mrb[93].mxu0  ;;  %6157 = vmatmul.mubr.bf16.gmra.mrb[196].mxu1 %v15264_v51  ;;  %v15267_v8 = vld [vmem:[#allocation62_spill] sm:$0xff] }
 0x5ba   : > { %v4975_v63 = vmax.f32 %v4974_v26, %v4366_v57  ;;  %v4374_v35 = vmax.f32 %v3867_v56, 0.0  ;;  %v3520_v27 = vadd.f32 %v3519_v29, %v13724_v15  ;;  %v3521_v37 = vpop.f32.mrb[94].mxu0  ;;  %6166 = vmatprep.mubr.bf16.mxu1 %v15215_v43  ;;  %v5159_v26 = vld [vmem:[%s15265_s24] sm:$0xff] }
 0x5bb   : > { %v4939_v38 = vmax.f32 %v4938_v48, %v4373_v4  ;;  %v4379_v16 = vmax.f32 %v3518_v54, 0.0  ;;  %v3522_v6 = vadd.f32 %v3521_v37, %v13719_v34  ;;  %v3523_v52 = vpop.f32.mrb[95].mxu0 }
 0x5bc   : > { %v4976_v11 = vmax.f32 %v4975_v63, %v4374_v35  ;;  %v4380_v21 = vmax.f32 %v3520_v27, 0.0  ;;  %v3524_v41 = vadd.f32 %v3523_v52, %v13724_v15  ;;  %v3870_v40 = vpop.f32.mrb[92].mxu1  ;;  %v15268_v27 = vld [vmem:[#allocation34_spill] sm:$0xff] }
 0x5bd   : > { %v4866_v18 = vmax.f32 %v4865_v30, %v4379_v16  ;;  %v4387_v22 = vmax.f32 %v3522_v6, 0.0  ;;  %v3871_v57 = vadd.f32 %v3870_v40, %v13730_v13  ;;  %v3872_v56 = vpop.f32.mrb[93].mxu1  ;;  %5814 = vmatmul.mubr.bf16.gmra.mrb[200].mxu0 %v15267_v8  ;;  %v14203_v30 = vrot.slane %v5159_v26, %v15268_v27 }
 0x5be   : > { %v4903_v48 = vmax.f32 %v4902_v7, %v4380_v21  ;;  %v4388_v4 = vmax.f32 %v3524_v41, 0.0  ;;  %v3873_v34 = vadd.f32 %v3872_v56, %v13735_v32  ;;  %v3874_v54 = vpop.f32.mrb[94].mxu1  ;;  %5823 = vmatprep.mubr.bf16.mxu0 %v15215_v43  ;;  %v15269_v7 = vld [vmem:[#allocation35_spill] sm:$0xff] }
 0x5bf   : > { %v4867_v15 = vmax.f32 %v4866_v18, %v4387_v22  ;;  %v4381_v29 = vmax.f32 %v3871_v57, 0.0  ;;  %v3875_v63 = vadd.f32 %v3874_v54, %v13730_v13  ;;  %v3876_v35 = vpop.f32.mrb[95].mxu1  ;;  %v14207_v21 = vrot.slane %v5159_v26, %v15269_v7  ;;  %v15270_v18 = vld [vmem:[#allocation70_spill] sm:$0xff] }
 0x5c0   : > { %v4904_v37 = vmax.f32 %v4903_v48, %v4388_v4  ;;  %v4382_v16 = vmax.f32 %v3873_v34, 0.0  ;;  %v3877_v6 = vadd.f32 %v3876_v35, %v13735_v32  ;;  %v5555_v52 = vpop.f32.mrb[96].mxu0  ;;  %v14211_v13 = vrot.slane %v5159_v26, %v15270_v18  ;;  %v15271_v4 = vld [vmem:[#allocation71_spill] sm:$0xff] }
 0x5c1   : > { %v4868_v41 = vrot.slane %v4867_v15, 4  ;;  %v4940_v40 = vmax.f32 %v4939_v38, %v4381_v29  ;;  %v4389_v56 = vmax.f32 %v3875_v63, 0.0  ;;  %v5557_v59 = vpop.f32.mrb[97].mxu0  ;;  %6167 = vmatmul.mubr.bf16.gmra.mrb[200].mxu1 %v15267_v8  ;;  %v14214_v34 = vrot.slane %v5159_v26, %v15271_v4  ;;  %v15272_v4 = vld [vmem:[#allocation64_spill] sm:$0xff] }
 0x5c2   : > { %v4905_v22 = vrot.slane %v4904_v37, 4  ;;  %v4977_v57 = vmax.f32 %v4976_v11, %v4382_v16  ;;  %v4390_v54 = vmax.f32 %v3877_v6, 0.0  ;;  %v5559_v48 = vpop.f32.mrb[98].mxu0  ;;  %6176 = vmatprep.mubr.bf16.mxu1 %v15215_v43  ;;  %v5556_v38 = vadd.f32 %v5555_v52, %v14203_v30 }
 0x5c3   : > { %v4869_v32 = vmax.f32 %v4867_v15, %v4868_v41  ;;  %v4941_v35 = vmax.f32 %v4940_v40, %v4389_v56  ;;  %v5560_v29 = vadd.f32 %v5559_v48, %v14203_v30  ;;  %v5561_v63 = vpop.f32.mrb[99].mxu0  ;;  %v5558_v18 = vadd.f32 %v5557_v59, %v14207_v21 }
 0x5c4   : > { %v4906_v27 = vmax.f32 %v4904_v37, %v4905_v22  ;;  %v4978_v7 = vmax.f32 %v4977_v57, %v4390_v54  ;;  %v5562_v11 = vadd.f32 %v5561_v63, %v14207_v21  ;;  %v5908_v16 = vpop.f32.mrb[96].mxu1 }
 0x5c5   : > { %v4870_v6 = vrot.slane %v4869_v32, 2  ;;  %v4942_v50 = vrot.slane %v4941_v35, 4  ;;  %v6935_v26 = vmax.f32 %v5556_v38, %v5560_v29  ;;  %5824 = vmatmul.mubr.bf16.gmra.mrb[204].mxu0 %v15272_v4  ;;  %v5910_v2 = vpop.f32.mrb[97].mxu1  ;;  %v5909_v22 = vadd.f32 %v5908_v16, %v14211_v13 }
 0x5c6   : > { %v4907_v15 = vrot.slane %v4906_v27, 2  ;;  %v4979_v41 = vrot.slane %v4978_v7, 4  ;;  %v6972_v40 = vmax.f32 %v5558_v18, %v5562_v11  ;;  %v5912_v52 = vpop.f32.mrb[98].mxu1  ;;  %5833 = vmatprep.mubr.bf16.mxu0 %v15215_v43  ;;  %v5911_v38 = vadd.f32 %v5910_v2, %v14214_v34 }
 0x5c7   : > { %v4871_v56 = vmax.f32 %v4869_v32, %v4870_v6  ;;  %v4943_v37 = vmax.f32 %v4941_v35, %v4942_v50  ;;  %v5913_v59 = vadd.f32 %v5912_v52, %v14211_v13  ;;  %v5914_v57 = vpop.f32.mrb[99].mxu1 }
 0x5c8   : > { %v4908_v54 = vmax.f32 %v4906_v27, %v4907_v15  ;;  %v4980_v48 = vmax.f32 %v4978_v7, %v4979_v41  ;;  %v5915_v29 = vadd.f32 %v5914_v57, %v14214_v34  ;;  %v5565_v63 = vpop.f32.mrb[100].mxu0 }
 0x5c9   : > { %v4872_v12 = vrot.slane %v4871_v56, 1  ;;  %v4944_v1 = vrot.slane %v4943_v37, 2  ;;  %v7009_v18 = vmax.f32 %v5909_v22, %v5913_v59  ;;  %v5566_v11 = vadd.f32 %v5565_v63, %v14203_v30  ;;  %v5567_v9 = vpop.f32.mrb[101].mxu0  ;;  %6177 = vmatmul.mubr.bf16.gmra.mrb[204].mxu1 %v15272_v4 }
 0x5ca   : > { %v4909_v50 = vrot.slane %v4908_v54, 1  ;;  %v4981_v32 = vrot.slane %v4980_v48, 2  ;;  %v7046_v35 = vmax.f32 %v5911_v38, %v5915_v29  ;;  %v5568_v16 = vadd.f32 %v5567_v9, %v14207_v21  ;;  %v5569_v27 = vpop.f32.mrb[102].mxu0  ;;  %6186 = vmatprep.mubr.bf16.mxu1 %v15215_v43  ;;  %v15273_v9 = vld [vmem:[#allocation65_spill] sm:$0xff] }
 0x5cb   : > { %v4873_v2 = vmax.f32 %v4871_v56, %v4872_v12  ;;  %v4945_v7 = vmax.f32 %v4943_v37, %v4944_v1  ;;  %v6936_v6 = vmax.f32 %v6935_v26, %v5566_v11  ;;  %v5570_v15 = vadd.f32 %v5569_v27, %v14203_v30  ;;  %v5571_v41 = vpop.f32.mrb[103].mxu0 }
 0x5cc   : > { %v4910_v52 = vmax.f32 %v4908_v54, %v4909_v50  ;;  %v4982_v22 = vmax.f32 %v4980_v48, %v4981_v32  ;;  %v6973_v59 = vmax.f32 %v6972_v40, %v5568_v16  ;;  %v5572_v57 = vadd.f32 %v5571_v41, %v14207_v21  ;;  %v5918_v63 = vpop.f32.mrb[100].mxu1 }
 0x5cd   : > { %v4946_v4 = vrot.slane %v4945_v7, 1  ;;  %v6937_v8 = vmax.f32 %v6936_v6, %v5570_v15  ;;  %v5919_v38 = vadd.f32 %v5918_v63, %v14211_v13  ;;  %5834 = vmatmul.mubr.bf16.gmra.mrb[208].mxu0 %v15273_v9  ;;  %v5920_v29 = vpop.f32.mrb[101].mxu1 }
 0x5ce   : > { %v5052_v51 = vcombine.low %v4873_v2, %v4910_v52  ;;  %v4983_v12 = vrot.slane %v4982_v22, 1  ;;  %v6974_v1 = vmax.f32 %v6973_v59, %v5572_v57  ;;  %v5921_v26 = vadd.f32 %v5920_v29, %v14214_v34  ;;  %v5922_v56 = vpop.f32.mrb[102].mxu1  ;;  %5843 = vmatprep.mubr.bf16.mxu0 %v15215_v43 }
 0x5cf   : > { %v4947_v37 = vmax.f32 %v4945_v7, %v4946_v4  ;;  %v7010_v40 = vmax.f32 %v7009_v18, %v5919_v38  ;;  %v5923_v54 = vadd.f32 %v5922_v56, %v14211_v13  ;;  %v5924_v48 = vpop.f32.mrb[103].mxu1 }
 0x5d0   : > { %v4984_v11 = vmax.f32 %v4982_v22, %v4983_v12  ;;  %v7047_v50 = vmax.f32 %v7046_v35, %v5921_v26  ;;  %v5925_v32 = vadd.f32 %v5924_v48, %v14214_v34  ;;  %v5575_v16 = vpop.f32.mrb[104].mxu0  ;;  %v5060_v22 = vrot.slane %v5052_v51, %v13495_v23  ;;  %v15274_v26 = vld [vmem:[#allocation67_spill] sm:$0xff] }
 0x5d1   : > { %v7011_v27 = vmax.f32 %v7010_v40, %v5923_v54  ;;  %v5576_v2 = vadd.f32 %v5575_v16, %v14203_v30  ;;  %v5577_v6 = vpop.f32.mrb[105].mxu0  ;;  %6187 = vmatmul.mubr.bf16.gmra.mrb[208].mxu1 %v15273_v9 }
 0x5d2   : > { %v5053_v15 = vcombine.low %v4947_v37, %v4984_v11  ;;  %v7048_v41 = vmax.f32 %v7047_v50, %v5925_v32  ;;  %v5578_v52 = vadd.f32 %v5577_v6, %v14207_v21  ;;  %v5579_v4 = vpop.f32.mrb[106].mxu0  ;;  %6196 = vmatprep.mubr.bf16.mxu1 %v15215_v43 }
 0x5d3   : > { %v6938_v18 = vmax.f32 %v6937_v8, %v5576_v2  ;;  %v5580_v7 = vadd.f32 %v5579_v4, %v14203_v30  ;;  %v5581_v35 = vpop.f32.mrb[107].mxu0 }
 0x5d4   : > { %v5067_v59 = vrot.slane %v5053_v15, %v13495_v23  ;;  %v6975_v57 = vmax.f32 %v6974_v1, %v5578_v52  ;;  %v5582_v63 = vadd.f32 %v5581_v35, %v14207_v21  ;;  %v5928_v38 = vpop.f32.mrb[104].mxu1  ;;  %v15275_v52 = vcombine.low %v14022_v61, %v14032_v44 }
 0x5d5   : > { %v6939_v29 = vmax.f32 %v6938_v18, %v5580_v7  ;;  %v5929_v12 = vadd.f32 %v5928_v38, %v14211_v13  ;;  %5844 = vmatmul.mubr.bf16.gmra.mrb[212].mxu0 %v15274_v26  ;;  %v5930_v56 = vpop.f32.mrb[105].mxu1 }
 0x5d6   : > { %v5068_v37 = vcombine.low %v5060_v22, %v5067_v59  ;;  %v6976_v40 = vmax.f32 %v6975_v57, %v5582_v63  ;;  %v5931_v8 = vadd.f32 %v5930_v56, %v14214_v34  ;;  %v5932_v54 = vpop.f32.mrb[106].mxu1  ;;  %5853 = vmatprep.mubr.bf16.mxu0 %v15215_v43 }
 0x5d7   : > { %v7012_v51 = vmax.f32 %v7011_v27, %v5929_v12  ;;  %v5933_v48 = vadd.f32 %v5932_v54, %v14211_v13  ;;  %v5934_v1 = vpop.f32.mrb[107].mxu1 }
 0x5d8   : > { %v5084_v11 = vrot.slane %v5068_v37, 7  ;;  %v7049_v50 = vmax.f32 %v7048_v41, %v5931_v8  ;;  %v5935_v32 = vadd.f32 %v5934_v1, %v14214_v34  ;;  %v5585_v16 = vpop.f32.mrb[108].mxu0  ;;  %v4392_v41 = vld [vmem:[#allocation2 + $0x8] sm:$0xff] }
 0x5d9   : > { %v7013_v2 = vmax.f32 %v7012_v51, %v5933_v48  ;;  %v5586_v6 = vadd.f32 %v5585_v16, %v14203_v30  ;;  %v5587_v15 = vpop.f32.mrb[109].mxu0  ;;  %6197 = vmatmul.mubr.bf16.gmra.mrb[212].mxu1 %v15274_v26  ;;  %v15276_v8 = vld [vmem:[#allocation69_spill] sm:$0xff] }
 0x5da   : > { %v5085_v4 = vsel %vm5074_vm0, %v5084_v11, %v15275_v52  ;;  %v7050_v27 = vmax.f32 %v7049_v50, %v5935_v32  ;;  %v5588_v18 = vadd.f32 %v5587_v15, %v14207_v21  ;;  %v5589_v7 = vpop.f32.mrb[110].mxu0  ;;  %6206 = vmatprep.mubr.bf16.mxu1 %v15215_v43 }
 0x5db   : > { %v5086_v35 = vsel %vm5076_vm1, %v5084_v11, %v5085_v4  ;;  %v6940_v22 = vmax.f32 %v6939_v29, %v5586_v6  ;;  %v5590_v59 = vadd.f32 %v5589_v7, %v14203_v30  ;;  %v5591_v57 = vpop.f32.mrb[111].mxu0 }
 0x5dc   : > { %v5087_v63 = vsel %vm5078_vm2, %v5084_v11, %v5086_v35  ;;  %v6977_v38 = vmax.f32 %v6976_v40, %v5588_v18  ;;  %v5592_v61 = vadd.f32 %v5591_v57, %v14207_v21  ;;  %v5938_v44 = vpop.f32.mrb[108].mxu1 }
 0x5dd   : > { %v5088_v12 = vsel %vm5080_vm3, %v5084_v11, %v5087_v63  ;;  %v6941_v56 = vmax.f32 %v6940_v22, %v5590_v59  ;;  %v5939_v37 = vadd.f32 %v5938_v44, %v14211_v13  ;;  %5854 = vmatmul.mubr.bf16.gmra.mrb[216].mxu0 %v15276_v8  ;;  %v5940_v54 = vpop.f32.mrb[109].mxu1 }
 0x5de   : > { %v5092_v51 = vmax.f32 %v4392_v41, %v5088_v12  ;;  %v6978_v48 = vmax.f32 %v6977_v38, %v5592_v61  ;;  %v5941_v29 = vadd.f32 %v5940_v54, %v14214_v34  ;;  %v5942_v1 = vpop.f32.mrb[110].mxu1  ;;  %5863 = vmatprep.mubr.bf16.mxu0 %v15215_v43  ;;  %v15277_v61 = vld [vmem:[#allocation73_spill] sm:$0xff] }
 0x5df   : > { %v7014_v50 = vmax.f32 %v7013_v2, %v5939_v37  ;;  %v5943_v40 = vadd.f32 %v5942_v1, %v14211_v13  ;;  %v5944_v32 = vpop.f32.mrb[111].mxu1 }
 0x5e0   : > { %5094 = vst [vmem:[#allocation2 + $0x8] sm:$0xff] %v5092_v51  ;;  %v7051_v16 = vmax.f32 %v7050_v27, %v5941_v29  ;;  %v5945_v11 = vadd.f32 %v5944_v32, %v14214_v34  ;;  %v5595_v6 = vpop.f32.mrb[112].mxu0 }
 0x5e1   : > { %v7015_v15 = vmax.f32 %v7014_v50, %v5943_v40  ;;  %v5596_v52 = vadd.f32 %v5595_v6, %v14203_v30  ;;  %v5597_v4 = vpop.f32.mrb[113].mxu0  ;;  %6207 = vmatmul.mubr.bf16.gmra.mrb[216].mxu1 %v15276_v8 }
 0x5e2   : > { %v7052_v18 = vmax.f32 %v7051_v16, %v5945_v11  ;;  %v5598_v7 = vadd.f32 %v5597_v4, %v14207_v21  ;;  %v5599_v41 = vpop.f32.mrb[114].mxu0  ;;  %6216 = vmatprep.mubr.bf16.mxu1 %v15215_v43 }
 0x5e3   : > { %v6942_v2 = vmax.f32 %v6941_v56, %v5596_v52  ;;  %v5600_v35 = vadd.f32 %v5599_v41, %v14203_v30  ;;  %v5601_v22 = vpop.f32.mrb[115].mxu0 }
 0x5e4   : > { %v6979_v27 = vmax.f32 %v6978_v48, %v5598_v7  ;;  %v5602_v59 = vadd.f32 %v5601_v22, %v14207_v21  ;;  %v5948_v57 = vpop.f32.mrb[112].mxu1 }
 0x5e5   : > { %v6943_v63 = vmax.f32 %v6942_v2, %v5600_v35  ;;  %v5949_v38 = vadd.f32 %v5948_v57, %v14211_v13  ;;  %5864 = vmatmul.mubr.bf16.gmra.mrb[220].mxu0 %v15277_v61  ;;  %v5950_v44 = vpop.f32.mrb[113].mxu1 }
 0x5e6   : > { %v6980_v12 = vmax.f32 %v6979_v27, %v5602_v59  ;;  %v5951_v37 = vadd.f32 %v5950_v44, %v14214_v34  ;;  %v5952_v54 = vpop.f32.mrb[114].mxu1  ;;  %6259 = vmatprep.mubr.bf16.mxu0 %v15215_v43 }
 0x5e7   : > { %v7016_v56 = vmax.f32 %v7015_v15, %v5949_v38  ;;  %v5953_v51 = vadd.f32 %v5952_v54, %v14211_v13  ;;  %v5954_v29 = vpop.f32.mrb[115].mxu1 }
 0x5e8   : > { %v7053_v48 = vmax.f32 %v7052_v18, %v5951_v37  ;;  %v5955_v1 = vadd.f32 %v5954_v29, %v14214_v34  ;;  %v5605_v50 = vpop.f32.mrb[116].mxu0 }
 0x5e9   : > { %v7017_v40 = vmax.f32 %v7016_v56, %v5953_v51  ;;  %v5606_v32 = vadd.f32 %v5605_v50, %v14203_v30  ;;  %v5607_v16 = vpop.f32.mrb[117].mxu0  ;;  %6217 = vmatmul.mubr.bf16.gmra.mrb[220].mxu1 %v15277_v61 }
 0x5ea   : > { %v7054_v11 = vmax.f32 %v7053_v48, %v5955_v1  ;;  %v5608_v6 = vadd.f32 %v5607_v16, %v14207_v21  ;;  %v5609_v52 = vpop.f32.mrb[118].mxu0  ;;  %6612 = vmatprep.mubr.bf16.mxu1 %v15215_v43 }
 0x5eb   : > { %v6944_v15 = vmax.f32 %v6943_v63, %v5606_v32  ;;  %v5610_v4 = vadd.f32 %v5609_v52, %v14203_v30  ;;  %v5611_v7 = vpop.f32.mrb[119].mxu0 }
 0x5ec   : > { %v6981_v18 = vmax.f32 %v6980_v12, %v5608_v6  ;;  %v5612_v41 = vadd.f32 %v5611_v7, %v14207_v21  ;;  %v5958_v2 = vpop.f32.mrb[116].mxu1 }
 0x5ed   : > { %v6945_v35 = vmax.f32 %v6944_v15, %v5610_v4  ;;  %v5959_v22 = vadd.f32 %v5958_v2, %v14211_v13  ;;  %v5960_v27 = vpop.f32.mrb[117].mxu1  ;;  %6260 = vmatmul.mubr.bf16.vlgmr.msra.gmra.mrb[224].mxu0 %v15239_v58 }
 0x5ee   : > { %v6982_v59 = vmax.f32 %v6981_v18, %v5612_v41  ;;  %v5961_v57 = vadd.f32 %v5960_v27, %v14214_v34  ;;  %v5962_v38 = vpop.f32.mrb[118].mxu1  ;;  %6269 = vmatprep.mubr.bf16.mxu0 %v15215_v43 }
 0x5ef   : > { %v7018_v63 = vmax.f32 %v7017_v40, %v5959_v22  ;;  %v5963_v44 = vadd.f32 %v5962_v38, %v14211_v13  ;;  %v5964_v37 = vpop.f32.mrb[119].mxu1 }
 0x5f0   : > { %v7055_v12 = vmax.f32 %v7054_v11, %v5961_v57  ;;  %v5965_v54 = vadd.f32 %v5964_v37, %v14214_v34  ;;  %v5615_v56 = vpop.f32.mrb[120].mxu0 }
 0x5f1   : > { %v7019_v51 = vmax.f32 %v7018_v63, %v5963_v44  ;;  %v5616_v29 = vadd.f32 %v5615_v56, %v14203_v30  ;;  %v5617_v48 = vpop.f32.mrb[121].mxu0  ;;  %6613 = vmatmul.mubr.bf16.vlgmr.msra.gmra.mrb[224].mxu1 %v15239_v58 }
 0x5f2   : > { %v7056_v1 = vmax.f32 %v7055_v12, %v5965_v54  ;;  %v5618_v50 = vadd.f32 %v5617_v48, %v14207_v21  ;;  %v5619_v32 = vpop.f32.mrb[122].mxu0  ;;  %6622 = vmatprep.mubr.bf16.mxu1 %v15215_v43 }
 0x5f3   : > { %v6946_v40 = vmax.f32 %v6945_v35, %v5616_v29  ;;  %v5620_v16 = vadd.f32 %v5619_v32, %v14203_v30  ;;  %v5621_v6 = vpop.f32.mrb[123].mxu0 }
 0x5f4   : > { %v6983_v11 = vmax.f32 %v6982_v59, %v5618_v50  ;;  %v5622_v52 = vadd.f32 %v5621_v6, %v14207_v21  ;;  %v5968_v15 = vpop.f32.mrb[120].mxu1 }
 0x5f5   : > { %v6947_v4 = vmax.f32 %v6946_v40, %v5620_v16  ;;  %v5969_v7 = vadd.f32 %v5968_v15, %v14211_v13  ;;  %v5970_v18 = vpop.f32.mrb[121].mxu1  ;;  %6270 = vmatmul.mubr.bf16.gmra.mrb[228].mxu0 %v15240_v39 }
 0x5f6   : > { %v6984_v58 = vmax.f32 %v6983_v11, %v5622_v52  ;;  %v5971_v41 = vadd.f32 %v5970_v18, %v14214_v34  ;;  %v5972_v2 = vpop.f32.mrb[122].mxu1  ;;  %6279 = vmatprep.mubr.bf16.mxu0 %v15215_v43 }
 0x5f7   : > { %v7020_v35 = vmax.f32 %v7019_v51, %v5969_v7  ;;  %v5973_v22 = vadd.f32 %v5972_v2, %v14211_v13  ;;  %v5974_v27 = vpop.f32.mrb[123].mxu1 }
 0x5f8   : > { %v7057_v59 = vmax.f32 %v7056_v1, %v5971_v41  ;;  %v5975_v57 = vadd.f32 %v5974_v27, %v14214_v34  ;;  %v5625_v38 = vpop.f32.mrb[124].mxu0 }
 0x5f9   : > { %v7021_v63 = vmax.f32 %v7020_v35, %v5973_v22  ;;  %v5626_v44 = vadd.f32 %v5625_v38, %v14203_v30  ;;  %v5627_v37 = vpop.f32.mrb[125].mxu0  ;;  %6623 = vmatmul.mubr.bf16.gmra.mrb[228].mxu1 %v15240_v39 }
 0x5fa   : > { %v7058_v12 = vmax.f32 %v7057_v59, %v5975_v57  ;;  %v5628_v54 = vadd.f32 %v5627_v37, %v14207_v21  ;;  %v5629_v56 = vpop.f32.mrb[126].mxu0  ;;  %6632 = vmatprep.mubr.bf16.mxu1 %v15215_v43 }
 0x5fb   : > { %v6948_v51 = vmax.f32 %v6947_v4, %v5626_v44  ;;  %v5630_v29 = vadd.f32 %v5629_v56, %v14203_v30  ;;  %v5631_v48 = vpop.f32.mrb[127].mxu0 }
 0x5fc   : > { %v6985_v1 = vmax.f32 %v6984_v58, %v5628_v54  ;;  %v5632_v50 = vadd.f32 %v5631_v48, %v14207_v21  ;;  %v5978_v32 = vpop.f32.mrb[124].mxu1 }
 0x5fd   : > { %v6949_v40 = vmax.f32 %v6948_v51, %v5630_v29  ;;  %v5979_v16 = vadd.f32 %v5978_v32, %v14211_v13  ;;  %v5980_v6 = vpop.f32.mrb[125].mxu1  ;;  %6280 = vmatmul.mubr.bf16.gmra.mrb[232].mxu0 %v15241_v36 }
 0x5fe   : > { %v6986_v39 = vmax.f32 %v6985_v1, %v5632_v50  ;;  %v5981_v11 = vadd.f32 %v5980_v6, %v14214_v34  ;;  %v5982_v52 = vpop.f32.mrb[126].mxu1  ;;  %6289 = vmatprep.mubr.bf16.mxu0 %v15215_v43 }
 0x5ff   : > { %v7022_v15 = vmax.f32 %v7021_v63, %v5979_v16  ;;  %v5983_v4 = vadd.f32 %v5982_v52, %v14211_v13  ;;  %v5984_v7 = vpop.f32.mrb[127].mxu1 }
 0x600   : > { %v7059_v18 = vmax.f32 %v7058_v12, %v5981_v11  ;;  %v5985_v58 = vadd.f32 %v5984_v7, %v14214_v34  ;;  %v5635_v41 = vpop.f32.mrb[128].mxu0 }
 0x601   : > { %v7023_v2 = vmax.f32 %v7022_v15, %v5983_v4  ;;  %v5636_v35 = vadd.f32 %v5635_v41, %v14203_v30  ;;  %v5637_v22 = vpop.f32.mrb[129].mxu0  ;;  %6633 = vmatmul.mubr.bf16.gmra.mrb[232].mxu1 %v15241_v36 }
 0x602   : > { %v7060_v27 = vmax.f32 %v7059_v18, %v5985_v58  ;;  %v5638_v59 = vadd.f32 %v5637_v22, %v14207_v21  ;;  %v5639_v57 = vpop.f32.mrb[130].mxu0  ;;  %6642 = vmatprep.mubr.bf16.mxu1 %v15215_v43 }
 0x603   : > { %v6950_v38 = vmax.f32 %v6949_v40, %v5636_v35  ;;  %v5640_v63 = vadd.f32 %v5639_v57, %v14203_v30  ;;  %v5641_v44 = vpop.f32.mrb[131].mxu0 }
 0x604   : > { %v6987_v37 = vmax.f32 %v6986_v39, %v5638_v59  ;;  %v5642_v12 = vadd.f32 %v5641_v44, %v14207_v21  ;;  %v5988_v54 = vpop.f32.mrb[128].mxu1 }
 0x605   : > { %v6951_v56 = vmax.f32 %v6950_v38, %v5640_v63  ;;  %v5989_v51 = vadd.f32 %v5988_v54, %v14211_v13  ;;  %v5990_v29 = vpop.f32.mrb[129].mxu1  ;;  %6290 = vmatmul.mubr.bf16.gmra.mrb[236].mxu0 %v15242_v14 }
 0x606   : > { %v6988_v36 = vmax.f32 %v6987_v37, %v5642_v12  ;;  %v5991_v48 = vadd.f32 %v5990_v29, %v14214_v34  ;;  %v5992_v1 = vpop.f32.mrb[130].mxu1  ;;  %6299 = vmatprep.mubr.bf16.mxu0 %v15215_v43 }
 0x607   : > { %v7024_v50 = vmax.f32 %v7023_v2, %v5989_v51  ;;  %v5993_v32 = vadd.f32 %v5992_v1, %v14211_v13  ;;  %v5994_v40 = vpop.f32.mrb[131].mxu1 }
 0x608   : > { %v7061_v16 = vmax.f32 %v7060_v27, %v5991_v48  ;;  %v5995_v6 = vadd.f32 %v5994_v40, %v14214_v34  ;;  %v5645_v39 = vpop.f32.mrb[132].mxu0 }
 0x609   : > { %v7025_v11 = vmax.f32 %v7024_v50, %v5993_v32  ;;  %v5646_v52 = vadd.f32 %v5645_v39, %v14203_v30  ;;  %v5647_v15 = vpop.f32.mrb[133].mxu0  ;;  %6643 = vmatmul.mubr.bf16.gmra.mrb[236].mxu1 %v15242_v14 }
 0x60a   : > { %v7062_v4 = vmax.f32 %v7061_v16, %v5995_v6  ;;  %v5648_v7 = vadd.f32 %v5647_v15, %v14207_v21  ;;  %v5649_v18 = vpop.f32.mrb[134].mxu0  ;;  %6652 = vmatprep.mubr.bf16.mxu1 %v15215_v43 }
 0x60b   : > { %v6952_v58 = vmax.f32 %v6951_v56, %v5646_v52  ;;  %v5650_v41 = vadd.f32 %v5649_v18, %v14203_v30  ;;  %v5651_v2 = vpop.f32.mrb[135].mxu0 }
 0x60c   : > { %v6989_v35 = vmax.f32 %v6988_v36, %v5648_v7  ;;  %v5652_v22 = vadd.f32 %v5651_v2, %v14207_v21  ;;  %v5998_v27 = vpop.f32.mrb[132].mxu1 }
 0x60d   : > { %v6953_v59 = vmax.f32 %v6952_v58, %v5650_v41  ;;  %v5999_v57 = vadd.f32 %v5998_v27, %v14211_v13  ;;  %v6000_v38 = vpop.f32.mrb[133].mxu1  ;;  %6300 = vmatmul.mubr.bf16.gmra.mrb[240].mxu0 %v15243_v0 }
 0x60e   : > { %v6990_v14 = vmax.f32 %v6989_v35, %v5652_v22  ;;  %v6001_v63 = vadd.f32 %v6000_v38, %v14214_v34  ;;  %v6002_v44 = vpop.f32.mrb[134].mxu1  ;;  %6309 = vmatprep.mubr.bf16.mxu0 %v15215_v43 }
 0x60f   : > { %v7026_v37 = vmax.f32 %v7025_v11, %v5999_v57  ;;  %v6003_v12 = vadd.f32 %v6002_v44, %v14211_v13  ;;  %v6004_v54 = vpop.f32.mrb[135].mxu1 }
 0x610   : > { %v7063_v56 = vmax.f32 %v7062_v4, %v6001_v63  ;;  %v6005_v51 = vadd.f32 %v6004_v54, %v14214_v34  ;;  %v5655_v29 = vpop.f32.mrb[136].mxu0 }
 0x611   : > { %v7027_v36 = vmax.f32 %v7026_v37, %v6003_v12  ;;  %v5656_v48 = vadd.f32 %v5655_v29, %v14203_v30  ;;  %v5657_v1 = vpop.f32.mrb[137].mxu0  ;;  %6653 = vmatmul.mubr.bf16.gmra.mrb[240].mxu1 %v15243_v0 }
 0x612   : > { %v7064_v50 = vmax.f32 %v7063_v56, %v6005_v51  ;;  %v5658_v32 = vadd.f32 %v5657_v1, %v14207_v21  ;;  %v5659_v40 = vpop.f32.mrb[138].mxu0  ;;  %6662 = vmatprep.mubr.bf16.mxu1 %v15215_v43 }
 0x613   : > { %v6954_v16 = vmax.f32 %v6953_v59, %v5656_v48  ;;  %v5660_v6 = vadd.f32 %v5659_v40, %v14203_v30  ;;  %v5661_v39 = vpop.f32.mrb[139].mxu0 }
 0x614   : > { %v6991_v11 = vmax.f32 %v6990_v14, %v5658_v32  ;;  %v5662_v52 = vadd.f32 %v5661_v39, %v14207_v21  ;;  %v6008_v15 = vpop.f32.mrb[136].mxu1 }
 0x615   : > { %v6955_v4 = vmax.f32 %v6954_v16, %v5660_v6  ;;  %v6009_v7 = vadd.f32 %v6008_v15, %v14211_v13  ;;  %v6010_v18 = vpop.f32.mrb[137].mxu1  ;;  %6310 = vmatmul.mubr.bf16.gmra.mrb[244].mxu0 %v15244_v28 }
 0x616   : > { %v6992_v0 = vmax.f32 %v6991_v11, %v5662_v52  ;;  %v6011_v58 = vadd.f32 %v6010_v18, %v14214_v34  ;;  %v6012_v41 = vpop.f32.mrb[138].mxu1  ;;  %6319 = vmatprep.mubr.bf16.mxu0 %v15215_v43 }
 0x617   : > { %v7028_v2 = vmax.f32 %v7027_v36, %v6009_v7  ;;  %v6013_v35 = vadd.f32 %v6012_v41, %v14211_v13  ;;  %v6014_v22 = vpop.f32.mrb[139].mxu1 }
 0x618   : > { %v7065_v27 = vmax.f32 %v7064_v50, %v6011_v58  ;;  %v6015_v59 = vadd.f32 %v6014_v22, %v14214_v34  ;;  %v5665_v57 = vpop.f32.mrb[140].mxu0 }
 0x619   : > { %v7029_v38 = vmax.f32 %v7028_v2, %v6013_v35  ;;  %v5666_v14 = vadd.f32 %v5665_v57, %v14203_v30  ;;  %v5667_v63 = vpop.f32.mrb[141].mxu0  ;;  %6663 = vmatmul.mubr.bf16.gmra.mrb[244].mxu1 %v15244_v28 }
 0x61a   : > { %v7066_v44 = vmax.f32 %v7065_v27, %v6015_v59  ;;  %v5668_v37 = vadd.f32 %v5667_v63, %v14207_v21  ;;  %v5669_v12 = vpop.f32.mrb[142].mxu0  ;;  %6672 = vmatprep.mubr.bf16.mxu1 %v15215_v43 }
 0x61b   : > { %v6956_v54 = vmax.f32 %v6955_v4, %v5666_v14  ;;  %v5670_v56 = vadd.f32 %v5669_v12, %v14203_v30  ;;  %v5671_v51 = vpop.f32.mrb[143].mxu0 }
 0x61c   : > { %v6993_v29 = vmax.f32 %v6992_v0, %v5668_v37  ;;  %v5672_v36 = vadd.f32 %v5671_v51, %v14207_v21  ;;  %v6018_v48 = vpop.f32.mrb[140].mxu1 }
 0x61d   : > { %v6957_v1 = vmax.f32 %v6956_v54, %v5670_v56  ;;  %v6019_v50 = vadd.f32 %v6018_v48, %v14211_v13  ;;  %v6020_v32 = vpop.f32.mrb[141].mxu1  ;;  %6320 = vmatmul.mubr.bf16.gmra.mrb[248].mxu0 %v15245_v17 }
 0x61e   : > { %v6994_v28 = vmax.f32 %v6993_v29, %v5672_v36  ;;  %v6021_v40 = vadd.f32 %v6020_v32, %v14214_v34  ;;  %v6022_v16 = vpop.f32.mrb[142].mxu1  ;;  %6329 = vmatprep.mubr.bf16.mxu0 %v15215_v43 }
 0x61f   : > { %v7030_v6 = vmax.f32 %v7029_v38, %v6019_v50  ;;  %v6023_v39 = vadd.f32 %v6022_v16, %v14211_v13  ;;  %v6024_v11 = vpop.f32.mrb[143].mxu1 }
 0x620   : > { %v7067_v52 = vmax.f32 %v7066_v44, %v6021_v40  ;;  %v6025_v15 = vadd.f32 %v6024_v11, %v14214_v34  ;;  %v5675_v4 = vpop.f32.mrb[144].mxu0 }
 0x621   : > { %v7031_v7 = vmax.f32 %v7030_v6, %v6023_v39  ;;  %v5676_v18 = vadd.f32 %v5675_v4, %v14203_v30  ;;  %v5677_v0 = vpop.f32.mrb[145].mxu0  ;;  %6673 = vmatmul.mubr.bf16.gmra.mrb[248].mxu1 %v15245_v17 }
 0x622   : > { %v7068_v58 = vmax.f32 %v7067_v52, %v6025_v15  ;;  %v5678_v41 = vadd.f32 %v5677_v0, %v14207_v21  ;;  %v5679_v2 = vpop.f32.mrb[146].mxu0  ;;  %6682 = vmatprep.mubr.bf16.mxu1 %v15215_v43 }
 0x623   : > { %v6958_v35 = vmax.f32 %v6957_v1, %v5676_v18  ;;  %v5680_v22 = vadd.f32 %v5679_v2, %v14203_v30  ;;  %v5681_v27 = vpop.f32.mrb[147].mxu0 }
 0x624   : > { %v6995_v59 = vmax.f32 %v6994_v28, %v5678_v41  ;;  %v5682_v57 = vadd.f32 %v5681_v27, %v14207_v21  ;;  %v6028_v38 = vpop.f32.mrb[144].mxu1 }
 0x625   : > { %v6959_v14 = vmax.f32 %v6958_v35, %v5680_v22  ;;  %v6029_v63 = vadd.f32 %v6028_v38, %v14211_v13  ;;  %v6030_v44 = vpop.f32.mrb[145].mxu1  ;;  %6330 = vmatmul.mubr.bf16.gmra.mrb[252].mxu0 %v15246_v42 }
 0x626   : > { %v6996_v17 = vmax.f32 %v6995_v59, %v5682_v57  ;;  %v6031_v37 = vadd.f32 %v6030_v44, %v14214_v34  ;;  %v6032_v12 = vpop.f32.mrb[146].mxu1  ;;  %6339 = vmatprep.mubr.bf16.mxu0 %v15215_v43 }
 0x627   : > { %v7032_v54 = vmax.f32 %v7031_v7, %v6029_v63  ;;  %v6033_v56 = vadd.f32 %v6032_v12, %v14211_v13  ;;  %v6034_v51 = vpop.f32.mrb[147].mxu1 }
 0x628   : > { %v7069_v29 = vmax.f32 %v7068_v58, %v6031_v37  ;;  %v6035_v36 = vadd.f32 %v6034_v51, %v14214_v34  ;;  %v5685_v48 = vpop.f32.mrb[148].mxu0 }
 0x629   : > { %v7033_v1 = vmax.f32 %v7032_v54, %v6033_v56  ;;  %v5686_v50 = vadd.f32 %v5685_v48, %v14203_v30  ;;  %v5687_v32 = vpop.f32.mrb[149].mxu0  ;;  %6683 = vmatmul.mubr.bf16.gmra.mrb[252].mxu1 %v15246_v42 }
 0x62a   : > { %v7070_v28 = vmax.f32 %v7069_v29, %v6035_v36  ;;  %v5688_v40 = vadd.f32 %v5687_v32, %v14207_v21  ;;  %v5689_v16 = vpop.f32.mrb[150].mxu0  ;;  %6692 = vmatprep.mubr.bf16.mxu1 %v15215_v43 }
 0x62b   : > { %v6960_v6 = vmax.f32 %v6959_v14, %v5686_v50  ;;  %v5690_v39 = vadd.f32 %v5689_v16, %v14203_v30  ;;  %v5691_v11 = vpop.f32.mrb[151].mxu0 }
 0x62c   : > { %v6997_v52 = vmax.f32 %v6996_v17, %v5688_v40  ;;  %v5692_v15 = vadd.f32 %v5691_v11, %v14207_v21  ;;  %v6038_v4 = vpop.f32.mrb[148].mxu1 }
 0x62d   : > { %v6961_v7 = vmax.f32 %v6960_v6, %v5690_v39  ;;  %v6039_v18 = vadd.f32 %v6038_v4, %v14211_v13  ;;  %v6040_v0 = vpop.f32.mrb[149].mxu1  ;;  %6340 = vmatmul.mubr.bf16.gmra.mrb[0].mxu0 %v15247_v49 }
 0x62e   : > { %v6998_v42 = vmax.f32 %v6997_v52, %v5692_v15  ;;  %v6041_v58 = vadd.f32 %v6040_v0, %v14214_v34  ;;  %v6042_v41 = vpop.f32.mrb[150].mxu1  ;;  %6349 = vmatprep.mubr.bf16.mxu0 %v15215_v43 }
 0x62f   : > { %v7034_v2 = vmax.f32 %v7033_v1, %v6039_v18  ;;  %v6043_v35 = vadd.f32 %v6042_v41, %v14211_v13  ;;  %v6044_v22 = vpop.f32.mrb[151].mxu1 }
 0x630   : > { %v7071_v27 = vmax.f32 %v7070_v28, %v6041_v58  ;;  %v6045_v59 = vadd.f32 %v6044_v22, %v14214_v34  ;;  %v5695_v57 = vpop.f32.mrb[152].mxu0 }
 0x631   : > { %v7035_v38 = vmax.f32 %v7034_v2, %v6043_v35  ;;  %v5696_v14 = vadd.f32 %v5695_v57, %v14203_v30  ;;  %v5697_v63 = vpop.f32.mrb[153].mxu0  ;;  %6693 = vmatmul.mubr.bf16.gmra.mrb[0].mxu1 %v15247_v49 }
 0x632   : > { %v7072_v44 = vmax.f32 %v7071_v27, %v6045_v59  ;;  %v5698_v17 = vadd.f32 %v5697_v63, %v14207_v21  ;;  %v5699_v37 = vpop.f32.mrb[154].mxu0  ;;  %6702 = vmatprep.mubr.bf16.mxu1 %v15215_v43 }
 0x633   : > { %v6962_v12 = vmax.f32 %v6961_v7, %v5696_v14  ;;  %v5700_v54 = vadd.f32 %v5699_v37, %v14203_v30  ;;  %v5701_v56 = vpop.f32.mrb[155].mxu0 }
 0x634   : > { %v6999_v51 = vmax.f32 %v6998_v42, %v5698_v17  ;;  %v5702_v29 = vadd.f32 %v5701_v56, %v14207_v21  ;;  %v6048_v36 = vpop.f32.mrb[152].mxu1 }
 0x635   : > { %v6963_v48 = vmax.f32 %v6962_v12, %v5700_v54  ;;  %v6049_v1 = vadd.f32 %v6048_v36, %v14211_v13  ;;  %v6050_v50 = vpop.f32.mrb[153].mxu1  ;;  %6350 = vmatmul.mubr.bf16.gmra.mrb[4].mxu0 %v15248_v19 }
 0x636   : > { %v7000_v49 = vmax.f32 %v6999_v51, %v5702_v29  ;;  %v6051_v32 = vadd.f32 %v6050_v50, %v14214_v34  ;;  %v6052_v28 = vpop.f32.mrb[154].mxu1  ;;  %6359 = vmatprep.mubr.bf16.mxu0 %v15215_v43 }
 0x637   : > { %v7036_v40 = vmax.f32 %v7035_v38, %v6049_v1  ;;  %v6053_v16 = vadd.f32 %v6052_v28, %v14211_v13  ;;  %v6054_v6 = vpop.f32.mrb[155].mxu1 }
 0x638   : > { %v7073_v39 = vmax.f32 %v7072_v44, %v6051_v32  ;;  %v6055_v11 = vadd.f32 %v6054_v6, %v14214_v34  ;;  %v5705_v52 = vpop.f32.mrb[156].mxu0 }
 0x639   : > { %v7037_v15 = vmax.f32 %v7036_v40, %v6053_v16  ;;  %v5706_v4 = vadd.f32 %v5705_v52, %v14203_v30  ;;  %v5707_v7 = vpop.f32.mrb[157].mxu0  ;;  %6703 = vmatmul.mubr.bf16.gmra.mrb[4].mxu1 %v15248_v19 }
 0x63a   : > { %v7074_v18 = vmax.f32 %v7073_v39, %v6055_v11  ;;  %v5708_v0 = vadd.f32 %v5707_v7, %v14207_v21  ;;  %v5709_v42 = vpop.f32.mrb[158].mxu0  ;;  %6712 = vmatprep.mubr.bf16.mxu1 %v15215_v43 }
 0x63b   : > { %v6964_v58 = vmax.f32 %v6963_v48, %v5706_v4  ;;  %v5710_v41 = vadd.f32 %v5709_v42, %v14203_v30  ;;  %v5711_v2 = vpop.f32.mrb[159].mxu0 }
 0x63c   : > { %v7001_v35 = vmax.f32 %v7000_v49, %v5708_v0  ;;  %v5712_v22 = vadd.f32 %v5711_v2, %v14207_v21  ;;  %v6058_v27 = vpop.f32.mrb[156].mxu1 }
 0x63d   : > { %v6965_v59 = vmax.f32 %v6964_v58, %v5710_v41  ;;  %v6059_v57 = vadd.f32 %v6058_v27, %v14211_v13  ;;  %v6060_v38 = vpop.f32.mrb[157].mxu1  ;;  %6360 = vmatmul.mubr.bf16.gmra.mrb[8].mxu0 %v15249_v31 }
 0x63e   : > { %v7002_v19 = vmax.f32 %v7001_v35, %v5712_v22  ;;  %v6061_v14 = vadd.f32 %v6060_v38, %v14214_v34  ;;  %v6062_v63 = vpop.f32.mrb[158].mxu1  ;;  %6369 = vmatprep.mubr.bf16.mxu0 %v15215_v43 }
 0x63f   : > { %v6966_v44 = vrot.slane %v6965_v59, 4  ;;  %v7038_v17 = vmax.f32 %v7037_v15, %v6059_v57  ;;  %v6063_v37 = vadd.f32 %v6062_v63, %v14211_v13  ;;  %v6064_v12 = vpop.f32.mrb[159].mxu1 }
 0x640   : > { %v7003_v54 = vrot.slane %v7002_v19, 4  ;;  %v7075_v56 = vmax.f32 %v7074_v18, %v6061_v14  ;;  %v6065_v51 = vadd.f32 %v6064_v12, %v14214_v34  ;;  %v5715_v29 = vpop.f32.mrb[160].mxu0 }
 0x641   : > { %v6967_v36 = vmax.f32 %v6965_v59, %v6966_v44  ;;  %v7039_v48 = vmax.f32 %v7038_v17, %v6063_v37  ;;  %v5717_v1 = vpop.f32.mrb[161].mxu0  ;;  %6713 = vmatmul.mubr.bf16.gmra.mrb[8].mxu1 %v15249_v31  ;;  %v5716_v16 = vadd.f32 %v5715_v29, %v14203_v30 }
 0x642   : > { %v7004_v50 = vmax.f32 %v7002_v19, %v7003_v54  ;;  %v7076_v49 = vmax.f32 %v7075_v56, %v6065_v51  ;;  %v5719_v32 = vpop.f32.mrb[162].mxu0  ;;  %6722 = vmatprep.mubr.bf16.mxu1 %v15215_v43  ;;  %v5718_v15 = vadd.f32 %v5717_v1, %v14207_v21 }
 0x643   : > { %v6968_v28 = vrot.slane %v6967_v36, 2  ;;  %v7040_v40 = vrot.slane %v7039_v48, 4  ;;  %v5720_v6 = vadd.f32 %v5719_v32, %v14203_v30  ;;  %v5721_v39 = vpop.f32.mrb[163].mxu0 }
 0x644   : > { %v7005_v11 = vrot.slane %v7004_v50, 2  ;;  %v7077_v52 = vrot.slane %v7076_v49, 4  ;;  %v5722_v4 = vadd.f32 %v5721_v39, %v14207_v21  ;;  %v6068_v7 = vpop.f32.mrb[160].mxu1 }
 0x645   : > { %v6969_v31 = vmax.f32 %v6967_v36, %v6968_v28  ;;  %v7041_v18 = vmax.f32 %v7039_v48, %v7040_v40  ;;  %v7231_v0 = vmax.f32 %v5716_v16, %v5720_v6  ;;  %v6070_v42 = vpop.f32.mrb[161].mxu1  ;;  %6370 = vmatmul.mubr.bf16.gmra.mrb[12].mxu0 %v15250_v10  ;;  %v6069_v59 = vadd.f32 %v6068_v7, %v14211_v13 }
 0x646   : > { %v7006_v58 = vmax.f32 %v7004_v50, %v7005_v11  ;;  %v7078_v41 = vmax.f32 %v7076_v49, %v7077_v52  ;;  %v7268_v2 = vmax.f32 %v5718_v15, %v5722_v4  ;;  %v6072_v35 = vpop.f32.mrb[162].mxu1  ;;  %6379 = vmatprep.mubr.bf16.mxu0 %v15215_v43  ;;  %v6071_v63 = vadd.f32 %v6070_v42, %v14214_v34 }
 0x647   : > { %v6970_v22 = vrot.slane %v6969_v31, 1  ;;  %v7042_v27 = vrot.slane %v7041_v18, 2  ;;  %v6073_v57 = vadd.f32 %v6072_v35, %v14211_v13  ;;  %v6074_v38 = vpop.f32.mrb[163].mxu1 }
 0x648   : > { %v7007_v19 = vrot.slane %v7006_v58, 1  ;;  %v7079_v14 = vrot.slane %v7078_v41, 2  ;;  %v6075_v44 = vadd.f32 %v6074_v38, %v14214_v34  ;;  %v5725_v17 = vpop.f32.mrb[164].mxu0 }
 0x649   : > { %v6971_v37 = vmax.f32 %v6969_v31, %v6970_v22  ;;  %v7043_v12 = vmax.f32 %v7041_v18, %v7042_v27  ;;  %v7305_v54 = vmax.f32 %v6069_v59, %v6073_v57  ;;  %v5726_v56 = vadd.f32 %v5725_v17, %v14203_v30  ;;  %v5727_v51 = vpop.f32.mrb[165].mxu0  ;;  %6723 = vmatmul.mubr.bf16.gmra.mrb[12].mxu1 %v15250_v10 }
 0x64a   : > { %v7008_v29 = vmax.f32 %v7006_v58, %v7007_v19  ;;  %v7080_v36 = vmax.f32 %v7078_v41, %v7079_v14  ;;  %v7342_v48 = vmax.f32 %v6071_v63, %v6075_v44  ;;  %v5728_v1 = vadd.f32 %v5727_v51, %v14207_v21  ;;  %v5729_v50 = vpop.f32.mrb[166].mxu0  ;;  %6732 = vmatprep.mubr.bf16.mxu1 %v15215_v43 }
 0x64b   : > { %v7044_v49 = vrot.slane %v7043_v12, 1  ;;  %v7232_v32 = vmax.f32 %v7231_v0, %v5726_v56  ;;  %v5730_v28 = vadd.f32 %v5729_v50, %v14203_v30  ;;  %v5731_v40 = vpop.f32.mrb[167].mxu0 }
 0x64c   : > { %v7543_v16 = vcombine.low %v6971_v37, %v7008_v29  ;;  %v7081_v6 = vrot.slane %v7080_v36, 1  ;;  %v7269_v39 = vmax.f32 %v7268_v2, %v5728_v1  ;;  %v5732_v11 = vadd.f32 %v5731_v40, %v14207_v21  ;;  %v6078_v52 = vpop.f32.mrb[164].mxu1 }
 0x64d   : > { %v7045_v10 = vmax.f32 %v7043_v12, %v7044_v49  ;;  %v7233_v15 = vmax.f32 %v7232_v32, %v5730_v28  ;;  %v6079_v4 = vadd.f32 %v6078_v52, %v14211_v13  ;;  %v6080_v7 = vpop.f32.mrb[165].mxu1  ;;  %6380 = vmatmul.mubr.bf16.gmra.mrb[16].mxu0 %v15251_v55 }
 0x64e   : > { %v7082_v31 = vmax.f32 %v7080_v36, %v7081_v6  ;;  %v7270_v18 = vmax.f32 %v7269_v39, %v5732_v11  ;;  %v6081_v0 = vadd.f32 %v6080_v7, %v14214_v34  ;;  %v6082_v42 = vpop.f32.mrb[166].mxu1  ;;  %6389 = vmatprep.mubr.bf16.mxu0 %v15215_v43  ;;  %v14443_v14 = vrot.slane %v7543_v16, %v13495_v23 }
 0x64f   : > { %v7306_v58 = vmax.f32 %v7305_v54, %v6079_v4  ;;  %v6083_v41 = vadd.f32 %v6082_v42, %v14211_v13  ;;  %v6084_v2 = vpop.f32.mrb[167].mxu1 }
 0x650   : > { %v7544_v35 = vcombine.low %v7045_v10, %v7082_v31  ;;  %v7343_v22 = vmax.f32 %v7342_v48, %v6081_v0  ;;  %v6085_v27 = vadd.f32 %v6084_v2, %v14214_v34  ;;  %v5735_v59 = vpop.f32.mrb[168].mxu0 }
 0x651   : > { %v7307_v57 = vmax.f32 %v7306_v58, %v6083_v41  ;;  %v5736_v38 = vadd.f32 %v5735_v59, %v14203_v30  ;;  %v5737_v19 = vpop.f32.mrb[169].mxu0  ;;  %6733 = vmatmul.mubr.bf16.gmra.mrb[16].mxu1 %v15251_v55 }
 0x652   : > { %v14446_v63 = vrot.slane %v7544_v35, %v13495_v23  ;;  %v7344_v44 = vmax.f32 %v7343_v22, %v6085_v27  ;;  %v5738_v17 = vadd.f32 %v5737_v19, %v14207_v21  ;;  %v5739_v37 = vpop.f32.mrb[170].mxu0  ;;  %6742 = vmatprep.mubr.bf16.mxu1 %v15215_v43 }
 0x653   : > { %v7234_v12 = vmax.f32 %v7233_v15, %v5736_v38  ;;  %v5740_v54 = vadd.f32 %v5739_v37, %v14203_v30  ;;  %v5741_v56 = vpop.f32.mrb[171].mxu0 }
 0x654   : > { %v7559_v51 = vcombine.low %v14443_v14, %v14446_v63  ;;  %v7271_v55 = vmax.f32 %v7270_v18, %v5738_v17  ;;  %v5742_v29 = vadd.f32 %v5741_v56, %v14207_v21  ;;  %v6088_v36 = vpop.f32.mrb[168].mxu1 }
 0x655   : > { %v7235_v48 = vmax.f32 %v7234_v12, %v5740_v54  ;;  %v6089_v1 = vadd.f32 %v6088_v36, %v14211_v13  ;;  %v6090_v50 = vpop.f32.mrb[169].mxu1  ;;  %6390 = vmatmul.mubr.bf16.gmra.mrb[20].mxu0 %v15252_v46 }
 0x656   : > { %v7272_v49 = vmax.f32 %v7271_v55, %v5742_v29  ;;  %v6091_v32 = vadd.f32 %v6090_v50, %v14214_v34  ;;  %v6092_v28 = vpop.f32.mrb[170].mxu1  ;;  %6399 = vmatprep.mubr.bf16.mxu0 %v15215_v43 }
 0x657   : > { %v7308_v40 = vmax.f32 %v7307_v57, %v6089_v1  ;;  %v6093_v16 = vadd.f32 %v6092_v28, %v14211_v13  ;;  %v6094_v6 = vpop.f32.mrb[171].mxu1 }
 0x658   : > { %v7345_v39 = vmax.f32 %v7344_v44, %v6091_v32  ;;  %v6095_v11 = vadd.f32 %v6094_v6, %v14214_v34  ;;  %v5745_v52 = vpop.f32.mrb[172].mxu0 }
 0x659   : > { %v7309_v10 = vmax.f32 %v7308_v40, %v6093_v16  ;;  %v5746_v15 = vadd.f32 %v5745_v52, %v14203_v30  ;;  %v5747_v4 = vpop.f32.mrb[173].mxu0  ;;  %6743 = vmatmul.mubr.bf16.gmra.mrb[20].mxu1 %v15252_v46 }
 0x65a   : > { %v7346_v7 = vmax.f32 %v7345_v39, %v6095_v11  ;;  %v5748_v31 = vadd.f32 %v5747_v4, %v14207_v21  ;;  %v5749_v18 = vpop.f32.mrb[174].mxu0  ;;  %6752 = vmatprep.mubr.bf16.mxu1 %v15215_v43 }
 0x65b   : > { %v7236_v0 = vmax.f32 %v7235_v48, %v5746_v15  ;;  %v5750_v42 = vadd.f32 %v5749_v18, %v14203_v30  ;;  %v5751_v58 = vpop.f32.mrb[175].mxu0 }
 0x65c   : > { %v7273_v41 = vmax.f32 %v7272_v49, %v5748_v31  ;;  %v5752_v2 = vadd.f32 %v5751_v58, %v14207_v21  ;;  %v6098_v35 = vpop.f32.mrb[172].mxu1 }
 0x65d   : > { %v7237_v22 = vmax.f32 %v7236_v0, %v5750_v42  ;;  %v6099_v27 = vadd.f32 %v6098_v35, %v14211_v13  ;;  %v6100_v59 = vpop.f32.mrb[173].mxu1  ;;  %6400 = vmatmul.mubr.bf16.gmra.mrb[24].mxu0 %v15253_v53 }
 0x65e   : > { %v7274_v46 = vmax.f32 %v7273_v41, %v5752_v2  ;;  %v6101_v57 = vadd.f32 %v6100_v59, %v14214_v34  ;;  %v6102_v38 = vpop.f32.mrb[174].mxu1  ;;  %6409 = vmatprep.mubr.bf16.mxu0 %v15215_v43 }
 0x65f   : > { %v7310_v19 = vmax.f32 %v7309_v10, %v6099_v27  ;;  %v6103_v44 = vadd.f32 %v6102_v38, %v14211_v13  ;;  %v6104_v17 = vpop.f32.mrb[175].mxu1 }
 0x660   : > { %v7347_v37 = vmax.f32 %v7346_v7, %v6101_v57  ;;  %v6105_v12 = vadd.f32 %v6104_v17, %v14214_v34  ;;  %v5755_v54 = vpop.f32.mrb[176].mxu0 }
 0x661   : > { %v7311_v56 = vmax.f32 %v7310_v19, %v6103_v44  ;;  %v5756_v55 = vadd.f32 %v5755_v54, %v14203_v30  ;;  %v5757_v29 = vpop.f32.mrb[177].mxu0  ;;  %6753 = vmatmul.mubr.bf16.gmra.mrb[24].mxu1 %v15253_v53 }
 0x662   : > { %v7348_v36 = vmax.f32 %v7347_v37, %v6105_v12  ;;  %v5758_v48 = vadd.f32 %v5757_v29, %v14207_v21  ;;  %v5759_v1 = vpop.f32.mrb[178].mxu0  ;;  %6762 = vmatprep.mubr.bf16.mxu1 %v15215_v43 }
 0x663   : > { %v7238_v50 = vmax.f32 %v7237_v22, %v5756_v55  ;;  %v5760_v49 = vadd.f32 %v5759_v1, %v14203_v30  ;;  %v5761_v32 = vpop.f32.mrb[179].mxu0 }
 0x664   : > { %v7275_v28 = vmax.f32 %v7274_v46, %v5758_v48  ;;  %v5762_v40 = vadd.f32 %v5761_v32, %v14207_v21  ;;  %v6108_v16 = vpop.f32.mrb[176].mxu1 }
 0x665   : > { %v7239_v6 = vmax.f32 %v7238_v50, %v5760_v49  ;;  %v6109_v39 = vadd.f32 %v6108_v16, %v14211_v13  ;;  %v6110_v11 = vpop.f32.mrb[177].mxu1  ;;  %6410 = vmatmul.mubr.bf16.gmra.mrb[28].mxu0 %v15254_v33 }
 0x666   : > { %v7276_v53 = vmax.f32 %v7275_v28, %v5762_v40  ;;  %v6111_v52 = vadd.f32 %v6110_v11, %v14214_v34  ;;  %v6112_v10 = vpop.f32.mrb[178].mxu1  ;;  %6419 = vmatprep.mubr.bf16.mxu0 %v15215_v43 }
 0x667   : > { %v7312_v15 = vmax.f32 %v7311_v56, %v6109_v39  ;;  %v6113_v4 = vadd.f32 %v6112_v10, %v14211_v13  ;;  %v6114_v7 = vpop.f32.mrb[179].mxu1 }
 0x668   : > { %v7349_v31 = vmax.f32 %v7348_v36, %v6111_v52  ;;  %v6115_v18 = vadd.f32 %v6114_v7, %v14214_v34  ;;  %v5765_v0 = vpop.f32.mrb[180].mxu0 }
 0x669   : > { %v7313_v42 = vmax.f32 %v7312_v15, %v6113_v4  ;;  %v5766_v58 = vadd.f32 %v5765_v0, %v14203_v30  ;;  %v5767_v41 = vpop.f32.mrb[181].mxu0  ;;  %6763 = vmatmul.mubr.bf16.gmra.mrb[28].mxu1 %v15254_v33 }
 0x66a   : > { %v7350_v2 = vmax.f32 %v7349_v31, %v6115_v18  ;;  %v5768_v35 = vadd.f32 %v5767_v41, %v14207_v21  ;;  %v5769_v22 = vpop.f32.mrb[182].mxu0  ;;  %6772 = vmatprep.mubr.bf16.mxu1 %v15215_v43 }
 0x66b   : > { %v7240_v27 = vmax.f32 %v7239_v6, %v5766_v58  ;;  %v5770_v59 = vadd.f32 %v5769_v22, %v14203_v30  ;;  %v5771_v46 = vpop.f32.mrb[183].mxu0 }
 0x66c   : > { %v7277_v57 = vmax.f32 %v7276_v53, %v5768_v35  ;;  %v5772_v38 = vadd.f32 %v5771_v46, %v14207_v21  ;;  %v6118_v19 = vpop.f32.mrb[180].mxu1 }
 0x66d   : > { %v7241_v44 = vmax.f32 %v7240_v27, %v5770_v59  ;;  %v6119_v17 = vadd.f32 %v6118_v19, %v14211_v13  ;;  %v6120_v37 = vpop.f32.mrb[181].mxu1  ;;  %6420 = vmatmul.mubr.bf16.gmra.mrb[32].mxu0 %v15255_v47 }
 0x66e   : > { %v7278_v33 = vmax.f32 %v7277_v57, %v5772_v38  ;;  %v6121_v12 = vadd.f32 %v6120_v37, %v14214_v34  ;;  %v6122_v54 = vpop.f32.mrb[182].mxu1  ;;  %6429 = vmatprep.mubr.bf16.mxu0 %v15215_v43 }
 0x66f   : > { %v7314_v56 = vmax.f32 %v7313_v42, %v6119_v17  ;;  %v6123_v55 = vadd.f32 %v6122_v54, %v14211_v13  ;;  %v6124_v29 = vpop.f32.mrb[183].mxu1 }
 0x670   : > { %v7351_v36 = vmax.f32 %v7350_v2, %v6121_v12  ;;  %v6125_v48 = vadd.f32 %v6124_v29, %v14214_v34  ;;  %v5775_v1 = vpop.f32.mrb[184].mxu0 }
 0x671   : > { %v7315_v50 = vmax.f32 %v7314_v56, %v6123_v55  ;;  %v5776_v49 = vadd.f32 %v5775_v1, %v14203_v30  ;;  %v5777_v32 = vpop.f32.mrb[185].mxu0  ;;  %6773 = vmatmul.mubr.bf16.gmra.mrb[32].mxu1 %v15255_v47 }
 0x672   : > { %v7352_v28 = vmax.f32 %v7351_v36, %v6125_v48  ;;  %v5778_v40 = vadd.f32 %v5777_v32, %v14207_v21  ;;  %v5779_v16 = vpop.f32.mrb[186].mxu0  ;;  %6782 = vmatprep.mubr.bf16.mxu1 %v15215_v43 }
 0x673   : > { %v7242_v6 = vmax.f32 %v7241_v44, %v5776_v49  ;;  %v5780_v39 = vadd.f32 %v5779_v16, %v14203_v30  ;;  %v5781_v11 = vpop.f32.mrb[187].mxu0 }
 0x674   : > { %v7279_v53 = vmax.f32 %v7278_v33, %v5778_v40  ;;  %v5782_v52 = vadd.f32 %v5781_v11, %v14207_v21  ;;  %v6128_v10 = vpop.f32.mrb[184].mxu1 }
 0x675   : > { %v7243_v15 = vmax.f32 %v7242_v6, %v5780_v39  ;;  %v6129_v4 = vadd.f32 %v6128_v10, %v14211_v13  ;;  %v6130_v7 = vpop.f32.mrb[185].mxu1  ;;  %6430 = vmatmul.mubr.bf16.gmra.mrb[36].mxu0 %v15256_v60 }
 0x676   : > { %v7280_v47 = vmax.f32 %v7279_v53, %v5782_v52  ;;  %v6131_v31 = vadd.f32 %v6130_v7, %v14214_v34  ;;  %v6132_v18 = vpop.f32.mrb[186].mxu1  ;;  %6439 = vmatprep.mubr.bf16.mxu0 %v15215_v43 }
 0x677   : > { %v7316_v0 = vmax.f32 %v7315_v50, %v6129_v4  ;;  %v6133_v42 = vadd.f32 %v6132_v18, %v14211_v13  ;;  %v6134_v58 = vpop.f32.mrb[187].mxu1 }
 0x678   : > { %v7353_v41 = vmax.f32 %v7352_v28, %v6131_v31  ;;  %v6135_v2 = vadd.f32 %v6134_v58, %v14214_v34  ;;  %v5785_v35 = vpop.f32.mrb[188].mxu0 }
 0x679   : > { %v7317_v22 = vmax.f32 %v7316_v0, %v6133_v42  ;;  %v5786_v27 = vadd.f32 %v5785_v35, %v14203_v30  ;;  %v5787_v59 = vpop.f32.mrb[189].mxu0  ;;  %6783 = vmatmul.mubr.bf16.gmra.mrb[36].mxu1 %v15256_v60 }
 0x67a   : > { %v7354_v46 = vmax.f32 %v7353_v41, %v6135_v2  ;;  %v5788_v57 = vadd.f32 %v5787_v59, %v14207_v21  ;;  %v5789_v38 = vpop.f32.mrb[190].mxu0  ;;  %6792 = vmatprep.mubr.bf16.mxu1 %v15215_v43 }
 0x67b   : > { %v7244_v19 = vmax.f32 %v7243_v15, %v5786_v27  ;;  %v5790_v44 = vadd.f32 %v5789_v38, %v14203_v30  ;;  %v5791_v17 = vpop.f32.mrb[191].mxu0 }
 0x67c   : > { %v7281_v37 = vmax.f32 %v7280_v47, %v5788_v57  ;;  %v5792_v33 = vadd.f32 %v5791_v17, %v14207_v21  ;;  %v6138_v12 = vpop.f32.mrb[188].mxu1 }
 0x67d   : > { %v7245_v54 = vmax.f32 %v7244_v19, %v5790_v44  ;;  %v6139_v56 = vadd.f32 %v6138_v12, %v14211_v13  ;;  %v6140_v55 = vpop.f32.mrb[189].mxu1  ;;  %6440 = vmatmul.mubr.bf16.gmra.mrb[40].mxu0 %v15257_v5 }
 0x67e   : > { %v7282_v60 = vmax.f32 %v7281_v37, %v5792_v33  ;;  %v6141_v29 = vadd.f32 %v6140_v55, %v14214_v34  ;;  %v6142_v36 = vpop.f32.mrb[190].mxu1  ;;  %6449 = vmatprep.mubr.bf16.mxu0 %v15215_v43 }
 0x67f   : > { %v7318_v48 = vmax.f32 %v7317_v22, %v6139_v56  ;;  %v6143_v1 = vadd.f32 %v6142_v36, %v14211_v13  ;;  %v6144_v50 = vpop.f32.mrb[191].mxu1 }
 0x680   : > { %v7355_v49 = vmax.f32 %v7354_v46, %v6141_v29  ;;  %v6145_v32 = vadd.f32 %v6144_v50, %v14214_v34  ;;  %v5795_v28 = vpop.f32.mrb[192].mxu0 }
 0x681   : > { %v7319_v40 = vmax.f32 %v7318_v48, %v6143_v1  ;;  %v5796_v16 = vadd.f32 %v5795_v28, %v14203_v30  ;;  %v5797_v6 = vpop.f32.mrb[193].mxu0  ;;  %6793 = vmatmul.mubr.bf16.gmra.mrb[40].mxu1 %v15257_v5 }
 0x682   : > { %v7356_v39 = vmax.f32 %v7355_v49, %v6145_v32  ;;  %v5798_v11 = vadd.f32 %v5797_v6, %v14207_v21  ;;  %v5799_v53 = vpop.f32.mrb[194].mxu0  ;;  %6802 = vmatprep.mubr.bf16.mxu1 %v15215_v43 }
 0x683   : > { %v7246_v52 = vmax.f32 %v7245_v54, %v5796_v16  ;;  %v5800_v10 = vadd.f32 %v5799_v53, %v14203_v30  ;;  %v5801_v15 = vpop.f32.mrb[195].mxu0 }
 0x684   : > { %v7283_v4 = vmax.f32 %v7282_v60, %v5798_v11  ;;  %v5802_v7 = vadd.f32 %v5801_v15, %v14207_v21  ;;  %v6148_v47 = vpop.f32.mrb[192].mxu1 }
 0x685   : > { %v7247_v31 = vmax.f32 %v7246_v52, %v5800_v10  ;;  %v6149_v18 = vadd.f32 %v6148_v47, %v14211_v13  ;;  %v6150_v0 = vpop.f32.mrb[193].mxu1  ;;  %6450 = vmatmul.mubr.bf16.gmra.mrb[44].mxu0 %v15258_v25 }
 0x686   : > { %v7284_v5 = vmax.f32 %v7283_v4, %v5802_v7  ;;  %v6151_v42 = vadd.f32 %v6150_v0, %v14214_v34  ;;  %v6152_v58 = vpop.f32.mrb[194].mxu1  ;;  %6459 = vmatprep.mubr.bf16.mxu0 %v15215_v43 }
 0x687   : > { %v7320_v41 = vmax.f32 %v7319_v40, %v6149_v18  ;;  %v6153_v2 = vadd.f32 %v6152_v58, %v14211_v13  ;;  %v6154_v35 = vpop.f32.mrb[195].mxu1 }
 0x688   : > { %v7357_v22 = vmax.f32 %v7356_v39, %v6151_v42  ;;  %v6155_v27 = vadd.f32 %v6154_v35, %v14214_v34  ;;  %v5805_v59 = vpop.f32.mrb[196].mxu0 }
 0x689   : > { %v7321_v46 = vmax.f32 %v7320_v41, %v6153_v2  ;;  %v5806_v57 = vadd.f32 %v5805_v59, %v14203_v30  ;;  %v5807_v38 = vpop.f32.mrb[197].mxu0  ;;  %6803 = vmatmul.mubr.bf16.gmra.mrb[44].mxu1 %v15258_v25 }
 0x68a   : > { %v7358_v19 = vmax.f32 %v7357_v22, %v6155_v27  ;;  %v5808_v44 = vadd.f32 %v5807_v38, %v14207_v21  ;;  %v5809_v17 = vpop.f32.mrb[198].mxu0  ;;  %6812 = vmatprep.mubr.bf16.mxu1 %v15215_v43 }
 0x68b   : > { %v7248_v37 = vmax.f32 %v7247_v31, %v5806_v57  ;;  %v5810_v33 = vadd.f32 %v5809_v17, %v14203_v30  ;;  %v5811_v12 = vpop.f32.mrb[199].mxu0 }
 0x68c   : > { %v7285_v54 = vmax.f32 %v7284_v5, %v5808_v44  ;;  %v5812_v56 = vadd.f32 %v5811_v12, %v14207_v21  ;;  %v6158_v55 = vpop.f32.mrb[196].mxu1 }
 0x68d   : > { %v7249_v60 = vmax.f32 %v7248_v37, %v5810_v33  ;;  %v6159_v29 = vadd.f32 %v6158_v55, %v14211_v13  ;;  %v6160_v36 = vpop.f32.mrb[197].mxu1  ;;  %6460 = vmatmul.mubr.bf16.gmra.mrb[48].mxu0 %v15259_v3 }
 0x68e   : > { %v7286_v25 = vmax.f32 %v7285_v54, %v5812_v56  ;;  %v6161_v48 = vadd.f32 %v6160_v36, %v14214_v34  ;;  %v6162_v1 = vpop.f32.mrb[198].mxu1  ;;  %6469 = vmatprep.mubr.bf16.mxu0 %v15215_v43 }
 0x68f   : > { %v7322_v50 = vmax.f32 %v7321_v46, %v6159_v29  ;;  %v6163_v49 = vadd.f32 %v6162_v1, %v14211_v13  ;;  %v6164_v32 = vpop.f32.mrb[199].mxu1 }
 0x690   : > { %v7359_v28 = vmax.f32 %v7358_v19, %v6161_v48  ;;  %v6165_v40 = vadd.f32 %v6164_v32, %v14214_v34  ;;  %v5815_v16 = vpop.f32.mrb[200].mxu0 }
 0x691   : > { %v7323_v6 = vmax.f32 %v7322_v50, %v6163_v49  ;;  %v5816_v39 = vadd.f32 %v5815_v16, %v14203_v30  ;;  %v5817_v11 = vpop.f32.mrb[201].mxu0  ;;  %6813 = vmatmul.mubr.bf16.gmra.mrb[48].mxu1 %v15259_v3 }
 0x692   : > { %v7360_v53 = vmax.f32 %v7359_v28, %v6165_v40  ;;  %v5818_v52 = vadd.f32 %v5817_v11, %v14207_v21  ;;  %v5819_v10 = vpop.f32.mrb[202].mxu0  ;;  %6822 = vmatprep.mubr.bf16.mxu1 %v15215_v43 }
 0x693   : > { %v7250_v15 = vmax.f32 %v7249_v60, %v5816_v39  ;;  %v5820_v4 = vadd.f32 %v5819_v10, %v14203_v30  ;;  %v5821_v7 = vpop.f32.mrb[203].mxu0 }
 0x694   : > { %v7287_v47 = vmax.f32 %v7286_v25, %v5818_v52  ;;  %v5822_v31 = vadd.f32 %v5821_v7, %v14207_v21  ;;  %v6168_v18 = vpop.f32.mrb[200].mxu1 }
 0x695   : > { %v7251_v0 = vmax.f32 %v7250_v15, %v5820_v4  ;;  %v6169_v5 = vadd.f32 %v6168_v18, %v14211_v13  ;;  %v6170_v42 = vpop.f32.mrb[201].mxu1  ;;  %6470 = vmatmul.mubr.bf16.gmra.mrb[52].mxu0 %v15260_v62 }
 0x696   : > { %v7288_v3 = vmax.f32 %v7287_v47, %v5822_v31  ;;  %v6171_v58 = vadd.f32 %v6170_v42, %v14214_v34  ;;  %v6172_v41 = vpop.f32.mrb[202].mxu1  ;;  %6479 = vmatprep.mubr.bf16.mxu0 %v15215_v43 }
 0x697   : > { %v7324_v2 = vmax.f32 %v7323_v6, %v6169_v5  ;;  %v6173_v35 = vadd.f32 %v6172_v41, %v14211_v13  ;;  %v6174_v22 = vpop.f32.mrb[203].mxu1 }
 0x698   : > { %v7361_v27 = vmax.f32 %v7360_v53, %v6171_v58  ;;  %v6175_v59 = vadd.f32 %v6174_v22, %v14214_v34  ;;  %v5825_v46 = vpop.f32.mrb[204].mxu0 }
 0x699   : > { %v7325_v57 = vmax.f32 %v7324_v2, %v6173_v35  ;;  %v5826_v38 = vadd.f32 %v5825_v46, %v14203_v30  ;;  %v5827_v19 = vpop.f32.mrb[205].mxu0  ;;  %6823 = vmatmul.mubr.bf16.gmra.mrb[52].mxu1 %v15260_v62 }
 0x69a   : > { %v7362_v44 = vmax.f32 %v7361_v27, %v6175_v59  ;;  %v5828_v17 = vadd.f32 %v5827_v19, %v14207_v21  ;;  %v5829_v37 = vpop.f32.mrb[206].mxu0  ;;  %6832 = vmatprep.mubr.bf16.mxu1 %v15215_v43 }
 0x69b   : > { %v7252_v33 = vmax.f32 %v7251_v0, %v5826_v38  ;;  %v5830_v12 = vadd.f32 %v5829_v37, %v14203_v30  ;;  %v5831_v54 = vpop.f32.mrb[207].mxu0 }
 0x69c   : > { %v7289_v56 = vmax.f32 %v7288_v3, %v5828_v17  ;;  %v5832_v55 = vadd.f32 %v5831_v54, %v14207_v21  ;;  %v6178_v60 = vpop.f32.mrb[204].mxu1 }
 0x69d   : > { %v7253_v29 = vmax.f32 %v7252_v33, %v5830_v12  ;;  %v6179_v36 = vadd.f32 %v6178_v60, %v14211_v13  ;;  %v6180_v25 = vpop.f32.mrb[205].mxu1  ;;  %6480 = vmatmul.mubr.bf16.gmra.mrb[56].mxu0 %v15261_v20 }
 0x69e   : > { %v7290_v62 = vmax.f32 %v7289_v56, %v5832_v55  ;;  %v6181_v48 = vadd.f32 %v6180_v25, %v14214_v34  ;;  %v6182_v1 = vpop.f32.mrb[206].mxu1  ;;  %6489 = vmatprep.mubr.bf16.mxu0 %v15215_v43 }
 0x69f   : > { %v7326_v50 = vmax.f32 %v7325_v57, %v6179_v36  ;;  %v6183_v49 = vadd.f32 %v6182_v1, %v14211_v13  ;;  %v6184_v32 = vpop.f32.mrb[207].mxu1 }
 0x6a0   : > { %v7363_v28 = vmax.f32 %v7362_v44, %v6181_v48  ;;  %v6185_v40 = vadd.f32 %v6184_v32, %v14214_v34  ;;  %v5835_v16 = vpop.f32.mrb[208].mxu0 }
 0x6a1   : > { %v7327_v6 = vmax.f32 %v7326_v50, %v6183_v49  ;;  %v5836_v39 = vadd.f32 %v5835_v16, %v14203_v30  ;;  %v5837_v11 = vpop.f32.mrb[209].mxu0  ;;  %6833 = vmatmul.mubr.bf16.gmra.mrb[56].mxu1 %v15261_v20 }
 0x6a2   : > { %v7364_v53 = vmax.f32 %v7363_v28, %v6185_v40  ;;  %v5838_v52 = vadd.f32 %v5837_v11, %v14207_v21  ;;  %v5839_v10 = vpop.f32.mrb[210].mxu0  ;;  %6842 = vmatprep.mubr.bf16.mxu1 %v15215_v43 }
 0x6a3   : > { %v7254_v15 = vmax.f32 %v7253_v29, %v5836_v39  ;;  %v5840_v4 = vadd.f32 %v5839_v10, %v14203_v30  ;;  %v5841_v7 = vpop.f32.mrb[211].mxu0 }
 0x6a4   : > { %v7291_v47 = vmax.f32 %v7290_v62, %v5838_v52  ;;  %v5842_v31 = vadd.f32 %v5841_v7, %v14207_v21  ;;  %v6188_v18 = vpop.f32.mrb[208].mxu1 }
 0x6a5   : > { %v7255_v0 = vmax.f32 %v7254_v15, %v5840_v4  ;;  %v6189_v5 = vadd.f32 %v6188_v18, %v14211_v13  ;;  %v6190_v42 = vpop.f32.mrb[209].mxu1  ;;  %6490 = vmatmul.mubr.bf16.gmra.mrb[60].mxu0 %v15262_v45 }
 0x6a6   : > { %v7292_v20 = vmax.f32 %v7291_v47, %v5842_v31  ;;  %v6191_v3 = vadd.f32 %v6190_v42, %v14214_v34  ;;  %v6192_v58 = vpop.f32.mrb[210].mxu1  ;;  %6499 = vmatprep.mubr.bf16.mxu0 %v15215_v43 }
 0x6a7   : > { %v7328_v41 = vmax.f32 %v7327_v6, %v6189_v5  ;;  %v6193_v2 = vadd.f32 %v6192_v58, %v14211_v13  ;;  %v6194_v35 = vpop.f32.mrb[211].mxu1  ;;  %v15278_v5 = vld [vmem:[#allocation61_spill] sm:$0xff] }
 0x6a8   : > { %v7365_v22 = vmax.f32 %v7364_v53, %v6191_v3  ;;  %v6195_v27 = vadd.f32 %v6194_v35, %v14214_v34  ;;  %v5845_v59 = vpop.f32.mrb[212].mxu0 }
 0x6a9   : > { %v7329_v46 = vmax.f32 %v7328_v41, %v6193_v2  ;;  %v5846_v57 = vadd.f32 %v5845_v59, %v14203_v30  ;;  %v5847_v38 = vpop.f32.mrb[213].mxu0  ;;  %6843 = vmatmul.mubr.bf16.gmra.mrb[60].mxu1 %v15262_v45 }
 0x6aa   : > { %v7366_v19 = vmax.f32 %v7365_v22, %v6195_v27  ;;  %v5848_v44 = vadd.f32 %v5847_v38, %v14207_v21  ;;  %v5849_v17 = vpop.f32.mrb[214].mxu0  ;;  %6852 = vmatprep.mubr.bf16.mxu1 %v15215_v43 }
 0x6ab   : > { %v7256_v37 = vmax.f32 %v7255_v0, %v5846_v57  ;;  %v5850_v33 = vadd.f32 %v5849_v17, %v14203_v30  ;;  %v5851_v12 = vpop.f32.mrb[215].mxu0 }
 0x6ac   : > { %v7293_v54 = vmax.f32 %v7292_v20, %v5848_v44  ;;  %v5852_v56 = vadd.f32 %v5851_v12, %v14207_v21  ;;  %v6198_v55 = vpop.f32.mrb[212].mxu1 }
 0x6ad   : > { %v7257_v60 = vmax.f32 %v7256_v37, %v5850_v33  ;;  %v6199_v29 = vadd.f32 %v6198_v55, %v14211_v13  ;;  %v6200_v36 = vpop.f32.mrb[213].mxu1  ;;  %6500 = vmatmul.mubr.bf16.gmra.mrb[64].mxu0 %v15263_v24 }
 0x6ae   : > { %v7294_v45 = vmax.f32 %v7293_v54, %v5852_v56  ;;  %v6201_v25 = vadd.f32 %v6200_v36, %v14214_v34  ;;  %v6202_v62 = vpop.f32.mrb[214].mxu1  ;;  %6509 = vmatprep.mubr.bf16.mxu0 %v15215_v43 }
 0x6af   : > { %v7330_v48 = vmax.f32 %v7329_v46, %v6199_v29  ;;  %v6203_v1 = vadd.f32 %v6202_v62, %v14211_v13  ;;  %v6204_v50 = vpop.f32.mrb[215].mxu1  ;;  %v15279_v29 = vld [vmem:[#allocation62_spill] sm:$0xff] }
 0x6b0   : > { %v7367_v49 = vmax.f32 %v7366_v19, %v6201_v25  ;;  %v6205_v32 = vadd.f32 %v6204_v50, %v14214_v34  ;;  %v5855_v28 = vpop.f32.mrb[216].mxu0  ;;  %v15280_v50 = vld [vmem:[#allocation33_spill] sm:$0xff] }
 0x6b1   : > { %v7331_v40 = vmax.f32 %v7330_v48, %v6203_v1  ;;  %v5856_v16 = vadd.f32 %v5855_v28, %v14203_v30  ;;  %v5857_v6 = vpop.f32.mrb[217].mxu0  ;;  %6853 = vmatmul.mubr.bf16.gmra.mrb[64].mxu1 %v15263_v24 }
 0x6b2   : > { %v7368_v39 = vmax.f32 %v7367_v49, %v6205_v32  ;;  %v5858_v11 = vadd.f32 %v5857_v6, %v14207_v21  ;;  %v5859_v53 = vpop.f32.mrb[218].mxu0  ;;  %6862 = vmatprep.mubr.bf16.mxu1 %v15215_v43  ;;  %v15281_v49 = vsub.s32 4, %v15280_v50 }
 0x6b3   : > { %v7258_v52 = vmax.f32 %v7257_v60, %v5856_v16  ;;  %v5860_v10 = vadd.f32 %v5859_v53, %v14203_v30  ;;  %v5861_v15 = vpop.f32.mrb[219].mxu0 }
 0x6b4   : > { %v7295_v4 = vmax.f32 %v7294_v45, %v5858_v11  ;;  %v5862_v7 = vadd.f32 %v5861_v15, %v14207_v21  ;;  %v6208_v47 = vpop.f32.mrb[216].mxu1 }
 0x6b5   : > { %v7259_v31 = vmax.f32 %v7258_v52, %v5860_v10  ;;  %v6209_v18 = vadd.f32 %v6208_v47, %v14211_v13  ;;  %v6210_v0 = vpop.f32.mrb[217].mxu1  ;;  %6510 = vmatmul.mubr.bf16.gmra.mrb[68].mxu0 %v15278_v5 }
 0x6b6   : > { %v7296_v24 = vmax.f32 %v7295_v4, %v5862_v7  ;;  %v6211_v42 = vadd.f32 %v6210_v0, %v14214_v34  ;;  %v6212_v20 = vpop.f32.mrb[218].mxu1  ;;  %6519 = vmatprep.mubr.bf16.mxu0 %v15215_v43  ;;  %v15283_v7 = vsub.s32 6, %v15280_v50 }
 0x6b7   : > { %v7332_v3 = vmax.f32 %v7331_v40, %v6209_v18  ;;  %v6213_v58 = vadd.f32 %v6212_v20, %v14211_v13  ;;  %v6214_v41 = vpop.f32.mrb[219].mxu1 }
 0x6b8   : > { %v7369_v2 = vmax.f32 %v7368_v39, %v6211_v42  ;;  %v6215_v35 = vadd.f32 %v6214_v41, %v14214_v34  ;;  %v5865_v22 = vpop.f32.mrb[220].mxu0  ;;  %v15282_v39 = vsub.s32 5, %v15280_v50 }
 0x6b9   : > { %v7333_v27 = vmax.f32 %v7332_v3, %v6213_v58  ;;  %v5866_v59 = vadd.f32 %v5865_v22, %v14203_v30  ;;  %v5867_v46 = vpop.f32.mrb[221].mxu0  ;;  %6863 = vmatmul.mubr.bf16.gmra.mrb[68].mxu1 %v15278_v5 }
 0x6ba   : > { %v7370_v57 = vmax.f32 %v7369_v2, %v6215_v35  ;;  %v5868_v38 = vadd.f32 %v5867_v46, %v14207_v21  ;;  %v5869_v19 = vpop.f32.mrb[222].mxu0  ;;  %6872 = vmatprep.mubr.bf16.mxu1 %v15215_v43 }
 0x6bb   : > { %v7260_v44 = vmax.f32 %v7259_v31, %v5866_v59  ;;  %v5870_v17 = vadd.f32 %v5869_v19, %v14203_v30  ;;  %v5871_v37 = vpop.f32.mrb[223].mxu0  ;;  %v15284_v31 = vsub.s32 7, %v15280_v50  ;;  %v15285_v59 = vld [vmem:[#allocation64_spill] sm:$0xff] }
 0x6bc   : > { %v7297_v33 = vmax.f32 %v7296_v24, %v5868_v38  ;;  %v5872_v12 = vadd.f32 %v5871_v37, %v14207_v21  ;;  %v6218_v54 = vpop.f32.mrb[220].mxu1  ;;  %v11361_v21 = vld [vmem:[%s15266_s10] sm:$0xff] }
 0x6bd   : > { %v7261_v56 = vmax.f32 %v7260_v44, %v5870_v17  ;;  %v6219_v55 = vadd.f32 %v6218_v54, %v14211_v13  ;;  %v6220_v60 = vpop.f32.mrb[221].mxu1  ;;  %6520 = vmatmul.mubr.bf16.gmra.mrb[72].mxu0 %v15279_v29  ;;  %v14620_v32 = vrot.slane %v11361_v21, %v15281_v49  ;;  %v14625_v11 = vrot.slane %v11361_v21, %v15282_v39 }
 0x6be   : > { %v7298_v36 = vmax.f32 %v7297_v33, %v5872_v12  ;;  %v6221_v45 = vadd.f32 %v6220_v60, %v14214_v34  ;;  %v6222_v25 = vpop.f32.mrb[222].mxu1  ;;  %6529 = vmatprep.mubr.bf16.mxu0 %v15215_v43  ;;  %v14630_v47 = vrot.slane %v11361_v21, %v15283_v7 }
 0x6bf   : > { %v7262_v62 = vrot.slane %v7261_v56, 4  ;;  %v7334_v48 = vmax.f32 %v7333_v27, %v6219_v55  ;;  %v6223_v30 = vadd.f32 %v6222_v25, %v14211_v13  ;;  %v6224_v1 = vpop.f32.mrb[223].mxu1 }
 0x6c0   : > { %v7299_v28 = vrot.slane %v7298_v36, 4  ;;  %v7371_v40 = vmax.f32 %v7370_v57, %v6221_v45  ;;  %v6225_v16 = vadd.f32 %v6224_v1, %v14214_v34  ;;  %v6261_v6 = vpop.f32.mrb[224].mxu0  ;;  %v14634_v34 = vrot.slane %v11361_v21, %v15284_v31 }
 0x6c1   : > { %v7263_v53 = vmax.f32 %v7261_v56, %v7262_v62  ;;  %v7335_v13 = vmax.f32 %v7334_v48, %v6223_v30  ;;  %v6263_v52 = vpop.f32.mrb[225].mxu0  ;;  %6873 = vmatmul.mubr.bf16.gmra.mrb[72].mxu1 %v15279_v29  ;;  %v6262_v5 = vadd.f32 %v6261_v6, %v14620_v32 }
 0x6c2   : > { %v7300_v10 = vmax.f32 %v7298_v36, %v7299_v28  ;;  %v7372_v15 = vmax.f32 %v7371_v40, %v6225_v16  ;;  %v6265_v4 = vpop.f32.mrb[226].mxu0  ;;  %6882 = vmatprep.mubr.bf16.mxu1 %v15215_v43  ;;  %v6264_v58 = vadd.f32 %v6263_v52, %v14625_v11 }
 0x6c3   : > { %v7264_v18 = vrot.slane %v7263_v53, 2  ;;  %v7336_v0 = vrot.slane %v7335_v13, 4  ;;  %v6266_v24 = vadd.f32 %v6265_v4, %v14620_v32  ;;  %v6267_v42 = vpop.f32.mrb[227].mxu0 }
 0x6c4   : > { %v7301_v20 = vrot.slane %v7300_v10, 2  ;;  %v7373_v3 = vrot.slane %v7372_v15, 4  ;;  %v6268_v41 = vadd.f32 %v6267_v42, %v14625_v11  ;;  %v6614_v2 = vpop.f32.mrb[224].mxu1 }
 0x6c5   : > { %v7265_v35 = vmax.f32 %v7263_v53, %v7264_v18  ;;  %v7337_v22 = vmax.f32 %v7335_v13, %v7336_v0  ;;  %v7083_v27 = vmax.f32 %v6262_v5, %v6266_v24  ;;  %6530 = vmatmul.mubr.bf16.gmra.mrb[76].mxu0 %v15285_v59  ;;  %v6616_v46 = vpop.f32.mrb[225].mxu1  ;;  %v6615_v33 = vadd.f32 %v6614_v2, %v14630_v47 }
 0x6c6   : > { %v7302_v57 = vmax.f32 %v7300_v10, %v7301_v20  ;;  %v7374_v38 = vmax.f32 %v7372_v15, %v7373_v3  ;;  %v7120_v19 = vmax.f32 %v6264_v58, %v6268_v41  ;;  %v6618_v44 = vpop.f32.mrb[226].mxu1  ;;  %6539 = vmatprep.mubr.bf16.mxu0 %v15215_v43  ;;  %v6617_v60 = vadd.f32 %v6616_v46, %v14634_v34 }
 0x6c7   : > { %v7266_v17 = vrot.slane %v7265_v35, 1  ;;  %v7338_v37 = vrot.slane %v7337_v22, 2  ;;  %v6619_v12 = vadd.f32 %v6618_v44, %v14630_v47  ;;  %v6620_v54 = vpop.f32.mrb[227].mxu1 }
 0x6c8   : > { %v7303_v56 = vrot.slane %v7302_v57, 1  ;;  %v7375_v55 = vrot.slane %v7374_v38, 2  ;;  %v6621_v29 = vadd.f32 %v6620_v54, %v14634_v34  ;;  %v6271_v36 = vpop.f32.mrb[228].mxu0 }
 0x6c9   : > { %v7267_v45 = vmax.f32 %v7265_v35, %v7266_v17  ;;  %v7339_v25 = vmax.f32 %v7337_v22, %v7338_v37  ;;  %v7157_v62 = vmax.f32 %v6615_v33, %v6619_v12  ;;  %v6272_v48 = vadd.f32 %v6271_v36, %v14620_v32  ;;  %v6273_v30 = vpop.f32.mrb[229].mxu0  ;;  %6883 = vmatmul.mubr.bf16.gmra.mrb[76].mxu1 %v15285_v59 }
 0x6ca   : > { %v7304_v1 = vmax.f32 %v7302_v57, %v7303_v56  ;;  %v7376_v21 = vmax.f32 %v7374_v38, %v7375_v55  ;;  %v7194_v50 = vmax.f32 %v6617_v60, %v6621_v29  ;;  %v6274_v49 = vadd.f32 %v6273_v30, %v14625_v11  ;;  %v6275_v28 = vpop.f32.mrb[230].mxu0  ;;  %6892 = vmatprep.mubr.bf16.mxu1 %v15215_v43 }
 0x6cb   : > { %v7340_v40 = vrot.slane %v7339_v25, 1  ;;  %v7084_v16 = vmax.f32 %v7083_v27, %v6272_v48  ;;  %v6276_v6 = vadd.f32 %v6275_v28, %v14620_v32  ;;  %v6277_v39 = vpop.f32.mrb[231].mxu0 }
 0x6cc   : > { %v7577_v53 = vcombine.low %v7267_v45, %v7304_v1  ;;  %v7377_v13 = vrot.slane %v7376_v21, 1  ;;  %v7121_v52 = vmax.f32 %v7120_v19, %v6274_v49  ;;  %v6278_v10 = vadd.f32 %v6277_v39, %v14625_v11  ;;  %v6624_v15 = vpop.f32.mrb[228].mxu1 }
 0x6cd   : > { %v7341_v4 = vmax.f32 %v7339_v25, %v7340_v40  ;;  %v7085_v7 = vmax.f32 %v7084_v16, %v6276_v6  ;;  %v6625_v31 = vadd.f32 %v6624_v15, %v14630_v47  ;;  %6540 = vmatmul.mubr.bf16.gmra.mrb[80].mxu0 %v15273_v9  ;;  %v6626_v18 = vpop.f32.mrb[229].mxu1  ;;  %v6933_v16 = vld [vmem:[#allocation18] sm:$0xff] }
 0x6ce   : > { %v7378_v0 = vmax.f32 %v7376_v21, %v7377_v13  ;;  %v7122_v5 = vmax.f32 %v7121_v52, %v6278_v10  ;;  %v6627_v24 = vadd.f32 %v6626_v18, %v14634_v34  ;;  %v6628_v42 = vpop.f32.mrb[230].mxu1  ;;  %6549 = vmatprep.mubr.bf16.mxu0 %v15215_v43  ;;  %v7585_v57 = vrot.slane %v7577_v53, %v13495_v23 }
 0x6cf   : > { %v7158_v20 = vmax.f32 %v7157_v62, %v6625_v31  ;;  %v6629_v3 = vadd.f32 %v6628_v42, %v14630_v47  ;;  %v6630_v58 = vpop.f32.mrb[231].mxu1 }
 0x6d0   : > { %v7578_v41 = vcombine.low %v7341_v4, %v7378_v0  ;;  %v7195_v2 = vmax.f32 %v7194_v50, %v6627_v24  ;;  %v6631_v35 = vadd.f32 %v6630_v58, %v14634_v34  ;;  %v6281_v22 = vpop.f32.mrb[232].mxu0 }
 0x6d1   : > { %v7159_v27 = vmax.f32 %v7158_v20, %v6629_v3  ;;  %v6282_v59 = vadd.f32 %v6281_v22, %v14620_v32  ;;  %v6283_v46 = vpop.f32.mrb[233].mxu0  ;;  %6893 = vmatmul.mubr.bf16.gmra.mrb[80].mxu1 %v15273_v9 }
 0x6d2   : > { %v7592_v38 = vrot.slane %v7578_v41, %v13495_v23  ;;  %v7196_v19 = vmax.f32 %v7195_v2, %v6631_v35  ;;  %v6284_v44 = vadd.f32 %v6283_v46, %v14625_v11  ;;  %v6285_v17 = vpop.f32.mrb[234].mxu0  ;;  %6902 = vmatprep.mubr.bf16.mxu1 %v15215_v43 }
 0x6d3   : > { %v7086_v37 = vmax.f32 %v7085_v7, %v6282_v59  ;;  %v6286_v33 = vadd.f32 %v6285_v17, %v14620_v32  ;;  %v6287_v12 = vpop.f32.mrb[235].mxu0 }
 0x6d4   : > { %v7593_v54 = vcombine.low %v7585_v57, %v7592_v38  ;;  %v7123_v56 = vmax.f32 %v7122_v5, %v6284_v44  ;;  %v6288_v55 = vadd.f32 %v6287_v12, %v14625_v11  ;;  %v6634_v60 = vpop.f32.mrb[232].mxu1 }
 0x6d5   : > { %v7087_v9 = vmax.f32 %v7086_v37, %v6286_v33  ;;  %v6635_v29 = vadd.f32 %v6634_v60, %v14630_v47  ;;  %6550 = vmatmul.mubr.bf16.gmra.mrb[84].mxu0 %v15274_v26  ;;  %v6636_v36 = vpop.f32.mrb[233].mxu1 }
 0x6d6   : > { %v7613_v45 = vrot.slane %v7593_v54, 7  ;;  %v7124_v25 = vmax.f32 %v7123_v56, %v6288_v55  ;;  %v6637_v62 = vadd.f32 %v6636_v36, %v14634_v34  ;;  %v6638_v48 = vpop.f32.mrb[234].mxu1  ;;  %6559 = vmatprep.mubr.bf16.mxu0 %v15215_v43 }
 0x6d7   : > { %v7160_v30 = vmax.f32 %v7159_v27, %v6635_v29  ;;  %v6639_v1 = vadd.f32 %v6638_v48, %v14630_v47  ;;  %v6640_v21 = vpop.f32.mrb[235].mxu1 }
 0x6d8   : > { %v7614_v50 = vsel %vm5074_vm0, %v7613_v45, %v7559_v51  ;;  %v7197_v49 = vmax.f32 %v7196_v19, %v6637_v62  ;;  %v6641_v28 = vadd.f32 %v6640_v21, %v14634_v34  ;;  %v6291_v40 = vpop.f32.mrb[236].mxu0 }
 0x6d9   : > { %v7615_v6 = vsel %vm5076_vm1, %v7613_v45, %v7614_v50  ;;  %v7161_v39 = vmax.f32 %v7160_v30, %v6639_v1  ;;  %v6292_v53 = vadd.f32 %v6291_v40, %v14620_v32  ;;  %v6293_v13 = vpop.f32.mrb[237].mxu0  ;;  %6903 = vmatmul.mubr.bf16.gmra.mrb[84].mxu1 %v15274_v26 }
 0x6da   : > { %v7616_v52 = vsel %vm5078_vm2, %v7613_v45, %v7615_v6  ;;  %v7198_v10 = vmax.f32 %v7197_v49, %v6641_v28  ;;  %v6294_v14 = vadd.f32 %v6293_v13, %v14625_v11  ;;  %v6295_v63 = vpop.f32.mrb[238].mxu0  ;;  %6912 = vmatprep.mubr.bf16.mxu1 %v15215_v43 }
 0x6db   : > { %v7617_v51 = vsel %vm5080_vm3, %v7613_v45, %v7616_v52  ;;  %v7088_v15 = vmax.f32 %v7087_v9, %v6292_v53  ;;  %v6296_v4 = vadd.f32 %v6295_v63, %v14620_v32  ;;  %v6297_v7 = vpop.f32.mrb[239].mxu0 }
 0x6dc   : > { %v7627_v31 = vmax.f32 %v6933_v16, %v7617_v51  ;;  %v7125_v18 = vmax.f32 %v7124_v25, %v6294_v14  ;;  %v6298_v0 = vadd.f32 %v6297_v7, %v14625_v11  ;;  %v6644_v5 = vpop.f32.mrb[236].mxu1 }
 0x6dd   : > { %v7089_v26 = vmax.f32 %v7088_v15, %v6296_v4  ;;  %v6645_v24 = vadd.f32 %v6644_v5, %v14630_v47  ;;  %6560 = vmatmul.mubr.bf16.gmra.mrb[88].mxu0 %v15276_v8  ;;  %v6646_v42 = vpop.f32.mrb[237].mxu1 }
 0x6de   : > { %7629 = vst [vmem:[#allocation18] sm:$0xff] %v7627_v31  ;;  %v7126_v20 = vmax.f32 %v7125_v18, %v6298_v0  ;;  %v6647_v3 = vadd.f32 %v6646_v42, %v14634_v34  ;;  %v6648_v58 = vpop.f32.mrb[238].mxu1  ;;  %6569 = vmatprep.mubr.bf16.mxu0 %v15215_v43 }
 0x6df   : > { %v7162_v41 = vmax.f32 %v7161_v39, %v6645_v24  ;;  %v6649_v2 = vadd.f32 %v6648_v58, %v14630_v47  ;;  %v6650_v35 = vpop.f32.mrb[239].mxu1 }
 0x6e0   : > { %v7199_v22 = vmax.f32 %v7198_v10, %v6647_v3  ;;  %v6651_v27 = vadd.f32 %v6650_v35, %v14634_v34  ;;  %v6301_v59 = vpop.f32.mrb[240].mxu0 }
 0x6e1   : > { %v7163_v46 = vmax.f32 %v7162_v41, %v6649_v2  ;;  %v6302_v57 = vadd.f32 %v6301_v59, %v14620_v32  ;;  %v6303_v38 = vpop.f32.mrb[241].mxu0  ;;  %6913 = vmatmul.mubr.bf16.gmra.mrb[88].mxu1 %v15276_v8 }
 0x6e2   : > { %v7200_v19 = vmax.f32 %v7199_v22, %v6651_v27  ;;  %v6304_v44 = vadd.f32 %v6303_v38, %v14625_v11  ;;  %v6305_v17 = vpop.f32.mrb[242].mxu0  ;;  %6922 = vmatprep.mubr.bf16.mxu1 %v15215_v43 }
 0x6e3   : > { %v7090_v37 = vmax.f32 %v7089_v26, %v6302_v57  ;;  %v6306_v33 = vadd.f32 %v6305_v17, %v14620_v32  ;;  %v6307_v12 = vpop.f32.mrb[243].mxu0 }
 0x6e4   : > { %v7127_v54 = vmax.f32 %v7126_v20, %v6304_v44  ;;  %v6308_v56 = vadd.f32 %v6307_v12, %v14625_v11  ;;  %v6654_v55 = vpop.f32.mrb[240].mxu1 }
 0x6e5   : > { %v7091_v60 = vmax.f32 %v7090_v37, %v6306_v33  ;;  %v6655_v9 = vadd.f32 %v6654_v55, %v14630_v47  ;;  %6570 = vmatmul.mubr.bf16.gmra.mrb[92].mxu0 %v15277_v61  ;;  %v6656_v8 = vpop.f32.mrb[241].mxu1 }
 0x6e6   : > { %v7128_v29 = vmax.f32 %v7127_v54, %v6308_v56  ;;  %v6657_v36 = vadd.f32 %v6656_v8, %v14634_v34  ;;  %v6658_v45 = vpop.f32.mrb[242].mxu1 }
 0x6e7   : > { %v7164_v25 = vmax.f32 %v7163_v46, %v6655_v9  ;;  %v6659_v43 = vadd.f32 %v6658_v45, %v14630_v47  ;;  %v6660_v62 = vpop.f32.mrb[243].mxu1 }
 0x6e8   : > { %v7201_v48 = vmax.f32 %v7200_v19, %v6657_v36  ;;  %v6661_v30 = vadd.f32 %v6660_v62, %v14634_v34  ;;  %v6311_v1 = vpop.f32.mrb[244].mxu0 }
 0x6e9   : > { %v7165_v21 = vmax.f32 %v7164_v25, %v6659_v43  ;;  %v6312_v50 = vadd.f32 %v6311_v1, %v14620_v32  ;;  %v6313_v49 = vpop.f32.mrb[245].mxu0  ;;  %6923 = vmatmul.mubr.bf16.gmra.mrb[92].mxu1 %v15277_v61 }
 0x6ea   : > { %v7202_v28 = vmax.f32 %v7201_v48, %v6661_v30  ;;  %v6314_v40 = vadd.f32 %v6313_v49, %v14625_v11  ;;  %v6315_v16 = vpop.f32.mrb[246].mxu0 }
 0x6eb   : > { %v7092_v6 = vmax.f32 %v7091_v60, %v6312_v50  ;;  %v6316_v39 = vadd.f32 %v6315_v16, %v14620_v32  ;;  %v6317_v53 = vpop.f32.mrb[247].mxu0 }
 0x6ec   : > { %v7129_v13 = vmax.f32 %v7128_v29, %v6314_v40  ;;  %v6318_v52 = vadd.f32 %v6317_v53, %v14625_v11  ;;  %v6664_v10 = vpop.f32.mrb[244].mxu1 }
 0x6ed   : > { %v7093_v14 = vmax.f32 %v7092_v6, %v6316_v39  ;;  %v6665_v63 = vadd.f32 %v6664_v10, %v14630_v47  ;;  %v6666_v51 = vpop.f32.mrb[245].mxu1 }
 0x6ee   : > { %v7130_v15 = vmax.f32 %v7129_v13, %v6318_v52  ;;  %v6667_v4 = vadd.f32 %v6666_v51, %v14634_v34  ;;  %v6668_v61 = vpop.f32.mrb[246].mxu1 }
 0x6ef   : > { %v7166_v7 = vmax.f32 %v7165_v21, %v6665_v63  ;;  %v6669_v31 = vadd.f32 %v6668_v61, %v14630_v47  ;;  %v6670_v18 = vpop.f32.mrb[247].mxu1 }
 0x6f0   : > { %v7203_v0 = vmax.f32 %v7202_v28, %v6667_v4  ;;  %v6671_v5 = vadd.f32 %v6670_v18, %v14634_v34  ;;  %v6321_v26 = vpop.f32.mrb[248].mxu0 }
 0x6f1   : > { %v7167_v24 = vmax.f32 %v7166_v7, %v6669_v31  ;;  %v6322_v42 = vadd.f32 %v6321_v26, %v14620_v32  ;;  %v6323_v20 = vpop.f32.mrb[249].mxu0 }
 0x6f2   : > { %v7204_v3 = vmax.f32 %v7203_v0, %v6671_v5  ;;  %v6324_v58 = vadd.f32 %v6323_v20, %v14625_v11  ;;  %v6325_v41 = vpop.f32.mrb[250].mxu0 }
 0x6f3   : > { %v7094_v2 = vmax.f32 %v7093_v14, %v6322_v42  ;;  %v6326_v35 = vadd.f32 %v6325_v41, %v14620_v32  ;;  %v6327_v22 = vpop.f32.mrb[251].mxu0 }
 0x6f4   : > { %v7131_v27 = vmax.f32 %v7130_v15, %v6324_v58  ;;  %v6328_v59 = vadd.f32 %v6327_v22, %v14625_v11  ;;  %v6674_v46 = vpop.f32.mrb[248].mxu1 }
 0x6f5   : > { %v7095_v57 = vmax.f32 %v7094_v2, %v6326_v35  ;;  %v6675_v38 = vadd.f32 %v6674_v46, %v14630_v47  ;;  %v6676_v19 = vpop.f32.mrb[249].mxu1 }
 0x6f6   : > { %v7132_v44 = vmax.f32 %v7131_v27, %v6328_v59  ;;  %v6677_v17 = vadd.f32 %v6676_v19, %v14634_v34  ;;  %v6678_v37 = vpop.f32.mrb[250].mxu1 }
 0x6f7   : > { %v7168_v33 = vmax.f32 %v7167_v24, %v6675_v38  ;;  %v6679_v12 = vadd.f32 %v6678_v37, %v14630_v47  ;;  %v6680_v54 = vpop.f32.mrb[251].mxu1 }
 0x6f8   : > { %v7205_v56 = vmax.f32 %v7204_v3, %v6677_v17  ;;  %v6681_v55 = vadd.f32 %v6680_v54, %v14634_v34  ;;  %v6331_v60 = vpop.f32.mrb[252].mxu0 }
 0x6f9   : > { %v7169_v9 = vmax.f32 %v7168_v33, %v6679_v12  ;;  %v6332_v8 = vadd.f32 %v6331_v60, %v14620_v32  ;;  %v6333_v29 = vpop.f32.mrb[253].mxu0 }
 0x6fa   : > { %v7206_v36 = vmax.f32 %v7205_v56, %v6681_v55  ;;  %v6334_v45 = vadd.f32 %v6333_v29, %v14625_v11  ;;  %v6335_v25 = vpop.f32.mrb[254].mxu0 }
 0x6fb   : > { %v7096_v43 = vmax.f32 %v7095_v57, %v6332_v8  ;;  %v6336_v62 = vadd.f32 %v6335_v25, %v14620_v32  ;;  %v6337_v48 = vpop.f32.mrb[255].mxu0 }
 0x6fc   : > { %v7133_v30 = vmax.f32 %v7132_v44, %v6334_v45  ;;  %v6338_v1 = vadd.f32 %v6337_v48, %v14625_v11  ;;  %v6684_v21 = vpop.f32.mrb[252].mxu1 }
 0x6fd   : > { %v7097_v50 = vmax.f32 %v7096_v43, %v6336_v62  ;;  %v6685_v49 = vadd.f32 %v6684_v21, %v14630_v47  ;;  %v6686_v28 = vpop.f32.mrb[253].mxu1 }
 0x6fe   : > { %v7134_v40 = vmax.f32 %v7133_v30, %v6338_v1  ;;  %v6687_v16 = vadd.f32 %v6686_v28, %v14634_v34  ;;  %v6688_v6 = vpop.f32.mrb[254].mxu1 }
 0x6ff   : > { %v7170_v39 = vmax.f32 %v7169_v9, %v6685_v49  ;;  %v6689_v53 = vadd.f32 %v6688_v6, %v14630_v47  ;;  %v6690_v13 = vpop.f32.mrb[255].mxu1 }
 0x700   : > { %v7207_v52 = vmax.f32 %v7206_v36, %v6687_v16  ;;  %v6691_v10 = vadd.f32 %v6690_v13, %v14634_v34  ;;  %v6341_v14 = vpop.f32.mrb[0].mxu0 }
 0x701   : > { %v7171_v63 = vmax.f32 %v7170_v39, %v6689_v53  ;;  %v6342_v51 = vadd.f32 %v6341_v14, %v14620_v32  ;;  %v6343_v15 = vpop.f32.mrb[1].mxu0 }
 0x702   : > { %v7208_v4 = vmax.f32 %v7207_v52, %v6691_v10  ;;  %v6344_v61 = vadd.f32 %v6343_v15, %v14625_v11  ;;  %v6345_v7 = vpop.f32.mrb[2].mxu0 }
 0x703   : > { %v7098_v31 = vmax.f32 %v7097_v50, %v6342_v51  ;;  %v6346_v18 = vadd.f32 %v6345_v7, %v14620_v32  ;;  %v6347_v0 = vpop.f32.mrb[3].mxu0 }
 0x704   : > { %v7135_v5 = vmax.f32 %v7134_v40, %v6344_v61  ;;  %v6348_v26 = vadd.f32 %v6347_v0, %v14625_v11  ;;  %v6694_v24 = vpop.f32.mrb[0].mxu1 }
 0x705   : > { %v7099_v42 = vmax.f32 %v7098_v31, %v6346_v18  ;;  %v6695_v20 = vadd.f32 %v6694_v24, %v14630_v47  ;;  %v6696_v3 = vpop.f32.mrb[1].mxu1 }
 0x706   : > { %v7136_v58 = vmax.f32 %v7135_v5, %v6348_v26  ;;  %v6697_v41 = vadd.f32 %v6696_v3, %v14634_v34  ;;  %v6698_v2 = vpop.f32.mrb[2].mxu1 }
 0x707   : > { %v7172_v35 = vmax.f32 %v7171_v63, %v6695_v20  ;;  %v6699_v22 = vadd.f32 %v6698_v2, %v14630_v47  ;;  %v6700_v27 = vpop.f32.mrb[3].mxu1 }
 0x708   : > { %v7209_v59 = vmax.f32 %v7208_v4, %v6697_v41  ;;  %v6701_v46 = vadd.f32 %v6700_v27, %v14634_v34  ;;  %v6351_v57 = vpop.f32.mrb[4].mxu0 }
 0x709   : > { %v7173_v38 = vmax.f32 %v7172_v35, %v6699_v22  ;;  %v6352_v19 = vadd.f32 %v6351_v57, %v14620_v32  ;;  %v6353_v44 = vpop.f32.mrb[5].mxu0 }
 0x70a   : > { %v7210_v17 = vmax.f32 %v7209_v59, %v6701_v46  ;;  %v6354_v37 = vadd.f32 %v6353_v44, %v14625_v11  ;;  %v6355_v33 = vpop.f32.mrb[6].mxu0 }
 0x70b   : > { %v7100_v12 = vmax.f32 %v7099_v42, %v6352_v19  ;;  %v6356_v54 = vadd.f32 %v6355_v33, %v14620_v32  ;;  %v6357_v56 = vpop.f32.mrb[7].mxu0 }
 0x70c   : > { %v7137_v55 = vmax.f32 %v7136_v58, %v6354_v37  ;;  %v6358_v60 = vadd.f32 %v6357_v56, %v14625_v11  ;;  %v6704_v9 = vpop.f32.mrb[4].mxu1 }
 0x70d   : > { %v7101_v8 = vmax.f32 %v7100_v12, %v6356_v54  ;;  %v6705_v29 = vadd.f32 %v6704_v9, %v14630_v47  ;;  %v6706_v36 = vpop.f32.mrb[5].mxu1 }
 0x70e   : > { %v7138_v45 = vmax.f32 %v7137_v55, %v6358_v60  ;;  %v6707_v25 = vadd.f32 %v6706_v36, %v14634_v34  ;;  %v6708_v43 = vpop.f32.mrb[6].mxu1 }
 0x70f   : > { %v7174_v62 = vmax.f32 %v7173_v38, %v6705_v29  ;;  %v6709_v48 = vadd.f32 %v6708_v43, %v14630_v47  ;;  %v6710_v30 = vpop.f32.mrb[7].mxu1 }
 0x710   : > { %v7211_v1 = vmax.f32 %v7210_v17, %v6707_v25  ;;  %v6711_v21 = vadd.f32 %v6710_v30, %v14634_v34  ;;  %v6361_v50 = vpop.f32.mrb[8].mxu0 }
 0x711   : > { %v7175_v49 = vmax.f32 %v7174_v62, %v6709_v48  ;;  %v6362_v28 = vadd.f32 %v6361_v50, %v14620_v32  ;;  %v6363_v40 = vpop.f32.mrb[9].mxu0 }
 0x712   : > { %v7212_v16 = vmax.f32 %v7211_v1, %v6711_v21  ;;  %v6364_v6 = vadd.f32 %v6363_v40, %v14625_v11  ;;  %v6365_v39 = vpop.f32.mrb[10].mxu0 }
 0x713   : > { %v7102_v53 = vmax.f32 %v7101_v8, %v6362_v28  ;;  %v6366_v13 = vadd.f32 %v6365_v39, %v14620_v32  ;;  %v6367_v52 = vpop.f32.mrb[11].mxu0 }
 0x714   : > { %v7139_v10 = vmax.f32 %v7138_v45, %v6364_v6  ;;  %v6368_v14 = vadd.f32 %v6367_v52, %v14625_v11  ;;  %v6714_v63 = vpop.f32.mrb[8].mxu1 }
 0x715   : > { %v7103_v51 = vmax.f32 %v7102_v53, %v6366_v13  ;;  %v6715_v15 = vadd.f32 %v6714_v63, %v14630_v47  ;;  %v6716_v4 = vpop.f32.mrb[9].mxu1 }
 0x716   : > { %v7140_v61 = vmax.f32 %v7139_v10, %v6368_v14  ;;  %v6717_v7 = vadd.f32 %v6716_v4, %v14634_v34  ;;  %v6718_v31 = vpop.f32.mrb[10].mxu1 }
 0x717   : > { %v7176_v18 = vmax.f32 %v7175_v49, %v6715_v15  ;;  %v6719_v0 = vadd.f32 %v6718_v31, %v14630_v47  ;;  %v6720_v5 = vpop.f32.mrb[11].mxu1 }
 0x718   : > { %v7213_v26 = vmax.f32 %v7212_v16, %v6717_v7  ;;  %v6721_v24 = vadd.f32 %v6720_v5, %v14634_v34  ;;  %v6371_v42 = vpop.f32.mrb[12].mxu0 }
 0x719   : > { %v7177_v20 = vmax.f32 %v7176_v18, %v6719_v0  ;;  %v6372_v3 = vadd.f32 %v6371_v42, %v14620_v32  ;;  %v6373_v58 = vpop.f32.mrb[13].mxu0 }
 0x71a   : > { %v7214_v41 = vmax.f32 %v7213_v26, %v6721_v24  ;;  %v6374_v2 = vadd.f32 %v6373_v58, %v14625_v11  ;;  %v6375_v35 = vpop.f32.mrb[14].mxu0 }
 0x71b   : > { %v7104_v22 = vmax.f32 %v7103_v51, %v6372_v3  ;;  %v6376_v27 = vadd.f32 %v6375_v35, %v14620_v32  ;;  %v6377_v59 = vpop.f32.mrb[15].mxu0 }
 0x71c   : > { %v7141_v46 = vmax.f32 %v7140_v61, %v6374_v2  ;;  %v6378_v57 = vadd.f32 %v6377_v59, %v14625_v11  ;;  %v6724_v38 = vpop.f32.mrb[12].mxu1 }
 0x71d   : > { %v7105_v19 = vmax.f32 %v7104_v22, %v6376_v27  ;;  %v6725_v44 = vadd.f32 %v6724_v38, %v14630_v47  ;;  %v6726_v17 = vpop.f32.mrb[13].mxu1 }
 0x71e   : > { %v7142_v37 = vmax.f32 %v7141_v46, %v6378_v57  ;;  %v6727_v33 = vadd.f32 %v6726_v17, %v14634_v34  ;;  %v6728_v12 = vpop.f32.mrb[14].mxu1 }
 0x71f   : > { %v7178_v54 = vmax.f32 %v7177_v20, %v6725_v44  ;;  %v6729_v56 = vadd.f32 %v6728_v12, %v14630_v47  ;;  %v6730_v55 = vpop.f32.mrb[15].mxu1 }
 0x720   : > { %v7215_v60 = vmax.f32 %v7214_v41, %v6727_v33  ;;  %v6731_v9 = vadd.f32 %v6730_v55, %v14634_v34  ;;  %v6381_v8 = vpop.f32.mrb[16].mxu0 }
 0x721   : > { %v7179_v29 = vmax.f32 %v7178_v54, %v6729_v56  ;;  %v6382_v36 = vadd.f32 %v6381_v8, %v14620_v32  ;;  %v6383_v45 = vpop.f32.mrb[17].mxu0 }
 0x722   : > { %v7216_v25 = vmax.f32 %v7215_v60, %v6731_v9  ;;  %v6384_v43 = vadd.f32 %v6383_v45, %v14625_v11  ;;  %v6385_v62 = vpop.f32.mrb[18].mxu0 }
 0x723   : > { %v7106_v48 = vmax.f32 %v7105_v19, %v6382_v36  ;;  %v6386_v30 = vadd.f32 %v6385_v62, %v14620_v32  ;;  %v6387_v1 = vpop.f32.mrb[19].mxu0 }
 0x724   : > { %v7143_v21 = vmax.f32 %v7142_v37, %v6384_v43  ;;  %v6388_v50 = vadd.f32 %v6387_v1, %v14625_v11  ;;  %v6734_v49 = vpop.f32.mrb[16].mxu1 }
 0x725   : > { %v7107_v28 = vmax.f32 %v7106_v48, %v6386_v30  ;;  %v6735_v40 = vadd.f32 %v6734_v49, %v14630_v47  ;;  %v6736_v16 = vpop.f32.mrb[17].mxu1 }
 0x726   : > { %v7144_v6 = vmax.f32 %v7143_v21, %v6388_v50  ;;  %v6737_v39 = vadd.f32 %v6736_v16, %v14634_v34  ;;  %v6738_v53 = vpop.f32.mrb[18].mxu1 }
 0x727   : > { %v7180_v13 = vmax.f32 %v7179_v29, %v6735_v40  ;;  %v6739_v52 = vadd.f32 %v6738_v53, %v14630_v47  ;;  %v6740_v10 = vpop.f32.mrb[19].mxu1 }
 0x728   : > { %v7217_v14 = vmax.f32 %v7216_v25, %v6737_v39  ;;  %v6741_v63 = vadd.f32 %v6740_v10, %v14634_v34  ;;  %v6391_v51 = vpop.f32.mrb[20].mxu0 }
 0x729   : > { %v7181_v15 = vmax.f32 %v7180_v13, %v6739_v52  ;;  %v6392_v4 = vadd.f32 %v6391_v51, %v14620_v32  ;;  %v6393_v61 = vpop.f32.mrb[21].mxu0 }
 0x72a   : > { %v7218_v7 = vmax.f32 %v7217_v14, %v6741_v63  ;;  %v6394_v31 = vadd.f32 %v6393_v61, %v14625_v11  ;;  %v6395_v18 = vpop.f32.mrb[22].mxu0 }
 0x72b   : > { %v7108_v0 = vmax.f32 %v7107_v28, %v6392_v4  ;;  %v6396_v5 = vadd.f32 %v6395_v18, %v14620_v32  ;;  %v6397_v26 = vpop.f32.mrb[23].mxu0 }
 0x72c   : > { %v7145_v24 = vmax.f32 %v7144_v6, %v6394_v31  ;;  %v6398_v42 = vadd.f32 %v6397_v26, %v14625_v11  ;;  %v6744_v20 = vpop.f32.mrb[20].mxu1 }
 0x72d   : > { %v7109_v3 = vmax.f32 %v7108_v0, %v6396_v5  ;;  %v6745_v58 = vadd.f32 %v6744_v20, %v14630_v47  ;;  %v6746_v41 = vpop.f32.mrb[21].mxu1 }
 0x72e   : > { %v7146_v2 = vmax.f32 %v7145_v24, %v6398_v42  ;;  %v6747_v35 = vadd.f32 %v6746_v41, %v14634_v34  ;;  %v6748_v22 = vpop.f32.mrb[22].mxu1 }
 0x72f   : > { %v7182_v27 = vmax.f32 %v7181_v15, %v6745_v58  ;;  %v6749_v59 = vadd.f32 %v6748_v22, %v14630_v47  ;;  %v6750_v46 = vpop.f32.mrb[23].mxu1 }
 0x730   : > { %v7219_v57 = vmax.f32 %v7218_v7, %v6747_v35  ;;  %v6751_v38 = vadd.f32 %v6750_v46, %v14634_v34  ;;  %v6401_v19 = vpop.f32.mrb[24].mxu0 }
 0x731   : > { %v7183_v44 = vmax.f32 %v7182_v27, %v6749_v59  ;;  %v6402_v17 = vadd.f32 %v6401_v19, %v14620_v32  ;;  %v6403_v37 = vpop.f32.mrb[25].mxu0 }
 0x732   : > { %v7220_v33 = vmax.f32 %v7219_v57, %v6751_v38  ;;  %v6404_v12 = vadd.f32 %v6403_v37, %v14625_v11  ;;  %v6405_v54 = vpop.f32.mrb[26].mxu0 }
 0x733   : > { %v7110_v56 = vmax.f32 %v7109_v3, %v6402_v17  ;;  %v6406_v55 = vadd.f32 %v6405_v54, %v14620_v32  ;;  %v6407_v60 = vpop.f32.mrb[27].mxu0 }
 0x734   : > { %v7147_v9 = vmax.f32 %v7146_v2, %v6404_v12  ;;  %v6408_v8 = vadd.f32 %v6407_v60, %v14625_v11  ;;  %v6754_v29 = vpop.f32.mrb[24].mxu1 }
 0x735   : > { %v7111_v36 = vmax.f32 %v7110_v56, %v6406_v55  ;;  %v6755_v45 = vadd.f32 %v6754_v29, %v14630_v47  ;;  %v6756_v25 = vpop.f32.mrb[25].mxu1 }
 0x736   : > { %v7148_v43 = vmax.f32 %v7147_v9, %v6408_v8  ;;  %v6757_v62 = vadd.f32 %v6756_v25, %v14634_v34  ;;  %v6758_v48 = vpop.f32.mrb[26].mxu1 }
 0x737   : > { %v7184_v30 = vmax.f32 %v7183_v44, %v6755_v45  ;;  %v6759_v1 = vadd.f32 %v6758_v48, %v14630_v47  ;;  %v6760_v21 = vpop.f32.mrb[27].mxu1 }
 0x738   : > { %v7221_v50 = vmax.f32 %v7220_v33, %v6757_v62  ;;  %v6761_v49 = vadd.f32 %v6760_v21, %v14634_v34  ;;  %v6411_v28 = vpop.f32.mrb[28].mxu0 }
 0x739   : > { %v7185_v40 = vmax.f32 %v7184_v30, %v6759_v1  ;;  %v6412_v16 = vadd.f32 %v6411_v28, %v14620_v32  ;;  %v6413_v6 = vpop.f32.mrb[29].mxu0 }
 0x73a   : > { %v7222_v39 = vmax.f32 %v7221_v50, %v6761_v49  ;;  %v6414_v53 = vadd.f32 %v6413_v6, %v14625_v11  ;;  %v6415_v13 = vpop.f32.mrb[30].mxu0 }
 0x73b   : > { %v7112_v52 = vmax.f32 %v7111_v36, %v6412_v16  ;;  %v6416_v10 = vadd.f32 %v6415_v13, %v14620_v32  ;;  %v6417_v14 = vpop.f32.mrb[31].mxu0 }
 0x73c   : > { %v7149_v63 = vmax.f32 %v7148_v43, %v6414_v53  ;;  %v6418_v51 = vadd.f32 %v6417_v14, %v14625_v11  ;;  %v6764_v15 = vpop.f32.mrb[28].mxu1 }
 0x73d   : > { %v7113_v4 = vmax.f32 %v7112_v52, %v6416_v10  ;;  %v6765_v61 = vadd.f32 %v6764_v15, %v14630_v47  ;;  %v6766_v7 = vpop.f32.mrb[29].mxu1 }
 0x73e   : > { %v7150_v31 = vmax.f32 %v7149_v63, %v6418_v51  ;;  %v6767_v18 = vadd.f32 %v6766_v7, %v14634_v34  ;;  %v6768_v0 = vpop.f32.mrb[30].mxu1 }
 0x73f   : > { %v7114_v5 = vrot.slane %v7113_v4, 4  ;;  %v7186_v26 = vmax.f32 %v7185_v40, %v6765_v61  ;;  %v6769_v24 = vadd.f32 %v6768_v0, %v14630_v47  ;;  %v6770_v42 = vpop.f32.mrb[31].mxu1 }
 0x740   : > { %v7151_v20 = vrot.slane %v7150_v31, 4  ;;  %v7223_v3 = vmax.f32 %v7222_v39, %v6767_v18  ;;  %v6771_v58 = vadd.f32 %v6770_v42, %v14634_v34  ;;  %v6421_v41 = vpop.f32.mrb[32].mxu0 }
 0x741   : > { %v7115_v2 = vmax.f32 %v7113_v4, %v7114_v5  ;;  %v7187_v35 = vmax.f32 %v7186_v26, %v6769_v24  ;;  %v6423_v22 = vpop.f32.mrb[33].mxu0  ;;  %v6422_v19 = vadd.f32 %v6421_v41, %v14620_v32 }
 0x742   : > { %v7152_v27 = vmax.f32 %v7150_v31, %v7151_v20  ;;  %v7224_v59 = vmax.f32 %v7223_v3, %v6771_v58  ;;  %v6425_v46 = vpop.f32.mrb[34].mxu0  ;;  %v6424_v12 = vadd.f32 %v6423_v22, %v14625_v11 }
 0x743   : > { %v7116_v57 = vrot.slane %v7115_v2, 2  ;;  %v7188_v38 = vrot.slane %v7187_v35, 4  ;;  %v6426_v44 = vadd.f32 %v6425_v46, %v14620_v32  ;;  %v6427_v17 = vpop.f32.mrb[35].mxu0 }
 0x744   : > { %v7153_v37 = vrot.slane %v7152_v27, 2  ;;  %v7225_v33 = vrot.slane %v7224_v59, 4  ;;  %v6428_v54 = vadd.f32 %v6427_v17, %v14625_v11  ;;  %v6774_v56 = vpop.f32.mrb[32].mxu1 }
 0x745   : > { %v7117_v55 = vmax.f32 %v7115_v2, %v7116_v57  ;;  %v7189_v60 = vmax.f32 %v7187_v35, %v7188_v38  ;;  %v7379_v9 = vmax.f32 %v6422_v19, %v6426_v44  ;;  %v6776_v8 = vpop.f32.mrb[33].mxu1  ;;  %v6775_v48 = vadd.f32 %v6774_v56, %v14630_v47 }
 0x746   : > { %v7154_v29 = vmax.f32 %v7152_v27, %v7153_v37  ;;  %v7226_v36 = vmax.f32 %v7224_v59, %v7225_v33  ;;  %v7416_v45 = vmax.f32 %v6424_v12, %v6428_v54  ;;  %v6778_v25 = vpop.f32.mrb[34].mxu1  ;;  %v6777_v49 = vadd.f32 %v6776_v8, %v14634_v34 }
 0x747   : > { %v7118_v43 = vrot.slane %v7117_v55, 1  ;;  %v7190_v62 = vrot.slane %v7189_v60, 2  ;;  %v6779_v30 = vadd.f32 %v6778_v25, %v14630_v47  ;;  %v6780_v1 = vpop.f32.mrb[35].mxu1 }
 0x748   : > { %v7155_v21 = vrot.slane %v7154_v29, 1  ;;  %v7227_v50 = vrot.slane %v7226_v36, 2  ;;  %v6781_v28 = vadd.f32 %v6780_v1, %v14634_v34  ;;  %v6431_v40 = vpop.f32.mrb[36].mxu0 }
 0x749   : > { %v7119_v16 = vmax.f32 %v7117_v55, %v7118_v43  ;;  %v7191_v6 = vmax.f32 %v7189_v60, %v7190_v62  ;;  %v7453_v39 = vmax.f32 %v6775_v48, %v6779_v30  ;;  %v6432_v53 = vadd.f32 %v6431_v40, %v14620_v32  ;;  %v6433_v13 = vpop.f32.mrb[37].mxu0 }
 0x74a   : > { %v7156_v52 = vmax.f32 %v7154_v29, %v7155_v21  ;;  %v7228_v10 = vmax.f32 %v7226_v36, %v7227_v50  ;;  %v7490_v14 = vmax.f32 %v6777_v49, %v6781_v28  ;;  %v6434_v63 = vadd.f32 %v6433_v13, %v14625_v11  ;;  %v6435_v51 = vpop.f32.mrb[38].mxu0 }
 0x74b   : > { %v7192_v15 = vrot.slane %v7191_v6, 1  ;;  %v7380_v4 = vmax.f32 %v7379_v9, %v6432_v53  ;;  %v6436_v61 = vadd.f32 %v6435_v51, %v14620_v32  ;;  %v6437_v7 = vpop.f32.mrb[39].mxu0 }
 0x74c   : > { %v7560_v31 = vcombine.low %v7119_v16, %v7156_v52  ;;  %v7229_v18 = vrot.slane %v7228_v10, 1  ;;  %v7417_v0 = vmax.f32 %v7416_v45, %v6434_v63  ;;  %v6438_v5 = vadd.f32 %v6437_v7, %v14625_v11  ;;  %v6784_v26 = vpop.f32.mrb[36].mxu1 }
 0x74d   : > { %v7193_v24 = vmax.f32 %v7191_v6, %v7192_v15  ;;  %v7381_v42 = vmax.f32 %v7380_v4, %v6436_v61  ;;  %v6785_v20 = vadd.f32 %v6784_v26, %v14630_v47  ;;  %v6786_v3 = vpop.f32.mrb[37].mxu1 }
 0x74e   : > { %v7230_v58 = vmax.f32 %v7228_v10, %v7229_v18  ;;  %v7418_v41 = vmax.f32 %v7417_v0, %v6438_v5  ;;  %v6787_v2 = vadd.f32 %v6786_v3, %v14634_v34  ;;  %v6788_v35 = vpop.f32.mrb[38].mxu1  ;;  %v14810_v33 = vrot.slane %v7560_v31, %v13495_v23 }
 0x74f   : > { %v7454_v22 = vmax.f32 %v7453_v39, %v6785_v20  ;;  %v6789_v27 = vadd.f32 %v6788_v35, %v14630_v47  ;;  %v6790_v59 = vpop.f32.mrb[39].mxu1 }
 0x750   : > { %v7561_v46 = vcombine.low %v7193_v24, %v7230_v58  ;;  %v7491_v57 = vmax.f32 %v7490_v14, %v6787_v2  ;;  %v6791_v38 = vadd.f32 %v6790_v59, %v14634_v34  ;;  %v6441_v19 = vpop.f32.mrb[40].mxu0 }
 0x751   : > { %v7455_v44 = vmax.f32 %v7454_v22, %v6789_v27  ;;  %v6442_v17 = vadd.f32 %v6441_v19, %v14620_v32  ;;  %v6443_v37 = vpop.f32.mrb[41].mxu0 }
 0x752   : > { %v14813_v12 = vrot.slane %v7561_v46, %v13495_v23  ;;  %v7492_v54 = vmax.f32 %v7491_v57, %v6791_v38  ;;  %v6444_v56 = vadd.f32 %v6443_v37, %v14625_v11  ;;  %v6445_v55 = vpop.f32.mrb[42].mxu0 }
 0x753   : > { %v7382_v60 = vmax.f32 %v7381_v42, %v6442_v17  ;;  %v6446_v9 = vadd.f32 %v6445_v55, %v14620_v32  ;;  %v6447_v8 = vpop.f32.mrb[43].mxu0 }
 0x754   : > { %v7576_v29 = vcombine.low %v14810_v33, %v14813_v12  ;;  %v7419_v36 = vmax.f32 %v7418_v41, %v6444_v56  ;;  %v6448_v45 = vadd.f32 %v6447_v8, %v14625_v11  ;;  %v6794_v25 = vpop.f32.mrb[40].mxu1  ;;  %v11368_v33 = vld [vmem:[#allocation14 + $0x24] ss:$16 sps:$4 sm:$0xff] (!%p10608_p11)  }
 0x755   : > { %v7383_v43 = vmax.f32 %v7382_v60, %v6446_v9  ;;  %v6795_v62 = vadd.f32 %v6794_v25, %v14630_v47  ;;  %v6796_v48 = vpop.f32.mrb[41].mxu1  ;;  %v11370_v12 = vld [vmem:[#allocation14 + $0x224] ss:$16 sps:$4 sm:$0xff] (!%p10608_p11)  }
 0x756   : > { %v7420_v30 = vmax.f32 %v7419_v36, %v6448_v45  ;;  %v6797_v1 = vadd.f32 %v6796_v48, %v14634_v34  ;;  %v6798_v21 = vpop.f32.mrb[42].mxu1 }
 0x757   : > { %v7456_v50 = vmax.f32 %v7455_v44, %v6795_v62  ;;  %v6799_v49 = vadd.f32 %v6798_v21, %v14630_v47  ;;  %v6800_v28 = vpop.f32.mrb[43].mxu1 }
 0x758   : > { %v7493_v40 = vmax.f32 %v7492_v54, %v6797_v1  ;;  %v6801_v16 = vadd.f32 %v6800_v28, %v14634_v34  ;;  %v6451_v6 = vpop.f32.mrb[44].mxu0 }
 0x759   : > { %v7457_v39 = vmax.f32 %v7456_v50, %v6799_v49  ;;  %v6452_v53 = vadd.f32 %v6451_v6, %v14620_v32  ;;  %v6453_v13 = vpop.f32.mrb[45].mxu0 }
 0x75a   : > { %v7494_v52 = vmax.f32 %v7493_v40, %v6801_v16  ;;  %v6454_v10 = vadd.f32 %v6453_v13, %v14625_v11  ;;  %v6455_v14 = vpop.f32.mrb[46].mxu0 }
 0x75b   : > { %v7384_v63 = vmax.f32 %v7383_v43, %v6452_v53  ;;  %v6456_v51 = vadd.f32 %v6455_v14, %v14620_v32  ;;  %v6457_v15 = vpop.f32.mrb[47].mxu0 }
 0x75c   : > { %v7421_v4 = vmax.f32 %v7420_v30, %v6454_v10  ;;  %v6458_v61 = vadd.f32 %v6457_v15, %v14625_v11  ;;  %v6804_v7 = vpop.f32.mrb[44].mxu1 }
 0x75d   : > { %v7385_v31 = vmax.f32 %v7384_v63, %v6456_v51  ;;  %v6805_v18 = vadd.f32 %v6804_v7, %v14630_v47  ;;  %v6806_v0 = vpop.f32.mrb[45].mxu1 }
 0x75e   : > { %v7422_v5 = vmax.f32 %v7421_v4, %v6458_v61  ;;  %v6807_v26 = vadd.f32 %v6806_v0, %v14634_v34  ;;  %v6808_v24 = vpop.f32.mrb[46].mxu1 }
 0x75f   : > { %v7458_v42 = vmax.f32 %v7457_v39, %v6805_v18  ;;  %v6809_v20 = vadd.f32 %v6808_v24, %v14630_v47  ;;  %v6810_v3 = vpop.f32.mrb[47].mxu1 }
 0x760   : > { %v7495_v58 = vmax.f32 %v7494_v52, %v6807_v26  ;;  %v6811_v41 = vadd.f32 %v6810_v3, %v14634_v34  ;;  %v6461_v2 = vpop.f32.mrb[48].mxu0 }
 0x761   : > { %v7459_v35 = vmax.f32 %v7458_v42, %v6809_v20  ;;  %v6462_v22 = vadd.f32 %v6461_v2, %v14620_v32  ;;  %v6463_v27 = vpop.f32.mrb[49].mxu0 }
 0x762   : > { %v7496_v59 = vmax.f32 %v7495_v58, %v6811_v41  ;;  %v6464_v46 = vadd.f32 %v6463_v27, %v14625_v11  ;;  %v6465_v57 = vpop.f32.mrb[50].mxu0 }
 0x763   : > { %v7386_v38 = vmax.f32 %v7385_v31, %v6462_v22  ;;  %v6466_v19 = vadd.f32 %v6465_v57, %v14620_v32  ;;  %v6467_v44 = vpop.f32.mrb[51].mxu0 }
 0x764   : > { %v7423_v17 = vmax.f32 %v7422_v5, %v6464_v46  ;;  %v6468_v37 = vadd.f32 %v6467_v44, %v14625_v11  ;;  %v6814_v54 = vpop.f32.mrb[48].mxu1 }
 0x765   : > { %v7387_v56 = vmax.f32 %v7386_v38, %v6466_v19  ;;  %v6815_v55 = vadd.f32 %v6814_v54, %v14630_v47  ;;  %v6816_v60 = vpop.f32.mrb[49].mxu1 }
 0x766   : > { %v7424_v9 = vmax.f32 %v7423_v17, %v6468_v37  ;;  %v6817_v8 = vadd.f32 %v6816_v60, %v14634_v34  ;;  %v6818_v36 = vpop.f32.mrb[50].mxu1 }
 0x767   : > { %v7460_v45 = vmax.f32 %v7459_v35, %v6815_v55  ;;  %v6819_v25 = vadd.f32 %v6818_v36, %v14630_v47  ;;  %v6820_v43 = vpop.f32.mrb[51].mxu1 }
 0x768   : > { %v7497_v62 = vmax.f32 %v7496_v59, %v6817_v8  ;;  %v6821_v48 = vadd.f32 %v6820_v43, %v14634_v34  ;;  %v6471_v30 = vpop.f32.mrb[52].mxu0 }
 0x769   : > { %v7461_v1 = vmax.f32 %v7460_v45, %v6819_v25  ;;  %v6472_v21 = vadd.f32 %v6471_v30, %v14620_v32  ;;  %v6473_v50 = vpop.f32.mrb[53].mxu0 }
 0x76a   : > { %v7498_v49 = vmax.f32 %v7497_v62, %v6821_v48  ;;  %v6474_v28 = vadd.f32 %v6473_v50, %v14625_v11  ;;  %v6475_v40 = vpop.f32.mrb[54].mxu0 }
 0x76b   : > { %v7388_v16 = vmax.f32 %v7387_v56, %v6472_v21  ;;  %v6476_v6 = vadd.f32 %v6475_v40, %v14620_v32  ;;  %v6477_v39 = vpop.f32.mrb[55].mxu0 }
 0x76c   : > { %v7425_v53 = vmax.f32 %v7424_v9, %v6474_v28  ;;  %v6478_v13 = vadd.f32 %v6477_v39, %v14625_v11  ;;  %v6824_v52 = vpop.f32.mrb[52].mxu1 }
 0x76d   : > { %v7389_v10 = vmax.f32 %v7388_v16, %v6476_v6  ;;  %v6825_v14 = vadd.f32 %v6824_v52, %v14630_v47  ;;  %v6826_v63 = vpop.f32.mrb[53].mxu1 }
 0x76e   : > { %v7426_v51 = vmax.f32 %v7425_v53, %v6478_v13  ;;  %v6827_v15 = vadd.f32 %v6826_v63, %v14634_v34  ;;  %v6828_v4 = vpop.f32.mrb[54].mxu1 }
 0x76f   : > { %v7462_v61 = vmax.f32 %v7461_v1, %v6825_v14  ;;  %v6829_v7 = vadd.f32 %v6828_v4, %v14630_v47  ;;  %v6830_v31 = vpop.f32.mrb[55].mxu1 }
 0x770   : > { %v7499_v18 = vmax.f32 %v7498_v49, %v6827_v15  ;;  %v6831_v0 = vadd.f32 %v6830_v31, %v14634_v34  ;;  %v6481_v5 = vpop.f32.mrb[56].mxu0 }
 0x771   : > { %v7463_v26 = vmax.f32 %v7462_v61, %v6829_v7  ;;  %v6482_v24 = vadd.f32 %v6481_v5, %v14620_v32  ;;  %v6483_v42 = vpop.f32.mrb[57].mxu0 }
 0x772   : > { %v7500_v20 = vmax.f32 %v7499_v18, %v6831_v0  ;;  %v6484_v3 = vadd.f32 %v6483_v42, %v14625_v11  ;;  %v6485_v58 = vpop.f32.mrb[58].mxu0 }
 0x773   : > { %v7390_v41 = vmax.f32 %v7389_v10, %v6482_v24  ;;  %v6486_v2 = vadd.f32 %v6485_v58, %v14620_v32  ;;  %v6487_v35 = vpop.f32.mrb[59].mxu0 }
 0x774   : > { %v7427_v22 = vmax.f32 %v7426_v51, %v6484_v3  ;;  %v6488_v27 = vadd.f32 %v6487_v35, %v14625_v11  ;;  %v6834_v59 = vpop.f32.mrb[56].mxu1 }
 0x775   : > { %v7391_v46 = vmax.f32 %v7390_v41, %v6486_v2  ;;  %v6835_v57 = vadd.f32 %v6834_v59, %v14630_v47  ;;  %v6836_v38 = vpop.f32.mrb[57].mxu1 }
 0x776   : > { %v7428_v19 = vmax.f32 %v7427_v22, %v6488_v27  ;;  %v6837_v44 = vadd.f32 %v6836_v38, %v14634_v34  ;;  %v6838_v17 = vpop.f32.mrb[58].mxu1 }
 0x777   : > { %v7464_v37 = vmax.f32 %v7463_v26, %v6835_v57  ;;  %v6839_v54 = vadd.f32 %v6838_v17, %v14630_v47  ;;  %v6840_v56 = vpop.f32.mrb[59].mxu1 }
 0x778   : > { %v7501_v55 = vmax.f32 %v7500_v20, %v6837_v44  ;;  %v6841_v60 = vadd.f32 %v6840_v56, %v14634_v34  ;;  %v6491_v9 = vpop.f32.mrb[60].mxu0 }
 0x779   : > { %v7465_v8 = vmax.f32 %v7464_v37, %v6839_v54  ;;  %v6492_v36 = vadd.f32 %v6491_v9, %v14620_v32  ;;  %v6493_v45 = vpop.f32.mrb[61].mxu0 }
 0x77a   : > { %v7502_v25 = vmax.f32 %v7501_v55, %v6841_v60  ;;  %v6494_v43 = vadd.f32 %v6493_v45, %v14625_v11  ;;  %v6495_v62 = vpop.f32.mrb[62].mxu0 }
 0x77b   : > { %v7392_v48 = vmax.f32 %v7391_v46, %v6492_v36  ;;  %v6496_v30 = vadd.f32 %v6495_v62, %v14620_v32  ;;  %v6497_v1 = vpop.f32.mrb[63].mxu0 }
 0x77c   : > { %v7429_v21 = vmax.f32 %v7428_v19, %v6494_v43  ;;  %v6498_v50 = vadd.f32 %v6497_v1, %v14625_v11  ;;  %v6844_v49 = vpop.f32.mrb[60].mxu1 }
 0x77d   : > { %v7393_v28 = vmax.f32 %v7392_v48, %v6496_v30  ;;  %v6845_v40 = vadd.f32 %v6844_v49, %v14630_v47  ;;  %v6846_v16 = vpop.f32.mrb[61].mxu1 }
 0x77e   : > { %v7430_v6 = vmax.f32 %v7429_v21, %v6498_v50  ;;  %v6847_v39 = vadd.f32 %v6846_v16, %v14634_v34  ;;  %v6848_v53 = vpop.f32.mrb[62].mxu1 }
 0x77f   : > { %v7466_v13 = vmax.f32 %v7465_v8, %v6845_v40  ;;  %v6849_v52 = vadd.f32 %v6848_v53, %v14630_v47  ;;  %v6850_v10 = vpop.f32.mrb[63].mxu1 }
 0x780   : > { %v7503_v14 = vmax.f32 %v7502_v25, %v6847_v39  ;;  %v6851_v63 = vadd.f32 %v6850_v10, %v14634_v34  ;;  %v6501_v51 = vpop.f32.mrb[64].mxu0 }
 0x781   : > { %v7467_v15 = vmax.f32 %v7466_v13, %v6849_v52  ;;  %v6502_v4 = vadd.f32 %v6501_v51, %v14620_v32  ;;  %v6503_v61 = vpop.f32.mrb[65].mxu0 }
 0x782   : > { %v7504_v7 = vmax.f32 %v7503_v14, %v6851_v63  ;;  %v6504_v31 = vadd.f32 %v6503_v61, %v14625_v11  ;;  %v6505_v18 = vpop.f32.mrb[66].mxu0 }
 0x783   : > { %v7394_v0 = vmax.f32 %v7393_v28, %v6502_v4  ;;  %v6506_v5 = vadd.f32 %v6505_v18, %v14620_v32  ;;  %v6507_v26 = vpop.f32.mrb[67].mxu0 }
 0x784   : > { %v7431_v24 = vmax.f32 %v7430_v6, %v6504_v31  ;;  %v6508_v42 = vadd.f32 %v6507_v26, %v14625_v11  ;;  %v6854_v20 = vpop.f32.mrb[64].mxu1 }
 0x785   : > { %v7395_v3 = vmax.f32 %v7394_v0, %v6506_v5  ;;  %v6855_v58 = vadd.f32 %v6854_v20, %v14630_v47  ;;  %v6856_v41 = vpop.f32.mrb[65].mxu1 }
 0x786   : > { %v7432_v2 = vmax.f32 %v7431_v24, %v6508_v42  ;;  %v6857_v35 = vadd.f32 %v6856_v41, %v14634_v34  ;;  %v6858_v22 = vpop.f32.mrb[66].mxu1 }
 0x787   : > { %v7468_v27 = vmax.f32 %v7467_v15, %v6855_v58  ;;  %v6859_v59 = vadd.f32 %v6858_v22, %v14630_v47  ;;  %v6860_v46 = vpop.f32.mrb[67].mxu1 }
 0x788   : > { %v7505_v57 = vmax.f32 %v7504_v7, %v6857_v35  ;;  %v6861_v38 = vadd.f32 %v6860_v46, %v14634_v34  ;;  %v6511_v19 = vpop.f32.mrb[68].mxu0 }
 0x789   : > { %v7469_v44 = vmax.f32 %v7468_v27, %v6859_v59  ;;  %v6512_v17 = vadd.f32 %v6511_v19, %v14620_v32  ;;  %v6513_v37 = vpop.f32.mrb[69].mxu0 }
 0x78a   : > { %v7506_v54 = vmax.f32 %v7505_v57, %v6861_v38  ;;  %v6514_v56 = vadd.f32 %v6513_v37, %v14625_v11  ;;  %v6515_v55 = vpop.f32.mrb[70].mxu0 }
 0x78b   : > { %v7396_v60 = vmax.f32 %v7395_v3, %v6512_v17  ;;  %v6516_v9 = vadd.f32 %v6515_v55, %v14620_v32  ;;  %v6517_v8 = vpop.f32.mrb[71].mxu0 }
 0x78c   : > { %v7433_v36 = vmax.f32 %v7432_v2, %v6514_v56  ;;  %v6518_v45 = vadd.f32 %v6517_v8, %v14625_v11  ;;  %v6864_v25 = vpop.f32.mrb[68].mxu1 }
 0x78d   : > { %v7397_v43 = vmax.f32 %v7396_v60, %v6516_v9  ;;  %v6865_v62 = vadd.f32 %v6864_v25, %v14630_v47  ;;  %v6866_v48 = vpop.f32.mrb[69].mxu1 }
 0x78e   : > { %v7434_v30 = vmax.f32 %v7433_v36, %v6518_v45  ;;  %v6867_v1 = vadd.f32 %v6866_v48, %v14634_v34  ;;  %v6868_v21 = vpop.f32.mrb[70].mxu1 }
 0x78f   : > { %v7470_v50 = vmax.f32 %v7469_v44, %v6865_v62  ;;  %v6869_v49 = vadd.f32 %v6868_v21, %v14630_v47  ;;  %v6870_v28 = vpop.f32.mrb[71].mxu1 }
 0x790   : > { %v7507_v40 = vmax.f32 %v7506_v54, %v6867_v1  ;;  %v6871_v16 = vadd.f32 %v6870_v28, %v14634_v34  ;;  %v6521_v6 = vpop.f32.mrb[72].mxu0 }
 0x791   : > { %v7471_v39 = vmax.f32 %v7470_v50, %v6869_v49  ;;  %v6522_v53 = vadd.f32 %v6521_v6, %v14620_v32  ;;  %v6523_v13 = vpop.f32.mrb[73].mxu0 }
 0x792   : > { %v7508_v52 = vmax.f32 %v7507_v40, %v6871_v16  ;;  %v6524_v10 = vadd.f32 %v6523_v13, %v14625_v11  ;;  %v6525_v14 = vpop.f32.mrb[74].mxu0 }
 0x793   : > { %v7398_v63 = vmax.f32 %v7397_v43, %v6522_v53  ;;  %v6526_v51 = vadd.f32 %v6525_v14, %v14620_v32  ;;  %v6527_v15 = vpop.f32.mrb[75].mxu0 }
 0x794   : > { %v7435_v4 = vmax.f32 %v7434_v30, %v6524_v10  ;;  %v6528_v61 = vadd.f32 %v6527_v15, %v14625_v11  ;;  %v6874_v7 = vpop.f32.mrb[72].mxu1 }
 0x795   : > { %v7399_v31 = vmax.f32 %v7398_v63, %v6526_v51  ;;  %v6875_v18 = vadd.f32 %v6874_v7, %v14630_v47  ;;  %v6876_v0 = vpop.f32.mrb[73].mxu1 }
 0x796   : > { %v7436_v5 = vmax.f32 %v7435_v4, %v6528_v61  ;;  %v6877_v26 = vadd.f32 %v6876_v0, %v14634_v34  ;;  %v6878_v24 = vpop.f32.mrb[74].mxu1 }
 0x797   : > { %v7472_v42 = vmax.f32 %v7471_v39, %v6875_v18  ;;  %v6879_v20 = vadd.f32 %v6878_v24, %v14630_v47  ;;  %v6880_v3 = vpop.f32.mrb[75].mxu1 }
 0x798   : > { %v7509_v58 = vmax.f32 %v7508_v52, %v6877_v26  ;;  %v6881_v41 = vadd.f32 %v6880_v3, %v14634_v34  ;;  %v6531_v2 = vpop.f32.mrb[76].mxu0 }
 0x799   : > { %v7473_v35 = vmax.f32 %v7472_v42, %v6879_v20  ;;  %v6532_v22 = vadd.f32 %v6531_v2, %v14620_v32  ;;  %v6533_v27 = vpop.f32.mrb[77].mxu0 }
 0x79a   : > { %v7510_v59 = vmax.f32 %v7509_v58, %v6881_v41  ;;  %v6534_v46 = vadd.f32 %v6533_v27, %v14625_v11  ;;  %v6535_v57 = vpop.f32.mrb[78].mxu0 }
 0x79b   : > { %v7400_v38 = vmax.f32 %v7399_v31, %v6532_v22  ;;  %v6536_v19 = vadd.f32 %v6535_v57, %v14620_v32  ;;  %v6537_v44 = vpop.f32.mrb[79].mxu0 }
 0x79c   : > { %v7437_v17 = vmax.f32 %v7436_v5, %v6534_v46  ;;  %v6538_v37 = vadd.f32 %v6537_v44, %v14625_v11  ;;  %v6884_v54 = vpop.f32.mrb[76].mxu1 }
 0x79d   : > { %v7401_v56 = vmax.f32 %v7400_v38, %v6536_v19  ;;  %v6885_v55 = vadd.f32 %v6884_v54, %v14630_v47  ;;  %v6886_v60 = vpop.f32.mrb[77].mxu1 }
 0x79e   : > { %v7438_v9 = vmax.f32 %v7437_v17, %v6538_v37  ;;  %v6887_v8 = vadd.f32 %v6886_v60, %v14634_v34  ;;  %v6888_v36 = vpop.f32.mrb[78].mxu1 }
 0x79f   : > { %v7474_v45 = vmax.f32 %v7473_v35, %v6885_v55  ;;  %v6889_v25 = vadd.f32 %v6888_v36, %v14630_v47  ;;  %v6890_v43 = vpop.f32.mrb[79].mxu1 }
 0x7a0   : > { %v7511_v62 = vmax.f32 %v7510_v59, %v6887_v8  ;;  %v6891_v48 = vadd.f32 %v6890_v43, %v14634_v34  ;;  %v6541_v30 = vpop.f32.mrb[80].mxu0 }
 0x7a1   : > { %v7475_v1 = vmax.f32 %v7474_v45, %v6889_v25  ;;  %v6542_v21 = vadd.f32 %v6541_v30, %v14620_v32  ;;  %v6543_v50 = vpop.f32.mrb[81].mxu0 }
 0x7a2   : > { %v7512_v49 = vmax.f32 %v7511_v62, %v6891_v48  ;;  %v6544_v28 = vadd.f32 %v6543_v50, %v14625_v11  ;;  %v6545_v40 = vpop.f32.mrb[82].mxu0 }
 0x7a3   : > { %v7402_v16 = vmax.f32 %v7401_v56, %v6542_v21  ;;  %v6546_v6 = vadd.f32 %v6545_v40, %v14620_v32  ;;  %v6547_v39 = vpop.f32.mrb[83].mxu0 }
 0x7a4   : > { %v7439_v53 = vmax.f32 %v7438_v9, %v6544_v28  ;;  %v6548_v13 = vadd.f32 %v6547_v39, %v14625_v11  ;;  %v6894_v52 = vpop.f32.mrb[80].mxu1 }
 0x7a5   : > { %v7403_v10 = vmax.f32 %v7402_v16, %v6546_v6  ;;  %v6895_v14 = vadd.f32 %v6894_v52, %v14630_v47  ;;  %v6896_v63 = vpop.f32.mrb[81].mxu1 }
 0x7a6   : > { %v7440_v51 = vmax.f32 %v7439_v53, %v6548_v13  ;;  %v6897_v15 = vadd.f32 %v6896_v63, %v14634_v34  ;;  %v6898_v4 = vpop.f32.mrb[82].mxu1 }
 0x7a7   : > { %v7476_v61 = vmax.f32 %v7475_v1, %v6895_v14  ;;  %v6899_v7 = vadd.f32 %v6898_v4, %v14630_v47  ;;  %v6900_v31 = vpop.f32.mrb[83].mxu1 }
 0x7a8   : > { %v7513_v18 = vmax.f32 %v7512_v49, %v6897_v15  ;;  %v6901_v0 = vadd.f32 %v6900_v31, %v14634_v34  ;;  %v6551_v5 = vpop.f32.mrb[84].mxu0 }
 0x7a9   : > { %v7477_v26 = vmax.f32 %v7476_v61, %v6899_v7  ;;  %v6552_v24 = vadd.f32 %v6551_v5, %v14620_v32  ;;  %v6553_v42 = vpop.f32.mrb[85].mxu0 }
 0x7aa   : > { %v7514_v20 = vmax.f32 %v7513_v18, %v6901_v0  ;;  %v6554_v3 = vadd.f32 %v6553_v42, %v14625_v11  ;;  %v6555_v58 = vpop.f32.mrb[86].mxu0 }
 0x7ab   : > { %v7404_v41 = vmax.f32 %v7403_v10, %v6552_v24  ;;  %v6556_v2 = vadd.f32 %v6555_v58, %v14620_v32  ;;  %v6557_v35 = vpop.f32.mrb[87].mxu0 }
 0x7ac   : > { %v7441_v22 = vmax.f32 %v7440_v51, %v6554_v3  ;;  %v6558_v27 = vadd.f32 %v6557_v35, %v14625_v11  ;;  %v6904_v59 = vpop.f32.mrb[84].mxu1 }
 0x7ad   : > { %v7405_v46 = vmax.f32 %v7404_v41, %v6556_v2  ;;  %v6905_v57 = vadd.f32 %v6904_v59, %v14630_v47  ;;  %v6906_v38 = vpop.f32.mrb[85].mxu1 }
 0x7ae   : > { %v7442_v19 = vmax.f32 %v7441_v22, %v6558_v27  ;;  %v6907_v44 = vadd.f32 %v6906_v38, %v14634_v34  ;;  %v6908_v17 = vpop.f32.mrb[86].mxu1 }
 0x7af   : > { %v7478_v37 = vmax.f32 %v7477_v26, %v6905_v57  ;;  %v6909_v54 = vadd.f32 %v6908_v17, %v14630_v47  ;;  %v6910_v56 = vpop.f32.mrb[87].mxu1 }
 0x7b0   : > { %v7515_v55 = vmax.f32 %v7514_v20, %v6907_v44  ;;  %v6911_v60 = vadd.f32 %v6910_v56, %v14634_v34  ;;  %v6561_v9 = vpop.f32.mrb[88].mxu0 }
 0x7b1   : > { %v7479_v8 = vmax.f32 %v7478_v37, %v6909_v54  ;;  %v6562_v36 = vadd.f32 %v6561_v9, %v14620_v32  ;;  %v6563_v45 = vpop.f32.mrb[89].mxu0 }
 0x7b2   : > { %v7516_v25 = vmax.f32 %v7515_v55, %v6911_v60  ;;  %v6564_v43 = vadd.f32 %v6563_v45, %v14625_v11  ;;  %v6565_v62 = vpop.f32.mrb[90].mxu0 }
 0x7b3   : > { %v7406_v48 = vmax.f32 %v7405_v46, %v6562_v36  ;;  %v6566_v30 = vadd.f32 %v6565_v62, %v14620_v32  ;;  %v6567_v1 = vpop.f32.mrb[91].mxu0 }
 0x7b4   : > { %v7443_v21 = vmax.f32 %v7442_v19, %v6564_v43  ;;  %v6568_v50 = vadd.f32 %v6567_v1, %v14625_v11  ;;  %v6914_v49 = vpop.f32.mrb[88].mxu1 }
 0x7b5   : > { %v7407_v28 = vmax.f32 %v7406_v48, %v6566_v30  ;;  %v6915_v40 = vadd.f32 %v6914_v49, %v14630_v47  ;;  %v6916_v16 = vpop.f32.mrb[89].mxu1 }
 0x7b6   : > { %v7444_v6 = vmax.f32 %v7443_v21, %v6568_v50  ;;  %v6917_v39 = vadd.f32 %v6916_v16, %v14634_v34  ;;  %v6918_v53 = vpop.f32.mrb[90].mxu1 }
 0x7b7   : > { %v7480_v13 = vmax.f32 %v7479_v8, %v6915_v40  ;;  %v6919_v52 = vadd.f32 %v6918_v53, %v14630_v47  ;;  %v6920_v10 = vpop.f32.mrb[91].mxu1 }
 0x7b8   : > { %v7517_v14 = vmax.f32 %v7516_v25, %v6917_v39  ;;  %v6921_v63 = vadd.f32 %v6920_v10, %v14634_v34  ;;  %v6571_v51 = vpop.f32.mrb[92].mxu0  ;;  %v6934_v10 = vld [vmem:[#allocation18 + $0x8] sm:$0xff] }
 0x7b9   : > { %v7481_v15 = vmax.f32 %v7480_v13, %v6919_v52  ;;  %v6572_v4 = vadd.f32 %v6571_v51, %v14620_v32  ;;  %v6573_v61 = vpop.f32.mrb[93].mxu0 }
 0x7ba   : > { %v7518_v7 = vmax.f32 %v7517_v14, %v6921_v63  ;;  %v6574_v31 = vadd.f32 %v6573_v61, %v14625_v11  ;;  %v6575_v18 = vpop.f32.mrb[94].mxu0  ;;  %v11364_v61 = vld [vmem:[#allocation14 + $0x204] ss:$16 sps:$4 sm:$0xff] (!%p10608_p11)  }
 0x7bb   : > { %v7408_v0 = vmax.f32 %v7407_v28, %v6572_v4  ;;  %v6576_v5 = vadd.f32 %v6575_v18, %v14620_v32  ;;  %v6577_v26 = vpop.f32.mrb[95].mxu0  ;;  %v11362_v4 = vld [vmem:[#allocation14 + $0x4] ss:$16 sps:$4 sm:$0xff] (!%p10608_p11)   ;;  %9288 = vmatprep.subr.bf16.mxu0 (!%p10608_p11), %v11364_v61  ;;  %v11373_v18 = vld [vmem:[#allocation14 + $0x220] ss:$16 sps:$4 sm:$0xff] (!%p10608_p11)  }
 0x7bc   : > { %v7445_v24 = vmax.f32 %v7444_v6, %v6574_v31  ;;  %v6578_v42 = vadd.f32 %v6577_v26, %v14625_v11  ;;  %v6924_v20 = vpop.f32.mrb[92].mxu1  ;;  %9247 = vmatprep.subr.bf16.mxu1 (!%p10608_p11), %v11362_v4  ;;  %v11367_v31 = vld [vmem:[#allocation14 + $0x200] ss:$16 sps:$4 sm:$0xff] (!%p10608_p11)   ;;  %v11446_v61 = vld [vmem:[#allocation14 + $0x1c4] ss:$16 sps:$4 sm:$0xff] (!%p10608_p11)  }
 0x7bd   : > { %v7409_v3 = vmax.f32 %v7408_v0, %v6576_v5  ;;  %v6925_v58 = vadd.f32 %v6924_v20, %v14630_v47  ;;  %v6926_v41 = vpop.f32.mrb[93].mxu1  ;;  %9289 = vmatpush1.bf16.msra.mxu0 (!%p10608_p11), %v11367_v31  ;;  %v11374_v0 = vld [vmem:[#allocation14 + $0x44] ss:$16 sps:$4 sm:$0xff] (!%p10608_p11)   ;;  %v11378_v26 = vld [vmem:[#allocation14 + $0x40] ss:$16 sps:$4 sm:$0xff] (!%p10608_p11)  }
 0x7be   : > { %v7446_v2 = vmax.f32 %v7445_v24, %v6578_v42  ;;  %v6927_v35 = vadd.f32 %v6926_v41, %v14634_v34  ;;  %v6928_v22 = vpop.f32.mrb[94].mxu1  ;;  %9290 = vmatprep.subr.bf16.mxu0 (!%p10608_p11), %v11370_v12  ;;  %v11376_v5 = vld [vmem:[#allocation14 + $0x244] ss:$16 sps:$4 sm:$0xff] (!%p10608_p11)   ;;  %v11379_v24 = vld [vmem:[#allocation14 + $0x240] ss:$16 sps:$4 sm:$0xff] (!%p10608_p11)  }
 0x7bf   : > { %v7410_v27 = vrot.slane %v7409_v3, 4  ;;  %v7482_v59 = vmax.f32 %v7481_v15, %v6925_v58  ;;  %v6929_v46 = vadd.f32 %v6928_v22, %v14630_v47  ;;  %v6930_v57 = vpop.f32.mrb[95].mxu1  ;;  %v11380_v42 = vld [vmem:[#allocation14 + $0x64] ss:$16 sps:$4 sm:$0xff] (!%p10608_p11)   ;;  %v11385_v58 = vld [vmem:[#allocation14 + $0x260] ss:$16 sps:$4 sm:$0xff] (!%p10608_p11)  }
 0x7c0   : > { %v7447_v38 = vrot.slane %v7446_v2, 4  ;;  %v7519_v32 = vmax.f32 %v7518_v7, %v6927_v35  ;;  %v6931_v19 = vadd.f32 %v6930_v57, %v14634_v34  ;;  %v11366_v7 = vld [vmem:[#allocation14] ss:$16 sps:$4 sm:$0xff] (!%p10608_p11)   ;;  %v11382_v20 = vld [vmem:[#allocation14 + $0x264] ss:$16 sps:$4 sm:$0xff] (!%p10608_p11)  }
 0x7c1   : > { %v7411_v44 = vmax.f32 %v7409_v3, %v7410_v27  ;;  %v7483_v11 = vmax.f32 %v7482_v59, %v6929_v46  ;;  %9248 = vmatpush1.bf16.msra.mxu1 (!%p10608_p11), %v11366_v7  ;;  %9291 = vmatpush1.bf16.msra.mxu0 (!%p10608_p11), %v11373_v18  ;;  %v11384_v3 = vld [vmem:[#allocation14 + $0x60] ss:$16 sps:$4 sm:$0xff] (!%p10608_p11)   ;;  %v11386_v41 = vld [vmem:[#allocation14 + $0x84] ss:$16 sps:$4 sm:$0xff] (!%p10608_p11)  }
 0x7c2   : > { %v7448_v17 = vmax.f32 %v7446_v2, %v7447_v38  ;;  %v7520_v37 = vmax.f32 %v7519_v32, %v6931_v19  ;;  %9249 = vmatprep.subr.bf16.mxu1 (!%p10608_p11), %v11368_v33  ;;  %9292 = vmatprep.subr.bf16.mxu0 (!%p10608_p11), %v11376_v5  ;;  %v11388_v2 = vld [vmem:[#allocation14 + $0x284] ss:$16 sps:$4 sm:$0xff] (!%p10608_p11)   ;;  %v11390_v35 = vld [vmem:[#allocation14 + $0x80] ss:$16 sps:$4 sm:$0xff] (!%p10608_p11)  }
 0x7c3   : > { %v7412_v54 = vrot.slane %v7411_v44, 2  ;;  %v7484_v56 = vrot.slane %v7483_v11, 4  ;;  %v11391_v22 = vld [vmem:[#allocation14 + $0x280] ss:$16 sps:$4 sm:$0xff] (!%p10608_p11)   ;;  %v11392_v27 = vld [vmem:[#allocation14 + $0xa4] ss:$16 sps:$4 sm:$0xff] (!%p10608_p11)  }
 0x7c4   : > { %v7449_v55 = vrot.slane %v7448_v17, 2  ;;  %v7521_v60 = vrot.slane %v7520_v37, 4  ;;  %v11394_v59 = vld [vmem:[#allocation14 + $0x2a4] ss:$16 sps:$4 sm:$0xff] (!%p10608_p11)   ;;  %v11396_v46 = vld [vmem:[#allocation14 + $0xa0] ss:$16 sps:$4 sm:$0xff] (!%p10608_p11)  }
 0x7c5   : > { %v7413_v9 = vmax.f32 %v7411_v44, %v7412_v54  ;;  %v7485_v8 = vmax.f32 %v7483_v11, %v7484_v56  ;;  %9293 = vmatpush1.bf16.msra.mxu0 (!%p10608_p11), %v11379_v24  ;;  %v11397_v57 = vld [vmem:[#allocation14 + $0x2a0] ss:$16 sps:$4 sm:$0xff] (!%p10608_p11)   ;;  %v11398_v38 = vld [vmem:[#allocation14 + $0xc4] ss:$16 sps:$4 sm:$0xff] (!%p10608_p11)  }
 0x7c6   : > { %v7450_v36 = vmax.f32 %v7448_v17, %v7449_v55  ;;  %v7522_v45 = vmax.f32 %v7520_v37, %v7521_v60  ;;  %9294 = vmatprep.subr.bf16.mxu0 (!%p10608_p11), %v11382_v20  ;;  %v11400_v32 = vld [vmem:[#allocation14 + $0x2c4] ss:$16 sps:$4 sm:$0xff] (!%p10608_p11)   ;;  %v11402_v19 = vld [vmem:[#allocation14 + $0xc0] ss:$16 sps:$4 sm:$0xff] (!%p10608_p11)  }
 0x7c7   : > { %v7414_v25 = vrot.slane %v7413_v9, 1  ;;  %v7486_v43 = vrot.slane %v7485_v8, 2  ;;  %v11403_v44 = vld [vmem:[#allocation14 + $0x2c0] ss:$16 sps:$4 sm:$0xff] (!%p10608_p11)   ;;  %v11404_v11 = vld [vmem:[#allocation14 + $0xe4] ss:$16 sps:$4 sm:$0xff] (!%p10608_p11)  }
 0x7c8   : > { %v7451_v47 = vrot.slane %v7450_v36, 1  ;;  %v7523_v62 = vrot.slane %v7522_v45, 2  ;;  %v11406_v17 = vld [vmem:[#allocation14 + $0x2e4] ss:$16 sps:$4 sm:$0xff] (!%p10608_p11)   ;;  %v11408_v37 = vld [vmem:[#allocation14 + $0xe0] ss:$16 sps:$4 sm:$0xff] (!%p10608_p11)  }
 0x7c9   : > { %v7415_v48 = vmax.f32 %v7413_v9, %v7414_v25  ;;  %v7487_v30 = vmax.f32 %v7485_v8, %v7486_v43  ;;  %9295 = vmatpush1.bf16.msra.mxu0 (!%p10608_p11), %v11385_v58  ;;  %v11409_v54 = vld [vmem:[#allocation14 + $0x2e0] ss:$16 sps:$4 sm:$0xff] (!%p10608_p11)   ;;  %v11410_v56 = vld [vmem:[#allocation14 + $0x104] ss:$16 sps:$4 sm:$0xff] (!%p10608_p11)  }
 0x7ca   : > { %v7452_v1 = vmax.f32 %v7450_v36, %v7451_v47  ;;  %v7524_v34 = vmax.f32 %v7522_v45, %v7523_v62  ;;  %9296 = vmatprep.subr.bf16.mxu0 (!%p10608_p11), %v11388_v2  ;;  %v11412_v55 = vld [vmem:[#allocation14 + $0x304] ss:$16 sps:$4 sm:$0xff] (!%p10608_p11)   ;;  %v11414_v60 = vld [vmem:[#allocation14 + $0x100] ss:$16 sps:$4 sm:$0xff] (!%p10608_p11)  }
 0x7cb   : > { %v7488_v21 = vrot.slane %v7487_v30, 1  ;;  %v11415_v9 = vld [vmem:[#allocation14 + $0x300] ss:$16 sps:$4 sm:$0xff] (!%p10608_p11)   ;;  %v11416_v8 = vld [vmem:[#allocation14 + $0x124] ss:$16 sps:$4 sm:$0xff] (!%p10608_p11)  }
 0x7cc   : > { %v7594_v50 = vcombine.low %v7415_v48, %v7452_v1  ;;  %v7525_v49 = vrot.slane %v7524_v34, 1  ;;  %v11418_v36 = vld [vmem:[#allocation14 + $0x324] ss:$16 sps:$4 sm:$0xff] (!%p10608_p11)   ;;  %v11420_v45 = vld [vmem:[#allocation14 + $0x120] ss:$16 sps:$4 sm:$0xff] (!%p10608_p11)  }
 0x7cd   : > { %v7489_v28 = vmax.f32 %v7487_v30, %v7488_v21  ;;  %9297 = vmatpush1.bf16.msra.mxu0 (!%p10608_p11), %v11391_v22  ;;  %v11421_v25 = vld [vmem:[#allocation14 + $0x320] ss:$16 sps:$4 sm:$0xff] (!%p10608_p11)   ;;  %v11422_v43 = vld [vmem:[#allocation14 + $0x144] ss:$16 sps:$4 sm:$0xff] (!%p10608_p11)  }
 0x7ce   : > { %v7526_v40 = vmax.f32 %v7524_v34, %v7525_v49  ;;  %v7602_v6 = vrot.slane %v7594_v50, %v13495_v23  ;;  %9298 = vmatprep.subr.bf16.mxu0 (!%p10608_p11), %v11394_v59  ;;  %v11424_v47 = vld [vmem:[#allocation14 + $0x344] ss:$16 sps:$4 sm:$0xff] (!%p10608_p11)   ;;  %v11426_v62 = vld [vmem:[#allocation14 + $0x140] ss:$16 sps:$4 sm:$0xff] (!%p10608_p11)  }
 0x7cf   : > { %v11427_v48 = vld [vmem:[#allocation14 + $0x340] ss:$16 sps:$4 sm:$0xff] (!%p10608_p11)   ;;  %v11428_v30 = vld [vmem:[#allocation14 + $0x164] ss:$16 sps:$4 sm:$0xff] (!%p10608_p11)  }
 0x7d0   : > { %v7595_v16 = vcombine.low %v7489_v28, %v7526_v40  ;;  %v11430_v1 = vld [vmem:[#allocation14 + $0x364] ss:$16 sps:$4 sm:$0xff] (!%p10608_p11)   ;;  %v11432_v21 = vld [vmem:[#allocation14 + $0x160] ss:$16 sps:$4 sm:$0xff] (!%p10608_p11)  }
 0x7d1   : > { %9299 = vmatpush1.bf16.msra.mxu0 (!%p10608_p11), %v11397_v57  ;;  %v7635_v34 = vld [vmem:[#allocation2] sm:$0xff] (!%p10608_p11) }
 0x7d2   : > { %v7609_v39 = vrot.slane %v7595_v16, %v13495_v23  ;;  %9300 = vmatprep.subr.bf16.mxu0 (!%p10608_p11), %v11400_v32  ;;  %v7646_v50 = vrot.slane (!%p10608_p11), %v7635_v34, %v13495_v23  ;;  %v7639_v49 = vcombine.high (!%p10608_p11), %v7635_v34, %v7635_v34  ;;  %v11433_v28 = vld [vmem:[#allocation14 + $0x360] ss:$16 sps:$4 sm:$0xff] (!%p10608_p11)   ;;  %v11434_v40 = vld [vmem:[#allocation14 + $0x184] ss:$16 sps:$4 sm:$0xff] (!%p10608_p11)   ;;  %v11504_v34 = vld [vmem:[#allocation14 + $0xe8] ss:$16 sps:$4 sm:$0xff] (!%p10608_p11)  }
 0x7d3   : > { %v11436_v16 = vld [vmem:[#allocation14 + $0x384] ss:$16 sps:$4 sm:$0xff] (!%p10608_p11)   ;;  %v11445_v4 = vld [vmem:[#allocation14 + $0x3a0] ss:$16 sps:$4 sm:$0xff] (!%p10608_p11)  }
 0x7d4   : > { %v7610_v53 = vcombine.low %v7602_v6, %v7609_v39  ;;  %v7654_v6 = vcombine.high (!%p10608_p11), %v7646_v50, %v7646_v50  ;;  %v7653_v39 = vrot.slane (!%p10608_p11), %v7639_v49, %v13495_v23  ;;  %v11448_v7 = vld [vmem:[#allocation14 + $0x3c4] ss:$16 sps:$4 sm:$0xff] (!%p10608_p11)   ;;  %v11450_v31 = vld [vmem:[#allocation14 + $0x1c0] ss:$16 sps:$4 sm:$0xff] (!%p10608_p11)   ;;  %v14943_v24 = vpack.c.bf16 (!%p10608_p11), %v7646_v50, %v7646_v50  ;;  %v11512_v50 = vld [vmem:[#allocation14 + $0x10c] ss:$16 sps:$4 sm:$0xff] (!%p10608_p11)  }
 0x7d5   : > { %9301 = vmatpush1.bf16.msra.mxu0 (!%p10608_p11), %v11403_v44  ;;  %v11451_v33 = vld [vmem:[#allocation14 + $0x3c0] ss:$16 sps:$4 sm:$0xff] (!%p10608_p11)   ;;  %v11452_v12 = vld [vmem:[#allocation14 + $0x1e4] ss:$16 sps:$4 sm:$0xff] (!%p10608_p11)  }
 0x7d6   : > { %v7620_v13 = vrot.slane %v7610_v53, 7  ;;  %9302 = vmatprep.subr.bf16.mxu0 (!%p10608_p11), %v11406_v17  ;;  %v11438_v53 = vld [vmem:[#allocation14 + $0x180] ss:$16 sps:$4 sm:$0xff] (!%p10608_p11)   ;;  %v11461_v5 = vld [vmem:[#allocation14 + $0x404] ss:$16 sps:$4 sm:$0xff] (!%p10608_p11)   ;;  %v14945_v20 = vpack.c.bf16 (!%p10608_p11), %v7653_v39, %v7653_v39 }
 0x7d7   : > { %v11456_v18 = vld [vmem:[#allocation14 + $0x1e0] ss:$16 sps:$4 sm:$0xff] (!%p10608_p11)   ;;  %v11467_v58 = vld [vmem:[#allocation14 + $0x424] ss:$16 sps:$4 sm:$0xff] (!%p10608_p11)  }
 0x7d8   : > { %v7621_v52 = vsel %vm5074_vm0, %v7620_v13, %v7576_v29  ;;  %7634 = sbr.rel (%p10608_p11) target bundleno = 2982 (0xba6), region = 124  ;;  %v11372_v29 = vld [vmem:[#allocation14 + $0x20] ss:$16 sps:$4 sm:$0xff] (!%p10608_p11)   ;;  %v11473_v22 = vld [vmem:[#allocation14 + $0x444] ss:$16 sps:$4 sm:$0xff] (!%p10608_p11)  }
 0x7d9   : > { %v7622_v14 = vsel %vm5076_vm1, %v7620_v13, %v7621_v52  ;;  %9250 = vmatpush1.bf16.msra.mxu1 (!%p10608_p11), %v11372_v29  ;;  %9303 = vmatpush1.bf16.msra.mxu0 (!%p10608_p11), %v11409_v54  ;;  %v7655_v52 = vcombine.high (!%p10608_p11), %v7653_v39, %v7653_v39  ;;  %v11454_v29 = vld [vmem:[#allocation14 + $0x3e4] ss:$16 sps:$4 sm:$0xff] (!%p10608_p11)   ;;  %v11465_v2 = vld [vmem:[#allocation14 + $0x420] ss:$16 sps:$4 sm:$0xff] (!%p10608_p11)   ;;  %v11516_v39 = vld [vmem:[#allocation14 + $0x128] ss:$16 sps:$4 sm:$0xff] (!%p10608_p11)  }
 0x7da   : > { %v7623_v63 = vsel %vm5078_vm2, %v7620_v13, %v7622_v14  ;;  %9251 = vmatprep.subr.bf16.mxu1 (!%p10608_p11), %v11374_v0  ;;  %9304 = vmatprep.subr.bf16.mxu0 (!%p10608_p11), %v11412_v55  ;;  %v11440_v14 = vld [vmem:[#allocation14 + $0x1a4] ss:$16 sps:$4 sm:$0xff] (!%p10608_p11)   ;;  %v11457_v0 = vld [vmem:[#allocation14 + $0x3e0] ss:$16 sps:$4 sm:$0xff] (!%p10608_p11)  }
 0x7db   : > { %v7624_v51 = vsel %vm5080_vm3, %v7620_v13, %v7623_v63  ;;  %v7682_v13 = vpack.c.bf16 (!%p10608_p11), %v7654_v6, %v7654_v6  ;;  %v11442_v63 = vld [vmem:[#allocation14 + $0x3a4] ss:$16 sps:$4 sm:$0xff] (!%p10608_p11)   ;;  %v11471_v59 = vld [vmem:[#allocation14 + $0x440] ss:$16 sps:$4 sm:$0xff] (!%p10608_p11)  }
 0x7dc   : > { %v7628_v15 = vmax.f32 %v6934_v10, %v7624_v51  ;;  %v11439_v10 = vld [vmem:[#allocation14 + $0x380] ss:$16 sps:$4 sm:$0xff] (!%p10608_p11)   ;;  %v14940_v51 = vpack.c.bf16 (!%p10608_p11), %v7655_v52, %v7655_v52  ;;  %v11479_v57 = vld [vmem:[#allocation14 + $0x464] ss:$16 sps:$4 sm:$0xff] (!%p10608_p11)  }
 0x7dd   : > { %9252 = vmatpush1.bf16.msra.mxu1 (!%p10608_p11), %v11378_v26  ;;  %9305 = vmatpush1.bf16.msra.mxu0 (!%p10608_p11), %v11415_v9  ;;  %v11464_v26 = vld [vmem:[#allocation14 + $0xc] ss:$16 sps:$4 sm:$0xff] (!%p10608_p11)   ;;  %v11477_v32 = vld [vmem:[#allocation14 + $0x460] ss:$16 sps:$4 sm:$0xff] (!%p10608_p11)   ;;  %v11485_v44 = vld [vmem:[#allocation14 + $0x484] ss:$16 sps:$4 sm:$0xff] (!%p10608_p11)  }
 0x7de   : > { %7630 = vst [vmem:[#allocation18 + $0x8] sm:$0xff] %v7628_v15  ;;  %9253 = vmatprep.subr.bf16.mxu1 (!%p10608_p11), %v11380_v42  ;;  %9306 = vmatprep.subr.bf16.mxu0 (!%p10608_p11), %v11418_v36  ;;  %v11444_v15 = vld [vmem:[#allocation14 + $0x1a0] ss:$16 sps:$4 sm:$0xff] (!%p10608_p11)   ;;  %v11491_v54 = vld [vmem:[#allocation14 + $0x4a4] ss:$16 sps:$4 sm:$0xff] (!%p10608_p11)  }
 0x7df   : > { %9279 = vmatprep.mubr.bf16.mxu1 %v7682_v13  ;;  %9320 = vmatprep.mubr.bf16.mxu0 %v14940_v51  ;;  %v11459_v42 = vld [vmem:[#allocation14 + $0x400] ss:$16 sps:$4 sm:$0xff]   ;;  %v11497_v9 = vld [vmem:[#allocation14 + $0x4c4] ss:$16 sps:$4 sm:$0xff]  }
 0x7e0   : > { %v11483_v17 = vld [vmem:[#allocation14 + $0x480] ss:$16 sps:$4 sm:$0xff]   ;;  %v14949_v36 = vld [vmem:[#allocation2 + $0x8] sm:$0xff] }
 0x7e1   : > { %9254 = vmatpush1.bf16.msra.mxu1 %v11384_v3  ;;  %9307 = vmatpush1.bf16.msra.mxu0 %v11421_v25  ;;  %v11462_v3 = vld [vmem:[#allocation14 + $0x8] ss:$16 sps:$4 sm:$0xff]   ;;  %v11489_v55 = vld [vmem:[#allocation14 + $0x4a0] ss:$16 sps:$4 sm:$0xff]  }
 0x7e2   : > { %9255 = vmatprep.subr.bf16.mxu1 %v11386_v41  ;;  %9308 = vmatprep.subr.bf16.mxu0 %v11424_v47  ;;  %v11470_v41 = vld [vmem:[#allocation14 + $0x2c] ss:$16 sps:$4 sm:$0xff]   ;;  %v11495_v25 = vld [vmem:[#allocation14 + $0x4c0] ss:$16 sps:$4 sm:$0xff]  }
 0x7e3   : > { %v11507_v49 = vld [vmem:[#allocation14 + $0x500] ss:$16 sps:$4 sm:$0xff]  }
 0x7e4   : > { %v11513_v6 = vld [vmem:[#allocation14 + $0x520] ss:$16 sps:$4 sm:$0xff]  }
 0x7e5   : > { %9256 = vmatpush1.bf16.msra.mxu1 %v11390_v35  ;;  %9309 = vmatpush1.bf16.msra.mxu0 %v11427_v48  ;;  %v11468_v35 = vld [vmem:[#allocation14 + $0x28] ss:$16 sps:$4 sm:$0xff]   ;;  %v11506_v48 = vld [vmem:[#allocation14 + $0xec] ss:$16 sps:$4 sm:$0xff]   ;;  %v11519_v52 = vld [vmem:[#allocation14 + $0x540] ss:$16 sps:$4 sm:$0xff]  }
 0x7e6   : > { %9257 = vmatprep.subr.bf16.mxu1 %v11392_v27  ;;  %9310 = vmatprep.subr.bf16.mxu0 %v11430_v1  ;;  %v11476_v27 = vld [vmem:[#allocation14 + $0x4c] ss:$16 sps:$4 sm:$0xff]   ;;  %v11501_v1 = vld [vmem:[#allocation14 + $0x4e0] ss:$16 sps:$4 sm:$0xff]  }
 0x7e9   : > { %9258 = vmatpush1.bf16.msra.mxu1 %v11396_v46  ;;  %9311 = vmatpush1.bf16.msra.mxu0 %v11433_v28  ;;  %v11474_v46 = vld [vmem:[#allocation14 + $0x48] ss:$16 sps:$4 sm:$0xff]  }
 0x7ea   : > { %9259 = vmatprep.subr.bf16.mxu1 %v11398_v38  ;;  %9312 = vmatprep.subr.bf16.mxu0 %v11436_v16  ;;  %v11482_v38 = vld [vmem:[#allocation14 + $0x6c] ss:$16 sps:$4 sm:$0xff]   ;;  %v11510_v28 = vld [vmem:[#allocation14 + $0x108] ss:$16 sps:$4 sm:$0xff]  }
 0x7eb   : > { %v11518_v16 = vld [vmem:[#allocation14 + $0x12c] ss:$16 sps:$4 sm:$0xff]  }
 0x7ed   : > { %9260 = vmatpush1.bf16.msra.mxu1 %v11402_v19  ;;  %9313 = vmatpush1.bf16.msra.mxu0 %v11439_v10  ;;  %v11480_v19 = vld [vmem:[#allocation14 + $0x68] ss:$16 sps:$4 sm:$0xff]  }
 0x7ee   : > { %9261 = vmatprep.subr.bf16.mxu1 %v11404_v11  ;;  %9314 = vmatprep.subr.bf16.mxu0 %v11442_v63  ;;  %v11488_v11 = vld [vmem:[#allocation14 + $0x8c] ss:$16 sps:$4 sm:$0xff]   ;;  %v11522_v10 = vld [vmem:[#allocation14 + $0x148] ss:$16 sps:$4 sm:$0xff]  }
 0x7ef   : > { %v11530_v63 = vld [vmem:[#allocation14 + $0x16c] ss:$16 sps:$4 sm:$0xff]  }
 0x7f1   : > { %9262 = vmatpush1.bf16.msra.mxu1 %v11408_v37  ;;  %9315 = vmatpush1.bf16.msra.mxu0 %v11445_v4  ;;  %v11486_v37 = vld [vmem:[#allocation14 + $0x88] ss:$16 sps:$4 sm:$0xff]  }
 0x7f2   : > { %9263 = vmatprep.subr.bf16.mxu1 %v11410_v56  ;;  %9316 = vmatprep.subr.bf16.mxu0 %v11448_v7  ;;  %v11494_v56 = vld [vmem:[#allocation14 + $0xac] ss:$16 sps:$4 sm:$0xff]   ;;  %v11528_v4 = vld [vmem:[#allocation14 + $0x168] ss:$16 sps:$4 sm:$0xff]  }
 0x7f3   : > { %v11536_v7 = vld [vmem:[#allocation14 + $0x18c] ss:$16 sps:$4 sm:$0xff]  }
 0x7f5   : > { %9264 = vmatpush1.bf16.msra.mxu1 %v11414_v60  ;;  %9317 = vmatpush1.bf16.msra.mxu0 %v11451_v33  ;;  %v11492_v60 = vld [vmem:[#allocation14 + $0xa8] ss:$16 sps:$4 sm:$0xff]  }
 0x7f6   : > { %9265 = vmatprep.subr.bf16.mxu1 %v11416_v8  ;;  %9318 = vmatprep.subr.bf16.mxu0 %v11454_v29  ;;  %v11500_v8 = vld [vmem:[#allocation14 + $0xcc] ss:$16 sps:$4 sm:$0xff]   ;;  %v11534_v33 = vld [vmem:[#allocation14 + $0x188] ss:$16 sps:$4 sm:$0xff]  }
 0x7f7   : > { %v11542_v29 = vld [vmem:[#allocation14 + $0x1ac] ss:$16 sps:$4 sm:$0xff]  }
 0x7f9   : > { %9266 = vmatpush1.bf16.msra.mxu1 %v11420_v45  ;;  %9319 = vmatpush1.bf16.msra.mxu0 %v11457_v0  ;;  %v14953_v45 = vrot.slane %v14949_v36, %v13495_v23  ;;  %v11540_v0 = vld [vmem:[#allocation14 + $0x1a8] ss:$16 sps:$4 sm:$0xff]  }
 0x7fa   : > { %9267 = vmatprep.subr.bf16.mxu1 %v11422_v43  ;;  %9329 = vmatprep.subr.bf16.mxu0 %v11461_v5  ;;  %v11498_v43 = vld [vmem:[#allocation14 + $0xc8] ss:$16 sps:$4 sm:$0xff]   ;;  %v11545_v5 = vld [vmem:[#allocation14 + $0x5c4] ss:$16 sps:$4 sm:$0xff]  }
 0x7fb   : > { %v7671_v47 = vcombine.high %v14953_v45, %v14953_v45 }
 0x7fc   : > { %9321 = vmatmul.mubr.bf16.vlgmr.msra.gmra.mrb[0].mxu0 %v14945_v20 }
 0x7fd   : > { %9268 = vmatpush1.bf16.msra.mxu1 %v11426_v62  ;;  %9330 = vmatpush1.bf16.msra.mxu0 %v11459_v42  ;;  %v11503_v62 = vld [vmem:[#allocation14 + $0x4e4] ss:$16 sps:$4 sm:$0xff]   ;;  %v7656_v42 = vcombine.high %v14949_v36, %v14949_v36  ;;  %v11576_v36 = vld [vmem:[#allocation14 + $0x268] ss:$16 sps:$4 sm:$0xff]  }
 0x7fe   : > { %9269 = vmatprep.subr.bf16.mxu1 %v11428_v30  ;;  %9331 = vmatprep.subr.bf16.mxu0 %v11467_v58  ;;  %v14957_v30 = vpack.c.bf16 %v7671_v47, %v7671_v47  ;;  %v11546_v58 = vld [vmem:[#allocation14 + $0x1c8] ss:$16 sps:$4 sm:$0xff]   ;;  %v11587_v47 = vld [vmem:[#allocation14 + $0x6a4] ss:$16 sps:$4 sm:$0xff]  }
 0x800   : > { %9361 = vmatprep.mubr.bf16.mxu0 %v14957_v30 }
 0x801   : > { %9270 = vmatpush1.bf16.msra.mxu1 %v11432_v21  ;;  %9332 = vmatpush1.bf16.msra.mxu0 %v11465_v2  ;;  %v11509_v21 = vld [vmem:[#allocation14 + $0x504] ss:$16 sps:$4 sm:$0xff]   ;;  %v11554_v2 = vld [vmem:[#allocation14 + $0x1ec] ss:$16 sps:$4 sm:$0xff]  }
 0x802   : > { %9271 = vmatprep.subr.bf16.mxu1 %v11434_v40  ;;  %9333 = vmatprep.subr.bf16.mxu0 %v11473_v22  ;;  %v11515_v40 = vld [vmem:[#allocation14 + $0x524] ss:$16 sps:$4 sm:$0xff]   ;;  %v11549_v22 = vld [vmem:[#allocation14 + $0x5e0] ss:$16 sps:$4 sm:$0xff]  }
 0x805   : > { %9272 = vmatpush1.bf16.msra.mxu1 %v11438_v53  ;;  %9334 = vmatpush1.bf16.msra.mxu0 %v11471_v59  ;;  %v11521_v53 = vld [vmem:[#allocation14 + $0x544] ss:$16 sps:$4 sm:$0xff]  }
 0x806   : > { %9273 = vmatprep.subr.bf16.mxu1 %v11440_v14  ;;  %9335 = vmatprep.subr.bf16.mxu0 %v11479_v57  ;;  %v11527_v14 = vld [vmem:[#allocation14 + $0x564] ss:$16 sps:$4 sm:$0xff]  }
 0x807   : > { %v11557_v59 = vld [vmem:[#allocation14 + $0x604] ss:$16 sps:$4 sm:$0xff]  }
 0x809   : > { %9274 = vmatpush1.bf16.msra.mxu1 %v11444_v15  ;;  %9336 = vmatpush1.bf16.msra.mxu0 %v11477_v32  ;;  %v11525_v15 = vld [vmem:[#allocation14 + $0x560] ss:$16 sps:$4 sm:$0xff]  }
 0x80a   : > { %9275 = vmatprep.subr.bf16.mxu1 %v11446_v61  ;;  %9337 = vmatprep.subr.bf16.mxu0 %v11485_v44  ;;  %v11533_v61 = vld [vmem:[#allocation14 + $0x584] ss:$16 sps:$4 sm:$0xff]   ;;  %v11555_v32 = vld [vmem:[#allocation14 + $0x600] ss:$16 sps:$4 sm:$0xff]   ;;  %v11566_v44 = vld [vmem:[#allocation14 + $0x22c] ss:$16 sps:$4 sm:$0xff]  }
 0x80d   : > { %9276 = vmatpush1.bf16.msra.mxu1 %v11450_v31  ;;  %9338 = vmatpush1.bf16.msra.mxu0 %v11483_v17  ;;  %v11531_v31 = vld [vmem:[#allocation14 + $0x580] ss:$16 sps:$4 sm:$0xff]  }
 0x80e   : > { %9277 = vmatprep.subr.bf16.mxu1 %v11452_v12  ;;  %9339 = vmatprep.subr.bf16.mxu0 %v11491_v54  ;;  %v11539_v12 = vld [vmem:[#allocation14 + $0x5a4] ss:$16 sps:$4 sm:$0xff]   ;;  %v11561_v17 = vld [vmem:[#allocation14 + $0x620] ss:$16 sps:$4 sm:$0xff]  }
 0x80f   : > { %v11569_v54 = vld [vmem:[#allocation14 + $0x644] ss:$16 sps:$4 sm:$0xff]  }
 0x811   : > { %9278 = vmatpush1.bf16.msra.mxu1 %v11456_v18  ;;  %9340 = vmatpush1.bf16.msra.mxu0 %v11489_v55  ;;  %v11537_v18 = vld [vmem:[#allocation14 + $0x5a0] ss:$16 sps:$4 sm:$0xff]  }
 0x812   : > { %9411 = vmatprep.subr.bf16.mxu1 %v11464_v26  ;;  %9341 = vmatprep.subr.bf16.mxu0 %v11497_v9  ;;  %v11548_v26 = vld [vmem:[#allocation14 + $0x1cc] ss:$16 sps:$4 sm:$0xff]   ;;  %v11567_v55 = vld [vmem:[#allocation14 + $0x640] ss:$16 sps:$4 sm:$0xff]   ;;  %v11575_v9 = vld [vmem:[#allocation14 + $0x664] ss:$16 sps:$4 sm:$0xff]  }
 0x814   : > { %9280 = vmatmul.mubr.bf16.vlgmr.msra.gmra.mrb[0].mxu1 %v14943_v24 }
 0x815   : > { %9412 = vmatpush1.bf16.msra.mxu1 %v11462_v3  ;;  %9443 = vmatprep.mubr.bf16.mxu1 %v7682_v13  ;;  %v11524_v13 = vld [vmem:[#allocation14 + $0x14c] ss:$16 sps:$4 sm:$0xff]   ;;  %v11543_v3 = vld [vmem:[#allocation14 + $0x5c0] ss:$16 sps:$4 sm:$0xff]  }
 0x816   : > { %9413 = vmatprep.subr.bf16.mxu1 %v11470_v41  ;;  %9342 = vmatpush1.bf16.msra.mxu0 %v11495_v25  ;;  %v11551_v41 = vld [vmem:[#allocation14 + $0x5e4] ss:$16 sps:$4 sm:$0xff]   ;;  %v11584_v25 = vld [vmem:[#allocation14 + $0x28c] ss:$16 sps:$4 sm:$0xff]  }
 0x817   : > { %9343 = vmatprep.subr.bf16.mxu0 %v11503_v62  ;;  %v11590_v62 = vld [vmem:[#allocation14 + $0x2ac] ss:$16 sps:$4 sm:$0xff]  }
 0x819   : > { %9414 = vmatpush1.bf16.msra.mxu1 %v11468_v35  ;;  %v14963_v35 = vrot.slane %v7656_v42, %v13495_v23  ;;  %v11558_v23 = vld [vmem:[#allocation14 + $0x208] ss:$16 sps:$4 sm:$0xff]  }
 0x81a   : > { %9415 = vmatprep.subr.bf16.mxu1 %v11476_v27  ;;  %9344 = vmatpush1.bf16.msra.mxu0 %v11501_v1  ;;  %v11552_v27 = vld [vmem:[#allocation14 + $0x1e8] ss:$16 sps:$4 sm:$0xff]  }
 0x81b   : > { %9345 = vmatprep.subr.bf16.mxu0 %v11509_v21  ;;  %v7672_v57 = vcombine.high %v14963_v35, %v14963_v35  ;;  %v11588_v1 = vld [vmem:[#allocation14 + $0x2a8] ss:$16 sps:$4 sm:$0xff]   ;;  %v11596_v21 = vld [vmem:[#allocation14 + $0x2cc] ss:$16 sps:$4 sm:$0xff]  }
 0x81c   : > { %v11630_v42 = vld [vmem:[#allocation14 + $0x388] ss:$16 sps:$4 sm:$0xff]  }
 0x81d   : > { %9416 = vmatpush1.bf16.msra.mxu1 %v11474_v46  ;;  %v11560_v46 = vld [vmem:[#allocation14 + $0x20c] ss:$16 sps:$4 sm:$0xff]  }
 0x81e   : > { %9417 = vmatprep.subr.bf16.mxu1 %v11482_v38  ;;  %9346 = vmatpush1.bf16.msra.mxu0 %v11507_v49  ;;  %v14969_v38 = vpack.c.bf16 %v14953_v45, %v14953_v45  ;;  %v11581_v45 = vld [vmem:[#allocation14 + $0x684] ss:$16 sps:$4 sm:$0xff]   ;;  %v11594_v49 = vld [vmem:[#allocation14 + $0x2c8] ss:$16 sps:$4 sm:$0xff]  }
 0x81f   : > { %9347 = vmatprep.subr.bf16.mxu0 %v11515_v40  ;;  %v11602_v40 = vld [vmem:[#allocation14 + $0x2ec] ss:$16 sps:$4 sm:$0xff]  }
 0x821   : > { %9418 = vmatpush1.bf16.msra.mxu1 %v11480_v19  ;;  %v11563_v19 = vld [vmem:[#allocation14 + $0x624] ss:$16 sps:$4 sm:$0xff]  }
 0x822   : > { %9419 = vmatprep.subr.bf16.mxu1 %v11488_v11  ;;  %9348 = vmatpush1.bf16.msra.mxu0 %v11513_v6  ;;  %v14971_v11 = vpack.c.bf16 %v7672_v57, %v7672_v57  ;;  %v11600_v6 = vld [vmem:[#allocation14 + $0x2e8] ss:$16 sps:$4 sm:$0xff]   ;;  %v11647_v57 = vld [vmem:[#allocation14 + $0x7e4] ss:$16 sps:$4 sm:$0xff]  }
 0x823   : > { %9349 = vmatprep.subr.bf16.mxu0 %v11521_v53  ;;  %v11608_v53 = vld [vmem:[#allocation14 + $0x30c] ss:$16 sps:$4 sm:$0xff]  }
 0x825   : > { %9420 = vmatpush1.bf16.msra.mxu1 %v11486_v37  ;;  %v11564_v37 = vld [vmem:[#allocation14 + $0x228] ss:$16 sps:$4 sm:$0xff]  }
 0x826   : > { %9421 = vmatprep.subr.bf16.mxu1 %v11494_v56  ;;  %9350 = vmatpush1.bf16.msra.mxu0 %v11519_v52  ;;  %v11572_v56 = vld [vmem:[#allocation14 + $0x24c] ss:$16 sps:$4 sm:$0xff]   ;;  %v11606_v52 = vld [vmem:[#allocation14 + $0x308] ss:$16 sps:$4 sm:$0xff]  }
 0x827   : > { %9351 = vmatprep.subr.bf16.mxu0 %v11527_v14  ;;  %v11614_v14 = vld [vmem:[#allocation14 + $0x32c] ss:$16 sps:$4 sm:$0xff]  }
 0x829   : > { %9422 = vmatpush1.bf16.msra.mxu1 %v11492_v60  ;;  %v11570_v60 = vld [vmem:[#allocation14 + $0x248] ss:$16 sps:$4 sm:$0xff]  }
 0x82a   : > { %9423 = vmatprep.subr.bf16.mxu1 %v11500_v8  ;;  %9352 = vmatpush1.bf16.msra.mxu0 %v11525_v15  ;;  %v11573_v8 = vld [vmem:[#allocation14 + $0x660] ss:$16 sps:$4 sm:$0xff]   ;;  %v11612_v15 = vld [vmem:[#allocation14 + $0x328] ss:$16 sps:$4 sm:$0xff]  }
 0x82b   : > { %9353 = vmatprep.subr.bf16.mxu0 %v11533_v61  ;;  %v11620_v61 = vld [vmem:[#allocation14 + $0x34c] ss:$16 sps:$4 sm:$0xff]  }
 0x82d   : > { %9424 = vmatpush1.bf16.msra.mxu1 %v11498_v43  ;;  %v11579_v43 = vld [vmem:[#allocation14 + $0x680] ss:$16 sps:$4 sm:$0xff]  }
 0x82e   : > { %9425 = vmatprep.subr.bf16.mxu1 %v11506_v48  ;;  %9354 = vmatpush1.bf16.msra.mxu0 %v11531_v31  ;;  %v11585_v48 = vld [vmem:[#allocation14 + $0x6a0] ss:$16 sps:$4 sm:$0xff]   ;;  %v11618_v31 = vld [vmem:[#allocation14 + $0x348] ss:$16 sps:$4 sm:$0xff]  }
 0x82f   : > { %9355 = vmatprep.subr.bf16.mxu0 %v11539_v12  ;;  %v11626_v12 = vld [vmem:[#allocation14 + $0x36c] ss:$16 sps:$4 sm:$0xff]  }
 0x831   : > { %9426 = vmatpush1.bf16.msra.mxu1 %v11504_v34  ;;  %v11593_v34 = vld [vmem:[#allocation14 + $0x6c4] ss:$16 sps:$4 sm:$0xff]  }
 0x832   : > { %9427 = vmatprep.subr.bf16.mxu1 %v11512_v50  ;;  %9356 = vmatpush1.bf16.msra.mxu0 %v11537_v18  ;;  %v11591_v50 = vld [vmem:[#allocation14 + $0x6c0] ss:$16 sps:$4 sm:$0xff]   ;;  %v11624_v18 = vld [vmem:[#allocation14 + $0x368] ss:$16 sps:$4 sm:$0xff]  }
 0x833   : > { %9357 = vmatprep.subr.bf16.mxu0 %v11545_v5  ;;  %v11632_v5 = vld [vmem:[#allocation14 + $0x38c] ss:$16 sps:$4 sm:$0xff]  }
 0x835   : > { %9428 = vmatpush1.bf16.msra.mxu1 %v11510_v28  ;;  %v11599_v28 = vld [vmem:[#allocation14 + $0x6e4] ss:$16 sps:$4 sm:$0xff]  }
 0x836   : > { %9429 = vmatprep.subr.bf16.mxu1 %v11518_v16  ;;  %9358 = vmatpush1.bf16.msra.mxu0 %v11543_v3  ;;  %v11597_v16 = vld [vmem:[#allocation14 + $0x6e0] ss:$16 sps:$4 sm:$0xff]   ;;  %v11635_v3 = vld [vmem:[#allocation14 + $0x7a4] ss:$16 sps:$4 sm:$0xff]  }
 0x837   : > { %9359 = vmatprep.subr.bf16.mxu0 %v11551_v41  ;;  %v11633_v41 = vld [vmem:[#allocation14 + $0x7a0] ss:$16 sps:$4 sm:$0xff]  }
 0x839   : > { %9430 = vmatpush1.bf16.msra.mxu1 %v11516_v39  ;;  %v11605_v39 = vld [vmem:[#allocation14 + $0x704] ss:$16 sps:$4 sm:$0xff]  }
 0x83a   : > { %9431 = vmatprep.subr.bf16.mxu1 %v11524_v13  ;;  %9360 = vmatpush1.bf16.msra.mxu0 %v11549_v22  ;;  %v11603_v13 = vld [vmem:[#allocation14 + $0x700] ss:$16 sps:$4 sm:$0xff]   ;;  %v11641_v22 = vld [vmem:[#allocation14 + $0x7c4] ss:$16 sps:$4 sm:$0xff]  }
 0x83b   : > { %9370 = vmatprep.subr.bf16.mxu0 %v11557_v59  ;;  %v11639_v59 = vld [vmem:[#allocation14 + $0x7c0] ss:$16 sps:$4 sm:$0xff]  }
 0x83d   : > { %9432 = vmatpush1.bf16.msra.mxu1 %v11522_v10  ;;  %9362 = vmatmul.mubr.bf16.vlgmr.msra.gmra.mrb[0].mxu0 %v14969_v38  ;;  %v11611_v10 = vld [vmem:[#allocation14 + $0x724] ss:$16 sps:$4 sm:$0xff]  }
 0x83e   : > { %9433 = vmatprep.subr.bf16.mxu1 %v11530_v63  ;;  %9371 = vmatpush1.bf16.msra.mxu0 %v11555_v32  ;;  %v11609_v63 = vld [vmem:[#allocation14 + $0x720] ss:$16 sps:$4 sm:$0xff]   ;;  %v11650_v32 = vld [vmem:[#allocation14 + $0x3ec] ss:$16 sps:$4 sm:$0xff]  }
 0x83f   : > { %9372 = vmatprep.subr.bf16.mxu0 %v11563_v19  ;;  %9402 = vmatprep.mubr.bf16.mxu0 %v14971_v11  ;;  %v11648_v19 = vld [vmem:[#allocation14 + $0x3e8] ss:$16 sps:$4 sm:$0xff]  }
 0x841   : > { %9434 = vmatpush1.bf16.msra.mxu1 %v11528_v4  ;;  %v11617_v4 = vld [vmem:[#allocation14 + $0x744] ss:$16 sps:$4 sm:$0xff]  }
 0x842   : > { %9435 = vmatprep.subr.bf16.mxu1 %v11536_v7  ;;  %9373 = vmatpush1.bf16.msra.mxu0 %v11561_v17  ;;  %v11615_v7 = vld [vmem:[#allocation14 + $0x740] ss:$16 sps:$4 sm:$0xff]   ;;  %v11652_v17 = vld [vmem:[#allocation14 + $0x408] ss:$16 sps:$4 sm:$0xff]  }
 0x843   : > { %9374 = vmatprep.subr.bf16.mxu0 %v11569_v54  ;;  %v11657_v54 = vld [vmem:[#allocation14 + $0x42c] ss:$16 sps:$4 sm:$0xff]  }
 0x845   : > { %9436 = vmatpush1.bf16.msra.mxu1 %v11534_v33  ;;  %v11623_v33 = vld [vmem:[#allocation14 + $0x764] ss:$16 sps:$4 sm:$0xff]  }
 0x846   : > { %9437 = vmatprep.subr.bf16.mxu1 %v11542_v29  ;;  %9375 = vmatpush1.bf16.msra.mxu0 %v11567_v55  ;;  %v11621_v29 = vld [vmem:[#allocation14 + $0x760] ss:$16 sps:$4 sm:$0xff]   ;;  %v11750_v55 = vld [vmem:[#allocation15 + $0x4] ss:$8 sps:$4 sm:$0xff]  }
 0x847   : > { %9376 = vmatprep.subr.bf16.mxu0 %v11575_v9  ;;  %v11753_v9 = vld [vmem:[#allocation15 + $0x14] ss:$8 sps:$4 sm:$0xff]  }
 0x849   : > { %9438 = vmatpush1.bf16.msra.mxu1 %v11540_v0  ;;  %v11629_v0 = vld [vmem:[#allocation14 + $0x784] ss:$16 sps:$4 sm:$0xff]  }
 0x84a   : > { %9439 = vmatprep.subr.bf16.mxu1 %v11548_v26  ;;  %9377 = vmatpush1.bf16.msra.mxu0 %v11573_v8  ;;  %v11627_v26 = vld [vmem:[#allocation14 + $0x780] ss:$16 sps:$4 sm:$0xff]   ;;  %v11756_v8 = vld [vmem:[#allocation15 + $0x24] ss:$8 sps:$4 sm:$0xff]  }
 0x84b   : > { %9378 = vmatprep.subr.bf16.mxu0 %v11581_v45  ;;  %v11663_v45 = vld [vmem:[#allocation14 + $0x46c] ss:$16 sps:$4 sm:$0xff]  }
 0x84d   : > { %9440 = vmatpush1.bf16.msra.mxu1 %v11546_v58  ;;  %v11638_v58 = vld [vmem:[#allocation14 + $0x3ac] ss:$16 sps:$4 sm:$0xff]  }
 0x84e   : > { %9441 = vmatprep.subr.bf16.mxu1 %v11554_v2  ;;  %9379 = vmatpush1.bf16.msra.mxu0 %v11579_v43  ;;  %v11636_v2 = vld [vmem:[#allocation14 + $0x3a8] ss:$16 sps:$4 sm:$0xff]   ;;  %v11666_v43 = vld [vmem:[#allocation14 + $0x48c] ss:$16 sps:$4 sm:$0xff]  }
 0x84f   : > { %9380 = vmatprep.subr.bf16.mxu0 %v11587_v47  ;;  %v11762_v47 = vld [vmem:[#allocation15 + $0x44] ss:$8 sps:$4 sm:$0xff]  }
 0x851   : > { %9442 = vmatpush1.bf16.msra.mxu1 %v11552_v27  ;;  %v11644_v27 = vld [vmem:[#allocation14 + $0x3cc] ss:$16 sps:$4 sm:$0xff]  }
 0x852   : > { %9452 = vmatprep.subr.bf16.mxu1 %v11560_v46  ;;  %9381 = vmatpush1.bf16.msra.mxu0 %v11585_v48  ;;  %v11642_v46 = vld [vmem:[#allocation14 + $0x3c8] ss:$16 sps:$4 sm:$0xff]   ;;  %v11669_v48 = vld [vmem:[#allocation14 + $0x4ac] ss:$16 sps:$4 sm:$0xff]  }
 0x853   : > { %9382 = vmatprep.subr.bf16.mxu0 %v11593_v34  ;;  %v11765_v34 = vld [vmem:[#allocation15 + $0x54] ss:$8 sps:$4 sm:$0xff]  }
 0x854   : > { %9444 = vmatmul.mubr.bf16.vlgmr.msra.gmra.mrb[4].mxu1 %v14943_v24  ;;  %v11578_v24 = vld [vmem:[#allocation14 + $0x26c] ss:$16 sps:$4 sm:$0xff]  }
 0x855   : > { %9453 = vmatpush1.bf16.msra.mxu1 %v11558_v23  ;;  %9484 = vmatprep.mubr.bf16.mxu1 %v14940_v51  ;;  %v11582_v51 = vld [vmem:[#allocation14 + $0x288] ss:$16 sps:$4 sm:$0xff]   ;;  %v11645_v23 = vld [vmem:[#allocation14 + $0x7e0] ss:$16 sps:$4 sm:$0xff]  }
 0x856   : > { %9454 = vmatprep.subr.bf16.mxu1 %v11566_v44  ;;  %9383 = vmatpush1.bf16.msra.mxu0 %v11591_v50  ;;  %v11654_v44 = vld [vmem:[#allocation14 + $0x40c] ss:$16 sps:$4 sm:$0xff]  }
 0x857   : > { %9384 = vmatprep.subr.bf16.mxu0 %v11599_v28  ;;  %v11672_v50 = vld [vmem:[#allocation14 + $0x4cc] ss:$16 sps:$4 sm:$0xff]  }
 0x858   : > { %v11768_v28 = vld [vmem:[#allocation15 + $0x64] ss:$8 sps:$4 sm:$0xff]  }
 0x859   : > { %9455 = vmatpush1.bf16.msra.mxu1 %v11564_v37  ;;  %v14979_v37 = vpack.c.bf16 %v14963_v35, %v14963_v35  ;;  %v11751_v35 = vld [vmem:[#allocation15 + $0x10] ss:$8 sps:$4 sm:$0xff]  }
 0x85a   : > { %9456 = vmatprep.subr.bf16.mxu1 %v11572_v56  ;;  %9385 = vmatpush1.bf16.msra.mxu0 %v11597_v16  ;;  %v11748_v56 = vld [vmem:[#allocation15] ss:$8 sps:$4 sm:$0xff]   ;;  %v11675_v16 = vld [vmem:[#allocation14 + $0x4ec] ss:$16 sps:$4 sm:$0xff]  }
 0x85b   : > { %9386 = vmatprep.subr.bf16.mxu0 %v11605_v39  ;;  %v11771_v39 = vld [vmem:[#allocation15 + $0x74] ss:$8 sps:$4 sm:$0xff]  }
 0x85d   : > { %9457 = vmatpush1.bf16.msra.mxu1 %v11570_v60  ;;  %v11655_v60 = vld [vmem:[#allocation14 + $0x428] ss:$16 sps:$4 sm:$0xff]  }
 0x85e   : > { %9458 = vmatprep.subr.bf16.mxu1 %v11578_v24  ;;  %9387 = vmatpush1.bf16.msra.mxu0 %v11603_v13  ;;  %v11660_v24 = vld [vmem:[#allocation14 + $0x44c] ss:$16 sps:$4 sm:$0xff]  }
 0x85f   : > { %9388 = vmatprep.subr.bf16.mxu0 %v11611_v10  ;;  %v11678_v13 = vld [vmem:[#allocation14 + $0x50c] ss:$16 sps:$4 sm:$0xff]  }
 0x860   : > { %v11774_v10 = vld [vmem:[#allocation15 + $0x84] ss:$8 sps:$4 sm:$0xff]  }
 0x861   : > { %9459 = vmatpush1.bf16.msra.mxu1 %v11576_v36  ;;  %v11658_v36 = vld [vmem:[#allocation14 + $0x448] ss:$16 sps:$4 sm:$0xff]  }
 0x862   : > { %9460 = vmatprep.subr.bf16.mxu1 %v11584_v25  ;;  %9389 = vmatpush1.bf16.msra.mxu0 %v11609_v63  ;;  %v11661_v25 = vld [vmem:[#allocation14 + $0x468] ss:$16 sps:$4 sm:$0xff]   ;;  %v11681_v63 = vld [vmem:[#allocation14 + $0x52c] ss:$16 sps:$4 sm:$0xff]  }
 0x863   : > { %9390 = vmatprep.subr.bf16.mxu0 %v11617_v4  ;;  %v11777_v4 = vld [vmem:[#allocation15 + $0x94] ss:$8 sps:$4 sm:$0xff]  }
 0x865   : > { %9461 = vmatpush1.bf16.msra.mxu1 %v11582_v51  ;;  %v11759_v51 = vld [vmem:[#allocation15 + $0x34] ss:$8 sps:$4 sm:$0xff]  }
 0x866   : > { %9462 = vmatprep.subr.bf16.mxu1 %v11590_v62  ;;  %9391 = vmatpush1.bf16.msra.mxu0 %v11615_v7  ;;  %v11664_v62 = vld [vmem:[#allocation14 + $0x488] ss:$16 sps:$4 sm:$0xff]   ;;  %v11684_v7 = vld [vmem:[#allocation14 + $0x54c] ss:$16 sps:$4 sm:$0xff]  }
 0x867   : > { %9392 = vmatprep.subr.bf16.mxu0 %v11623_v33  ;;  %v11780_v33 = vld [vmem:[#allocation15 + $0xa4] ss:$8 sps:$4 sm:$0xff]  }
 0x869   : > { %9463 = vmatpush1.bf16.msra.mxu1 %v11588_v1  ;;  %v11760_v1 = vld [vmem:[#allocation15 + $0x40] ss:$8 sps:$4 sm:$0xff]  }
 0x86a   : > { %9464 = vmatprep.subr.bf16.mxu1 %v11596_v21  ;;  %9393 = vmatpush1.bf16.msra.mxu0 %v11621_v29  ;;  %v11667_v21 = vld [vmem:[#allocation14 + $0x4a8] ss:$16 sps:$4 sm:$0xff]   ;;  %v11687_v29 = vld [vmem:[#allocation14 + $0x56c] ss:$16 sps:$4 sm:$0xff]  }
 0x86b   : > { %9394 = vmatprep.subr.bf16.mxu0 %v11629_v0  ;;  %v11783_v0 = vld [vmem:[#allocation15 + $0xb4] ss:$8 sps:$4 sm:$0xff]  }
 0x86d   : > { %9465 = vmatpush1.bf16.msra.mxu1 %v11594_v49  ;;  %v11763_v49 = vld [vmem:[#allocation15 + $0x50] ss:$8 sps:$4 sm:$0xff]  }
 0x86e   : > { %9466 = vmatprep.subr.bf16.mxu1 %v11602_v40  ;;  %9395 = vmatpush1.bf16.msra.mxu0 %v11627_v26  ;;  %v11670_v40 = vld [vmem:[#allocation14 + $0x4c8] ss:$16 sps:$4 sm:$0xff]   ;;  %v11690_v26 = vld [vmem:[#allocation14 + $0x58c] ss:$16 sps:$4 sm:$0xff]  }
 0x86f   : > { %9396 = vmatprep.subr.bf16.mxu0 %v11635_v3  ;;  %v11786_v3 = vld [vmem:[#allocation15 + $0xc4] ss:$8 sps:$4 sm:$0xff]  }
 0x871   : > { %9467 = vmatpush1.bf16.msra.mxu1 %v11600_v6  ;;  %v11766_v6 = vld [vmem:[#allocation15 + $0x60] ss:$8 sps:$4 sm:$0xff]  }
 0x872   : > { %9468 = vmatprep.subr.bf16.mxu1 %v11608_v53  ;;  %9397 = vmatpush1.bf16.msra.mxu0 %v11633_v41  ;;  %v11673_v53 = vld [vmem:[#allocation14 + $0x4e8] ss:$16 sps:$4 sm:$0xff]   ;;  %v11693_v41 = vld [vmem:[#allocation14 + $0x5ac] ss:$16 sps:$4 sm:$0xff]  }
 0x873   : > { %9398 = vmatprep.subr.bf16.mxu0 %v11641_v22  ;;  %v11789_v22 = vld [vmem:[#allocation15 + $0xd4] ss:$8 sps:$4 sm:$0xff]  }
 0x875   : > { %9469 = vmatpush1.bf16.msra.mxu1 %v11606_v52  ;;  %v11769_v52 = vld [vmem:[#allocation15 + $0x70] ss:$8 sps:$4 sm:$0xff]  }
 0x876   : > { %9470 = vmatprep.subr.bf16.mxu1 %v11614_v14  ;;  %9399 = vmatpush1.bf16.msra.mxu0 %v11639_v59  ;;  %v11676_v14 = vld [vmem:[#allocation14 + $0x508] ss:$16 sps:$4 sm:$0xff]   ;;  %v11696_v59 = vld [vmem:[#allocation14 + $0x5cc] ss:$16 sps:$4 sm:$0xff]  }
 0x877   : > { %9400 = vmatprep.subr.bf16.mxu0 %v11647_v57  ;;  %v11694_v57 = vld [vmem:[#allocation14 + $0x5c8] ss:$16 sps:$4 sm:$0xff]  }
 0x879   : > { %9471 = vmatpush1.bf16.msra.mxu1 %v11612_v15  ;;  %v11772_v15 = vld [vmem:[#allocation15 + $0x80] ss:$8 sps:$4 sm:$0xff]  }
 0x87a   : > { %9472 = vmatprep.subr.bf16.mxu1 %v11620_v61  ;;  %9401 = vmatpush1.bf16.msra.mxu0 %v11645_v23  ;;  %v11679_v61 = vld [vmem:[#allocation14 + $0x528] ss:$16 sps:$4 sm:$0xff]  }
 0x87b   : > { %9979 = vmatprep.subr.bf16.mxu0 %v11750_v55  ;;  %v11697_v23 = vld [vmem:[#allocation14 + $0x5e8] ss:$16 sps:$4 sm:$0xff]  }
 0x87c   : > { %v11706_v55 = vld [vmem:[#allocation14 + $0x648] ss:$16 sps:$4 sm:$0xff]  }
 0x87d   : > { %9473 = vmatpush1.bf16.msra.mxu1 %v11618_v31  ;;  %9403 = vmatmul.mubr.bf16.vlgmr.msra.gmra.mrb[0].mxu0 %v14979_v37  ;;  %v11775_v31 = vld [vmem:[#allocation15 + $0x90] ss:$8 sps:$4 sm:$0xff]  }
 0x87e   : > { %9474 = vmatprep.subr.bf16.mxu1 %v11626_v12  ;;  %9980 = vmatpush1.bf16.msra.mxu0 %v11748_v56  ;;  %v11682_v12 = vld [vmem:[#allocation14 + $0x548] ss:$16 sps:$4 sm:$0xff]   ;;  %v11708_v56 = vld [vmem:[#allocation14 + $0x64c] ss:$16 sps:$4 sm:$0xff]  }
 0x87f   : > { %9981 = vmatprep.subr.bf16.mxu0 %v11753_v9  ;;  %v11709_v9 = vld [vmem:[#allocation14 + $0x668] ss:$16 sps:$4 sm:$0xff]  }
 0x881   : > { %9475 = vmatpush1.bf16.msra.mxu1 %v11624_v18  ;;  %v11778_v18 = vld [vmem:[#allocation15 + $0xa0] ss:$8 sps:$4 sm:$0xff]  }
 0x882   : > { %9476 = vmatprep.subr.bf16.mxu1 %v11632_v5  ;;  %9982 = vmatpush1.bf16.msra.mxu0 %v11751_v35  ;;  %v11685_v5 = vld [vmem:[#allocation14 + $0x568] ss:$16 sps:$4 sm:$0xff]  }
 0x883   : > { %9983 = vmatprep.subr.bf16.mxu0 %v11756_v8  ;;  %v11712_v35 = vld [vmem:[#allocation14 + $0x688] ss:$16 sps:$4 sm:$0xff]   ;;  %v11717_v8 = vld [vmem:[#allocation14 + $0x6ac] ss:$16 sps:$4 sm:$0xff]  }
 0x885   : > { %9477 = vmatpush1.bf16.msra.mxu1 %v11630_v42  ;;  %v11781_v42 = vld [vmem:[#allocation15 + $0xb0] ss:$8 sps:$4 sm:$0xff]  }
 0x886   : > { %9478 = vmatprep.subr.bf16.mxu1 %v11638_v58  ;;  %v11688_v58 = vld [vmem:[#allocation14 + $0x588] ss:$16 sps:$4 sm:$0xff]  }
 0x889   : > { %9479 = vmatpush1.bf16.msra.mxu1 %v11636_v2  ;;  %v11784_v2 = vld [vmem:[#allocation15 + $0xc0] ss:$8 sps:$4 sm:$0xff]  }
 0x88a   : > { %9480 = vmatprep.subr.bf16.mxu1 %v11644_v27  ;;  %v11691_v27 = vld [vmem:[#allocation14 + $0x5a8] ss:$16 sps:$4 sm:$0xff]  }
 0x88d   : > { %9481 = vmatpush1.bf16.msra.mxu1 %v11642_v46  ;;  %v11787_v46 = vld [vmem:[#allocation15 + $0xd0] ss:$8 sps:$4 sm:$0xff]  }
 0x88e   : > { %9482 = vmatprep.subr.bf16.mxu1 %v11650_v32  ;;  %v11699_v32 = vld [vmem:[#allocation14 + $0x5ec] ss:$16 sps:$4 sm:$0xff]  }
 0x891   : > { %9483 = vmatpush1.bf16.msra.mxu1 %v11648_v19  ;;  %v11702_v19 = vld [vmem:[#allocation14 + $0x60c] ss:$16 sps:$4 sm:$0xff]  }
 0x892   : > { %9493 = vmatprep.subr.bf16.mxu1 %v11654_v44  ;;  %v11700_v44 = vld [vmem:[#allocation14 + $0x608] ss:$16 sps:$4 sm:$0xff]  }
 0x894   : > { %9485 = vmatmul.mubr.bf16.vlgmr.msra.gmra.mrb[4].mxu1 %v14945_v20  ;;  %v11754_v20 = vld [vmem:[#allocation15 + $0x20] ss:$8 sps:$4 sm:$0xff]  }
 0x895   : > { %9494 = vmatpush1.bf16.msra.mxu1 %v11652_v17  ;;  %9525 = vmatprep.mubr.bf16.mxu1 %v14957_v30  ;;  %v11757_v30 = vld [vmem:[#allocation15 + $0x30] ss:$8 sps:$4 sm:$0xff]   ;;  %v11705_v17 = vld [vmem:[#allocation14 + $0x62c] ss:$16 sps:$4 sm:$0xff]  }
 0x896   : > { %9495 = vmatprep.subr.bf16.mxu1 %v11657_v54  ;;  %9984 = vmatpush1.bf16.msra.mxu0 %v11754_v20  ;;  %v11703_v54 = vld [vmem:[#allocation14 + $0x628] ss:$16 sps:$4 sm:$0xff]  }
 0x897   : > { %9985 = vmatprep.subr.bf16.mxu0 %v11759_v51  ;;  %v11790_v20 = vld [vmem:[#allocation15 + $0xe0] ss:$8 sps:$4 sm:$0xff]  }
 0x898   : > { %v11718_v51 = vld [vmem:[#allocation14 + $0x6c8] ss:$16 sps:$4 sm:$0xff]  }
 0x899   : > { %9496 = vmatpush1.bf16.msra.mxu1 %v11655_v60  ;;  %v11711_v60 = vld [vmem:[#allocation14 + $0x66c] ss:$16 sps:$4 sm:$0xff]  }
 0x89a   : > { %9497 = vmatprep.subr.bf16.mxu1 %v11660_v24  ;;  %9986 = vmatpush1.bf16.msra.mxu0 %v11757_v30  ;;  %v11714_v24 = vld [vmem:[#allocation14 + $0x68c] ss:$16 sps:$4 sm:$0xff]  }
 0x89b   : > { %9987 = vmatprep.subr.bf16.mxu0 %v11762_v47  ;;  %v11723_v47 = vld [vmem:[#allocation14 + $0x6ec] ss:$16 sps:$4 sm:$0xff]  }
 0x89d   : > { %9498 = vmatpush1.bf16.msra.mxu1 %v11658_v36  ;;  %v11720_v36 = vld [vmem:[#allocation14 + $0x6cc] ss:$16 sps:$4 sm:$0xff]  }
 0x89e   : > { %9499 = vmatprep.subr.bf16.mxu1 %v11663_v45  ;;  %9988 = vmatpush1.bf16.msra.mxu0 %v11760_v1  ;;  %v11792_v45 = vld [vmem:[#allocation15 + $0xe4] ss:$8 sps:$4 sm:$0xff]   ;;  %v11721_v1 = vld [vmem:[#allocation14 + $0x6e8] ss:$16 sps:$4 sm:$0xff]  }
 0x89f   : > { %9989 = vmatprep.subr.bf16.mxu0 %v11765_v34  ;;  %v11726_v34 = vld [vmem:[#allocation14 + $0x70c] ss:$16 sps:$4 sm:$0xff]  }
 0x8a1   : > { %9500 = vmatpush1.bf16.msra.mxu1 %v11661_v25 }
 0x8a2   : > { %9501 = vmatprep.subr.bf16.mxu1 %v11666_v43  ;;  %9990 = vmatpush1.bf16.msra.mxu0 %v11763_v49  ;;  %v11729_v49 = vld [vmem:[#allocation14 + $0x72c] ss:$16 sps:$4 sm:$0xff]  }
 0x8a3   : > { %9991 = vmatprep.subr.bf16.mxu0 %v11768_v28  ;;  %v11727_v28 = vld [vmem:[#allocation14 + $0x728] ss:$16 sps:$4 sm:$0xff]  }
 0x8a5   : > { %9502 = vmatpush1.bf16.msra.mxu1 %v11664_v62  ;;  %v11795_v62 = vld [vmem:[#allocation15 + $0xf4] ss:$8 sps:$4 sm:$0xff]  }
 0x8a6   : > { %9503 = vmatprep.subr.bf16.mxu1 %v11669_v48  ;;  %9992 = vmatpush1.bf16.msra.mxu0 %v11766_v6  ;;  %v11793_v48 = vld [vmem:[#allocation15 + $0xf0] ss:$8 sps:$4 sm:$0xff]   ;;  %v11735_v6 = vld [vmem:[#allocation14 + $0x76c] ss:$16 sps:$4 sm:$0xff]  }
 0x8a7   : > { %9993 = vmatprep.subr.bf16.mxu0 %v11771_v39  ;;  %v11733_v39 = vld [vmem:[#allocation14 + $0x768] ss:$16 sps:$4 sm:$0xff]  }
 0x8a9   : > { %9504 = vmatpush1.bf16.msra.mxu1 %v11667_v21  ;;  %v11798_v21 = vld [vmem:[#allocation15 + $0x104] ss:$8 sps:$4 sm:$0xff]  }
 0x8aa   : > { %9505 = vmatprep.subr.bf16.mxu1 %v11672_v50  ;;  %9994 = vmatpush1.bf16.msra.mxu0 %v11769_v52  ;;  %v11724_v50 = vld [vmem:[#allocation14 + $0x708] ss:$16 sps:$4 sm:$0xff]   ;;  %v11741_v52 = vld [vmem:[#allocation14 + $0x7ac] ss:$16 sps:$4 sm:$0xff]  }
 0x8ab   : > { %9995 = vmatprep.subr.bf16.mxu0 %v11774_v10  ;;  %v11739_v10 = vld [vmem:[#allocation14 + $0x7a8] ss:$16 sps:$4 sm:$0xff]  }
 0x8ad   : > { %9506 = vmatpush1.bf16.msra.mxu1 %v11670_v40  ;;  %v11732_v40 = vld [vmem:[#allocation14 + $0x74c] ss:$16 sps:$4 sm:$0xff]  }
 0x8ae   : > { %9507 = vmatprep.subr.bf16.mxu1 %v11675_v16  ;;  %9996 = vmatpush1.bf16.msra.mxu0 %v11772_v15  ;;  %v11730_v16 = vld [vmem:[#allocation14 + $0x748] ss:$16 sps:$4 sm:$0xff]   ;;  %v11747_v15 = vld [vmem:[#allocation14 + $0x7ec] ss:$16 sps:$4 sm:$0xff]  }
 0x8af   : > { %9997 = vmatprep.subr.bf16.mxu0 %v11777_v4  ;;  %v11745_v4 = vld [vmem:[#allocation14 + $0x7e8] ss:$16 sps:$4 sm:$0xff]  }
 0x8b1   : > { %9508 = vmatpush1.bf16.msra.mxu1 %v11673_v53  ;;  %v11738_v53 = vld [vmem:[#allocation14 + $0x78c] ss:$16 sps:$4 sm:$0xff]  }
 0x8b2   : > { %9509 = vmatprep.subr.bf16.mxu1 %v11678_v13  ;;  %9998 = vmatpush1.bf16.msra.mxu0 %v11775_v31  ;;  %v11736_v13 = vld [vmem:[#allocation14 + $0x788] ss:$16 sps:$4 sm:$0xff]  }
 0x8b3   : > { %9999 = vmatprep.subr.bf16.mxu0 %v11780_v33  ;;  %v15288_v33 = vld [vmem:[#allocation35_spill] sm:$0xff] }
 0x8b5   : > { %9510 = vmatpush1.bf16.msra.mxu1 %v11676_v14  ;;  %v11744_v14 = vld [vmem:[#allocation14 + $0x7cc] ss:$16 sps:$4 sm:$0xff]  }
 0x8b6   : > { %9511 = vmatprep.subr.bf16.mxu1 %v11681_v63  ;;  %10000 = vmatpush1.bf16.msra.mxu0 %v11778_v18  ;;  %v11742_v63 = vld [vmem:[#allocation14 + $0x7c8] ss:$16 sps:$4 sm:$0xff]  }
 0x8b7   : > { %10001 = vmatprep.subr.bf16.mxu0 %v11783_v0 }
 0x8b9   : > { %9512 = vmatpush1.bf16.msra.mxu1 %v11679_v61  ;;  %v14990_v61 = vld [vmem:[%s15286_s19] sm:$0xf] }
 0x8ba   : > { %9513 = vmatprep.subr.bf16.mxu1 %v11684_v7  ;;  %10002 = vmatpush1.bf16.msra.mxu0 %v11781_v42  ;;  %v15287_v7 = vld [vmem:[#allocation34_spill] sm:$0xff] }
 0x8bb   : > { %10003 = vmatprep.subr.bf16.mxu0 %v11786_v3  ;;  %v7950_v31 = vrot.slane %v14990_v61, %v15287_v7 }
 0x8bd   : > { %9514 = vmatpush1.bf16.msra.mxu1 %v11682_v12  ;;  %v7954_v12 = vrot.slane %v14990_v61, %v15288_v33 }
 0x8be   : > { %9515 = vmatprep.subr.bf16.mxu1 %v11687_v29  ;;  %10004 = vmatpush1.bf16.msra.mxu0 %v11784_v2 }
 0x8bf   : > { %10005 = vmatprep.subr.bf16.mxu0 %v11789_v22  ;;  %v11796_v22 = vld [vmem:[#allocation15 + $0x100] ss:$8 sps:$4 sm:$0xff]  }
 0x8c1   : > { %9516 = vmatpush1.bf16.msra.mxu1 %v11685_v5 }
 0x8c2   : > { %9517 = vmatprep.subr.bf16.mxu1 %v11690_v26  ;;  %10006 = vmatpush1.bf16.msra.mxu0 %v11787_v46  ;;  %v11844_v46 = vld [vmem:[#allocation17 + $0x40] sm:$0xff]  }
 0x8c3   : > { %10007 = vmatprep.subr.bf16.mxu0 %v11792_v45  ;;  %v11853_v45 = vld [vmem:[#allocation17 + $0x20] sm:$0xff]  }
 0x8c5   : > { %9518 = vmatpush1.bf16.msra.mxu1 %v11688_v58 }
 0x8c6   : > { %9519 = vmatprep.subr.bf16.mxu1 %v11693_v41  ;;  %10008 = vmatpush1.bf16.msra.mxu0 %v11790_v20  ;;  %v11811_v20 = vld [vmem:[#allocation15 + $0x150] ss:$8 sps:$4 sm:$0xff]  }
 0x8c7   : > { %10009 = vmatprep.subr.bf16.mxu0 %v11795_v62  ;;  %v11822_v62 = vld [vmem:[#allocation15 + $0x184] ss:$8 sps:$4 sm:$0xff]  }
 0x8c9   : > { %9520 = vmatpush1.bf16.msra.mxu1 %v11691_v27 }
 0x8ca   : > { %9521 = vmatprep.subr.bf16.mxu1 %v11696_v59  ;;  %10010 = vmatpush1.bf16.msra.mxu0 %v11793_v48  ;;  %v11801_v59 = vld [vmem:[#allocation15 + $0x114] ss:$8 sps:$4 sm:$0xff]   ;;  %v11820_v48 = vld [vmem:[#allocation15 + $0x180] ss:$8 sps:$4 sm:$0xff]  }
 0x8cb   : > { %10020 = vmatprep.subr.bf16.mxu0 %v11798_v21  ;;  %v11828_v21 = vld [vmem:[#allocation15 + $0x1a4] ss:$8 sps:$4 sm:$0xff]  }
 0x8cd   : > { %9522 = vmatpush1.bf16.msra.mxu1 %v11694_v57  ;;  %v11845_v57 = vld [vmem:[#allocation17] sm:$0xff]  }
 0x8ce   : > { %9523 = vmatprep.subr.bf16.mxu1 %v11699_v32  ;;  %v11846_v32 = vld [vmem:[#allocation17 + $0x48] sm:$0xff]  }
 0x8d1   : > { %9524 = vmatpush1.bf16.msra.mxu1 %v11697_v23  ;;  %v11799_v23 = vld [vmem:[#allocation15 + $0x110] ss:$8 sps:$4 sm:$0xff]  }
 0x8d2   : > { %9534 = vmatprep.subr.bf16.mxu1 %v11702_v19  ;;  %v11804_v19 = vld [vmem:[#allocation15 + $0x124] ss:$8 sps:$4 sm:$0xff]  }
 0x8d4   : > { %9526 = vmatmul.mubr.bf16.vlgmr.msra.gmra.mrb[4].mxu1 %v14969_v38  ;;  %v11715_v38 = vld [vmem:[#allocation14 + $0x6a8] ss:$16 sps:$4 sm:$0xff]  }
 0x8d5   : > { %9535 = vmatpush1.bf16.msra.mxu1 %v11700_v44  ;;  %9566 = vmatprep.mubr.bf16.mxu1 %v14971_v11  ;;  %v11847_v44 = vld [vmem:[#allocation17 + $0x8] sm:$0xff]  }
 0x8d6   : > { %9536 = vmatprep.subr.bf16.mxu1 %v11705_v17  ;;  %v11848_v17 = vld [vmem:[#allocation17 + $0x50] sm:$0xff]  }
 0x8d9   : > { %9537 = vmatpush1.bf16.msra.mxu1 %v11703_v54  ;;  %v11802_v54 = vld [vmem:[#allocation15 + $0x120] ss:$8 sps:$4 sm:$0xff]  }
 0x8da   : > { %9538 = vmatprep.subr.bf16.mxu1 %v11708_v56  ;;  %v11807_v56 = vld [vmem:[#allocation15 + $0x134] ss:$8 sps:$4 sm:$0xff]  }
 0x8dd   : > { %9539 = vmatpush1.bf16.msra.mxu1 %v11706_v55  ;;  %v11849_v55 = vld [vmem:[#allocation17 + $0x10] sm:$0xff]  }
 0x8de   : > { %9540 = vmatprep.subr.bf16.mxu1 %v11711_v60  ;;  %v11850_v60 = vld [vmem:[#allocation17 + $0x58] sm:$0xff]  }
 0x8e1   : > { %9541 = vmatpush1.bf16.msra.mxu1 %v11709_v9  ;;  %v11805_v9 = vld [vmem:[#allocation15 + $0x130] ss:$8 sps:$4 sm:$0xff]  }
 0x8e2   : > { %9542 = vmatprep.subr.bf16.mxu1 %v11714_v24  ;;  %v11810_v24 = vld [vmem:[#allocation15 + $0x144] ss:$8 sps:$4 sm:$0xff]  }
 0x8e5   : > { %9543 = vmatpush1.bf16.msra.mxu1 %v11712_v35  ;;  %v11851_v35 = vld [vmem:[#allocation17 + $0x18] sm:$0xff]  }
 0x8e6   : > { %9544 = vmatprep.subr.bf16.mxu1 %v11717_v8  ;;  %v11852_v8 = vld [vmem:[#allocation17 + $0x60] sm:$0xff]  }
 0x8e7   : > { %v9281_v11 = vpop.f32.mrb[0].mxu1 }
 0x8e8   : > { %v9283_v25 = vpop.f32.mrb[1].mxu1  ;;  %v9282_v29 = vadd.f32 %v9281_v11, %v7950_v31  ;;  %v11854_v11 = vld [vmem:[#allocation17 + $0x68] sm:$0xff]  }
 0x8e9   : > { %v9285_v43 = vpop.f32.mrb[2].mxu1  ;;  %9545 = vmatpush1.bf16.msra.mxu1 %v11715_v38  ;;  %v9284_v18 = vadd.f32 %v9283_v25, %v7954_v12  ;;  %v11808_v38 = vld [vmem:[#allocation15 + $0x140] ss:$8 sps:$4 sm:$0xff]   ;;  %v11816_v25 = vld [vmem:[#allocation15 + $0x164] ss:$8 sps:$4 sm:$0xff]  }
 0x8ea   : > { %v9286_v30 = vpop.f32.mrb[3].mxu1  ;;  %9546 = vmatprep.subr.bf16.mxu1 %v11720_v36  ;;  %v11813_v36 = vld [vmem:[#allocation15 + $0x154] ss:$8 sps:$4 sm:$0xff]   ;;  %v11855_v43 = vld [vmem:[#allocation17 + $0x28] sm:$0xff]  }
 0x8eb   : > { %v11819_v30 = vld [vmem:[#allocation15 + $0x174] ss:$8 sps:$4 sm:$0xff]  }
 0x8ed   : > { %9547 = vmatpush1.bf16.msra.mxu1 %v11718_v51  ;;  %v11814_v51 = vld [vmem:[#allocation15 + $0x160] ss:$8 sps:$4 sm:$0xff]  }
 0x8ee   : > { %9548 = vmatprep.subr.bf16.mxu1 %v11723_v47  ;;  %v11817_v47 = vld [vmem:[#allocation15 + $0x170] ss:$8 sps:$4 sm:$0xff]  }
 0x8f1   : > { %9549 = vmatpush1.bf16.msra.mxu1 %v11721_v1  ;;  %v11825_v1 = vld [vmem:[#allocation15 + $0x194] ss:$8 sps:$4 sm:$0xff]  }
 0x8f2   : > { %9550 = vmatprep.subr.bf16.mxu1 %v11726_v34  ;;  %v11823_v34 = vld [vmem:[#allocation15 + $0x190] ss:$8 sps:$4 sm:$0xff]  }
 0x8f5   : > { %9551 = vmatpush1.bf16.msra.mxu1 %v11724_v50  ;;  %v11826_v50 = vld [vmem:[#allocation15 + $0x1a0] ss:$8 sps:$4 sm:$0xff]  }
 0x8f6   : > { %9552 = vmatprep.subr.bf16.mxu1 %v11729_v49  ;;  %v11831_v49 = vld [vmem:[#allocation15 + $0x1b4] ss:$8 sps:$4 sm:$0xff]  }
 0x8f9   : > { %9553 = vmatpush1.bf16.msra.mxu1 %v11727_v28  ;;  %v11829_v28 = vld [vmem:[#allocation15 + $0x1b0] ss:$8 sps:$4 sm:$0xff]  }
 0x8fa   : > { %9554 = vmatprep.subr.bf16.mxu1 %v11732_v40  ;;  %v11834_v40 = vld [vmem:[#allocation15 + $0x1c4] ss:$8 sps:$4 sm:$0xff]  }
 0x8fd   : > { %9555 = vmatpush1.bf16.msra.mxu1 %v11730_v16  ;;  %v11832_v16 = vld [vmem:[#allocation15 + $0x1c0] ss:$8 sps:$4 sm:$0xff]  }
 0x8fe   : > { %9556 = vmatprep.subr.bf16.mxu1 %v11735_v6  ;;  %v11837_v6 = vld [vmem:[#allocation15 + $0x1d4] ss:$8 sps:$4 sm:$0xff]  }
 0x901   : > { %9557 = vmatpush1.bf16.msra.mxu1 %v11733_v39  ;;  %v11835_v39 = vld [vmem:[#allocation15 + $0x1d0] ss:$8 sps:$4 sm:$0xff]  }
 0x902   : > { %9558 = vmatprep.subr.bf16.mxu1 %v11738_v53  ;;  %v11840_v53 = vld [vmem:[#allocation15 + $0x1e4] ss:$8 sps:$4 sm:$0xff]  }
 0x905   : > { %9559 = vmatpush1.bf16.msra.mxu1 %v11736_v13  ;;  %v11838_v13 = vld [vmem:[#allocation15 + $0x1e0] ss:$8 sps:$4 sm:$0xff]  }
 0x906   : > { %9560 = vmatprep.subr.bf16.mxu1 %v11741_v52  ;;  %v11843_v52 = vld [vmem:[#allocation15 + $0x1f4] ss:$8 sps:$4 sm:$0xff]  }
 0x909   : > { %9561 = vmatpush1.bf16.msra.mxu1 %v11739_v10  ;;  %v11841_v10 = vld [vmem:[#allocation15 + $0x1f0] ss:$8 sps:$4 sm:$0xff]  }
 0x90a   : > { %9562 = vmatprep.subr.bf16.mxu1 %v11744_v14  ;;  %v15289_v14 = vld [vmem:[#allocation70_spill] sm:$0xff] }
 0x90d   : > { %9563 = vmatpush1.bf16.msra.mxu1 %v11742_v63  ;;  %v7958_v63 = vrot.slane %v14990_v61, %v15289_v14 }
 0x90e   : > { %9564 = vmatprep.subr.bf16.mxu1 %v11747_v15  ;;  %v15290_v15 = vld [vmem:[#allocation71_spill] sm:$0xff] }
 0x911   : > { %9565 = vmatpush1.bf16.msra.mxu1 %v11745_v4  ;;  %v7962_v4 = vrot.slane %v14990_v61, %v15290_v15  ;;  %v9647_v61 = vld [vmem:[%s15291_s28] sm:$0x3] }
 0x912   : > { %10993 = vmatprep.subr.bf16.mxu1 %v11844_v46 }
 0x914   : > { %9567 = vmatmul.mubr.bf16.vlgmr.msra.gmra.mrb[4].mxu1 %v14979_v37 }
 0x915   : > { %10994 = vmatpush3.bf16.msra.mxu1 %v11845_v57 }
 0x916   : > { %10995 = vmatprep.subr.bf16.mxu1 %v11846_v32 }
 0x919   : > { %10996 = vmatpush3.bf16.msra.mxu1 %v11847_v44 }
 0x91a   : > { %10997 = vmatprep.subr.bf16.mxu1 %v11848_v17 }
 0x91d   : > { %10998 = vmatpush3.bf16.msra.mxu1 %v11849_v55 }
 0x91e   : > { %10999 = vmatprep.subr.bf16.mxu1 %v11850_v60 }
 0x921   : > { %11000 = vmatpush3.bf16.msra.mxu1 %v11851_v35 }
 0x922   : > { %11001 = vmatprep.subr.bf16.mxu1 %v11852_v8 }
 0x925   : > { %11002 = vmatpush3.bf16.msra.mxu1 %v11853_v45 }
 0x926   : > { %11003 = vmatprep.subr.bf16.mxu1 %v11854_v11 }
 0x929   : > { %11004 = vmatpush3.bf16.msra.mxu1 %v11855_v43 }
 0x950   : > { %v9404_v0 = vpop.f32.mrb[0].mxu0 }
 0x951   : > { %v11112_v5 = vadd.f32 %v9404_v0, %v9282_v29  ;;  %v9406_v26 = vpop.f32.mrb[1].mxu0 }
 0x952   : > { %v11114_v42 = vadd.f32 %v9406_v26, %v9284_v18  ;;  %v9408_v3 = vpop.f32.mrb[2].mxu0 }
 0x953   : > { %v9575_v58 = vmax.f32 %v11112_v5, 0.0  ;;  %v9409_v37 = vpop.f32.mrb[3].mxu0 }
 0x954   : > { %v9576_v41 = vmax.f32 %v11114_v42, 0.0  ;;  %v11856_v37 = vld [vmem:[#allocation17 + $0x70] sm:$0xff]  }
 0x955   : > { %v9579_v27 = vpack.c.bf16 %v9575_v58, %v9575_v58  ;;  %11005 = vmatprep.subr.bf16.mxu1 %v11856_v37 }
 0x956   : > { %v9580_v2 = vpack.c.bf16 %v9576_v41, %v9576_v41  ;;  %v11857_v41 = vld [vmem:[#allocation17 + $0x30] sm:$0xff]  }
 0x957   : > { %11006 = vmatpush3.bf16.msra.mxu1 %v11857_v41 }
 0x958   : > { %10011 = vmatprep.mubr.bf16.mxu0 %v9580_v2  ;;  %v11858_v2 = vld [vmem:[#allocation17 + $0x78] sm:$0xff]  }
 0x959   : > { %10012 = vmatmul.mubr.bf16.vlgmr.msra.gmra.mrb[4].mxu0 %v9579_v27  ;;  %11007 = vmatprep.subr.bf16.mxu1 %v11858_v2  ;;  %v9652_v27 = vrot.slane %v9647_v61, %v15287_v7 }
 0x95a   : > { %10021 = vmatpush1.bf16.msra.mxu0 %v11796_v22  ;;  %v11859_v22 = vld [vmem:[#allocation17 + $0x38] sm:$0xff]  }
 0x95b   : > { %10022 = vmatprep.subr.bf16.mxu0 %v11801_v59  ;;  %11008 = vmatpush3.bf16.msra.mxu1 %v11859_v22  ;;  %v9656_v59 = vrot.slane %v9647_v61, %v15288_v33 }
 0x95e   : > { %10023 = vmatpush1.bf16.msra.mxu0 %v11799_v23 }
 0x95f   : > { %10024 = vmatprep.subr.bf16.mxu0 %v11804_v19 }
 0x962   : > { %10025 = vmatpush1.bf16.msra.mxu0 %v11802_v54 }
 0x963   : > { %10026 = vmatprep.subr.bf16.mxu0 %v11807_v56 }
 0x966   : > { %10027 = vmatpush1.bf16.msra.mxu0 %v11805_v9  ;;  %v10929_v9 = vld [vmem:[%s15292_s0] ss:$0 sm:$0xff] }
 0x967   : > { %10028 = vmatprep.subr.bf16.mxu0 %v11810_v24 }
 0x96a   : > { %10029 = vmatpush1.bf16.msra.mxu0 %v11808_v38 }
 0x96b   : > { %10030 = vmatprep.subr.bf16.mxu0 %v11813_v36 }
 0x96e   : > { %10031 = vmatpush1.bf16.msra.mxu0 %v11811_v20 }
 0x96f   : > { %10032 = vmatprep.subr.bf16.mxu0 %v11816_v25 }
 0x972   : > { %10033 = vmatpush1.bf16.msra.mxu0 %v11814_v51 }
 0x973   : > { %10034 = vmatprep.subr.bf16.mxu0 %v11819_v30 }
 0x976   : > { %10035 = vmatpush1.bf16.msra.mxu0 %v11817_v47 }
 0x977   : > { %10036 = vmatprep.subr.bf16.mxu0 %v11822_v62 }
 0x97a   : > { %10037 = vmatpush1.bf16.msra.mxu0 %v11820_v48 }
 0x97b   : > { %10038 = vmatprep.subr.bf16.mxu0 %v11825_v1 }
 0x97e   : > { %10039 = vmatpush1.bf16.msra.mxu0 %v11823_v34 }
 0x97f   : > { %10040 = vmatprep.subr.bf16.mxu0 %v11828_v21 }
 0x982   : > { %10041 = vmatpush1.bf16.msra.mxu0 %v11826_v50 }
 0x983   : > { %10042 = vmatprep.subr.bf16.mxu0 %v11831_v49 }
 0x986   : > { %10043 = vmatpush1.bf16.msra.mxu0 %v11829_v28 }
 0x987   : > { %10044 = vmatprep.subr.bf16.mxu0 %v11834_v40 }
 0x98a   : > { %10045 = vmatpush1.bf16.msra.mxu0 %v11832_v16 }
 0x98b   : > { %10046 = vmatprep.subr.bf16.mxu0 %v11837_v6 }
 0x98e   : > { %10047 = vmatpush1.bf16.msra.mxu0 %v11835_v39 }
 0x98f   : > { %10048 = vmatprep.subr.bf16.mxu0 %v11840_v53 }
 0x992   : > { %10049 = vmatpush1.bf16.msra.mxu0 %v11838_v13 }
 0x993   : > { %10050 = vmatprep.subr.bf16.mxu0 %v11843_v52 }
 0x996   : > { %10051 = vmatpush1.bf16.msra.mxu0 %v11841_v10 }
 0x9e7   : > { %v9568_v31 = vpop.f32.mrb[4].mxu1 }
 0x9e8   : > { %v11115_v12 = vadd.f32 %v9568_v31, %v7958_v63  ;;  %v9570_v29 = vpop.f32.mrb[5].mxu1 }
 0x9e9   : > { %v11116_v18 = vadd.f32 %v9570_v29, %v7962_v4  ;;  %v9572_v0 = vpop.f32.mrb[6].mxu1 }
 0x9ea   : > { %v9577_v5 = vmax.f32 %v11115_v12, 0.0  ;;  %v9573_v26 = vpop.f32.mrb[7].mxu1 }
 0x9eb   : > { %v9578_v42 = vmax.f32 %v11116_v18, 0.0 }
 0x9ec   : > { %v9581_v58 = vpack.c.bf16 %v9577_v5, %v9577_v5 }
 0x9ed   : > { %v9582_v3 = vpack.c.bf16 %v9578_v42, %v9578_v42 }
 0x9ef   : > { %10052 = vmatprep.mubr.bf16.mxu0 %v9582_v3 }
 0x9f0   : > { %10053 = vmatmul.mubr.bf16.vlgmr.msra.gmra.mrb[4].mxu0 %v9581_v58 }
 0xac3   : > { %v10054_v46 = vpop.f32.mrb[4].mxu0 }
 0xac4   : > { %v11117_v57 = vadd.f32 %v10054_v46, %v9652_v27  ;;  %v10056_v32 = vpop.f32.mrb[5].mxu0 }
 0xac5   : > { %v11118_v23 = vadd.f32 %v10056_v32, %v9656_v59  ;;  %v10058_v19 = vpop.f32.mrb[6].mxu0 }
 0xac6   : > { %v10061_v44 = vmax.f32 %v11117_v57, 0.0  ;;  %v10059_v17 = vpop.f32.mrb[7].mxu0 }
 0xac7   : > { %v10062_v54 = vmax.f32 %v11118_v23, 0.0 }
 0xac8   : > { %v10063_v55 = vpack.c.bf16 %v10061_v44, %v10061_v44 }
 0xac9   : > { %v10064_v56 = vpack.c.bf16 %v10062_v54, %v10062_v54 }
 0xacb   : > { %10232 = vmatprep.mubr.bf16.mxu1 %v10064_v56 }
 0xacc   : > { %10233 = vmatmul.mubr.bf16.vlgmr.msra.gmra.mrb[8].mxu1 %v10063_v55 }
 0xb9f   : > { %v11009_v60 = vpop.f32.mrb[8].mxu1 }
 0xba0   : > { %v11010_v7 = vpop.f32.mrb[9].mxu1 }
 0xba1   : > { %v11011_v24 = vadd.f32 %v11010_v7, %v11009_v60  ;;  %v11012_v33 = vpop.f32.mrb[10].mxu1 }
 0xba2   : > { %v11013_v35 = vpop.f32.mrb[11].mxu1 }
 0xba3   : > { %v10235_v8 = vadd.f32 %v11011_v24, %v10929_v9 }
 0xba5   : > { %10240 = vst [vmem:[#allocation19] sm:$0x3] %v10235_v8 }
 0xba6 PF: > { %p11233_p4 = scmp.eq.s32.totalorder %s12327_s25, 1  ;;  %s12221_s17 = smov [#allocation18]  }
 0xba7   : > { %s10248_s18 = sshll.u32 %s12221_s17, 4  ;;  %s12222_s29 = smov [#allocation19]   ;;  %s10249_s18 = int_to_ptr.vmem [resolvable:$true] %s10248_s18 }
 0xba8   : > { %s10259_s8 = sshll.u32 %s12222_s29, 4  ;;  %s12084_s14 = scalar_lea.vmem %s10249_s18, 256  ;;  %s10260_s8 = int_to_ptr.vmem [resolvable:$true] %s10259_s8 }
 0xba9   : > { %p12085_p0 = scmp.ne.s32.totalorder %s10249_s18, %s12084_s14  ;;  %p12091_p8 = scmp.lt.s32.totalorder %s10249_s18, %s10249_s18 }
 0xbaa   : > { %p12092_p9 = scmp.lt.s32.totalorder %s12084_s14, %s12084_s14 }
 0xbab   : > { %p12086_p12 = pnand %p12085_p0, %p11233_p4 }
 0xbac   : > { %p12093_p10 = por %p12092_p9, %p12091_p8 }
 0xbad   : > { %p12087_p5 = pneg %p12086_p12 }
 0xbaf   : > { %p12094_p13 = pnand %p12093_p10, %p12087_p5 }
 0xbb1   : > { %12097 = shalt.err (!%p12094_p13)
}
 0xbb2   : > { %s15293_s21 = sld [smem:[#allocation81_spill]] }
 0xbb8   : > { %s15294_s1 = smov %s15293_s21  ;;  %s12098_s16 = scalar_lea.hbm %s15293_s21, 256 }
 0xbb9   : > { %p12099_p1 = scmp.ne.s32.totalorder %s15294_s1, %s12098_s16  ;;  %p12104_p6 = scmp.lt.u32.totalorder %s12098_s16, %s15294_s1 }
 0xbbb   : > { %p12100_p2 = pnand %p12099_p1, %p11233_p4 }
 0xbbd   : > { %p12101_p3 = pneg %p12100_p2 }
 0xbbf   : > { %p12106_p7 = pnand %p12104_p6, %p12101_p3 }
 0xbc1   : > { %12109 = shalt.err (!%p12106_p7)
}
 0xbc2   : > { %11185 = dma.vmem_to_hbm [thread:$0]  (%p11233_p4), %s10249_s18, 256, %s15294_s1, [#allocation5]  }
 0xbc3   : > { %s12110_s30 = scalar_lea.vmem %s10260_s8, 32  ;;  %p12117_p5 = scmp.lt.s32.totalorder %s10260_s8, %s10260_s8 }
 0xbc4   : > { %p12111_p11 = scmp.ne.s32.totalorder %s10260_s8, %s12110_s30  ;;  %p12118_p8 = scmp.lt.s32.totalorder %s12110_s30, %s12110_s30 }
 0xbc6   : > { %p12112_p0 = pnand %p12111_p11, %p11233_p4  ;;  %p12119_p9 = por %p12118_p8, %p12117_p5 }
 0xbc8   : > { %p12113_p12 = pneg %p12112_p0 }
 0xbca   : > { %p12120_p10 = pnand %p12119_p9, %p12113_p12 }
 0xbcc   : > { %12123 = shalt.err (!%p12120_p10)
}
 0xbcd   : > { %s15295_s29 = sld [smem:[#allocation82_spill]] }
 0xbd3   : > { %s12124_s14 = scalar_lea.hbm %s15295_s29, 32 }
 0xbd4   : > { %p12125_p13 = scmp.ne.s32.totalorder %s15295_s29, %s12124_s14  ;;  %p12130_p3 = scmp.lt.u32.totalorder %s12124_s14, %s15295_s29 }
 0xbd6   : > { %p12126_p1 = pnand %p12125_p13, %p11233_p4 }
 0xbd8   : > { %p12127_p2 = pneg %p12126_p1 }
 0xbda   : > { %p12132_p6 = pnand %p12130_p3, %p12127_p2 }
 0xbdc   : > { %12135 = shalt.err (!%p12132_p6)
}
 0xbdd   : > { %11187 = dma.vmem_to_hbm [thread:$0]  (%p11233_p4), %s10260_s8, 32, %s15295_s29, [#allocation20]  }
 0xbde   : > { %12173 = dma.done.wait (%p11233_p4), [#allocation5], 256  }
 0xbdf   : > { %12175 = vsyncadd (%p11233_p4), [#allocation5], 4294967040 }
 0xbe0   : > { %12177 = dma.done.wait (%p11233_p4), [#allocation20], 32  }
 0xbe1   : > { %12179 = vsyncadd (%p11233_p4), [#allocation20], 4294967264 }
 0xbe2 PF: > { %s15296_s24 = sld [smem:[#allocation31_spill]]  ;;  %s15297_s19 = sld [smem:[#allocation32_spill]] }
 0xbe3   : > { %s15298_s21 = smov %s12186_s22  ;;  %s15299_s22 = smov %s12190_s23 }
 0xbe8   : > { %p33_p7 = scmp.ge.s32.totalorder %s15296_s24, 4   ;;  %s15300_s23 = smov %s15297_s19 }
 0xbea   :  { %35 = sbr.rel (!%p33_p7) target bundleno = 19 (0x13), region = 170 }
 0xbf1   :  { %10276 = vsyncpa [#allocation4], 1 }
 0xbf2   :  { %10278 = vsyncpa [#allocation4 + $0x1], 1 }
 0xbf3   :  { %10279 = vsyncpa [#allocation7], 1 }
 0xbf4   :  { %10280 = vsyncpa [#allocation10], 1 }
 0xbf5   :  { %10281 = vsyncpa [#allocation13], 1 }
 0xbf6   :  { %10282 = vsyncpa [#allocation16], 1 }
 0xbf7   :  { %10283 = vsyncpa [#allocation5], 1 }
 0xbf8   :  { %10285 = vsyncpa [#allocation5 + $0x1], 1 }
 0xbf9   :  { %10286 = vsyncpa [#allocation20], 1 }

</bundles_post_ra>
